<compile_context>
chip_gen: v7x
topology: tpu7x:2x2x1
jax: 0.10.0
libtpu: 0.0.40
codegen_flags: <defaults>
</compile_context>

<pallas_src>
import functools
import math

import jax
import jax.numpy as jnp
from jax import lax
from jax.experimental import pallas as pl
from jax.experimental.pallas import tpu as pltpu

RMS_EPS = 1e-6
LN_EPS = 1e-6


# ---------------------------------------------------------------------------
# Kernel body: one (block_batch, S, D) slab of sequences per grid step.
# ---------------------------------------------------------------------------
def _transformer_block_body(
    x_ref, mask_ref,
    rms_scale_ref, wqkv_ref, bqkv_ref, wpost_ref, bpost_ref,
    ln_scale_ref, ln_bias_ref, w1_ref, b1_ref, w2_ref, b2_ref,
    o_ref, ctx_ref,
    *, num_heads, d_k, matmul_dtype):
  f32 = jnp.float32
  bt, seq, d = x_ref.shape
  m = bt * seq

  x = x_ref[...].astype(f32).reshape(m, d)                 # (M, D) block input

  # ---- RmsNorm (direct_scale=True) ---------------------------------------
  ms = jnp.mean(x * x, axis=-1, keepdims=True)
  xn = x * lax.rsqrt(ms + RMS_EPS) * rms_scale_ref[...].astype(f32)

  # ---- fused Q/K/V projection (PerDimScale folded into W_q / b_q) --------
  qkv = lax.dot_general(
      xn.astype(matmul_dtype), wqkv_ref[...],
      (((1,), (0,)), ((), ())),
      preferred_element_type=f32) + bqkv_ref[...].astype(f32)      # (M, 3D)
  qkv = qkv.reshape(bt, seq, 3 * d)

  mask = None
  if mask_ref is not None:
    mask = mask_ref[...].astype(f32)                       # (1|bt, S, S)

  # ---- per-head attention, batched over the bt sequences of this block ---
  for h in range(num_heads):
    sl = slice(h * d_k, (h + 1) * d_k)
    q_h = qkv[:, :, sl].astype(matmul_dtype)                       # (bt,S,dk)
    k_h = qkv[:, :, d + h * d_k:d + (h + 1) * d_k].astype(matmul_dtype)
    v_h = qkv[:, :, 2 * d + h * d_k:2 * d + (h + 1) * d_k].astype(matmul_dtype)

    s = jnp.einsum("bqd,bkd->bqk", q_h, k_h,
                   preferred_element_type=f32)                     # (bt,S,S)
    if mask is not None:
      s = s + mask                                                 # broadcast
    s = s - jnp.max(s, axis=-1, keepdims=True)
    p = jnp.exp(s)
    # Softmax denominator on the EUP (approx reciprocal) instead of VALU div.
    p = p * pl.reciprocal(jnp.sum(p, axis=-1, keepdims=True), approx=True)
    # TODO(synk): attention dropout (p=0.0 here) would use pltpu.prng_* ops.
    ctx_ref[:, :, sl] = jnp.einsum("bqk,bkd->bqd", p.astype(matmul_dtype), v_h,
                                   preferred_element_type=f32)

  ctx = ctx_ref[...].reshape(m, d)

  # ---- output projection + residual with the block input ------------------
  attn_out = lax.dot_general(ctx.astype(matmul_dtype), wpost_ref[...],
                             (((1,), (0,)), ((), ())),
                             preferred_element_type=f32)
  attn_out = attn_out + bpost_ref[...].astype(f32)
  x1 = x + attn_out                                                # (M, D)

  # ---- FeedForward: LayerNorm -> relu(linear1) -> linear2 -> residual -----
  mean = jnp.mean(x1, axis=-1, keepdims=True)
  var = jnp.mean((x1 - mean) * (x1 - mean), axis=-1, keepdims=True)
  yn = (x1 - mean) * lax.rsqrt(var + LN_EPS)
  yn = yn * ln_scale_ref[...].astype(f32) + ln_bias_ref[...].astype(f32)

  h1 = lax.dot_general(yn.astype(matmul_dtype), w1_ref[...],
                       (((1,), (0,)), ((), ())),
                       preferred_element_type=f32) + b1_ref[...].astype(f32)
  h1 = jnp.maximum(h1, 0.0)                                        # relu
  h2 = lax.dot_general(h1.astype(matmul_dtype), w2_ref[...],
                       (((1,), (0,)), ((), ())),
                       preferred_element_type=f32) + b2_ref[...].astype(f32)
  # TODO(synk): FFN / post-attention dropouts (p=0.0) are identity here.

  o_ref[...] = (x1 + h2).reshape(bt, seq, d).astype(o_ref.dtype)


def _kernel_with_mask(x_ref, mask_ref, *rest, **kw):
  _transformer_block_body(x_ref, mask_ref, *rest, **kw)


def _kernel_no_mask(x_ref, *rest, **kw):
  _transformer_block_body(x_ref, None, *rest, **kw)


# ---------------------------------------------------------------------------
# Wrapper helpers
# ---------------------------------------------------------------------------
def _invariant_spec(shape, single_buffer):
  """Grid-invariant operand: constant index_map; single-buffered when possible."""
  ndim = len(shape)
  index_map = lambda b: (0,) * ndim
  if single_buffer and hasattr(pl, "Buffered"):
    return pl.BlockSpec(shape, index_map, pipeline_mode=pl.Buffered(1))
  return pl.BlockSpec(shape, index_map)


def _choose_block_batch(batch, seq, target_rows=256, max_rows=1024):
  """Pick how many sequences to process per grid step.

  Prefer block_batch*seq >= target_rows (fills the MXU M-dim on v6e/v7x) while
  keeping >= 2 grid steps so both v7x TensorCores get work."""
  divs = [d for d in range(1, batch + 1) if batch % d == 0]
  for d in divs:                                     # smallest first
    if d * seq >= target_rows and d * seq <= max_rows and batch // d >= 2:
      return d
  multi = [d for d in divs if batch // d >= 2 and d * seq <= max_rows]
  if multi:
    return multi[-1]                                 # biggest tile, >=2 steps
  return 1 if batch > 1 else batch


def _vmem_limit_bytes():
  """~75% of physical VMEM: ~48 MiB on v7x (64 MiB), ~96 MiB on v5e/v6e (128)."""
  cap = None
  try:
    cap = getattr(pltpu.get_tpu_info(), "vmem_capacity_bytes", None)
  except Exception:
    cap = None
  if not cap:
    cap = 64 * 1024 * 1024
  return int(min(cap * 3 // 4, 112 * 1024 * 1024))


def prepare_transformer_block_params(params, matmul_dtype=jnp.bfloat16):
  """One-time weight preprocessing (hoisted out of the per-call hot path).

  Folds PerDimScale into W_q/b_q, fuses Q/K/V into a single [D, 3D] matmul and
  casts the five big matmul operands to `matmul_dtype` (bf16 by default).
  Biases / norm parameters stay f32."""
  f32 = jnp.float32
  num_heads = params["num_heads"]
  d_model = params["wq"].shape[0]
  d_k = d_model // num_heads

  r_softplus_0 = 1.442695041
  q_scale = (r_softplus_0 / math.sqrt(d_k)) * jax.nn.softplus(
      params["per_dim_scale"].astype(f32))                         # (d_k,)
  q_scale_full = jnp.tile(q_scale, num_heads)                      # (D,)
  wq = params["wq"].astype(f32) * q_scale_full[None, :]
  bq = params["bq"].astype(f32) * q_scale_full

  wqkv = jnp.concatenate([wq, params["wk"].astype(f32),
                          params["wv"].astype(f32)], axis=1)       # (D, 3D)
  bqkv = jnp.concatenate([bq, params["bk"].astype(f32),
                          params["bv"].astype(f32)])[None, :]      # (1, 3D)

  weights = (
      params["rms_scale"].astype(f32)[None, :],
      wqkv.astype(matmul_dtype),
      bqkv,
      params["wpost"].astype(matmul_dtype),
      params["bpost"].astype(f32)[None, :],
      (1.0 + params["ln_scale"].astype(f32))[None, :],             # 1 + scale
      params["ln_bias"].astype(f32)[None, :],
      params["w1"].astype(matmul_dtype),
      params["b1"].astype(f32)[None, :],
      params["w2"].astype(matmul_dtype),
      params["b2"].astype(f32)[None, :],
  )
  return {"_prepared": True, "num_heads": num_heads, "d_k": d_k,
          "hidden": params["w1"].shape[1], "matmul_dtype": matmul_dtype,
          "weights": weights}


def transformer_block(inputs, params, mask=None, *, matmul_dtype=jnp.bfloat16,
                      block_batch=None):
  """inputs: [B, S, D] f32.  `params` is the raw parameter dict (weights stored
  pre-transposed as [in, out]) or the output of prepare_transformer_block_params
  (preferred for repeated calls).  mask (optional) broadcasts to [B, S, S] and
  is added to the attention logits."""
  if not (isinstance(params, dict) and params.get("_prepared", False)):
    params = prepare_transformer_block_params(params, matmul_dtype=matmul_dtype)

  weights = params["weights"]
  num_heads = params["num_heads"]
  d_k = params["d_k"]
  hidden = params["hidden"]
  mm_dtype = params["matmul_dtype"]

  B, S, D = inputs.shape
  bt = block_batch if block_batch is not None else _choose_block_batch(B, S)
  if B % bt != 0:
    raise ValueError(f"block_batch={bt} must divide batch={B}")
  grid_len = B // bt

  f32 = jnp.float32
  if mask is None:
    mask_mode, mask_args = "none", ()
  else:
    m = jnp.asarray(mask, f32)
    if m.ndim == 2:
      m = m[None]
    if m.shape[0] == 1:
      mask_mode, mask_args = "shared", (jnp.broadcast_to(m, (1, S, S)),)
    else:
      mask_mode, mask_args = "batched", (jnp.broadcast_to(m, (B, S, S)),)

  body_kw = dict(num_heads=num_heads, d_k=d_k, matmul_dtype=mm_dtype)
  kernel = (functools.partial(_kernel_no_mask, **body_kw) if mask_mode == "none"
            else functools.partial(_kernel_with_mask, **body_kw))

  def in_specs(single_buffer):
    specs = [pl.BlockSpec((bt, S, D), lambda b: (b, 0, 0))]        # inputs
    if mask_mode == "shared":
      specs.append(_invariant_spec((1, S, S), single_buffer))      # one mask
    elif mask_mode == "batched":
      specs.append(pl.BlockSpec((bt, S, S), lambda b: (b, 0, 0)))  # per-batch
    specs.extend(_invariant_spec(w.shape, single_buffer) for w in weights)
    return specs

  flops = 2 * B * S * (4 * D * D + 2 * S * D + 2 * D * hidden)
  transcendentals = B * S * (num_heads * S + 2)
  bytes_accessed = int(
      2 * inputs.size * inputs.dtype.itemsize
      + sum(int(a.size) * a.dtype.itemsize for a in mask_args)
      + sum(int(w.size) * w.dtype.itemsize for w in weights))
  cost = pl.CostEstimate(flops=int(flops), transcendentals=int(transcendentals),
                         bytes_accessed=bytes_accessed)
  vmem_limit = _vmem_limit_bytes()
  args = (inputs,) + mask_args + weights

  def build(single_buffer):
    return pl.pallas_call(
        kernel,
        out_shape=jax.ShapeDtypeStruct((B, S, D), inputs.dtype),
        grid_spec=pltpu.PrefetchScalarGridSpec(
            num_scalar_prefetch=0,
            grid=(grid_len,),
            in_specs=in_specs(single_buffer),
            out_specs=pl.BlockSpec((bt, S, D), lambda b: (b, 0, 0)),
            scratch_shapes=[pltpu.VMEM((bt, S, D), jnp.float32)],   # ctx scratch
        ),
        compiler_params=pltpu.CompilerParams(
            dimension_semantics=("parallel",),       # batch blocks -> megacore
            vmem_limit_bytes=vmem_limit,
        ),
        cost_estimate=cost,
    )

  try:
    return build(single_buffer=True)(*args)
  except Exception:
    # pl.Buffered(1) (single-buffered invariant operands) failed to construct
    # or lower on this jax version; retry with default double-buffering.  A
    # genuine error surfaces from this second, uncaught attempt.
    return build(single_buffer=False)(*args)


# ---------------------------------------------------------------------------
# Pure-JAX reference (mirrors the PyTorch module math)
# ---------------------------------------------------------------------------
def transformer_block_ref(inputs, params, mask=None):
  with jax.default_matmul_precision("highest"):
    x = inputs.astype(jnp.float32)
    B, S, D = x.shape
    H = params["num_heads"]
    d_k = D // H

    ms = jnp.mean(x * x, axis=-1, keepdims=True)
    xn = x * lax.rsqrt(ms + RMS_EPS) * params["rms_scale"]

    q = xn @ params["wq"] + params["bq"]
    k = xn @ params["wk"] + params["bk"]
    v = xn @ params["wv"] + params["bv"]
    q = q.reshape(B, S, H, d_k).transpose(0, 2, 1, 3)
    k = k.reshape(B, S, H, d_k).transpose(0, 2, 1, 3)
    v = v.reshape(B, S, H, d_k).transpose(0, 2, 1, 3)

    scale = (1.442695041 / math.sqrt(d_k)) * jax.nn.softplus(
        params["per_dim_scale"])
    q = q * scale

    attn = jnp.einsum("bhqd,bhkd->bhqk", q, k)
    if mask is not None:
      m = jnp.asarray(mask, jnp.float32)
      if m.ndim == 2:
        m = m[None]
      attn = attn + jnp.broadcast_to(m, (B, S, S))[:, None]
    attn = jax.nn.softmax(attn, axis=-1)
    ctx = jnp.einsum("bhqk,bhkd->bhqd", attn, v)
    ctx = ctx.transpose(0, 2, 1, 3).reshape(B, S, D)
    x1 = x + (ctx @ params["wpost"] + params["bpost"])

    mean = jnp.mean(x1, axis=-1, keepdims=True)
    var = jnp.mean((x1 - mean) ** 2, axis=-1, keepdims=True)
    yn = (x1 - mean) / jnp.sqrt(var + LN_EPS)
    yn = yn * (1.0 + params["ln_scale"]) + params["ln_bias"]
    h = jnp.maximum(yn @ params["w1"] + params["b1"], 0.0)
    return x1 + (h @ params["w2"] + params["b2"])


# ---------------------------------------------------------------------------
if __name__ == "__main__":
  # Small but lane-aligned shapes.  batch=8, seq=32 -> block_batch=4 sequences
  # per grid step (M=128 matmul rows) with an even grid length of 2.
  batch, seq, d_model, num_heads, hidden = 8, 32, 128, 4, 256
  d_k = d_model // num_heads

  key = jax.random.PRNGKey(0)
  ks = jax.random.split(key, 20)

  def init_linear(kw, kb, fan_in, fan_out):
    bound = 1.0 / math.sqrt(fan_in)
    w = jax.random.uniform(kw, (fan_in, fan_out), jnp.float32, -bound, bound)
    b = jax.random.uniform(kb, (fan_out,), jnp.float32, -bound, bound)
    return w, b

  wq, bq = init_linear(ks[0], ks[1], d_model, d_model)
  wk, bk = init_linear(ks[2], ks[3], d_model, d_model)
  wv, bv = init_linear(ks[4], ks[5], d_model, d_model)
  wpost, bpost = init_linear(ks[6], ks[7], d_model, d_model)
  w1, b1 = init_linear(ks[8], ks[9], d_model, hidden)
  w2, b2 = init_linear(ks[10], ks[11], hidden, d_model)

  params = dict(
      num_heads=num_heads,
      rms_scale=1.0 + 0.1 * jax.random.normal(ks[12], (d_model,), jnp.float32),
      per_dim_scale=0.1 * jax.random.normal(ks[13], (d_k,), jnp.float32),
      ln_scale=0.1 * jax.random.normal(ks[14], (d_model,), jnp.float32),
      ln_bias=0.1 * jax.random.normal(ks[15], (d_model,), jnp.float32),
      wq=wq, bq=bq, wk=wk, bk=bk, wv=wv, bv=bv,
      wpost=wpost, bpost=bpost, w1=w1, b1=b1, w2=w2, b2=b2,
  )

  x = jax.random.normal(ks[16], (batch, seq, d_model), jnp.float32)
  causal = jnp.where(jnp.arange(seq)[:, None] >= jnp.arange(seq)[None, :],
                     0.0, -1e9).astype(jnp.float32)        # (S, S) additive

  # Default path: bf16 MXU operands (f32 accumulation), batch-invariant causal
  # mask passed once as (1, S, S).  Weights prepared once, reused across calls.
  prepared = prepare_transformer_block_params(params)       # bf16 default
  out_bf16 = jax.block_until_ready(transformer_block(x, prepared, mask=causal))
  ref_m = transformer_block_ref(x, params, mask=causal)
  assert out_bf16.shape == (batch, seq, d_model)
  err = float(jnp.max(jnp.abs(out_bf16 - ref_m)))
  assert jnp.allclose(out_bf16, ref_m, atol=2e-1, rtol=2e-1), (
      f"bf16 kernel mismatch: max abs err {err:.3e}")

  # f32-operand fallback path, no mask (note: default MXU precision; not
  # guaranteed bit-exact f32 -- pass precision=HIGHEST upstream if needed).
  out_f32 = jax.block_until_ready(
      transformer_block(x, params, mask=None, matmul_dtype=jnp.float32))
  ref = transformer_block_ref(x, params, mask=None)
  err = float(jnp.max(jnp.abs(out_f32 - ref)))
  assert jnp.allclose(out_f32, ref, atol=5e-2, rtol=5e-2), (
      f"f32 kernel mismatch: max abs err {err:.3e}")

  print("KERNEL_OK")
</pallas_src>

<mosaic_0001>
module attributes {stable_mosaic.version = 11 : i64} {
  func.func @_kernel_with_mask(%arg0: i32, %arg1: memref<4x32x128xf32, #tpu.memory_space<vmem>>, %arg2: memref<1x32x32xf32, #tpu.memory_space<vmem>>, %arg3: memref<1x128xf32, #tpu.memory_space<vmem>>, %arg4: memref<128x384xbf16, #tpu.memory_space<vmem>>, %arg5: memref<1x384xf32, #tpu.memory_space<vmem>>, %arg6: memref<128x128xbf16, #tpu.memory_space<vmem>>, %arg7: memref<1x128xf32, #tpu.memory_space<vmem>>, %arg8: memref<1x128xf32, #tpu.memory_space<vmem>>, %arg9: memref<1x128xf32, #tpu.memory_space<vmem>>, %arg10: memref<128x256xbf16, #tpu.memory_space<vmem>>, %arg11: memref<1x256xf32, #tpu.memory_space<vmem>>, %arg12: memref<256x128xbf16, #tpu.memory_space<vmem>>, %arg13: memref<1x128xf32, #tpu.memory_space<vmem>>, %arg14: memref<4x32x128xf32, #tpu.memory_space<vmem>>, %arg15: memref<4x32x128xf32, #tpu.memory_space<vmem>>) attributes {dimension_semantics = [#tpu.dimension_semantics<parallel>], iteration_bounds = array<i64: 2>, scalar_prefetch = 0 : i64, scratch_operands = 1 : i64, tpu.core_type = #tpu.core_type<tc>, window_params = [{transform_indices = @transform_0, window_bounds = array<i64: 4, 32, 128>}, {pipeline_mode = #tpu.pipeline_mode<synchronous>, transform_indices = @transform_1, window_bounds = array<i64: 1, 32, 32>}, {pipeline_mode = #tpu.pipeline_mode<synchronous>, transform_indices = @transform_2, window_bounds = array<i64: 1, 128>}, {pipeline_mode = #tpu.pipeline_mode<synchronous>, transform_indices = @transform_3, window_bounds = array<i64: 128, 384>}, {pipeline_mode = #tpu.pipeline_mode<synchronous>, transform_indices = @transform_4, window_bounds = array<i64: 1, 384>}, {pipeline_mode = #tpu.pipeline_mode<synchronous>, transform_indices = @transform_5, window_bounds = array<i64: 128, 128>}, {pipeline_mode = #tpu.pipeline_mode<synchronous>, transform_indices = @transform_6, window_bounds = array<i64: 1, 128>}, {pipeline_mode = #tpu.pipeline_mode<synchronous>, transform_indices = @transform_7, window_bounds = array<i64: 1, 128>}, {pipeline_mode = #tpu.pipeline_mode<synchronous>, transform_indices = @transform_8, window_bounds = array<i64: 1, 128>}, {pipeline_mode = #tpu.pipeline_mode<synchronous>, transform_indices = @transform_9, window_bounds = array<i64: 128, 256>}, {pipeline_mode = #tpu.pipeline_mode<synchronous>, transform_indices = @transform_10, window_bounds = array<i64: 1, 256>}, {pipeline_mode = #tpu.pipeline_mode<synchronous>, transform_indices = @transform_11, window_bounds = array<i64: 256, 128>}, {pipeline_mode = #tpu.pipeline_mode<synchronous>, transform_indices = @transform_12, window_bounds = array<i64: 1, 128>}, {transform_indices = @transform_13, window_bounds = array<i64: 4, 32, 128>}]} {
    %c0 = arith.constant 0 : index
    %c0_0 = arith.constant 0 : index
    %c0_1 = arith.constant 0 : index
    %0 = vector.load %arg1[%c0, %c0_0, %c0_1] : memref<4x32x128xf32, #tpu.memory_space<vmem>>, vector<4x32x128xf32>
    %1 = vector.shape_cast %0 : vector<4x32x128xf32> to vector<128x128xf32>
    %2 = arith.mulf %1, %1 : vector<128x128xf32>
    %cst = arith.constant dense<0.000000e+00> : vector<128xf32>
    %3 = vector.multi_reduction <add>, %2, %cst [1] : vector<128x128xf32> to vector<128xf32>
    %4 = vector.shape_cast %3 : vector<128xf32> to vector<128x1xf32>
    %cst_2 = arith.constant 1.280000e+02 : f32
    %5 = vector.broadcast %cst_2 : f32 to vector<128x1xf32>
    %6 = arith.divf %4, %5 : vector<128x1xf32>
    %cst_3 = arith.constant 9.99999997E-7 : f32
    %7 = vector.broadcast %cst_3 : f32 to vector<128x1xf32>
    %8 = arith.addf %6, %7 : vector<128x1xf32>
    %9 = math.rsqrt %8 : vector<128x1xf32>
    %10 = vector.broadcast %9 : vector<128x1xf32> to vector<128x128xf32>
    %11 = arith.mulf %1, %10 : vector<128x128xf32>
    %c0_4 = arith.constant 0 : index
    %c0_5 = arith.constant 0 : index
    %12 = vector.load %arg3[%c0_4, %c0_5] : memref<1x128xf32, #tpu.memory_space<vmem>>, vector<1x128xf32>
    %13 = vector.broadcast %12 : vector<1x128xf32> to vector<128x128xf32>
    %14 = arith.mulf %11, %13 : vector<128x128xf32>
    %15 = arith.truncf %14 : vector<128x128xf32> to vector<128x128xbf16>
    %c0_6 = arith.constant 0 : index
    %c0_7 = arith.constant 0 : index
    %16 = vector.load %arg4[%c0_6, %c0_7] : memref<128x384xbf16, #tpu.memory_space<vmem>>, vector<128x384xbf16>
    %cst_8 = arith.constant dense<0.000000e+00> : vector<128x384xf32>
    %17 = tpu.matmul %15, %16, %cst_8 {dimension_numbers = #tpu.dot_dimension_numbers<[1], [0], [0], [1], [0, 0, 1, 1], [], []>} : vector<128x128xbf16>, vector<128x384xbf16>, vector<128x384xf32> -> vector<128x384xf32>
    %c0_9 = arith.constant 0 : index
    %c0_10 = arith.constant 0 : index
    %18 = vector.load %arg5[%c0_9, %c0_10] : memref<1x384xf32, #tpu.memory_space<vmem>>, vector<1x384xf32>
    %19 = vector.broadcast %18 : vector<1x384xf32> to vector<128x384xf32>
    %20 = arith.addf %17, %19 : vector<128x384xf32>
    %21 = vector.shape_cast %20 : vector<128x384xf32> to vector<4x32x384xf32>
    %c0_11 = arith.constant 0 : index
    %c0_12 = arith.constant 0 : index
    %c0_13 = arith.constant 0 : index
    %22 = vector.load %arg2[%c0_11, %c0_12, %c0_13] : memref<1x32x32xf32, #tpu.memory_space<vmem>>, vector<1x32x32xf32>
    %23 = vector.extract_strided_slice %21 {offsets = [0, 0, 0], sizes = [4, 32, 32], strides = [1, 1, 1]} : vector<4x32x384xf32> to vector<4x32x32xf32>
    %24 = arith.truncf %23 : vector<4x32x32xf32> to vector<4x32x32xbf16>
    %25 = vector.extract_strided_slice %21 {offsets = [0, 0, 128], sizes = [4, 32, 32], strides = [1, 1, 1]} : vector<4x32x384xf32> to vector<4x32x32xf32>
    %26 = arith.truncf %25 : vector<4x32x32xf32> to vector<4x32x32xbf16>
    %27 = vector.extract_strided_slice %21 {offsets = [0, 0, 256], sizes = [4, 32, 32], strides = [1, 1, 1]} : vector<4x32x384xf32> to vector<4x32x32xf32>
    %28 = arith.truncf %27 : vector<4x32x32xf32> to vector<4x32x32xbf16>
    "tpu.trace_start"() <{level = 10 : i32, message = "bqd,bkd->bqk"}> : () -> ()
    %cst_14 = arith.constant dense<0.000000e+00> : vector<4x32x32xf32>
    %29 = tpu.matmul %24, %26, %cst_14 {dimension_numbers = #tpu.dot_dimension_numbers<[2], [2], [1], [1], [0, 0, 0, 1, 1, 1], [0], [0]>} : vector<4x32x32xbf16>, vector<4x32x32xbf16>, vector<4x32x32xf32> -> vector<4x32x32xf32>
    "tpu.trace_stop"() : () -> ()
    %30 = vector.broadcast %22 : vector<1x32x32xf32> to vector<4x32x32xf32>
    %31 = arith.addf %29, %30 : vector<4x32x32xf32>
    %cst_15 = arith.constant dense<0xFF800000> : vector<4x32xf32>
    %32 = vector.multi_reduction <maximumf>, %31, %cst_15 [2] : vector<4x32x32xf32> to vector<4x32xf32>
    %33 = vector.shape_cast %32 : vector<4x32xf32> to vector<4x32x1xf32>
    %34 = vector.broadcast %33 : vector<4x32x1xf32> to vector<4x32x32xf32>
    %35 = arith.subf %31, %34 : vector<4x32x32xf32>
    %36 = math.exp %35 : vector<4x32x32xf32>
    %cst_16 = arith.constant dense<0.000000e+00> : vector<4x32xf32>
    %37 = vector.multi_reduction <add>, %36, %cst_16 [2] : vector<4x32x32xf32> to vector<4x32xf32>
    %38 = vector.shape_cast %37 : vector<4x32xf32> to vector<4x32x1xf32>
    %39 = tpu.reciprocal %38 {approx = true} : vector<4x32x1xf32> -> vector<4x32x1xf32>
    %40 = vector.broadcast %39 : vector<4x32x1xf32> to vector<4x32x32xf32>
    %41 = arith.mulf %36, %40 : vector<4x32x32xf32>
    %42 = arith.truncf %41 : vector<4x32x32xf32> to vector<4x32x32xbf16>
    "tpu.trace_start"() <{level = 10 : i32, message = "bqk,bkd->bqd"}> : () -> ()
    %cst_17 = arith.constant dense<0.000000e+00> : vector<4x32x32xf32>
    %43 = tpu.matmul %42, %28, %cst_17 {dimension_numbers = #tpu.dot_dimension_numbers<[2], [1], [1], [2], [0, 0, 0, 1, 1, 2], [0], [0]>} : vector<4x32x32xbf16>, vector<4x32x32xbf16>, vector<4x32x32xf32> -> vector<4x32x32xf32>
    "tpu.trace_stop"() : () -> ()
    %c0_18 = arith.constant 0 : index
    %c0_19 = arith.constant 0 : index
    %c0_20 = arith.constant 0 : index
    %44 = vector.load %arg15[%c0_18, %c0_19, %c0_20] : memref<4x32x128xf32, #tpu.memory_space<vmem>>, vector<4x32x32xf32>
    tpu.vector_store %arg15[%c0_18, %c0_19, %c0_20], %43 {strides = array<i32>} : memref<4x32x128xf32, #tpu.memory_space<vmem>>, vector<4x32x32xf32>,
    %45 = vector.extract_strided_slice %21 {offsets = [0, 0, 32], sizes = [4, 32, 32], strides = [1, 1, 1]} : vector<4x32x384xf32> to vector<4x32x32xf32>
    %46 = arith.truncf %45 : vector<4x32x32xf32> to vector<4x32x32xbf16>
    %47 = vector.extract_strided_slice %21 {offsets = [0, 0, 160], sizes = [4, 32, 32], strides = [1, 1, 1]} : vector<4x32x384xf32> to vector<4x32x32xf32>
    %48 = arith.truncf %47 : vector<4x32x32xf32> to vector<4x32x32xbf16>
    %49 = vector.extract_strided_slice %21 {offsets = [0, 0, 288], sizes = [4, 32, 32], strides = [1, 1, 1]} : vector<4x32x384xf32> to vector<4x32x32xf32>
    %50 = arith.truncf %49 : vector<4x32x32xf32> to vector<4x32x32xbf16>
    "tpu.trace_start"() <{level = 10 : i32, message = "bqd,bkd->bqk"}> : () -> ()
    %cst_21 = arith.constant dense<0.000000e+00> : vector<4x32x32xf32>
    %51 = tpu.matmul %46, %48, %cst_21 {dimension_numbers = #tpu.dot_dimension_numbers<[2], [2], [1], [1], [0, 0, 0, 1, 1, 1], [0], [0]>} : vector<4x32x32xbf16>, vector<4x32x32xbf16>, vector<4x32x32xf32> -> vector<4x32x32xf32>
    "tpu.trace_stop"() : () -> ()
    %52 = vector.broadcast %22 : vector<1x32x32xf32> to vector<4x32x32xf32>
    %53 = arith.addf %51, %52 : vector<4x32x32xf32>
    %cst_22 = arith.constant dense<0xFF800000> : vector<4x32xf32>
    %54 = vector.multi_reduction <maximumf>, %53, %cst_22 [2] : vector<4x32x32xf32> to vector<4x32xf32>
    %55 = vector.shape_cast %54 : vector<4x32xf32> to vector<4x32x1xf32>
    %56 = vector.broadcast %55 : vector<4x32x1xf32> to vector<4x32x32xf32>
    %57 = arith.subf %53, %56 : vector<4x32x32xf32>
    %58 = math.exp %57 : vector<4x32x32xf32>
    %cst_23 = arith.constant dense<0.000000e+00> : vector<4x32xf32>
    %59 = vector.multi_reduction <add>, %58, %cst_23 [2] : vector<4x32x32xf32> to vector<4x32xf32>
    %60 = vector.shape_cast %59 : vector<4x32xf32> to vector<4x32x1xf32>
    %61 = tpu.reciprocal %60 {approx = true} : vector<4x32x1xf32> -> vector<4x32x1xf32>
    %62 = vector.broadcast %61 : vector<4x32x1xf32> to vector<4x32x32xf32>
    %63 = arith.mulf %58, %62 : vector<4x32x32xf32>
    %64 = arith.truncf %63 : vector<4x32x32xf32> to vector<4x32x32xbf16>
    "tpu.trace_start"() <{level = 10 : i32, message = "bqk,bkd->bqd"}> : () -> ()
    %cst_24 = arith.constant dense<0.000000e+00> : vector<4x32x32xf32>
    %65 = tpu.matmul %64, %50, %cst_24 {dimension_numbers = #tpu.dot_dimension_numbers<[2], [1], [1], [2], [0, 0, 0, 1, 1, 2], [0], [0]>} : vector<4x32x32xbf16>, vector<4x32x32xbf16>, vector<4x32x32xf32> -> vector<4x32x32xf32>
    "tpu.trace_stop"() : () -> ()
    %c0_25 = arith.constant 0 : index
    %c0_26 = arith.constant 0 : index
    %c32 = arith.constant 32 : index
    %66 = vector.load %arg15[%c0_25, %c0_26, %c32] : memref<4x32x128xf32, #tpu.memory_space<vmem>>, vector<4x32x32xf32>
    tpu.vector_store %arg15[%c0_25, %c0_26, %c32], %65 {strides = array<i32>} : memref<4x32x128xf32, #tpu.memory_space<vmem>>, vector<4x32x32xf32>,
    %67 = vector.extract_strided_slice %21 {offsets = [0, 0, 64], sizes = [4, 32, 32], strides = [1, 1, 1]} : vector<4x32x384xf32> to vector<4x32x32xf32>
    %68 = arith.truncf %67 : vector<4x32x32xf32> to vector<4x32x32xbf16>
    %69 = vector.extract_strided_slice %21 {offsets = [0, 0, 192], sizes = [4, 32, 32], strides = [1, 1, 1]} : vector<4x32x384xf32> to vector<4x32x32xf32>
    %70 = arith.truncf %69 : vector<4x32x32xf32> to vector<4x32x32xbf16>
    %71 = vector.extract_strided_slice %21 {offsets = [0, 0, 320], sizes = [4, 32, 32], strides = [1, 1, 1]} : vector<4x32x384xf32> to vector<4x32x32xf32>
    %72 = arith.truncf %71 : vector<4x32x32xf32> to vector<4x32x32xbf16>
    "tpu.trace_start"() <{level = 10 : i32, message = "bqd,bkd->bqk"}> : () -> ()
    %cst_27 = arith.constant dense<0.000000e+00> : vector<4x32x32xf32>
    %73 = tpu.matmul %68, %70, %cst_27 {dimension_numbers = #tpu.dot_dimension_numbers<[2], [2], [1], [1], [0, 0, 0, 1, 1, 1], [0], [0]>} : vector<4x32x32xbf16>, vector<4x32x32xbf16>, vector<4x32x32xf32> -> vector<4x32x32xf32>
    "tpu.trace_stop"() : () -> ()
    %74 = vector.broadcast %22 : vector<1x32x32xf32> to vector<4x32x32xf32>
    %75 = arith.addf %73, %74 : vector<4x32x32xf32>
    %cst_28 = arith.constant dense<0xFF800000> : vector<4x32xf32>
    %76 = vector.multi_reduction <maximumf>, %75, %cst_28 [2] : vector<4x32x32xf32> to vector<4x32xf32>
    %77 = vector.shape_cast %76 : vector<4x32xf32> to vector<4x32x1xf32>
    %78 = vector.broadcast %77 : vector<4x32x1xf32> to vector<4x32x32xf32>
    %79 = arith.subf %75, %78 : vector<4x32x32xf32>
    %80 = math.exp %79 : vector<4x32x32xf32>
    %cst_29 = arith.constant dense<0.000000e+00> : vector<4x32xf32>
    %81 = vector.multi_reduction <add>, %80, %cst_29 [2] : vector<4x32x32xf32> to vector<4x32xf32>
    %82 = vector.shape_cast %81 : vector<4x32xf32> to vector<4x32x1xf32>
    %83 = tpu.reciprocal %82 {approx = true} : vector<4x32x1xf32> -> vector<4x32x1xf32>
    %84 = vector.broadcast %83 : vector<4x32x1xf32> to vector<4x32x32xf32>
    %85 = arith.mulf %80, %84 : vector<4x32x32xf32>
    %86 = arith.truncf %85 : vector<4x32x32xf32> to vector<4x32x32xbf16>
    "tpu.trace_start"() <{level = 10 : i32, message = "bqk,bkd->bqd"}> : () -> ()
    %cst_30 = arith.constant dense<0.000000e+00> : vector<4x32x32xf32>
    %87 = tpu.matmul %86, %72, %cst_30 {dimension_numbers = #tpu.dot_dimension_numbers<[2], [1], [1], [2], [0, 0, 0, 1, 1, 2], [0], [0]>} : vector<4x32x32xbf16>, vector<4x32x32xbf16>, vector<4x32x32xf32> -> vector<4x32x32xf32>
    "tpu.trace_stop"() : () -> ()
    %c0_31 = arith.constant 0 : index
    %c0_32 = arith.constant 0 : index
    %c64 = arith.constant 64 : index
    %88 = vector.load %arg15[%c0_31, %c0_32, %c64] : memref<4x32x128xf32, #tpu.memory_space<vmem>>, vector<4x32x32xf32>
    tpu.vector_store %arg15[%c0_31, %c0_32, %c64], %87 {strides = array<i32>} : memref<4x32x128xf32, #tpu.memory_space<vmem>>, vector<4x32x32xf32>,
    %89 = vector.extract_strided_slice %21 {offsets = [0, 0, 96], sizes = [4, 32, 32], strides = [1, 1, 1]} : vector<4x32x384xf32> to vector<4x32x32xf32>
    %90 = arith.truncf %89 : vector<4x32x32xf32> to vector<4x32x32xbf16>
    %91 = vector.extract_strided_slice %21 {offsets = [0, 0, 224], sizes = [4, 32, 32], strides = [1, 1, 1]} : vector<4x32x384xf32> to vector<4x32x32xf32>
    %92 = arith.truncf %91 : vector<4x32x32xf32> to vector<4x32x32xbf16>
    %93 = vector.extract_strided_slice %21 {offsets = [0, 0, 352], sizes = [4, 32, 32], strides = [1, 1, 1]} : vector<4x32x384xf32> to vector<4x32x32xf32>
    %94 = arith.truncf %93 : vector<4x32x32xf32> to vector<4x32x32xbf16>
    "tpu.trace_start"() <{level = 10 : i32, message = "bqd,bkd->bqk"}> : () -> ()
    %cst_33 = arith.constant dense<0.000000e+00> : vector<4x32x32xf32>
    %95 = tpu.matmul %90, %92, %cst_33 {dimension_numbers = #tpu.dot_dimension_numbers<[2], [2], [1], [1], [0, 0, 0, 1, 1, 1], [0], [0]>} : vector<4x32x32xbf16>, vector<4x32x32xbf16>, vector<4x32x32xf32> -> vector<4x32x32xf32>
    "tpu.trace_stop"() : () -> ()
    %96 = vector.broadcast %22 : vector<1x32x32xf32> to vector<4x32x32xf32>
    %97 = arith.addf %95, %96 : vector<4x32x32xf32>
    %cst_34 = arith.constant dense<0xFF800000> : vector<4x32xf32>
    %98 = vector.multi_reduction <maximumf>, %97, %cst_34 [2] : vector<4x32x32xf32> to vector<4x32xf32>
    %99 = vector.shape_cast %98 : vector<4x32xf32> to vector<4x32x1xf32>
    %100 = vector.broadcast %99 : vector<4x32x1xf32> to vector<4x32x32xf32>
    %101 = arith.subf %97, %100 : vector<4x32x32xf32>
    %102 = math.exp %101 : vector<4x32x32xf32>
    %cst_35 = arith.constant dense<0.000000e+00> : vector<4x32xf32>
    %103 = vector.multi_reduction <add>, %102, %cst_35 [2] : vector<4x32x32xf32> to vector<4x32xf32>
    %104 = vector.shape_cast %103 : vector<4x32xf32> to vector<4x32x1xf32>
    %105 = tpu.reciprocal %104 {approx = true} : vector<4x32x1xf32> -> vector<4x32x1xf32>
    %106 = vector.broadcast %105 : vector<4x32x1xf32> to vector<4x32x32xf32>
    %107 = arith.mulf %102, %106 : vector<4x32x32xf32>
    %108 = arith.truncf %107 : vector<4x32x32xf32> to vector<4x32x32xbf16>
    "tpu.trace_start"() <{level = 10 : i32, message = "bqk,bkd->bqd"}> : () -> ()
    %cst_36 = arith.constant dense<0.000000e+00> : vector<4x32x32xf32>
    %109 = tpu.matmul %108, %94, %cst_36 {dimension_numbers = #tpu.dot_dimension_numbers<[2], [1], [1], [2], [0, 0, 0, 1, 1, 2], [0], [0]>} : vector<4x32x32xbf16>, vector<4x32x32xbf16>, vector<4x32x32xf32> -> vector<4x32x32xf32>
    "tpu.trace_stop"() : () -> ()
    %c0_37 = arith.constant 0 : index
    %c0_38 = arith.constant 0 : index
    %c96 = arith.constant 96 : index
    %110 = vector.load %arg15[%c0_37, %c0_38, %c96] : memref<4x32x128xf32, #tpu.memory_space<vmem>>, vector<4x32x32xf32>
    tpu.vector_store %arg15[%c0_37, %c0_38, %c96], %109 {strides = array<i32>} : memref<4x32x128xf32, #tpu.memory_space<vmem>>, vector<4x32x32xf32>,
    %c0_39 = arith.constant 0 : index
    %c0_40 = arith.constant 0 : index
    %c0_41 = arith.constant 0 : index
    %111 = vector.load %arg15[%c0_39, %c0_40, %c0_41] : memref<4x32x128xf32, #tpu.memory_space<vmem>>, vector<4x32x128xf32>
    %112 = vector.shape_cast %111 : vector<4x32x128xf32> to vector<128x128xf32>
    %113 = arith.truncf %112 : vector<128x128xf32> to vector<128x128xbf16>
    %c0_42 = arith.constant 0 : index
    %c0_43 = arith.constant 0 : index
    %114 = vector.load %arg6[%c0_42, %c0_43] : memref<128x128xbf16, #tpu.memory_space<vmem>>, vector<128x128xbf16>
    %cst_44 = arith.constant dense<0.000000e+00> : vector<128x128xf32>
    %115 = tpu.matmul %113, %114, %cst_44 {dimension_numbers = #tpu.dot_dimension_numbers<[1], [0], [0], [1], [0, 0, 1, 1], [], []>} : vector<128x128xbf16>, vector<128x128xbf16>, vector<128x128xf32> -> vector<128x128xf32>
    %c0_45 = arith.constant 0 : index
    %c0_46 = arith.constant 0 : index
    %116 = vector.load %arg7[%c0_45, %c0_46] : memref<1x128xf32, #tpu.memory_space<vmem>>, vector<1x128xf32>
    %117 = vector.broadcast %116 : vector<1x128xf32> to vector<128x128xf32>
    %118 = arith.addf %115, %117 : vector<128x128xf32>
    %119 = arith.addf %1, %118 : vector<128x128xf32>
    %cst_47 = arith.constant dense<0.000000e+00> : vector<128xf32>
    %120 = vector.multi_reduction <add>, %119, %cst_47 [1] : vector<128x128xf32> to vector<128xf32>
    %121 = vector.shape_cast %120 : vector<128xf32> to vector<128x1xf32>
    %cst_48 = arith.constant 1.280000e+02 : f32
    %122 = vector.broadcast %cst_48 : f32 to vector<128x1xf32>
    %123 = arith.divf %121, %122 : vector<128x1xf32>
    %124 = vector.broadcast %123 : vector<128x1xf32> to vector<128x128xf32>
    %125 = arith.subf %119, %124 : vector<128x128xf32>
    %126 = vector.broadcast %123 : vector<128x1xf32> to vector<128x128xf32>
    %127 = arith.subf %119, %126 : vector<128x128xf32>
    %128 = arith.mulf %125, %127 : vector<128x128xf32>
    %cst_49 = arith.constant dense<0.000000e+00> : vector<128xf32>
    %129 = vector.multi_reduction <add>, %128, %cst_49 [1] : vector<128x128xf32> to vector<128xf32>
    %130 = vector.shape_cast %129 : vector<128xf32> to vector<128x1xf32>
    %cst_50 = arith.constant 1.280000e+02 : f32
    %131 = vector.broadcast %cst_50 : f32 to vector<128x1xf32>
    %132 = arith.divf %130, %131 : vector<128x1xf32>
    %133 = vector.broadcast %123 : vector<128x1xf32> to vector<128x128xf32>
    %134 = arith.subf %119, %133 : vector<128x128xf32>
    %cst_51 = arith.constant 9.99999997E-7 : f32
    %135 = vector.broadcast %cst_51 : f32 to vector<128x1xf32>
    %136 = arith.addf %132, %135 : vector<128x1xf32>
    %137 = math.rsqrt %136 : vector<128x1xf32>
    %138 = vector.broadcast %137 : vector<128x1xf32> to vector<128x128xf32>
    %139 = arith.mulf %134, %138 : vector<128x128xf32>
    %c0_52 = arith.constant 0 : index
    %c0_53 = arith.constant 0 : index
    %140 = vector.load %arg8[%c0_52, %c0_53] : memref<1x128xf32, #tpu.memory_space<vmem>>, vector<1x128xf32>
    %141 = vector.broadcast %140 : vector<1x128xf32> to vector<128x128xf32>
    %142 = arith.mulf %139, %141 : vector<128x128xf32>
    %c0_54 = arith.constant 0 : index
    %c0_55 = arith.constant 0 : index
    %143 = vector.load %arg9[%c0_54, %c0_55] : memref<1x128xf32, #tpu.memory_space<vmem>>, vector<1x128xf32>
    %144 = vector.broadcast %143 : vector<1x128xf32> to vector<128x128xf32>
    %145 = arith.addf %142, %144 : vector<128x128xf32>
    %146 = arith.truncf %145 : vector<128x128xf32> to vector<128x128xbf16>
    %c0_56 = arith.constant 0 : index
    %c0_57 = arith.constant 0 : index
    %147 = vector.load %arg10[%c0_56, %c0_57] : memref<128x256xbf16, #tpu.memory_space<vmem>>, vector<128x256xbf16>
    %cst_58 = arith.constant dense<0.000000e+00> : vector<128x256xf32>
    %148 = tpu.matmul %146, %147, %cst_58 {dimension_numbers = #tpu.dot_dimension_numbers<[1], [0], [0], [1], [0, 0, 1, 1], [], []>} : vector<128x128xbf16>, vector<128x256xbf16>, vector<128x256xf32> -> vector<128x256xf32>
    %c0_59 = arith.constant 0 : index
    %c0_60 = arith.constant 0 : index
    %149 = vector.load %arg11[%c0_59, %c0_60] : memref<1x256xf32, #tpu.memory_space<vmem>>, vector<1x256xf32>
    %150 = vector.broadcast %149 : vector<1x256xf32> to vector<128x256xf32>
    %151 = arith.addf %148, %150 : vector<128x256xf32>
    %cst_61 = arith.constant 0.000000e+00 : f32
    %152 = vector.broadcast %cst_61 : f32 to vector<128x256xf32>
    %153 = arith.maximumf %151, %152 : vector<128x256xf32>
    %154 = arith.truncf %153 : vector<128x256xf32> to vector<128x256xbf16>
    %c0_62 = arith.constant 0 : index
    %c0_63 = arith.constant 0 : index
    %155 = vector.load %arg12[%c0_62, %c0_63] : memref<256x128xbf16, #tpu.memory_space<vmem>>, vector<256x128xbf16>
    %cst_64 = arith.constant dense<0.000000e+00> : vector<128x128xf32>
    %156 = tpu.matmul %154, %155, %cst_64 {dimension_numbers = #tpu.dot_dimension_numbers<[1], [0], [0], [1], [0, 0, 1, 1], [], []>} : vector<128x256xbf16>, vector<256x128xbf16>, vector<128x128xf32> -> vector<128x128xf32>
    %c0_65 = arith.constant 0 : index
    %c0_66 = arith.constant 0 : index
    %157 = vector.load %arg13[%c0_65, %c0_66] : memref<1x128xf32, #tpu.memory_space<vmem>>, vector<1x128xf32>
    %158 = vector.broadcast %157 : vector<1x128xf32> to vector<128x128xf32>
    %159 = arith.addf %156, %158 : vector<128x128xf32>
    %160 = arith.addf %119, %159 : vector<128x128xf32>
    %161 = vector.shape_cast %160 : vector<128x128xf32> to vector<4x32x128xf32>
    %c0_67 = arith.constant 0 : index
    %c0_68 = arith.constant 0 : index
    %c0_69 = arith.constant 0 : index
    %162 = vector.load %arg14[%c0_67, %c0_68, %c0_69] : memref<4x32x128xf32, #tpu.memory_space<vmem>>, vector<4x32x128xf32>
    tpu.vector_store %arg14[%c0_67, %c0_68, %c0_69], %161 {strides = array<i32>} : memref<4x32x128xf32, #tpu.memory_space<vmem>>, vector<4x32x128xf32>,
    return
  }
  func.func @transform_0(%arg0: i32) -> (i32, i32, i32) {
    %c0_i32 = arith.constant 0 : i32
    %c0_i32_0 = arith.constant 0 : i32
    %c0_i32_1 = arith.constant 0 : i32
    return %arg0, %c0_i32, %c0_i32_0 : i32, i32, i32
  }
  func.func @transform_1(%arg0: i32) -> (i32, i32, i32) {
    %c0_i32 = arith.constant 0 : i32
    %c0_i32_0 = arith.constant 0 : i32
    %c0_i32_1 = arith.constant 0 : i32
    %c0_i32_2 = arith.constant 0 : i32
    return %c0_i32, %c0_i32_0, %c0_i32_1 : i32, i32, i32
  }
  func.func @transform_2(%arg0: i32) -> (i32, i32) {
    %c0_i32 = arith.constant 0 : i32
    %c0_i32_0 = arith.constant 0 : i32
    %c0_i32_1 = arith.constant 0 : i32
    return %c0_i32, %c0_i32_0 : i32, i32
  }
  func.func @transform_3(%arg0: i32) -> (i32, i32) {
    %c0_i32 = arith.constant 0 : i32
    %c0_i32_0 = arith.constant 0 : i32
    %c0_i32_1 = arith.constant 0 : i32
    return %c0_i32, %c0_i32_0 : i32, i32
  }
  func.func @transform_4(%arg0: i32) -> (i32, i32) {
    %c0_i32 = arith.constant 0 : i32
    %c0_i32_0 = arith.constant 0 : i32
    %c0_i32_1 = arith.constant 0 : i32
    return %c0_i32, %c0_i32_0 : i32, i32
  }
  func.func @transform_5(%arg0: i32) -> (i32, i32) {
    %c0_i32 = arith.constant 0 : i32
    %c0_i32_0 = arith.constant 0 : i32
    %c0_i32_1 = arith.constant 0 : i32
    return %c0_i32, %c0_i32_0 : i32, i32
  }
  func.func @transform_6(%arg0: i32) -> (i32, i32) {
    %c0_i32 = arith.constant 0 : i32
    %c0_i32_0 = arith.constant 0 : i32
    %c0_i32_1 = arith.constant 0 : i32
    return %c0_i32, %c0_i32_0 : i32, i32
  }
  func.func @transform_7(%arg0: i32) -> (i32, i32) {
    %c0_i32 = arith.constant 0 : i32
    %c0_i32_0 = arith.constant 0 : i32
    %c0_i32_1 = arith.constant 0 : i32
    return %c0_i32, %c0_i32_0 : i32, i32
  }
  func.func @transform_8(%arg0: i32) -> (i32, i32) {
    %c0_i32 = arith.constant 0 : i32
    %c0_i32_0 = arith.constant 0 : i32
    %c0_i32_1 = arith.constant 0 : i32
    return %c0_i32, %c0_i32_0 : i32, i32
  }
  func.func @transform_9(%arg0: i32) -> (i32, i32) {
    %c0_i32 = arith.constant 0 : i32
    %c0_i32_0 = arith.constant 0 : i32
    %c0_i32_1 = arith.constant 0 : i32
    return %c0_i32, %c0_i32_0 : i32, i32
  }
  func.func @transform_10(%arg0: i32) -> (i32, i32) {
    %c0_i32 = arith.constant 0 : i32
    %c0_i32_0 = arith.constant 0 : i32
    %c0_i32_1 = arith.constant 0 : i32
    return %c0_i32, %c0_i32_0 : i32, i32
  }
  func.func @transform_11(%arg0: i32) -> (i32, i32) {
    %c0_i32 = arith.constant 0 : i32
    %c0_i32_0 = arith.constant 0 : i32
    %c0_i32_1 = arith.constant 0 : i32
    return %c0_i32, %c0_i32_0 : i32, i32
  }
  func.func @transform_12(%arg0: i32) -> (i32, i32) {
    %c0_i32 = arith.constant 0 : i32
    %c0_i32_0 = arith.constant 0 : i32
    %c0_i32_1 = arith.constant 0 : i32
    return %c0_i32, %c0_i32_0 : i32, i32
  }
  func.func @transform_13(%arg0: i32) -> (i32, i32, i32) {
    %c0_i32 = arith.constant 0 : i32
    %c0_i32_0 = arith.constant 0 : i32
    %c0_i32_1 = arith.constant 0 : i32
    return %arg0, %c0_i32, %c0_i32_0 : i32, i32, i32
  }
}

module attributes {stable_mosaic.version = 11 : i64} {
  func.func @_kernel_with_mask(%arg0: i32, %arg1: memref<4x32x128xf32, #tpu.memory_space<vmem>>, %arg2: memref<1x32x32xf32, #tpu.memory_space<vmem>>, %arg3: memref<1x128xf32, #tpu.memory_space<vmem>>, %arg4: memref<128x384xbf16, #tpu.memory_space<vmem>>, %arg5: memref<1x384xf32, #tpu.memory_space<vmem>>, %arg6: memref<128x128xbf16, #tpu.memory_space<vmem>>, %arg7: memref<1x128xf32, #tpu.memory_space<vmem>>, %arg8: memref<1x128xf32, #tpu.memory_space<vmem>>, %arg9: memref<1x128xf32, #tpu.memory_space<vmem>>, %arg10: memref<128x256xbf16, #tpu.memory_space<vmem>>, %arg11: memref<1x256xf32, #tpu.memory_space<vmem>>, %arg12: memref<256x128xbf16, #tpu.memory_space<vmem>>, %arg13: memref<1x128xf32, #tpu.memory_space<vmem>>, %arg14: memref<4x32x128xf32, #tpu.memory_space<vmem>>, %arg15: memref<4x32x128xf32, #tpu.memory_space<vmem>>) attributes {dimension_semantics = [#tpu.dimension_semantics<parallel>], iteration_bounds = array<i64: 2>, scalar_prefetch = 0 : i64, scratch_operands = 1 : i64, tpu.core_type = #tpu.core_type<tc>, window_params = [{transform_indices = @transform_0, window_bounds = array<i64: 4, 32, 128>}, {pipeline_mode = #tpu.pipeline_mode<synchronous>, transform_indices = @transform_1, window_bounds = array<i64: 1, 32, 32>}, {pipeline_mode = #tpu.pipeline_mode<synchronous>, transform_indices = @transform_2, window_bounds = array<i64: 1, 128>}, {pipeline_mode = #tpu.pipeline_mode<synchronous>, transform_indices = @transform_3, window_bounds = array<i64: 128, 384>}, {pipeline_mode = #tpu.pipeline_mode<synchronous>, transform_indices = @transform_4, window_bounds = array<i64: 1, 384>}, {pipeline_mode = #tpu.pipeline_mode<synchronous>, transform_indices = @transform_5, window_bounds = array<i64: 128, 128>}, {pipeline_mode = #tpu.pipeline_mode<synchronous>, transform_indices = @transform_6, window_bounds = array<i64: 1, 128>}, {pipeline_mode = #tpu.pipeline_mode<synchronous>, transform_indices = @transform_7, window_bounds = array<i64: 1, 128>}, {pipeline_mode = #tpu.pipeline_mode<synchronous>, transform_indices = @transform_8, window_bounds = array<i64: 1, 128>}, {pipeline_mode = #tpu.pipeline_mode<synchronous>, transform_indices = @transform_9, window_bounds = array<i64: 128, 256>}, {pipeline_mode = #tpu.pipeline_mode<synchronous>, transform_indices = @transform_10, window_bounds = array<i64: 1, 256>}, {pipeline_mode = #tpu.pipeline_mode<synchronous>, transform_indices = @transform_11, window_bounds = array<i64: 256, 128>}, {pipeline_mode = #tpu.pipeline_mode<synchronous>, transform_indices = @transform_12, window_bounds = array<i64: 1, 128>}, {transform_indices = @transform_13, window_bounds = array<i64: 4, 32, 128>}]} {
    %c0 = arith.constant 0 : index
    %c0_0 = arith.constant 0 : index
    %c0_1 = arith.constant 0 : index
    %0 = vector.load %arg1[%c0, %c0_0, %c0_1] : memref<4x32x128xf32, #tpu.memory_space<vmem>>, vector<4x32x128xf32>
    %1 = vector.shape_cast %0 : vector<4x32x128xf32> to vector<128x128xf32>
    %2 = arith.mulf %1, %1 : vector<128x128xf32>
    %cst = arith.constant dense<0.000000e+00> : vector<128xf32>
    %3 = vector.multi_reduction <add>, %2, %cst [1] : vector<128x128xf32> to vector<128xf32>
    %4 = vector.shape_cast %3 : vector<128xf32> to vector<128x1xf32>
    %cst_2 = arith.constant 1.280000e+02 : f32
    %5 = vector.broadcast %cst_2 : f32 to vector<128x1xf32>
    %6 = arith.divf %4, %5 : vector<128x1xf32>
    %cst_3 = arith.constant 9.99999997E-7 : f32
    %7 = vector.broadcast %cst_3 : f32 to vector<128x1xf32>
    %8 = arith.addf %6, %7 : vector<128x1xf32>
    %9 = math.rsqrt %8 : vector<128x1xf32>
    %10 = vector.broadcast %9 : vector<128x1xf32> to vector<128x128xf32>
    %11 = arith.mulf %1, %10 : vector<128x128xf32>
    %c0_4 = arith.constant 0 : index
    %c0_5 = arith.constant 0 : index
    %12 = vector.load %arg3[%c0_4, %c0_5] : memref<1x128xf32, #tpu.memory_space<vmem>>, vector<1x128xf32>
    %13 = vector.broadcast %12 : vector<1x128xf32> to vector<128x128xf32>
    %14 = arith.mulf %11, %13 : vector<128x128xf32>
    %15 = arith.truncf %14 : vector<128x128xf32> to vector<128x128xbf16>
    %c0_6 = arith.constant 0 : index
    %c0_7 = arith.constant 0 : index
    %16 = vector.load %arg4[%c0_6, %c0_7] : memref<128x384xbf16, #tpu.memory_space<vmem>>, vector<128x384xbf16>
    %cst_8 = arith.constant dense<0.000000e+00> : vector<128x384xf32>
    %17 = tpu.matmul %15, %16, %cst_8 {dimension_numbers = #tpu.dot_dimension_numbers<[1], [0], [0], [1], [0, 0, 1, 1], [], []>} : vector<128x128xbf16>, vector<128x384xbf16>, vector<128x384xf32> -> vector<128x384xf32>
    %c0_9 = arith.constant 0 : index
    %c0_10 = arith.constant 0 : index
    %18 = vector.load %arg5[%c0_9, %c0_10] : memref<1x384xf32, #tpu.memory_space<vmem>>, vector<1x384xf32>
    %19 = vector.broadcast %18 : vector<1x384xf32> to vector<128x384xf32>
    %20 = arith.addf %17, %19 : vector<128x384xf32>
    %21 = vector.shape_cast %20 : vector<128x384xf32> to vector<4x32x384xf32>
    %c0_11 = arith.constant 0 : index
    %c0_12 = arith.constant 0 : index
    %c0_13 = arith.constant 0 : index
    %22 = vector.load %arg2[%c0_11, %c0_12, %c0_13] : memref<1x32x32xf32, #tpu.memory_space<vmem>>, vector<1x32x32xf32>
    %23 = vector.extract_strided_slice %21 {offsets = [0, 0, 0], sizes = [4, 32, 32], strides = [1, 1, 1]} : vector<4x32x384xf32> to vector<4x32x32xf32>
    %24 = arith.truncf %23 : vector<4x32x32xf32> to vector<4x32x32xbf16>
    %25 = vector.extract_strided_slice %21 {offsets = [0, 0, 128], sizes = [4, 32, 32], strides = [1, 1, 1]} : vector<4x32x384xf32> to vector<4x32x32xf32>
    %26 = arith.truncf %25 : vector<4x32x32xf32> to vector<4x32x32xbf16>
    %27 = vector.extract_strided_slice %21 {offsets = [0, 0, 256], sizes = [4, 32, 32], strides = [1, 1, 1]} : vector<4x32x384xf32> to vector<4x32x32xf32>
    %28 = arith.truncf %27 : vector<4x32x32xf32> to vector<4x32x32xbf16>
    "tpu.trace_start"() <{level = 10 : i32, message = "bqd,bkd->bqk"}> : () -> ()
    %cst_14 = arith.constant dense<0.000000e+00> : vector<4x32x32xf32>
    %29 = tpu.matmul %24, %26, %cst_14 {dimension_numbers = #tpu.dot_dimension_numbers<[2], [2], [1], [1], [0, 0, 0, 1, 1, 1], [0], [0]>} : vector<4x32x32xbf16>, vector<4x32x32xbf16>, vector<4x32x32xf32> -> vector<4x32x32xf32>
    "tpu.trace_stop"() : () -> ()
    %30 = vector.broadcast %22 : vector<1x32x32xf32> to vector<4x32x32xf32>
    %31 = arith.addf %29, %30 : vector<4x32x32xf32>
    %cst_15 = arith.constant dense<0xFF800000> : vector<4x32xf32>
    %32 = vector.multi_reduction <maximumf>, %31, %cst_15 [2] : vector<4x32x32xf32> to vector<4x32xf32>
    %33 = vector.shape_cast %32 : vector<4x32xf32> to vector<4x32x1xf32>
    %34 = vector.broadcast %33 : vector<4x32x1xf32> to vector<4x32x32xf32>
    %35 = arith.subf %31, %34 : vector<4x32x32xf32>
    %36 = math.exp %35 : vector<4x32x32xf32>
    %cst_16 = arith.constant dense<0.000000e+00> : vector<4x32xf32>
    %37 = vector.multi_reduction <add>, %36, %cst_16 [2] : vector<4x32x32xf32> to vector<4x32xf32>
    %38 = vector.shape_cast %37 : vector<4x32xf32> to vector<4x32x1xf32>
    %39 = tpu.reciprocal %38 {approx = true} : vector<4x32x1xf32> -> vector<4x32x1xf32>
    %40 = vector.broadcast %39 : vector<4x32x1xf32> to vector<4x32x32xf32>
    %41 = arith.mulf %36, %40 : vector<4x32x32xf32>
    %42 = arith.truncf %41 : vector<4x32x32xf32> to vector<4x32x32xbf16>
    "tpu.trace_start"() <{level = 10 : i32, message = "bqk,bkd->bqd"}> : () -> ()
    %cst_17 = arith.constant dense<0.000000e+00> : vector<4x32x32xf32>
    %43 = tpu.matmul %42, %28, %cst_17 {dimension_numbers = #tpu.dot_dimension_numbers<[2], [1], [1], [2], [0, 0, 0, 1, 1, 2], [0], [0]>} : vector<4x32x32xbf16>, vector<4x32x32xbf16>, vector<4x32x32xf32> -> vector<4x32x32xf32>
    "tpu.trace_stop"() : () -> ()
    %c0_18 = arith.constant 0 : index
    %c0_19 = arith.constant 0 : index
    %c0_20 = arith.constant 0 : index
    %44 = vector.load %arg15[%c0_18, %c0_19, %c0_20] : memref<4x32x128xf32, #tpu.memory_space<vmem>>, vector<4x32x32xf32>
    tpu.vector_store %arg15[%c0_18, %c0_19, %c0_20], %43 {strides = array<i32>} : memref<4x32x128xf32, #tpu.memory_space<vmem>>, vector<4x32x32xf32>,
    %45 = vector.extract_strided_slice %21 {offsets = [0, 0, 32], sizes = [4, 32, 32], strides = [1, 1, 1]} : vector<4x32x384xf32> to vector<4x32x32xf32>
    %46 = arith.truncf %45 : vector<4x32x32xf32> to vector<4x32x32xbf16>
    %47 = vector.extract_strided_slice %21 {offsets = [0, 0, 160], sizes = [4, 32, 32], strides = [1, 1, 1]} : vector<4x32x384xf32> to vector<4x32x32xf32>
    %48 = arith.truncf %47 : vector<4x32x32xf32> to vector<4x32x32xbf16>
    %49 = vector.extract_strided_slice %21 {offsets = [0, 0, 288], sizes = [4, 32, 32], strides = [1, 1, 1]} : vector<4x32x384xf32> to vector<4x32x32xf32>
    %50 = arith.truncf %49 : vector<4x32x32xf32> to vector<4x32x32xbf16>
    "tpu.trace_start"() <{level = 10 : i32, message = "bqd,bkd->bqk"}> : () -> ()
    %cst_21 = arith.constant dense<0.000000e+00> : vector<4x32x32xf32>
    %51 = tpu.matmul %46, %48, %cst_21 {dimension_numbers = #tpu.dot_dimension_numbers<[2], [2], [1], [1], [0, 0, 0, 1, 1, 1], [0], [0]>} : vector<4x32x32xbf16>, vector<4x32x32xbf16>, vector<4x32x32xf32> -> vector<4x32x32xf32>
    "tpu.trace_stop"() : () -> ()
    %52 = vector.broadcast %22 : vector<1x32x32xf32> to vector<4x32x32xf32>
    %53 = arith.addf %51, %52 : vector<4x32x32xf32>
    %cst_22 = arith.constant dense<0xFF800000> : vector<4x32xf32>
    %54 = vector.multi_reduction <maximumf>, %53, %cst_22 [2] : vector<4x32x32xf32> to vector<4x32xf32>
    %55 = vector.shape_cast %54 : vector<4x32xf32> to vector<4x32x1xf32>
    %56 = vector.broadcast %55 : vector<4x32x1xf32> to vector<4x32x32xf32>
    %57 = arith.subf %53, %56 : vector<4x32x32xf32>
    %58 = math.exp %57 : vector<4x32x32xf32>
    %cst_23 = arith.constant dense<0.000000e+00> : vector<4x32xf32>
    %59 = vector.multi_reduction <add>, %58, %cst_23 [2] : vector<4x32x32xf32> to vector<4x32xf32>
    %60 = vector.shape_cast %59 : vector<4x32xf32> to vector<4x32x1xf32>
    %61 = tpu.reciprocal %60 {approx = true} : vector<4x32x1xf32> -> vector<4x32x1xf32>
    %62 = vector.broadcast %61 : vector<4x32x1xf32> to vector<4x32x32xf32>
    %63 = arith.mulf %58, %62 : vector<4x32x32xf32>
    %64 = arith.truncf %63 : vector<4x32x32xf32> to vector<4x32x32xbf16>
    "tpu.trace_start"() <{level = 10 : i32, message = "bqk,bkd->bqd"}> : () -> ()
    %cst_24 = arith.constant dense<0.000000e+00> : vector<4x32x32xf32>
    %65 = tpu.matmul %64, %50, %cst_24 {dimension_numbers = #tpu.dot_dimension_numbers<[2], [1], [1], [2], [0, 0, 0, 1, 1, 2], [0], [0]>} : vector<4x32x32xbf16>, vector<4x32x32xbf16>, vector<4x32x32xf32> -> vector<4x32x32xf32>
    "tpu.trace_stop"() : () -> ()
    %c0_25 = arith.constant 0 : index
    %c0_26 = arith.constant 0 : index
    %c32 = arith.constant 32 : index
    %66 = vector.load %arg15[%c0_25, %c0_26, %c32] : memref<4x32x128xf32, #tpu.memory_space<vmem>>, vector<4x32x32xf32>
    tpu.vector_store %arg15[%c0_25, %c0_26, %c32], %65 {strides = array<i32>} : memref<4x32x128xf32, #tpu.memory_space<vmem>>, vector<4x32x32xf32>,
    %67 = vector.extract_strided_slice %21 {offsets = [0, 0, 64], sizes = [4, 32, 32], strides = [1, 1, 1]} : vector<4x32x384xf32> to vector<4x32x32xf32>
    %68 = arith.truncf %67 : vector<4x32x32xf32> to vector<4x32x32xbf16>
    %69 = vector.extract_strided_slice %21 {offsets = [0, 0, 192], sizes = [4, 32, 32], strides = [1, 1, 1]} : vector<4x32x384xf32> to vector<4x32x32xf32>
    %70 = arith.truncf %69 : vector<4x32x32xf32> to vector<4x32x32xbf16>
    %71 = vector.extract_strided_slice %21 {offsets = [0, 0, 320], sizes = [4, 32, 32], strides = [1, 1, 1]} : vector<4x32x384xf32> to vector<4x32x32xf32>
    %72 = arith.truncf %71 : vector<4x32x32xf32> to vector<4x32x32xbf16>
    "tpu.trace_start"() <{level = 10 : i32, message = "bqd,bkd->bqk"}> : () -> ()
    %cst_27 = arith.constant dense<0.000000e+00> : vector<4x32x32xf32>
    %73 = tpu.matmul %68, %70, %cst_27 {dimension_numbers = #tpu.dot_dimension_numbers<[2], [2], [1], [1], [0, 0, 0, 1, 1, 1], [0], [0]>} : vector<4x32x32xbf16>, vector<4x32x32xbf16>, vector<4x32x32xf32> -> vector<4x32x32xf32>
    "tpu.trace_stop"() : () -> ()
    %74 = vector.broadcast %22 : vector<1x32x32xf32> to vector<4x32x32xf32>
    %75 = arith.addf %73, %74 : vector<4x32x32xf32>
    %cst_28 = arith.constant dense<0xFF800000> : vector<4x32xf32>
    %76 = vector.multi_reduction <maximumf>, %75, %cst_28 [2] : vector<4x32x32xf32> to vector<4x32xf32>
    %77 = vector.shape_cast %76 : vector<4x32xf32> to vector<4x32x1xf32>
    %78 = vector.broadcast %77 : vector<4x32x1xf32> to vector<4x32x32xf32>
    %79 = arith.subf %75, %78 : vector<4x32x32xf32>
    %80 = math.exp %79 : vector<4x32x32xf32>
    %cst_29 = arith.constant dense<0.000000e+00> : vector<4x32xf32>
    %81 = vector.multi_reduction <add>, %80, %cst_29 [2] : vector<4x32x32xf32> to vector<4x32xf32>
    %82 = vector.shape_cast %81 : vector<4x32xf32> to vector<4x32x1xf32>
    %83 = tpu.reciprocal %82 {approx = true} : vector<4x32x1xf32> -> vector<4x32x1xf32>
    %84 = vector.broadcast %83 : vector<4x32x1xf32> to vector<4x32x32xf32>
    %85 = arith.mulf %80, %84 : vector<4x32x32xf32>
    %86 = arith.truncf %85 : vector<4x32x32xf32> to vector<4x32x32xbf16>
    "tpu.trace_start"() <{level = 10 : i32, message = "bqk,bkd->bqd"}> : () -> ()
    %cst_30 = arith.constant dense<0.000000e+00> : vector<4x32x32xf32>
    %87 = tpu.matmul %86, %72, %cst_30 {dimension_numbers = #tpu.dot_dimension_numbers<[2], [1], [1], [2], [0, 0, 0, 1, 1, 2], [0], [0]>} : vector<4x32x32xbf16>, vector<4x32x32xbf16>, vector<4x32x32xf32> -> vector<4x32x32xf32>
    "tpu.trace_stop"() : () -> ()
    %c0_31 = arith.constant 0 : index
    %c0_32 = arith.constant 0 : index
    %c64 = arith.constant 64 : index
    %88 = vector.load %arg15[%c0_31, %c0_32, %c64] : memref<4x32x128xf32, #tpu.memory_space<vmem>>, vector<4x32x32xf32>
    tpu.vector_store %arg15[%c0_31, %c0_32, %c64], %87 {strides = array<i32>} : memref<4x32x128xf32, #tpu.memory_space<vmem>>, vector<4x32x32xf32>,
    %89 = vector.extract_strided_slice %21 {offsets = [0, 0, 96], sizes = [4, 32, 32], strides = [1, 1, 1]} : vector<4x32x384xf32> to vector<4x32x32xf32>
    %90 = arith.truncf %89 : vector<4x32x32xf32> to vector<4x32x32xbf16>
    %91 = vector.extract_strided_slice %21 {offsets = [0, 0, 224], sizes = [4, 32, 32], strides = [1, 1, 1]} : vector<4x32x384xf32> to vector<4x32x32xf32>
    %92 = arith.truncf %91 : vector<4x32x32xf32> to vector<4x32x32xbf16>
    %93 = vector.extract_strided_slice %21 {offsets = [0, 0, 352], sizes = [4, 32, 32], strides = [1, 1, 1]} : vector<4x32x384xf32> to vector<4x32x32xf32>
    %94 = arith.truncf %93 : vector<4x32x32xf32> to vector<4x32x32xbf16>
    "tpu.trace_start"() <{level = 10 : i32, message = "bqd,bkd->bqk"}> : () -> ()
    %cst_33 = arith.constant dense<0.000000e+00> : vector<4x32x32xf32>
    %95 = tpu.matmul %90, %92, %cst_33 {dimension_numbers = #tpu.dot_dimension_numbers<[2], [2], [1], [1], [0, 0, 0, 1, 1, 1], [0], [0]>} : vector<4x32x32xbf16>, vector<4x32x32xbf16>, vector<4x32x32xf32> -> vector<4x32x32xf32>
    "tpu.trace_stop"() : () -> ()
    %96 = vector.broadcast %22 : vector<1x32x32xf32> to vector<4x32x32xf32>
    %97 = arith.addf %95, %96 : vector<4x32x32xf32>
    %cst_34 = arith.constant dense<0xFF800000> : vector<4x32xf32>
    %98 = vector.multi_reduction <maximumf>, %97, %cst_34 [2] : vector<4x32x32xf32> to vector<4x32xf32>
    %99 = vector.shape_cast %98 : vector<4x32xf32> to vector<4x32x1xf32>
    %100 = vector.broadcast %99 : vector<4x32x1xf32> to vector<4x32x32xf32>
    %101 = arith.subf %97, %100 : vector<4x32x32xf32>
    %102 = math.exp %101 : vector<4x32x32xf32>
    %cst_35 = arith.constant dense<0.000000e+00> : vector<4x32xf32>
    %103 = vector.multi_reduction <add>, %102, %cst_35 [2] : vector<4x32x32xf32> to vector<4x32xf32>
    %104 = vector.shape_cast %103 : vector<4x32xf32> to vector<4x32x1xf32>
    %105 = tpu.reciprocal %104 {approx = true} : vector<4x32x1xf32> -> vector<4x32x1xf32>
    %106 = vector.broadcast %105 : vector<4x32x1xf32> to vector<4x32x32xf32>
    %107 = arith.mulf %102, %106 : vector<4x32x32xf32>
    %108 = arith.truncf %107 : vector<4x32x32xf32> to vector<4x32x32xbf16>
    "tpu.trace_start"() <{level = 10 : i32, message = "bqk,bkd->bqd"}> : () -> ()
    %cst_36 = arith.constant dense<0.000000e+00> : vector<4x32x32xf32>
    %109 = tpu.matmul %108, %94, %cst_36 {dimension_numbers = #tpu.dot_dimension_numbers<[2], [1], [1], [2], [0, 0, 0, 1, 1, 2], [0], [0]>} : vector<4x32x32xbf16>, vector<4x32x32xbf16>, vector<4x32x32xf32> -> vector<4x32x32xf32>
    "tpu.trace_stop"() : () -> ()
    %c0_37 = arith.constant 0 : index
    %c0_38 = arith.constant 0 : index
    %c96 = arith.constant 96 : index
    %110 = vector.load %arg15[%c0_37, %c0_38, %c96] : memref<4x32x128xf32, #tpu.memory_space<vmem>>, vector<4x32x32xf32>
    tpu.vector_store %arg15[%c0_37, %c0_38, %c96], %109 {strides = array<i32>} : memref<4x32x128xf32, #tpu.memory_space<vmem>>, vector<4x32x32xf32>,
    %c0_39 = arith.constant 0 : index
    %c0_40 = arith.constant 0 : index
    %c0_41 = arith.constant 0 : index
    %111 = vector.load %arg15[%c0_39, %c0_40, %c0_41] : memref<4x32x128xf32, #tpu.memory_space<vmem>>, vector<4x32x128xf32>
    %112 = vector.shape_cast %111 : vector<4x32x128xf32> to vector<128x128xf32>
    %113 = arith.truncf %112 : vector<128x128xf32> to vector<128x128xbf16>
    %c0_42 = arith.constant 0 : index
    %c0_43 = arith.constant 0 : index
    %114 = vector.load %arg6[%c0_42, %c0_43] : memref<128x128xbf16, #tpu.memory_space<vmem>>, vector<128x128xbf16>
    %cst_44 = arith.constant dense<0.000000e+00> : vector<128x128xf32>
    %115 = tpu.matmul %113, %114, %cst_44 {dimension_numbers = #tpu.dot_dimension_numbers<[1], [0], [0], [1], [0, 0, 1, 1], [], []>} : vector<128x128xbf16>, vector<128x128xbf16>, vector<128x128xf32> -> vector<128x128xf32>
    %c0_45 = arith.constant 0 : index
    %c0_46 = arith.constant 0 : index
    %116 = vector.load %arg7[%c0_45, %c0_46] : memref<1x128xf32, #tpu.memory_space<vmem>>, vector<1x128xf32>
    %117 = vector.broadcast %116 : vector<1x128xf32> to vector<128x128xf32>
    %118 = arith.addf %115, %117 : vector<128x128xf32>
    %119 = arith.addf %1, %118 : vector<128x128xf32>
    %cst_47 = arith.constant dense<0.000000e+00> : vector<128xf32>
    %120 = vector.multi_reduction <add>, %119, %cst_47 [1] : vector<128x128xf32> to vector<128xf32>
    %121 = vector.shape_cast %120 : vector<128xf32> to vector<128x1xf32>
    %cst_48 = arith.constant 1.280000e+02 : f32
    %122 = vector.broadcast %cst_48 : f32 to vector<128x1xf32>
    %123 = arith.divf %121, %122 : vector<128x1xf32>
    %124 = vector.broadcast %123 : vector<128x1xf32> to vector<128x128xf32>
    %125 = arith.subf %119, %124 : vector<128x128xf32>
    %126 = vector.broadcast %123 : vector<128x1xf32> to vector<128x128xf32>
    %127 = arith.subf %119, %126 : vector<128x128xf32>
    %128 = arith.mulf %125, %127 : vector<128x128xf32>
    %cst_49 = arith.constant dense<0.000000e+00> : vector<128xf32>
    %129 = vector.multi_reduction <add>, %128, %cst_49 [1] : vector<128x128xf32> to vector<128xf32>
    %130 = vector.shape_cast %129 : vector<128xf32> to vector<128x1xf32>
    %cst_50 = arith.constant 1.280000e+02 : f32
    %131 = vector.broadcast %cst_50 : f32 to vector<128x1xf32>
    %132 = arith.divf %130, %131 : vector<128x1xf32>
    %133 = vector.broadcast %123 : vector<128x1xf32> to vector<128x128xf32>
    %134 = arith.subf %119, %133 : vector<128x128xf32>
    %cst_51 = arith.constant 9.99999997E-7 : f32
    %135 = vector.broadcast %cst_51 : f32 to vector<128x1xf32>
    %136 = arith.addf %132, %135 : vector<128x1xf32>
    %137 = math.rsqrt %136 : vector<128x1xf32>
    %138 = vector.broadcast %137 : vector<128x1xf32> to vector<128x128xf32>
    %139 = arith.mulf %134, %138 : vector<128x128xf32>
    %c0_52 = arith.constant 0 : index
    %c0_53 = arith.constant 0 : index
    %140 = vector.load %arg8[%c0_52, %c0_53] : memref<1x128xf32, #tpu.memory_space<vmem>>, vector<1x128xf32>
    %141 = vector.broadcast %140 : vector<1x128xf32> to vector<128x128xf32>
    %142 = arith.mulf %139, %141 : vector<128x128xf32>
    %c0_54 = arith.constant 0 : index
    %c0_55 = arith.constant 0 : index
    %143 = vector.load %arg9[%c0_54, %c0_55] : memref<1x128xf32, #tpu.memory_space<vmem>>, vector<1x128xf32>
    %144 = vector.broadcast %143 : vector<1x128xf32> to vector<128x128xf32>
    %145 = arith.addf %142, %144 : vector<128x128xf32>
    %146 = arith.truncf %145 : vector<128x128xf32> to vector<128x128xbf16>
    %c0_56 = arith.constant 0 : index
    %c0_57 = arith.constant 0 : index
    %147 = vector.load %arg10[%c0_56, %c0_57] : memref<128x256xbf16, #tpu.memory_space<vmem>>, vector<128x256xbf16>
    %cst_58 = arith.constant dense<0.000000e+00> : vector<128x256xf32>
    %148 = tpu.matmul %146, %147, %cst_58 {dimension_numbers = #tpu.dot_dimension_numbers<[1], [0], [0], [1], [0, 0, 1, 1], [], []>} : vector<128x128xbf16>, vector<128x256xbf16>, vector<128x256xf32> -> vector<128x256xf32>
    %c0_59 = arith.constant 0 : index
    %c0_60 = arith.constant 0 : index
    %149 = vector.load %arg11[%c0_59, %c0_60] : memref<1x256xf32, #tpu.memory_space<vmem>>, vector<1x256xf32>
    %150 = vector.broadcast %149 : vector<1x256xf32> to vector<128x256xf32>
    %151 = arith.addf %148, %150 : vector<128x256xf32>
    %cst_61 = arith.constant 0.000000e+00 : f32
    %152 = vector.broadcast %cst_61 : f32 to vector<128x256xf32>
    %153 = arith.maximumf %151, %152 : vector<128x256xf32>
    %154 = arith.truncf %153 : vector<128x256xf32> to vector<128x256xbf16>
    %c0_62 = arith.constant 0 : index
    %c0_63 = arith.constant 0 : index
    %155 = vector.load %arg12[%c0_62, %c0_63] : memref<256x128xbf16, #tpu.memory_space<vmem>>, vector<256x128xbf16>
    %cst_64 = arith.constant dense<0.000000e+00> : vector<128x128xf32>
    %156 = tpu.matmul %154, %155, %cst_64 {dimension_numbers = #tpu.dot_dimension_numbers<[1], [0], [0], [1], [0, 0, 1, 1], [], []>} : vector<128x256xbf16>, vector<256x128xbf16>, vector<128x128xf32> -> vector<128x128xf32>
    %c0_65 = arith.constant 0 : index
    %c0_66 = arith.constant 0 : index
    %157 = vector.load %arg13[%c0_65, %c0_66] : memref<1x128xf32, #tpu.memory_space<vmem>>, vector<1x128xf32>
    %158 = vector.broadcast %157 : vector<1x128xf32> to vector<128x128xf32>
    %159 = arith.addf %156, %158 : vector<128x128xf32>
    %160 = arith.addf %119, %159 : vector<128x128xf32>
    %161 = vector.shape_cast %160 : vector<128x128xf32> to vector<4x32x128xf32>
    %c0_67 = arith.constant 0 : index
    %c0_68 = arith.constant 0 : index
    %c0_69 = arith.constant 0 : index
    %162 = vector.load %arg14[%c0_67, %c0_68, %c0_69] : memref<4x32x128xf32, #tpu.memory_space<vmem>>, vector<4x32x128xf32>
    tpu.vector_store %arg14[%c0_67, %c0_68, %c0_69], %161 {strides = array<i32>} : memref<4x32x128xf32, #tpu.memory_space<vmem>>, vector<4x32x128xf32>,
    return
  }
  func.func @transform_0(%arg0: i32) -> (i32, i32, i32) {
    %c0_i32 = arith.constant 0 : i32
    %c0_i32_0 = arith.constant 0 : i32
    %c0_i32_1 = arith.constant 0 : i32
    return %arg0, %c0_i32, %c0_i32_0 : i32, i32, i32
  }
  func.func @transform_1(%arg0: i32) -> (i32, i32, i32) {
    %c0_i32 = arith.constant 0 : i32
    %c0_i32_0 = arith.constant 0 : i32
    %c0_i32_1 = arith.constant 0 : i32
    %c0_i32_2 = arith.constant 0 : i32
    return %c0_i32, %c0_i32_0, %c0_i32_1 : i32, i32, i32
  }
  func.func @transform_2(%arg0: i32) -> (i32, i32) {
    %c0_i32 = arith.constant 0 : i32
    %c0_i32_0 = arith.constant 0 : i32
    %c0_i32_1 = arith.constant 0 : i32
    return %c0_i32, %c0_i32_0 : i32, i32
  }
  func.func @transform_3(%arg0: i32) -> (i32, i32) {
    %c0_i32 = arith.constant 0 : i32
    %c0_i32_0 = arith.constant 0 : i32
    %c0_i32_1 = arith.constant 0 : i32
    return %c0_i32, %c0_i32_0 : i32, i32
  }
  func.func @transform_4(%arg0: i32) -> (i32, i32) {
    %c0_i32 = arith.constant 0 : i32
    %c0_i32_0 = arith.constant 0 : i32
    %c0_i32_1 = arith.constant 0 : i32
    return %c0_i32, %c0_i32_0 : i32, i32
  }
  func.func @transform_5(%arg0: i32) -> (i32, i32) {
    %c0_i32 = arith.constant 0 : i32
    %c0_i32_0 = arith.constant 0 : i32
    %c0_i32_1 = arith.constant 0 : i32
    return %c0_i32, %c0_i32_0 : i32, i32
  }
  func.func @transform_6(%arg0: i32) -> (i32, i32) {
    %c0_i32 = arith.constant 0 : i32
    %c0_i32_0 = arith.constant 0 : i32
    %c0_i32_1 = arith.constant 0 : i32
    return %c0_i32, %c0_i32_0 : i32, i32
  }
  func.func @transform_7(%arg0: i32) -> (i32, i32) {
    %c0_i32 = arith.constant 0 : i32
    %c0_i32_0 = arith.constant 0 : i32
    %c0_i32_1 = arith.constant 0 : i32
    return %c0_i32, %c0_i32_0 : i32, i32
  }
  func.func @transform_8(%arg0: i32) -> (i32, i32) {
    %c0_i32 = arith.constant 0 : i32
    %c0_i32_0 = arith.constant 0 : i32
    %c0_i32_1 = arith.constant 0 : i32
    return %c0_i32, %c0_i32_0 : i32, i32
  }
  func.func @transform_9(%arg0: i32) -> (i32, i32) {
    %c0_i32 = arith.constant 0 : i32
    %c0_i32_0 = arith.constant 0 : i32
    %c0_i32_1 = arith.constant 0 : i32
    return %c0_i32, %c0_i32_0 : i32, i32
  }
  func.func @transform_10(%arg0: i32) -> (i32, i32) {
    %c0_i32 = arith.constant 0 : i32
    %c0_i32_0 = arith.constant 0 : i32
    %c0_i32_1 = arith.constant 0 : i32
    return %c0_i32, %c0_i32_0 : i32, i32
  }
  func.func @transform_11(%arg0: i32) -> (i32, i32) {
    %c0_i32 = arith.constant 0 : i32
    %c0_i32_0 = arith.constant 0 : i32
    %c0_i32_1 = arith.constant 0 : i32
    return %c0_i32, %c0_i32_0 : i32, i32
  }
  func.func @transform_12(%arg0: i32) -> (i32, i32) {
    %c0_i32 = arith.constant 0 : i32
    %c0_i32_0 = arith.constant 0 : i32
    %c0_i32_1 = arith.constant 0 : i32
    return %c0_i32, %c0_i32_0 : i32, i32
  }
  func.func @transform_13(%arg0: i32) -> (i32, i32, i32) {
    %c0_i32 = arith.constant 0 : i32
    %c0_i32_0 = arith.constant 0 : i32
    %c0_i32_1 = arith.constant 0 : i32
    return %arg0, %c0_i32, %c0_i32_0 : i32, i32, i32
  }
}

</mosaic_0001>

<bundles_post_ra>
// kernel: tpu_custom_call.1
= control target key start
LH: loop header
LB: loop body
LE: loop exit
PB: predicated region body
PF: predicated region fallthrough
CT: control target
= control target key end

     0   :  { %s9033_s0 = inlined_call_operand.hbm [shape: f32[8,32,128], index: 0, kind: input, shape index: {}]   ;;  %s9034_s1 = inlined_call_operand.hbm [shape: f32[1,32,32], index: 1, kind: input, shape index: {}]   ;;  %s9035_s2 = inlined_call_operand.vmem [shape: f32[1,128], index: 2, kind: input, shape index: {}]   ;;  %s9036_s3 = inlined_call_operand.hbm [shape: bf16[128,384], index: 3, kind: input, shape index: {}]   ;;  %s9037_s4 = inlined_call_operand.vmem [shape: f32[1,384], index: 4, kind: input, shape index: {}]   ;;  %s9038_s5 = inlined_call_operand.hbm [shape: bf16[128,128], index: 5, kind: input, shape index: {}]   ;;  %s9039_s6 = inlined_call_operand.vmem [shape: f32[1,128], index: 6, kind: input, shape index: {}]   ;;  %s9040_s7 = inlined_call_operand.vmem [shape: f32[1,128], index: 7, kind: input, shape index: {}]   ;;  %s9041_s8 = inlined_call_operand.vmem [shape: f32[1,128], index: 8, kind: input, shape index: {}]   ;;  %s9042_s9 = inlined_call_operand.hbm [shape: bf16[128,256], index: 9, kind: input, shape index: {}]   ;;  %s9043_s10 = inlined_call_operand.vmem [shape: f32[1,256], index: 10, kind: input, shape index: {}]   ;;  %s9044_s11 = inlined_call_operand.hbm [shape: bf16[256,128], index: 11, kind: input, shape index: {}]   ;;  %s9045_s12 = inlined_call_operand.vmem [shape: f32[1,128], index: 12, kind: input, shape index: {}]   ;;  %s9046_s13 = inlined_call_operand.hbm [shape: f32[8,32,128], index: 13, kind: output, shape index: {}]  }
   0x1   :  { %9071 = sst [smem:[#allocation32_spill]] %s9034_s1 }
   0x2   :  { %9072 = sst [smem:[#allocation33_spill]] %s9038_s5 }
   0x3   :  { %9073 = sst [smem:[#allocation34_spill]] %s9040_s7 }
   0x4   :  { %9074 = sst [smem:[#allocation35_spill]] %s9041_s8 }
   0x5   :  { %9075 = sst [smem:[#allocation36_spill]] %s9043_s10 }
   0x6   :  { %9076 = sst [smem:[#allocation37_spill]] %s9045_s12 }
   0x7   :  { %9077 = sst [smem:[#allocation38_spill]] %s9046_s13 }
   0x8   :  { %18 = vsyncpa [#allocation4], 0 }
   0x9   :  { %20 = vsyncpa [#allocation4 + $0x1], 0 }
   0xa   :  { %21 = vsyncpa [#allocation7], 0 }
   0xb   :  { %22 = vsyncpa [#allocation10], 0 }
   0xc   :  { %23 = vsyncpa [#allocation13], 0 }
   0xd   :  { %24 = vsyncpa [#allocation5], 0 }
   0xe   :  { %26 = vsyncpa [#allocation5 + $0x1], 0  ;;  %s6869_s25 = smov 0   ;;  %s6871_s26 = smov 0  }
   0xf   :  { %s6873_s27 = smov 0   ;;  %s6875_s28 = smov 0  }
  0x10 LB: > { %s6780_s29 = smov [#allocation6]   ;;  %s6890_s14 = sadd.s32 4294967295, %s6778_s28   ;;  %s6778_s28 = sphi %s6875_s28, %s9145_s28   ;;  %s6774_s27 = sphi %s6873_s27, %s9144_s27   ;;  %s6770_s26 = sphi %s6871_s26, %s9143_s26   ;;  %s6766_s25 = sphi %s6869_s25, %s9142_s25  }
  0x11   : > { %s353_s30 = sshll.u32 %s6780_s29, 4  ;;  %p5263_p0 = scmp.ge.s32.totalorder %s6778_s28, 1  ;;  %s6895_s30 = int_to_ptr.vmem [resolvable:$true] %s353_s30 }
  0x12   : > { %p9050_p1 = scmp.eq.s32.totalorder %s6890_s14, 0  ;;  %p341_p2 = scmp.lt.s32.totalorder %s6778_s28, 3 }
  0x13   : > { %s6781_s16 = smov [#allocation9]   ;;  %s6782_s19 = smov [#allocation8]  }
  0x14   : > { %p6897_p3 = pnand %p5263_p0, %p341_p2  ;;  %s385_s17 = sshll.u32 %s6781_s16, 4  ;;  %s6910_s17 = int_to_ptr.vmem [resolvable:$true] %s385_s17 }
  0x15   : > { %s6912_s20 = sshll.u32 %s6782_s19, 4  ;;  %s9080_s1 = sld [smem:[#allocation32_spill]]  ;;  %s370_s20 = int_to_ptr.vmem [resolvable:$true] %s6912_s20 }
  0x16   : > { %s9078_s15 = scalar_select %p6897_p3, 1, 0 }
  0x17   : > { %p6025_p5 = pneg %p6897_p3 }
  0x19   : > { %p6906_p6 = pnand %p6025_p5, %p9050_p1 }
  0x1b   : > { %s6530_s23 = scalar_lea.hbm %s9080_s1, 512  ;;  %p6922_p8 = pneg %p6906_p6 }
  0x1c   : > { %p6531_p7 = scmp.ne.s32.totalorder %s9080_s1, %s6530_s23  ;;  %p6537_p11 = scmp.lt.u32.totalorder %s6530_s23, %s9080_s1 }
  0x1e   : > { %p6533_p9 = pnand %p6922_p8, %p6531_p7 }
  0x20   : > { %p6534_p10 = pneg %p6533_p9 }
  0x22   : > { %p6539_p12 = pnand %p6537_p11, %p6534_p10 }
  0x24   : > { %6542 = shalt.err (!%p6539_p12)
}
  0x25   : > { %s6543_s21 = scalar_lea.vmem %s6895_s30, 512  ;;  %p6551_p5 = scmp.lt.s32.totalorder %s6895_s30, %s6895_s30 }
  0x26   : > { %p6544_p13 = scmp.ne.s32.totalorder %s6895_s30, %s6543_s21  ;;  %p6552_p4 = scmp.lt.s32.totalorder %s6543_s21, %s6543_s21 }
  0x28   : > { %p6546_p0 = pnand %p6544_p13, %p6922_p8  ;;  %p6553_p7 = por %p6552_p4, %p6551_p5 }
  0x2a   : > { %p6547_p2 = pneg %p6546_p0 }
  0x2c   : > { %p6554_p9 = pnand %p6553_p7, %p6547_p2 }
  0x2e   : > { %6557 = shalt.err (!%p6554_p9)
}
  0x2f   : > { %s9048_s22 = smov 128   ;;  %s9054_s13 = smov 8  }
  0x30   : > { %6028 = dma.hbm_to_vmem [thread:$0]  (!%p6906_p6), %s9080_s1, 512, %s6895_s30, [#allocation7], %s9048_s22, %s9048_s22, %s9054_s13  }
  0x31   : > { %s9082_s5 = sld [smem:[#allocation33_spill]] }
  0x37   : > { %s6558_s21 = scalar_lea.hbm %s9082_s5, 1024 }
  0x38   : > { %p6559_p4 = scmp.ne.s32.totalorder %s9082_s5, %s6558_s21  ;;  %p6565_p12 = scmp.lt.u32.totalorder %s6558_s21, %s9082_s5 }
  0x3a   : > { %p6561_p10 = pnand %p6559_p4, %p6922_p8 }
  0x3c   : > { %p6562_p11 = pneg %p6561_p10 }
  0x3e   : > { %p6567_p13 = pnand %p6565_p12, %p6562_p11 }
  0x40   : > { %6570 = shalt.err (!%p6567_p13)
}
  0x41   : > { %s6571_s30 = scalar_lea.vmem %s6910_s17, 1024  ;;  %p6579_p7 = scmp.lt.s32.totalorder %s6910_s17, %s6910_s17 }
  0x42   : > { %p6572_p0 = scmp.ne.s32.totalorder %s6910_s17, %s6571_s30  ;;  %p6580_p9 = scmp.lt.s32.totalorder %s6571_s30, %s6571_s30 }
  0x44   : > { %p6574_p2 = pnand %p6572_p0, %p6922_p8  ;;  %p6581_p4 = por %p6580_p9, %p6579_p7 }
  0x46   : > { %p6575_p5 = pneg %p6574_p2 }
  0x48   : > { %p6582_p10 = pnand %p6581_p4, %p6575_p5 }
  0x4a   : > { %6585 = shalt.err (!%p6582_p10)
}
  0x4b   : > { %s9052_s10 = smov 64   ;;  %s9053_s7 = smov 4  }
  0x4c   : > { %6034 = dma.hbm_to_vmem [thread:$0]  (!%p6906_p6), %s9082_s5, 1024, %s6910_s17, [#allocation10], %s9052_s10, %s9052_s10, %s9053_s7  }
  0x4d   : > { %s6586_s29 = scalar_lea.hbm %s9036_s3, 3072 }
  0x4e   : > { %p6587_p11 = scmp.ne.s32.totalorder %s9036_s3, %s6586_s29  ;;  %p6593_p0 = scmp.lt.u32.totalorder %s6586_s29, %s9036_s3 }
  0x50   : > { %p6589_p12 = pnand %p6587_p11, %p6922_p8 }
  0x52   : > { %p6590_p13 = pneg %p6589_p12 }
  0x54   : > { %p6595_p2 = pnand %p6593_p0, %p6590_p13 }
  0x56   : > { %6598 = shalt.err (!%p6595_p2)
}
  0x57   : > { %s6599_s8 = scalar_lea.vmem %s370_s20, 3072  ;;  %p6607_p4 = scmp.lt.s32.totalorder %s370_s20, %s370_s20 }
  0x58   : > { %p6600_p5 = scmp.ne.s32.totalorder %s370_s20, %s6599_s8  ;;  %p6608_p10 = scmp.lt.s32.totalorder %s6599_s8, %s6599_s8 }
  0x5a   : > { %p6602_p7 = pnand %p6600_p5, %p6922_p8  ;;  %p6609_p1 = por %p6608_p10, %p6607_p4 }
  0x5c   : > { %p6603_p9 = pneg %p6602_p7 }
  0x5e   : > { %p6610_p3 = pnand %p6609_p1, %p6603_p9 }
  0x60   : > { %6613 = shalt.err (!%p6610_p3)
}
  0x61   : > { %s6787_s17 = smov 192   ;;  %s6788_s12 = smov 12  }
  0x62   : > { %6031 = dma.hbm_to_vmem [thread:$0]  (!%p6906_p6), %s9036_s3, 3072, %s370_s20, [#allocation7], %s6787_s17, %s6787_s17, %s6788_s12  }
  0x63   : > { %s6789_s24 = smov [#allocation11]   ;;  %s6790_s19 = smov [#allocation12]  }
  0x64   : > { %s407_s29 = sshll.u32 %s6789_s24, 4  ;;  %s423_s21 = sshll.u32 %s6790_s19, 4  ;;  %s408_s29 = int_to_ptr.vmem [resolvable:$true] %s407_s29  ;;  %s424_s21 = int_to_ptr.vmem [resolvable:$true] %s423_s21 }
  0x65   : > { %s6614_s8 = scalar_lea.hbm %s9042_s9, 2048 }
  0x66   : > { %p6615_p1 = scmp.ne.s32.totalorder %s9042_s9, %s6614_s8  ;;  %p6621_p12 = scmp.lt.u32.totalorder %s6614_s8, %s9042_s9 }
  0x68   : > { %p6617_p3 = pnand %p6615_p1, %p6922_p8 }
  0x6a   : > { %p6618_p11 = pneg %p6617_p3 }
  0x6c   : > { %p6623_p13 = pnand %p6621_p12, %p6618_p11 }
  0x6e   : > { %6626 = shalt.err (!%p6623_p13)
}
  0x6f   : > { %s6627_s20 = scalar_lea.vmem %s408_s29, 2048  ;;  %p6635_p7 = scmp.lt.s32.totalorder %s408_s29, %s408_s29 }
  0x70   : > { %p6628_p0 = scmp.ne.s32.totalorder %s408_s29, %s6627_s20  ;;  %p6636_p9 = scmp.lt.s32.totalorder %s6627_s20, %s6627_s20 }
  0x72   : > { %p6630_p2 = pnand %p6628_p0, %p6922_p8  ;;  %p6637_p4 = por %p6636_p9, %p6635_p7 }
  0x74   : > { %p6631_p5 = pneg %p6630_p2 }
  0x76   : > { %p6638_p10 = pnand %p6637_p4, %p6631_p5 }
  0x78   : > { %6641 = shalt.err (!%p6638_p10)
}
  0x79   : > { %s9083_s13 = smov 8   ;;  %s9084_s10 = smov 128  }
  0x7a   : > { %6037 = dma.hbm_to_vmem [thread:$0]  (!%p6906_p6), %s9042_s9, 2048, %s408_s29, [#allocation10], %s9084_s10, %s9084_s10, %s9083_s13  }
  0x7b   : > { %s6642_s12 = scalar_lea.hbm %s9044_s11, 2048 }
  0x7c   : > { %p6643_p1 = scmp.ne.s32.totalorder %s9044_s11, %s6642_s12  ;;  %p6649_p12 = scmp.lt.u32.totalorder %s6642_s12, %s9044_s11 }
  0x7e   : > { %p6645_p3 = pnand %p6643_p1, %p6922_p8 }
  0x80   : > { %p6646_p11 = pneg %p6645_p3 }
  0x82   : > { %p6651_p13 = pnand %p6649_p12, %p6646_p11 }
  0x84   : > { %6654 = shalt.err (!%p6651_p13)
}
  0x85   : > { %s6655_s30 = scalar_lea.vmem %s424_s21, 2048  ;;  %p6663_p7 = scmp.lt.s32.totalorder %s424_s21, %s424_s21 }
  0x86   : > { %p6656_p0 = scmp.ne.s32.totalorder %s424_s21, %s6655_s30  ;;  %p6664_p9 = scmp.lt.s32.totalorder %s6655_s30, %s6655_s30 }
  0x88   : > { %p6658_p2 = pnand %p6656_p0, %p6922_p8  ;;  %p6665_p4 = por %p6664_p9, %p6663_p7 }
  0x8a   : > { %p6659_p5 = pneg %p6658_p2 }
  0x8c   : > { %p6666_p10 = pnand %p6665_p4, %p6659_p5 }
  0x8e   : > { %6669 = shalt.err (!%p6666_p10)
}
  0x8f   : > { %s9085_s29 = smov 4   ;;  %s9086_s8 = smov 64  }
  0x90   : > { %6040 = dma.hbm_to_vmem [thread:$0]  (!%p6906_p6), %s9044_s11, 2048, %s424_s21, [#allocation13], %s9086_s8, %s9086_s8, %s9085_s29  }
  0x91   : > { %s5262_s18 = sadd.s32 4294967294, %s6778_s28   ;;  %s7035_s16 = sadd.s32 1, %s6778_s28  }
  0x92   : > { %s39_s5 = sadd.s32 1, %s6774_s27  ;;  %s36_s7 = ssub.s32 %s6778_s28, %s7035_s16 }
  0x93   : > { %p46_p8 = scmp.ne.s32.totalorder %s6774_s27, %s6770_s26  ;;  %p37_p1 = scmp.eq.s32.totalorder %s36_s7, 0 }
  0x94   : > { %p47_p3 = scmp.eq.s32.totalorder %s6778_s28, 0  ;;  %p52_p11 = scmp.ne.s32.totalorder %s6770_s26, %s6766_s25 }
  0x95   : > { %p328_p12 = scmp.eq.s32.totalorder %s6890_s14, 1  ;;  %p9087_p0 = scmp.eq.s32.totalorder %s6890_s14, 0 }
  0x96   : > { %s7047_s17 = scalar_select %p37_p1, %s6774_s27, %s39_s5  }
  0x97   : > { %p48_p13 = por %p47_p3, %p46_p8  ;;  %p7051_p2 = por %p9087_p0, %p52_p11 }
  0x98   : > { %p7055_p6 = por %p328_p12, %p46_p8  ;;  %p334_p5 = scmp.eq.s32.totalorder %s5262_s18, 1 }
  0x99   : > { %p6054_p7 = scmp.lt.s32.totalorder %s6778_s28, 2  ;;  %s440_s22 = sand.u32 1, %s6774_s27  }
  0x9a   : > { %s9089_s21 = scalar_select %p7055_p6, 1, 0 }
  0x9b   : > { %p7061_p9 = por %p334_p5, %p52_p11  ;;  %s5270_s24 = sshll.u32 %s440_s22, 7 }
  0x9c   : > { %s5422_s19 = sshll.u32 %s6778_s28, 11  ;;  %s444_s20 = scalar_lea.vmem [#allocation3], %s5270_s24 }
  0x9d   : > { %s9090_s23 = scalar_select %p7061_p9, 1, 0 }
  0x9e   : > { %s7069_s8 = scalar_lea.hbm %s9033_s0, %s5422_s19  ;;  %s452_s1 = sshll.u32 %s444_s20, 4  ;;  %s7075_s1 = int_to_ptr.vmem [resolvable:$true] %s452_s1 }
  0x9f   : > { %p7071_p4 = pnand %p6054_p7, %p48_p13  ;;  %s7077_s5 = scalar_lea.sflag [#allocation4], %s440_s22 }
  0xa0   : > { %s6670_s7 = scalar_lea.hbm %s7069_s8, 2048  ;;  %s6675_s30 = scalar_lea.hbm %s9033_s0, 4096 }
  0xa1   : > { %p6671_p10 = scmp.ne.s32.totalorder %s7069_s8, %s6670_s7  ;;  %p6672_p8 = pneg %p7071_p4 }
  0xa2   : > { %p6676_p11 = scmp.lt.u32.totalorder %s7069_s8, %s9033_s0  ;;  %p6677_p12 = scmp.lt.u32.totalorder %s6675_s30, %s6670_s7 }
  0xa3   : > { %p6673_p1 = pnand %p6672_p8, %p6671_p10  ;;  %p6679_p0 = scmp.lt.u32.totalorder %s6670_s7, %s7069_s8 }
  0xa4   : > { %p6678_p13 = por %p6677_p12, %p6676_p11 }
  0xa5   : > { %p6674_p3 = pneg %p6673_p1 }
  0xa6   : > { %p6680_p5 = por %p6679_p0, %p6678_p13 }
  0xa8   : > { %p6681_p7 = pnand %p6680_p5, %p6674_p3 }
  0xaa   : > { %6684 = shalt.err (!%p6681_p7)
}
  0xab   : > { %s6685_s22 = scalar_lea.vmem %s7075_s1, 2048  ;;  %s6791_s24 = smov [#allocation3]  }
  0xac   : > { %p6686_p10 = scmp.ne.s32.totalorder %s7075_s1, %s6685_s22  ;;  %s6690_s19 = sshll.u32 %s6791_s24, 4  ;;  %s6691_s19 = int_to_ptr.vmem [resolvable:$false] %s6690_s19 }
  0xad   : > { %s6692_s29 = scalar_lea.vmem %s6691_s19, 4096  ;;  %p6693_p6 = scmp.lt.s32.totalorder %s7075_s1, %s6691_s19 }
  0xae   : > { %p6688_p1 = pnand %p6686_p10, %p6672_p8  ;;  %p6694_p11 = scmp.lt.s32.totalorder %s6692_s29, %s6685_s22 }
  0xb0   : > { %p6689_p9 = pneg %p6688_p1  ;;  %p6695_p12 = por %p6694_p11, %p6693_p6 }
  0xb2   : > { %p6696_p13 = pnand %p6695_p12, %p6689_p9 }
  0xb4   : > { %6699 = shalt.err (!%p6696_p13)
}
  0xb5   : > { %6044 = dma.hbm_to_vmem [thread:$0]  (!%p7071_p4), %s7069_s8, 2048, %s7075_s1, %s7077_s5, %s9084_s10, %s9084_s10, %s9083_s13  }
  0xb6   : > { %p9092_p8 = scmp.ne.s32.totalorder %s9078_s15, 0 }
  0xb8   : > { %464 = sbr.rel (%p9092_p8) target bundleno = 4445 (0x115d), region = 72 }
  0xbf   : > { %s7111_s7 = sand.u32 1, %s6770_s26  }
  0xc0   : > { %s5275_s30 = sshll.u32 %s7111_s7, 7  ;;  %s467_s20 = scalar_lea.sflag [#allocation4], %s7111_s7 }
  0xc1   : > { %s7117_s18 = scalar_lea.vmem [#allocation3], %s5275_s30 }
  0xc2   : > { %6745 = dma.done.wait (%p7051_p2), %s467_s20, 2048  }
  0xc3   : > { %6747 = vsyncadd (%p7051_p2), %s467_s20, 4294965248  ;;  %p9093_p6 = scmp.eq.s32.totalorder %s6890_s14, 0 }
  0xc5   : > { %6749 = dma.done.wait (%p9093_p6), [#allocation7], 3584   ;;  %p9094_p9 = pmov %p9093_p6 }
  0xc6   : > { %p9095_p4 = pmov %p9093_p6 }
  0xc7   : > { %6751 = vsyncadd (%p9094_p9), [#allocation7], 4294963712 }
  0xc8   : > { %6753 = dma.done.wait (%p9095_p4), [#allocation10], 3072   ;;  %p9096_p3 = pmov %p9095_p4 }
  0xca   : > { %6755 = vsyncadd (%p9096_p3), [#allocation10], 4294964224  ;;  %p9097_p0 = pmov %p9096_p3 }
  0xcc   : > { %6757 = dma.done.wait (%p9097_p0), [#allocation13], 2048   ;;  %p9098_p5 = pmov %p9097_p0 }
  0xcd   : > { %v7136_v0 = vld [vmem:[%s7117_s18] sm:$0xff]  ;;  %v7139_v1 = vld [vmem:[%s7117_s18 + $0x10] sm:$0xff]  ;;  %v7142_v2 = vld [vmem:[%s7117_s18 + $0x8] sm:$0xff]  ;;  %v9059_v54 = vmov 0   ;;  %vm1111_vm0 = vcmask 261120   ;;  %s6793_s8 = smov 96  }
  0xce   : > { %6759 = vsyncadd (%p9098_p5), [#allocation13], 4294965248  ;;  %v552_v3 = vmul.f32 %v7136_v0, %v7136_v0  ;;  %v554_v4 = vmul.f32 %v7139_v1, %v7139_v1  ;;  %v7149_v5 = vld [vmem:[%s7117_s18 + $0x18] sm:$0xff]  ;;  %v553_v6 = vmul.f32 %v7142_v2, %v7142_v2  ;;  %v7156_v8 = vld [vmem:[%s7117_s18 + $0x28] sm:$0xff]  ;;  %905 = vmatprep.mubr.bf16.mxu0 %v9059_v54  ;;  %s6794_s1 = smov 64   ;;  %s6795_s5 = smov 32  }
  0xcf   : > { %v555_v7 = vmul.f32 %v7149_v5, %v7149_v5  ;;  %v7159_v9 = vld [vmem:[%s7117_s18 + $0x20] sm:$0xff]  ;;  %v7162_v10 = vld [vmem:[%s7117_s18 + $0x38] sm:$0xff]  ;;  %v7165_v11 = vld [vmem:[%s7117_s18 + $0x30] sm:$0xff]  ;;  %v557_v14 = vmul.f32 %v7156_v8, %v7156_v8  ;;  %vm2568_vm1 = vcmask 523520   ;;  %vm3353_vm2 = vcmask 785920   ;;  %s9131_s20 = sld [smem:[#allocation34_spill]] }
  0xd0   : > { %568 = vadd.xlane.f32.xlu0 %v552_v3  ;;  %572 = vadd.xlane.f32.xlu1 %v554_v4  ;;  %v6110_v12 = vld [vmem:[#allocation8 + $0x4] ss:$12 sps:$4 sm:$0xff]   ;;  %v6112_v13 = vld [vmem:[#allocation8] ss:$12 sps:$4 sm:$0xff]   ;;  %v556_v15 = vmul.f32 %v7159_v9, %v7159_v9  ;;  %v6113_v16 = vld [vmem:[#allocation8 + $0x8] ss:$12 sps:$4 sm:$0xff]   ;;  %v559_v22 = vmul.f32 %v7162_v10, %v7162_v10  ;;  %v558_v23 = vmul.f32 %v7165_v11, %v7165_v11 }
  0xd1   : > { %873 = vmatprep.subr.bf16.mxu0 %v6110_v12  ;;  %v6114_v17 = vld [vmem:[#allocation8 + $0x1c] ss:$12 sps:$4 sm:$0xff]   ;;  %v6116_v18 = vld [vmem:[#allocation8 + $0x18] ss:$12 sps:$4 sm:$0xff]   ;;  %5649 = vmatprep.subr.bf16.mxu1 %v6113_v16  ;;  %v6117_v19 = vld [vmem:[#allocation8 + $0x20] ss:$12 sps:$4 sm:$0xff]  }
  0xd2   : > { %874 = vmatpush1.bf16.msra.mxu0 %v6112_v13  ;;  %v7172_v20 = vld [vmem:[%s7117_s18 + $0x48] sm:$0xff]  ;;  %v7175_v21 = vld [vmem:[%s7117_s18 + $0x40] sm:$0xff]  ;;  %5650 = vmatpush3.bf16.msra.mxu1 %v6113_v16  ;;  %v7182_v24 = vld [vmem:[%s7117_s18 + $0x58] sm:$0xff]  ;;  %vm4138_vm3 = vcmask 1048320   ;;  %s9132_s13 = sld [smem:[#allocation35_spill]]  ;;  %s9137_s22 = sld [smem:[#allocation37_spill]] }
  0xd3   : > { %875 = vmatprep.subr.bf16.mxu0 %v6114_v17  ;;  %5651 = vmatprep.subr.bf16.mxu1 %v6117_v19  ;;  %v7185_v25 = vld [vmem:[%s7117_s18 + $0x50] sm:$0xff]  ;;  %v561_v26 = vmul.f32 %v7172_v20, %v7172_v20  ;;  %v560_v27 = vmul.f32 %v7175_v21, %v7175_v21  ;;  %v6121_v30 = vld [vmem:[#allocation8 + $0x38] ss:$12 sps:$4 sm:$0xff]   ;;  %v7192_v31 = vld [vmem:[%s7117_s18 + $0x68] sm:$0xff]  ;;  %v563_v33 = vmul.f32 %v7182_v24, %v7182_v24  ;;  %s8935_s24 = scalar_lea.vmem [#allocation14], %s5275_s30  ;;  %s5424_s30 = sshll.u32 %s6890_s14, 11 }
  0xd4   : > { %570 = vadd.xlane.f32.xlu0 %v553_v6  ;;  %574 = vadd.xlane.f32.xlu1 %v555_v7  ;;  %v6118_v28 = vld [vmem:[#allocation8 + $0x34] ss:$12 sps:$4 sm:$0xff]   ;;  %v6120_v29 = vld [vmem:[#allocation8 + $0x30] ss:$12 sps:$4 sm:$0xff]   ;;  %v562_v34 = vmul.f32 %v7185_v25, %v7185_v25  ;;  %v6122_v35 = vld [vmem:[#allocation8 + $0x4c] ss:$12 sps:$4 sm:$0xff]   ;;  %v565_v40 = vmul.f32 %v7192_v31, %v7192_v31 }
  0xd5   : > { %v7195_v32 = vld [vmem:[%s7117_s18 + $0x60] sm:$0xff]  ;;  %v6124_v36 = vld [vmem:[#allocation8 + $0x48] ss:$12 sps:$4 sm:$0xff]   ;;  %v6125_v37 = vld [vmem:[#allocation8 + $0x50] ss:$12 sps:$4 sm:$0xff]   ;;  %s5141_s19 = sshll.u32 %s8935_s24, 4  ;;  %s8986_s19 = int_to_ptr.vmem [resolvable:$true] %s5141_s19 }
  0xd6   : > { %876 = vmatpush1.bf16.msra.mxu0 %v6116_v18  ;;  %5652 = vmatpush3.bf16.msra.mxu1 %v6117_v19  ;;  %v7202_v38 = vld [vmem:[%s7117_s18 + $0x78] sm:$0xff]  ;;  %v7205_v39 = vld [vmem:[%s7117_s18 + $0x70] sm:$0xff]  ;;  %v564_v41 = vmul.f32 %v7195_v32, %v7195_v32  ;;  %v6128_v43 = vld [vmem:[#allocation8 + $0x60] ss:$12 sps:$4 sm:$0xff]   ;;  %s5127_s14 = scalar_lea.sflag [#allocation5], %s7111_s7  ;;  %p9139_p7 = scmp.ne.s32.totalorder %s9089_s21, 0 }
  0xd7   : > { %877 = vmatprep.subr.bf16.mxu0 %v6118_v28  ;;  %5653 = vmatprep.subr.bf16.mxu1 %v6121_v30  ;;  %v6126_v42 = vld [vmem:[#allocation8 + $0x64] ss:$12 sps:$4 sm:$0xff]   ;;  %v6129_v44 = vld [vmem:[#allocation8 + $0x68] ss:$12 sps:$4 sm:$0xff]   ;;  %v6133_v46 = vld [vmem:[#allocation8 + $0x80] ss:$12 sps:$4 sm:$0xff]   ;;  %v567_v47 = vmul.f32 %v7202_v38, %v7202_v38  ;;  %v566_v48 = vmul.f32 %v7205_v39, %v7205_v39 }
  0xd8   : > { %578 = vadd.xlane.f32.xlu1 %v557_v14  ;;  %576 = vadd.xlane.f32.xlu0 %v556_v15  ;;  %v6130_v45 = vld [vmem:[#allocation8 + $0x7c] ss:$12 sps:$4 sm:$0xff]   ;;  %v6132_v49 = vld [vmem:[#allocation8 + $0x78] ss:$12 sps:$4 sm:$0xff]   ;;  %v6134_v50 = vld [vmem:[#allocation8 + $0x94] ss:$12 sps:$4 sm:$0xff]  }
  0xd9   : > { %v6136_v51 = vld [vmem:[#allocation8 + $0x90] ss:$12 sps:$4 sm:$0xff]   ;;  %v6137_v52 = vld [vmem:[#allocation8 + $0x98] ss:$12 sps:$4 sm:$0xff]   ;;  %v6140_v56 = vld [vmem:[#allocation8 + $0xa8] ss:$12 sps:$4 sm:$0xff]  }
  0xda   : > { %878 = vmatpush1.bf16.msra.mxu0 %v6120_v29  ;;  %5654 = vmatpush3.bf16.msra.mxu1 %v6121_v30  ;;  %v6138_v53 = vld [vmem:[#allocation8 + $0xac] ss:$12 sps:$4 sm:$0xff]   ;;  %v6141_v55 = vld [vmem:[#allocation8 + $0xb0] ss:$12 sps:$4 sm:$0xff]   ;;  %s6796_s10 = smov [#allocation14]  }
  0xdb   : > { %879 = vmatprep.subr.bf16.mxu0 %v6122_v35  ;;  %5655 = vmatprep.subr.bf16.mxu1 %v6125_v37  ;;  %s6704_s12 = sshll.u32 %s6796_s10, 4  ;;  %s6705_s12 = int_to_ptr.vmem [resolvable:$false] %s6704_s12 }
  0xdc   : > { %582 = vadd.xlane.f32.xlu1 %v559_v22  ;;  %580 = vadd.xlane.f32.xlu0 %v558_v23  ;;  %p6707_p11 = scmp.lt.s32.totalorder %s8986_s19, %s6705_s12 }
  0xde   : > { %880 = vmatpush1.bf16.msra.mxu0 %v6124_v36  ;;  %5656 = vmatpush3.bf16.msra.mxu1 %v6125_v37 }
  0xdf   : > { %881 = vmatprep.subr.bf16.mxu0 %v6126_v42  ;;  %5657 = vmatprep.subr.bf16.mxu1 %v6129_v44  ;;  %v7221_v42 = vld [vmem:[%s9035_s2] ss:$0 sm:$0xff] }
  0xe0   : > { %586 = vadd.xlane.f32.xlu1 %v561_v26  ;;  %584 = vadd.xlane.f32.xlu0 %v560_v27 }
  0xe2   : > { %882 = vmatpush1.bf16.msra.mxu0 %v6128_v43  ;;  %5658 = vmatpush3.bf16.msra.mxu1 %v6129_v44 }
  0xe3   : > { %883 = vmatprep.subr.bf16.mxu0 %v6130_v45  ;;  %5659 = vmatprep.subr.bf16.mxu1 %v6133_v46 }
  0xe4   : > { %590 = vadd.xlane.f32.xlu1 %v563_v33  ;;  %588 = vadd.xlane.f32.xlu0 %v562_v34 }
  0xe6   : > { %884 = vmatpush1.bf16.msra.mxu0 %v6132_v49  ;;  %5660 = vmatpush3.bf16.msra.mxu1 %v6133_v46 }
  0xe7   : > { %885 = vmatprep.subr.bf16.mxu0 %v6134_v50  ;;  %5661 = vmatprep.subr.bf16.mxu1 %v6137_v52 }
  0xe8   : > { %594 = vadd.xlane.f32.xlu1 %v565_v40  ;;  %592 = vadd.xlane.f32.xlu0 %v564_v41 }
  0xea   : > { %886 = vmatpush1.bf16.msra.mxu0 %v6136_v51  ;;  %5662 = vmatpush3.bf16.msra.mxu1 %v6137_v52 }
  0xeb   : > { %887 = vmatprep.subr.bf16.mxu0 %v6138_v53  ;;  %5663 = vmatprep.subr.bf16.mxu1 %v6141_v55 }
  0xec   : > { %598 = vadd.xlane.f32.xlu1 %v567_v47  ;;  %596 = vadd.xlane.f32.xlu0 %v566_v48 }
  0xee   : > { %888 = vmatpush1.bf16.msra.mxu0 %v6140_v56  ;;  %5664 = vmatpush3.bf16.msra.mxu1 %v6141_v55 }
 0x15d   : > { %v569_v57 = vpop.xlane.xlu0 %568  ;;  %v573_v58 = vpop.xlane.xlu1 %572 }
 0x15e   : > { %v601_v59 = vmul.f32 0.0078125, %v569_v57  ;;  %v603_v60 = vmul.f32 0.0078125, %v573_v58 }
 0x160   : > { %v617_v61 = vadd.f32 1e-06, %v601_v59  ;;  %v619_v62 = vadd.f32 1e-06, %v603_v60 }
 0x161   : > { %v571_v63 = vpop.xlane.xlu0 %570  ;;  %v575_v3 = vpop.xlane.xlu1 %574 }
 0x162   : > { %6190 = vrsqrt.f32 %v617_v61  ;;  %v602_v4 = vmul.f32 0.0078125, %v571_v63  ;;  %v604_v6 = vmul.f32 0.0078125, %v575_v3 }
 0x163   : > { %6192 = vrsqrt.f32 %v619_v62 }
 0x164   : > { %v618_v7 = vadd.f32 1e-06, %v602_v4  ;;  %v620_v12 = vadd.f32 1e-06, %v604_v6 }
 0x165   : > { %v579_v13 = vpop.xlane.xlu1 %578  ;;  %v577_v14 = vpop.xlane.xlu0 %576 }
 0x166   : > { %6194 = vrsqrt.f32 %v618_v7  ;;  %v606_v15 = vmul.f32 0.0078125, %v579_v13  ;;  %v605_v16 = vmul.f32 0.0078125, %v577_v14 }
 0x167   : > { %6196 = vrsqrt.f32 %v620_v12 }
 0x168   : > { %v622_v17 = vadd.f32 1e-06, %v606_v15  ;;  %v621_v18 = vadd.f32 1e-06, %v605_v16 }
 0x169   : > { %v583_v19 = vpop.xlane.xlu1 %582  ;;  %v581_v22 = vpop.xlane.xlu0 %580 }
 0x16a   : > { %6198 = vrsqrt.f32 %v622_v17  ;;  %v608_v23 = vmul.f32 0.0078125, %v583_v19  ;;  %v607_v26 = vmul.f32 0.0078125, %v581_v22 }
 0x16b   : > { %6200 = vrsqrt.f32 %v621_v18 }
 0x16c   : > { %v6191_v27 = vpop.eup %6190  ;;  %v624_v28 = vadd.f32 1e-06, %v608_v23  ;;  %v623_v29 = vadd.f32 1e-06, %v607_v26 }
 0x16d   : > { %v6193_v30 = vpop.eup %6192  ;;  %v587_v33 = vpop.xlane.xlu1 %586  ;;  %v649_v40 = vmul.f32 %v6191_v27, %v7136_v0 }
 0x16e   : > { %v585_v34 = vpop.xlane.xlu0 %584  ;;  %6202 = vrsqrt.f32 %v624_v28  ;;  %v651_v35 = vmul.f32 %v6193_v30, %v7139_v1  ;;  %v610_v36 = vmul.f32 0.0078125, %v587_v33 }
 0x16f   : > { %v609_v37 = vmul.f32 0.0078125, %v585_v34  ;;  %6204 = vrsqrt.f32 %v623_v29  ;;  %v672_v51 = vmul.f32 %v7221_v42, %v649_v40 }
 0x170   : > { %v6195_v41 = vpop.eup %6194  ;;  %v626_v43 = vadd.f32 1e-06, %v610_v36  ;;  %v674_v47 = vmul.f32 %v7221_v42, %v651_v35 }
 0x171   : > { %v625_v44 = vadd.f32 1e-06, %v609_v37  ;;  %v6197_v45 = vpop.eup %6196  ;;  %v650_v46 = vmul.f32 %v6195_v41, %v7142_v2  ;;  %v591_v48 = vpop.xlane.xlu1 %590 }
 0x172   : > { %v589_v1 = vpop.xlane.xlu0 %588  ;;  %v652_v49 = vmul.f32 %v6197_v45, %v7149_v5  ;;  %6206 = vrsqrt.f32 %v626_v43  ;;  %v612_v50 = vmul.f32 0.0078125, %v591_v48 }
 0x173   : > { %v611_v0 = vmul.f32 0.0078125, %v589_v1  ;;  %v673_v52 = vmul.f32 %v7221_v42, %v650_v46  ;;  %6208 = vrsqrt.f32 %v625_v44 }
 0x174   : > { %v6199_v53 = vpop.eup %6198  ;;  %v675_v55 = vmul.f32 %v7221_v42, %v652_v49  ;;  %v628_v56 = vadd.f32 1e-06, %v612_v50 }
 0x175   : > { %v627_v57 = vadd.f32 1e-06, %v611_v0  ;;  %v6201_v2 = vpop.eup %6200  ;;  %v688_v58 = vpack.c.bf16 %v673_v52, %v672_v51  ;;  %v654_v59 = vmul.f32 %v6199_v53, %v7156_v8  ;;  %v595_v60 = vpop.xlane.xlu1 %594  ;;  %v728_v53 = vld [vmem:[%s9037_s4] sm:$0x7] }
 0x176   : > { %v593_v61 = vpop.xlane.xlu0 %592  ;;  %v689_v5 = vpack.c.bf16 %v675_v55, %v674_v47  ;;  %v653_v62 = vmul.f32 %v6201_v2, %v7159_v9  ;;  %6210 = vrsqrt.f32 %v628_v56  ;;  %v614_v63 = vmul.f32 0.0078125, %v595_v60 }
 0x177   : > { %906 = vmatmul.mubr.bf16.vlgmr.msra.gmra.mrb[0].mxu0 %v688_v58  ;;  %5665 = vmatprep.mubr.bf16.mxu1 %v688_v58  ;;  %v677_v3 = vmul.f32 %v7221_v42, %v654_v59  ;;  %6212 = vrsqrt.f32 %v627_v57  ;;  %v613_v4 = vmul.f32 0.0078125, %v593_v61 }
 0x178   : > { %v6203_v6 = vpop.eup %6202  ;;  %5666 = vmatmul.mubr.bf16.vlgmr.msra.gmra.mrb[0].mxu1 %v689_v5  ;;  %915 = vmatprep.mubr.bf16.mxu0 %v9059_v54  ;;  %v676_v7 = vmul.f32 %v7221_v42, %v653_v62  ;;  %v630_v8 = vadd.f32 1e-06, %v614_v63 }
 0x179   : > { %v6205_v12 = vpop.eup %6204  ;;  %v656_v13 = vmul.f32 %v6203_v6, %v7162_v10  ;;  %v629_v14 = vadd.f32 1e-06, %v613_v4  ;;  %v599_v9 = vpop.xlane.xlu1 %598 }
 0x17a   : > { %v597_v15 = vpop.xlane.xlu0 %596  ;;  %v690_v16 = vpack.c.bf16 %v677_v3, %v676_v7  ;;  %v655_v17 = vmul.f32 %v6205_v12, %v7165_v11  ;;  %6214 = vrsqrt.f32 %v630_v8  ;;  %v616_v18 = vmul.f32 0.0078125, %v599_v9 }
 0x17b   : > { %v679_v19 = vmul.f32 %v7221_v42, %v656_v13  ;;  %6216 = vrsqrt.f32 %v629_v14  ;;  %v615_v22 = vmul.f32 0.0078125, %v597_v15 }
 0x17c   : > { %v6207_v23 = vpop.eup %6206  ;;  %5669 = vmatprep.mubr.bf16.mxu1 %v690_v16  ;;  %v678_v26 = vmul.f32 %v7221_v42, %v655_v17  ;;  %v632_v27 = vadd.f32 1e-06, %v616_v18 }
 0x17d   : > { %v6209_v28 = vpop.eup %6208  ;;  %v658_v10 = vmul.f32 %v6207_v23, %v7172_v20  ;;  %v631_v29 = vadd.f32 1e-06, %v615_v22 }
 0x17e   : > { %v691_v30 = vpack.c.bf16 %v679_v19, %v678_v26  ;;  %v657_v33 = vmul.f32 %v6209_v28, %v7175_v21  ;;  %6218 = vrsqrt.f32 %v632_v27 }
 0x17f   : > { %916 = vmatmul.mubr.bf16.gmra.mrb[4].mxu0 %v689_v5  ;;  %v681_v11 = vmul.f32 %v7221_v42, %v658_v10  ;;  %6220 = vrsqrt.f32 %v631_v29 }
 0x180   : > { %v6211_v34 = vpop.eup %6210  ;;  %925 = vmatprep.mubr.bf16.mxu0 %v9059_v54  ;;  %5670 = vmatmul.mubr.bf16.gmra.mrb[4].mxu1 %v691_v30  ;;  %v680_v35 = vmul.f32 %v7221_v42, %v657_v33 }
 0x181   : > { %v6213_v36 = vpop.eup %6212  ;;  %v660_v37 = vmul.f32 %v6211_v34, %v7182_v24 }
 0x182   : > { %v692_v40 = vpack.c.bf16 %v681_v11, %v680_v35  ;;  %v659_v20 = vmul.f32 %v6213_v36, %v7185_v25 }
 0x183   : > { %v683_v41 = vmul.f32 %v7221_v42, %v660_v37 }
 0x184   : > { %v6215_v21 = vpop.eup %6214  ;;  %5673 = vmatprep.mubr.bf16.mxu1 %v692_v40  ;;  %v682_v43 = vmul.f32 %v7221_v42, %v659_v20 }
 0x185   : > { %v6217_v44 = vpop.eup %6216  ;;  %v662_v45 = vmul.f32 %v6215_v21, %v7192_v31 }
 0x186   : > { %v693_v46 = vpack.c.bf16 %v683_v41, %v682_v43  ;;  %v661_v47 = vmul.f32 %v6217_v44, %v7195_v32 }
 0x187   : > { %926 = vmatmul.mubr.bf16.gmra.mrb[8].mxu0 %v690_v16  ;;  %v685_v48 = vmul.f32 %v7221_v42, %v662_v45 }
 0x188   : > { %v6219_v1 = vpop.eup %6218  ;;  %935 = vmatprep.mubr.bf16.mxu0 %v9059_v54  ;;  %v684_v24 = vmul.f32 %v7221_v42, %v661_v47  ;;  %5674 = vmatmul.mubr.bf16.gmra.mrb[8].mxu1 %v693_v46 }
 0x189   : > { %v6221_v25 = vpop.eup %6220  ;;  %v664_v49 = vmul.f32 %v6219_v1, %v7202_v38  ;;  %v730_v38 = vlaneseq }
 0x18a   : > { %v694_v50 = vpack.c.bf16 %v685_v48, %v684_v24  ;;  %v663_v0 = vmul.f32 %v6221_v25, %v7205_v39 }
 0x18b   : > { %v687_v31 = vmul.f32 %v7221_v42, %v664_v49  ;;  %v7260_v39 = vshrl.u32 %v730_v38, 7 }
 0x18c   : > { %v686_v51 = vmul.f32 %v7221_v42, %v663_v0  ;;  %5677 = vmatprep.mubr.bf16.mxu1 %v694_v50 }
 0x18d   : > { %9099 = vst [vmem:[#allocation20_spill] sm:$0xff] %v7260_v39  ;;  %v740_v42 = vsub.s32 2, %v7260_v39  ;;  %v9058_v52 = vsub.s32 0, %v7260_v39  ;;  %v9057_v55 = vsub.s32 1, %v7260_v39 }
 0x18e   : > { %v695_v32 = vpack.c.bf16 %v687_v31, %v686_v51 }
 0x18f   : > { %936 = vmatmul.mubr.bf16.gmra.mrb[12].mxu0 %v691_v30  ;;  %v7268_v56 = vrot.slane %v728_v53, %v740_v42  ;;  %v7272_v57 = vrot.slane %v728_v53, %v9058_v52  ;;  %v7276_v58 = vrot.slane %v728_v53, %v9057_v55 }
 0x190   : > { %945 = vmatprep.mubr.bf16.mxu0 %v9059_v54  ;;  %5678 = vmatmul.mubr.bf16.gmra.mrb[12].mxu1 %v695_v32 }
 0x197   : > { %946 = vmatmul.mubr.bf16.gmra.mrb[16].mxu0 %v692_v40 }
 0x198   : > { %955 = vmatprep.mubr.bf16.mxu0 %v9059_v54 }
 0x19f   : > { %956 = vmatmul.mubr.bf16.gmra.mrb[20].mxu0 %v693_v46 }
 0x1a0   : > { %965 = vmatprep.mubr.bf16.mxu0 %v9059_v54 }
 0x1a7   : > { %966 = vmatmul.mubr.bf16.gmra.mrb[24].mxu0 %v694_v50 }
 0x1a8   : > { %975 = vmatprep.mubr.bf16.mxu0 %v9059_v54 }
 0x1af   : > { %976 = vmatmul.mubr.bf16.gmra.mrb[28].mxu0 %v695_v32 }
 0x24a   : > { %v907_v2 = vpop.f32.mrb[0].mxu0 }
 0x24b   : > { %v909_v59 = vpop.f32.mrb[1].mxu0  ;;  %v5667_v60 = vpop.f32.mrb[0].mxu1  ;;  %v908_v63 = vadd.f32 %v907_v2, %v7272_v57 }
 0x24c   : > { %v1029_v61 = vadd.f32 %v5667_v60, %v7268_v56  ;;  %v911_v5 = vpop.f32.mrb[2].mxu0  ;;  %v1020_v62 = vpop.f32.mrb[1].mxu1  ;;  %v910_v8 = vadd.f32 %v909_v59, %v7276_v58 }
 0x24d   : > { %v912_v3 = vadd.f32 %v911_v5, %v7272_v57  ;;  %v1021_v4 = vadd.f32 %v1020_v62, %v7268_v56  ;;  %v913_v6 = vpop.f32.mrb[3].mxu0  ;;  %v5668_v7 = vpop.f32.mrb[2].mxu1 }
 0x24e   : > { %v914_v12 = vadd.f32 %v913_v6, %v7276_v58  ;;  %v1032_v13 = vadd.f32 %v5668_v7, %v7268_v56  ;;  %v1023_v14 = vpop.f32.mrb[3].mxu1 }
 0x24f   : > { %v7285_v9 = vpack.c.bf16 %v912_v3, %v908_v63  ;;  %v1024_v15 = vadd.f32 %v1023_v14, %v7268_v56 }
 0x250   : > { %v7288_v16 = vpack.c.bf16 %v914_v12, %v910_v8  ;;  %v7290_v17 = vpack.c.bf16 %v1032_v13, %v1029_v61 }
 0x251   : > { %v7292_v18 = vpack.c.bf16 %v1024_v15, %v1021_v4  ;;  %5685 = vmatprep.mubr.msk.bf16.mxu1 %vm1111_vm0, %v7285_v9 }
 0x252   : > { %v917_v19 = vpop.f32.mrb[4].mxu0  ;;  %5969 = vmatprep.subr.msk.bf16.mxu1 %vm1111_vm0, %v7288_v16  ;;  %v1119_v22 = vsel %vm1111_vm0, %v7288_v16, 0 }
 0x253   : > { %v919_v23 = vpop.f32.mrb[5].mxu0  ;;  %5682 = vmatpush3.bf16.xpose.msra.mxu1 %v1119_v22  ;;  %v5671_v26 = vpop.f32.mrb[4].mxu1  ;;  %v918_v29 = vadd.f32 %v917_v19, %v7272_v57 }
 0x254   : > { %v921_v27 = vpop.f32.mrb[6].mxu0  ;;  %v1045_v28 = vadd.f32 %v5671_v26, %v7268_v56  ;;  %v1036_v10 = vpop.f32.mrb[5].mxu1  ;;  %v920_v35 = vadd.f32 %v919_v23, %v7276_v58 }
 0x255   : > { %v922_v30 = vadd.f32 %v921_v27, %v7272_v57  ;;  %v923_v33 = vpop.f32.mrb[7].mxu0  ;;  %v1037_v11 = vadd.f32 %v1036_v10, %v7268_v56  ;;  %v5672_v34 = vpop.f32.mrb[6].mxu1 }
 0x256   : > { %v924_v36 = vadd.f32 %v923_v33, %v7276_v58  ;;  %v1048_v37 = vadd.f32 %v5672_v34, %v7268_v56  ;;  %v1039_v40 = vpop.f32.mrb[7].mxu1 }
 0x257   : > { %v7307_v20 = vpack.c.bf16 %v922_v30, %v918_v29  ;;  %v1040_v41 = vadd.f32 %v1039_v40, %v7268_v56 }
 0x258   : > { %v7310_v21 = vpack.c.bf16 %v924_v36, %v920_v35  ;;  %v7312_v43 = vpack.c.bf16 %v1048_v37, %v1045_v28 }
 0x259   : > { %v7314_v44 = vpack.c.bf16 %v1040_v41, %v1037_v11 }
 0x25a   : > { %v927_v45 = vpop.f32.mrb[8].mxu0  ;;  %5970 = vmatprep.subr.msk.bf16.mxu1 %vm1111_vm0, %v7310_v21  ;;  %v1122_v46 = vsel %vm1111_vm0, %v7310_v21, 0 }
 0x25b   : > { %v929_v47 = vpop.f32.mrb[9].mxu0  ;;  %5684 = vmatpush3.bf16.xpose.msra.mxu1 %v1122_v46  ;;  %v5675_v48 = vpop.f32.mrb[8].mxu1  ;;  %v928_v49 = vadd.f32 %v927_v45, %v7272_v57 }
 0x25c   : > { %v931_v1 = vpop.f32.mrb[10].mxu0  ;;  %v1061_v24 = vadd.f32 %v5675_v48, %v7268_v56  ;;  %v1052_v25 = vpop.f32.mrb[9].mxu1  ;;  %v930_v32 = vadd.f32 %v929_v47, %v7276_v58 }
 0x25d   : > { %v932_v50 = vadd.f32 %v931_v1, %v7272_v57  ;;  %v933_v0 = vpop.f32.mrb[11].mxu0  ;;  %v1053_v31 = vadd.f32 %v1052_v25, %v7268_v56  ;;  %v5676_v51 = vpop.f32.mrb[10].mxu1 }
 0x25e   : > { %v934_v38 = vadd.f32 %v933_v0, %v7276_v58  ;;  %v1064_v42 = vadd.f32 %v5676_v51, %v7268_v56  ;;  %v1055_v53 = vpop.f32.mrb[11].mxu1 }
 0x25f   : > { %v7327_v2 = vpack.c.bf16 %v932_v50, %v928_v49  ;;  %v1056_v59 = vadd.f32 %v1055_v53, %v7268_v56 }
 0x260   : > { %v7330_v60 = vpack.c.bf16 %v934_v38, %v930_v32  ;;  %v7332_v61 = vpack.c.bf16 %v1064_v42, %v1061_v24 }
 0x261   : > { %v7334_v5 = vpack.c.bf16 %v1056_v59, %v1053_v31 }
 0x262   : > { %v937_v62 = vpop.f32.mrb[12].mxu0  ;;  %5686 = vmatmul.mubr.msk.bf16.vlgmr.msra.gmra.mrb[16].mxu1 %vm1111_vm0, %v7307_v20  ;;  %5971 = vmatprep.subr.msk.bf16.mxu1 %vm1111_vm0, %v7330_v60  ;;  %v1180_v63 = vsel %vm1111_vm0, %v7330_v60, 0 }
 0x263   : > { %v939_v3 = vpop.f32.mrb[13].mxu0  ;;  %5690 = vmatpush3.bf16.xpose.msra.mxu1 %v1180_v63  ;;  %5693 = vmatprep.mubr.msk.bf16.mxu1 %vm1111_vm0, %v7327_v2  ;;  %v5679_v4 = vpop.f32.mrb[12].mxu1  ;;  %v938_v12 = vadd.f32 %v937_v62, %v7272_v57 }
 0x264   : > { %v941_v6 = vpop.f32.mrb[14].mxu0  ;;  %v1077_v7 = vadd.f32 %v5679_v4, %v7268_v56  ;;  %v1068_v8 = vpop.f32.mrb[13].mxu1  ;;  %v940_v22 = vadd.f32 %v939_v3, %v7276_v58 }
 0x265   : > { %v942_v13 = vadd.f32 %v941_v6, %v7272_v57  ;;  %v943_v14 = vpop.f32.mrb[15].mxu0  ;;  %v1069_v15 = vadd.f32 %v1068_v8, %v7268_v56  ;;  %v5680_v19 = vpop.f32.mrb[14].mxu1 }
 0x266   : > { %v944_v23 = vadd.f32 %v943_v14, %v7276_v58  ;;  %v1080_v26 = vadd.f32 %v5680_v19, %v7268_v56  ;;  %v1071_v27 = vpop.f32.mrb[15].mxu1 }
 0x267   : > { %v7351_v28 = vpack.c.bf16 %v942_v13, %v938_v12  ;;  %v1072_v10 = vadd.f32 %v1071_v27, %v7268_v56 }
 0x268   : > { %v7354_v29 = vpack.c.bf16 %v944_v23, %v940_v22  ;;  %v7356_v30 = vpack.c.bf16 %v1080_v26, %v1077_v7 }
 0x269   : > { %v7358_v33 = vpack.c.bf16 %v1072_v10, %v1069_v15 }
 0x26a   : > { %v947_v11 = vpop.f32.mrb[16].mxu0  ;;  %5972 = vmatprep.subr.msk.bf16.mxu1 %vm1111_vm0, %v7354_v29  ;;  %v1183_v34 = vsel %vm1111_vm0, %v7354_v29, 0 }
 0x26b   : > { %v949_v35 = vpop.f32.mrb[17].mxu0  ;;  %5692 = vmatpush3.bf16.xpose.msra.mxu1 %v1183_v34  ;;  %v948_v37 = vadd.f32 %v947_v11, %v7272_v57 }
 0x26c   : > { %v951_v36 = vpop.f32.mrb[18].mxu0  ;;  %v950_v41 = vadd.f32 %v949_v35, %v7276_v58 }
 0x26d   : > { %v952_v56 = vadd.f32 %v951_v36, %v7272_v57  ;;  %v953_v40 = vpop.f32.mrb[19].mxu0 }
 0x26e   : > { %v954_v45 = vadd.f32 %v953_v40, %v7276_v58  ;;  %v7432_v40 = vld [vmem:[#allocation6] sm:$0xff] }
 0x26f   : > { %v7368_v46 = vpack.c.bf16 %v952_v56, %v948_v37  ;;  %9100 = vst [vmem:[#allocation21_spill] sm:$0xff] %v7432_v40 }
 0x270   : > { %v7370_v47 = vpack.c.bf16 %v954_v45, %v950_v41 }
 0x271   : > { %5701 = vmatprep.mubr.msk.bf16.mxu0 %vm1111_vm0, %v7368_v46 }
 0x272   : > { %v957_v48 = vpop.f32.mrb[20].mxu0  ;;  %5694 = vmatmul.mubr.msk.bf16.vlgmr.msra.gmra.mrb[20].mxu1 %vm1111_vm0, %v7351_v28  ;;  %5973 = vmatprep.subr.msk.bf16.mxu0 %vm1111_vm0, %v7370_v47  ;;  %v1241_v1 = vsel %vm1111_vm0, %v7370_v47, 0 }
 0x273   : > { %v959_v24 = vpop.f32.mrb[21].mxu0  ;;  %5698 = vmatpush3.bf16.xpose.msra.mxu0 %v1241_v1  ;;  %v958_v49 = vadd.f32 %v957_v48, %v7272_v57  ;;  %v7437_v1 = vld [vmem:[#allocation6 + $0x10] sm:$0xff] }
 0x274   : > { %v961_v25 = vpop.f32.mrb[22].mxu0  ;;  %v960_v31 = vadd.f32 %v959_v24, %v7276_v58  ;;  %9101 = vst [vmem:[#allocation22_spill] sm:$0xff] %v7437_v1  ;;  %v7439_v24 = vld [vmem:[#allocation6 + $0x8] sm:$0xff] }
 0x275   : > { %v962_v50 = vadd.f32 %v961_v25, %v7272_v57  ;;  %v963_v0 = vpop.f32.mrb[23].mxu0  ;;  %9102 = vst [vmem:[#allocation23_spill] sm:$0xff] %v7439_v24 }
 0x276   : > { %v964_v51 = vadd.f32 %v963_v0, %v7276_v58 }
 0x277   : > { %v7384_v32 = vpack.c.bf16 %v962_v50, %v958_v49 }
 0x278   : > { %v7386_v38 = vpack.c.bf16 %v964_v51, %v960_v31  ;;  %v7449_v31 = vld [vmem:[#allocation6 + $0x18] sm:$0xff] }
 0x279   : > { %9103 = vst [vmem:[#allocation24_spill] sm:$0xff] %v7449_v31 }
 0x27a   : > { %v967_v42 = vpop.f32.mrb[24].mxu0  ;;  %5974 = vmatprep.subr.msk.bf16.mxu0 %vm1111_vm0, %v7386_v38  ;;  %v1244_v53 = vsel %vm1111_vm0, %v7386_v38, 0 }
 0x27b   : > { %v969_v59 = vpop.f32.mrb[25].mxu0  ;;  %5700 = vmatpush3.bf16.xpose.msra.mxu0 %v1244_v53  ;;  %v968_v63 = vadd.f32 %v967_v42, %v7272_v57 }
 0x27c   : > { %v971_v62 = vpop.f32.mrb[26].mxu0  ;;  %5713 = vmatprep.subr.bf16.mxu0 %v7292_v18  ;;  %v970_v6 = vadd.f32 %v969_v59, %v7276_v58 }
 0x27d   : > { %v972_v3 = vadd.f32 %v971_v62, %v7272_v57  ;;  %v973_v4 = vpop.f32.mrb[27].mxu0 }
 0x27e   : > { %v974_v7 = vadd.f32 %v973_v4, %v7276_v58 }
 0x27f   : > { %v7397_v8 = vpack.c.bf16 %v972_v3, %v968_v63 }
 0x280   : > { %v7399_v12 = vpack.c.bf16 %v974_v7, %v970_v6 }
 0x281   : > { %5709 = vmatprep.mubr.msk.bf16.mxu1 %vm1111_vm0, %v7397_v8 }
 0x282   : > { %v977_v13 = vpop.f32.mrb[28].mxu0  ;;  %5702 = vmatmul.mubr.msk.bf16.vlgmr.msra.gmra.mrb[32].mxu0 %vm1111_vm0, %v7384_v32  ;;  %5975 = vmatprep.subr.msk.bf16.mxu1 %vm1111_vm0, %v7399_v12  ;;  %v1302_v14 = vsel %vm1111_vm0, %v7399_v12, 0 }
 0x283   : > { %v978_v15 = vadd.f32 %v977_v13, %v7272_v57  ;;  %v979_v19 = vpop.f32.mrb[29].mxu0  ;;  %5706 = vmatpush3.bf16.xpose.msra.mxu1 %v1302_v14  ;;  %5714 = vmatpush3.bf16.msra.mxu0 %v7292_v18 }
 0x284   : > { %v981_v22 = vpop.f32.mrb[30].mxu0  ;;  %5715 = vmatprep.subr.bf16.mxu0 %v7290_v17  ;;  %v980_v27 = vadd.f32 %v979_v19, %v7276_v58 }
 0x285   : > { %v982_v23 = vadd.f32 %v981_v22, %v7272_v57  ;;  %v983_v26 = vpop.f32.mrb[31].mxu0 }
 0x286   : > { %v984_v10 = vadd.f32 %v983_v26, %v7276_v58 }
 0x287   : > { %v7415_v11 = vpack.c.bf16 %v982_v23, %v978_v15  ;;  %5716 = vmatpush3.bf16.msra.mxu0 %v7290_v17 }
 0x288   : > { %v7418_v34 = vpack.c.bf16 %v984_v10, %v980_v27  ;;  %5729 = vmatprep.subr.bf16.mxu0 %v7334_v5 }
 0x28a   : > { %5976 = vmatprep.subr.msk.bf16.mxu1 %vm1111_vm0, %v7418_v34  ;;  %v1305_v35 = vsel %vm1111_vm0, %v7418_v34, 0 }
 0x28b   : > { %5708 = vmatpush3.bf16.xpose.msra.mxu1 %v1305_v35 }
 0x28c   : > { %5721 = vmatprep.subr.bf16.mxu1 %v7314_v44 }
 0x292   : > { %5710 = vmatmul.mubr.msk.bf16.vlgmr.msra.gmra.mrb[24].mxu1 %vm1111_vm0, %v7415_v11 }
 0x293   : > { %5722 = vmatpush3.bf16.msra.mxu1 %v7314_v44 }
 0x294   : > { %5723 = vmatprep.subr.bf16.mxu1 %v7312_v43 }
 0x297   : > { %5724 = vmatpush3.bf16.msra.mxu1 %v7312_v43 }
 0x298   : > { %5737 = vmatprep.subr.bf16.mxu1 %v7358_v33 }
 0x335   : > { %v5687_v57 = vpop.f32.mrb[16].mxu1 }
 0x336   : > { %v1158_v58 = vpop.f32.mrb[17].mxu1 }
 0x337   : > { %v5688_v36 = vpop.f32.mrb[18].mxu1  ;;  %v1159_v53 = vadd.f32 %v1158_v58, %v7432_v40 }
 0x338   : > { %v1161_v37 = vpop.f32.mrb[19].mxu1 }
 0x339   : > { %v7460_v62 = vadd.f32 %v1161_v37, %v7439_v24  ;;  %v1356_v3 = vsel %vm1111_vm0, %v1159_v53, -inf }
 0x33b   : > { %v1359_v4 = vsel %vm1111_vm0, %v7460_v62, -inf }
 0x345   : > { %v5695_v56 = vpop.f32.mrb[20].mxu1 }
 0x346   : > { %v1219_v41 = vpop.f32.mrb[21].mxu1  ;;  %v7442_v49 = vadd.f32 %v5695_v56, %v7437_v1  ;;  %v1167_v56 = vadd.f32 %v5687_v57, %v7437_v1 }
 0x347   : > { %v7435_v45 = vadd.f32 %v1219_v41, %v7432_v40  ;;  %v5696_v48 = vpop.f32.mrb[22].mxu1 }
 0x348   : > { %v1222_v25 = vpop.f32.mrb[23].mxu1  ;;  %v7452_v51 = vadd.f32 %v5696_v48, %v7449_v31  ;;  %v1374_v59 = vsel %vm1111_vm0, %v7442_v49, -inf  ;;  %v1170_v48 = vadd.f32 %v5688_v36, %v7449_v31 }
 0x349   : > { %v7445_v50 = vadd.f32 %v1222_v25, %v7439_v24  ;;  %v1368_v0 = vsel %vm1111_vm0, %v7435_v45, -inf }
 0x34a   : > { %1369 = vmax.xlane.f32.xlu0 %v1368_v0  ;;  %v1377_v63 = vsel %vm1111_vm0, %v7452_v51, -inf  ;;  %v1365_v57 = vsel %vm1111_vm0, %v1170_v48, -inf }
 0x34b   : > { %v1371_v42 = vsel %vm1111_vm0, %v7445_v50, -inf }
 0x34c   : > { %1372 = vmax.xlane.f32.xlu1 %v1371_v42  ;;  %v1362_v42 = vsel %vm1111_vm0, %v1167_v56, -inf }
 0x34e   : > { %1375 = vmax.xlane.f32.xlu0 %v1374_v59 }
 0x350   : > { %1378 = vmax.xlane.f32.xlu1 %v1377_v63 }
 0x352   : > { %1357 = vmax.xlane.f32.xlu0 %v1356_v3 }
 0x354   : > { %1360 = vmax.xlane.f32.xlu1 %v1359_v4 }
 0x355   : > { %v5703_v6 = vpop.f32.mrb[32].mxu0 }
 0x356   : > { %v1280_v7 = vpop.f32.mrb[33].mxu0  ;;  %v1289_v63 = vadd.f32 %v5703_v6, %v7437_v1 }
 0x357   : > { %v5704_v13 = vpop.f32.mrb[34].mxu0  ;;  %v7490_v0 = vadd.f32 %v1280_v7, %v7432_v40 }
 0x358   : > { %v1283_v14 = vpop.f32.mrb[35].mxu0  ;;  %v1292_v3 = vadd.f32 %v5704_v13, %v7449_v31  ;;  %v1386_v7 = vsel %vm1111_vm0, %v1289_v63, -inf }
 0x359   : > { %v7494_v59 = vadd.f32 %v1283_v14, %v7439_v24  ;;  %v1380_v36 = vsel %vm1111_vm0, %v7490_v0, -inf }
 0x35a   : > { %v1389_v14 = vsel %vm1111_vm0, %v1292_v3, -inf }
 0x35b   : > { %v1383_v4 = vsel %vm1111_vm0, %v7494_v59, -inf }
 0x365   : > { %v5711_v15 = vpop.f32.mrb[24].mxu1 }
 0x366   : > { %v7468_v19 = vadd.f32 %v5711_v15, %v7437_v1  ;;  %v1341_v22 = vpop.f32.mrb[25].mxu1 }
 0x367   : > { %v5712_v23 = vpop.f32.mrb[26].mxu1  ;;  %v7471_v26 = vadd.f32 %v1341_v22, %v7432_v40 }
 0x368   : > { %v7474_v27 = vadd.f32 %v5712_v23, %v7449_v31  ;;  %v1344_v10 = vpop.f32.mrb[27].mxu1  ;;  %v1398_v35 = vsel %vm1111_vm0, %v7468_v19, -inf }
 0x369   : > { %1399 = vmax.xlane.f32.xlu0 %v1398_v35  ;;  %v7479_v58 = vadd.f32 %v1344_v10, %v7439_v24  ;;  %v1392_v41 = vsel %vm1111_vm0, %v7471_v26, -inf }
 0x36a   : > { %v1401_v37 = vsel %vm1111_vm0, %v7474_v27, -inf }
 0x36b   : > { %1402 = vmax.xlane.f32.xlu1 %v1401_v37  ;;  %v1395_v25 = vsel %vm1111_vm0, %v7479_v58, -inf }
 0x36d   : > { %1393 = vmax.xlane.f32.xlu0 %v1392_v41 }
 0x36f   : > { %1396 = vmax.xlane.f32.xlu1 %v1395_v25 }
 0x371   : > { %1363 = vmax.xlane.f32.xlu0 %v1362_v42 }
 0x373   : > { %1366 = vmax.xlane.f32.xlu1 %v1365_v57 }
 0x375   : > { %1381 = vmax.xlane.f32.xlu0 %v1380_v36 }
 0x377   : > { %1384 = vmax.xlane.f32.xlu1 %v1383_v4 }
 0x379   : > { %1387 = vmax.xlane.f32.xlu0 %v1386_v7 }
 0x37b   : > { %1390 = vmax.xlane.f32.xlu1 %v1389_v14 }
 0x3d7   : > { %v1370_v15 = vpop.xlane.xlu0 %1369 }
 0x3d9   : > { %v1373_v22 = vpop.xlane.xlu1 %1372 }
 0x3db   : > { %v1376_v23 = vpop.xlane.xlu0 %1375 }
 0x3dc   : > { %v1410_v55 = vsub.f32 %v7442_v49, %v1376_v23 }
 0x3dd   : > { %v1379_v6 = vpop.xlane.xlu1 %1378 }
 0x3de   : > { %v1411_v24 = vsub.f32 %v7452_v51, %v1379_v6  ;;  %v1432_v1 = vmul.f32 1.442695, %v1410_v55 }
 0x3df   : > { %v1358_v10 = vpop.xlane.xlu0 %1357 }
 0x3e0   : > { %v1404_v25 = vsub.f32 %v1159_v53, %v1358_v10  ;;  %v1408_v10 = vsub.f32 %v7435_v45, %v1370_v15 }
 0x3e1   : > { %v1361_v35 = vpop.xlane.xlu1 %1360 }
 0x3e2   : > { %v1405_v36 = vsub.f32 %v7460_v62, %v1361_v35  ;;  %v1420_v7 = vmul.f32 1.442695, %v1404_v25  ;;  %v1434_v35 = vmul.f32 1.442695, %v1411_v24  ;;  %v1428_v23 = vmul.f32 1.442695, %v1408_v10 }
 0x3e4   : > { %v1422_v31 = vmul.f32 1.442695, %v1405_v36 }
 0x3f6   : > { %v1400_v37 = vpop.xlane.xlu0 %1399 }
 0x3f8   : > { %v7505_v41 = vpop.xlane.xlu1 %1402 }
 0x3fa   : > { %v7507_v13 = vpop.xlane.xlu0 %1393 }
 0x3fc   : > { %v7509_v42 = vpop.xlane.xlu1 %1396 }
 0x3fe   : > { %v1364_v57 = vpop.xlane.xlu0 %1363 }
 0x3ff   : > { %v1406_v4 = vsub.f32 %v1167_v56, %v1364_v57  ;;  %v1409_v56 = vsub.f32 %v7445_v50, %v1373_v22 }
 0x400   : > { %v1367_v14 = vpop.xlane.xlu1 %1366 }
 0x401   : > { %v1424_v52 = vmul.f32 1.442695, %v1406_v4  ;;  %v1407_v54 = vsub.f32 %v1170_v48, %v1367_v14  ;;  %v1430_v25 = vmul.f32 1.442695, %v1409_v56 }
 0x402   : > { %v1382_v39 = vpop.xlane.xlu0 %1381 }
 0x403   : > { %6222 = vpow2.f32 %v1424_v52  ;;  %v1426_v40 = vmul.f32 1.442695, %v1407_v54  ;;  %v1412_v54 = vsub.f32 %v7490_v0, %v1382_v39  ;;  %v1418_v39 = vsub.f32 %v7468_v19, %v1400_v37 }
 0x404   : > { %6224 = vpow2.f32 %v1420_v7  ;;  %v1385_v53 = vpop.xlane.xlu1 %1384  ;;  %v1416_v37 = vsub.f32 %v7471_v26, %v7507_v13 }
 0x405   : > { %6226 = vpow2.f32 %v1426_v40  ;;  %v1436_v0 = vmul.f32 1.442695, %v1412_v54  ;;  %v1448_v19 = vmul.f32 1.442695, %v1418_v39 }
 0x406   : > { %v1388_v62 = vpop.xlane.xlu0 %1387  ;;  %6228 = vpow2.f32 %v1422_v31  ;;  %v1444_v26 = vmul.f32 1.442695, %v1416_v37 }
 0x407   : > { %6230 = vpow2.f32 %v1432_v1  ;;  %v1414_v48 = vsub.f32 %v1289_v63, %v1388_v62  ;;  %v1413_v1 = vsub.f32 %v7494_v59, %v1385_v53  ;;  %v1419_v59 = vsub.f32 %v7474_v27, %v7505_v41 }
 0x408   : > { %v1391_v49 = vpop.xlane.xlu1 %1390  ;;  %6232 = vpow2.f32 %v1434_v35  ;;  %v1417_v41 = vsub.f32 %v7479_v58, %v7509_v42 }
 0x409   : > { %v1415_v51 = vsub.f32 %v1292_v3, %v1391_v49  ;;  %6234 = vpow2.f32 %v1428_v23  ;;  %v1440_v45 = vmul.f32 1.442695, %v1414_v48  ;;  %v1438_v22 = vmul.f32 1.442695, %v1413_v1 }
 0x40a   : > { %6236 = vpow2.f32 %v1430_v25  ;;  %v1450_v27 = vmul.f32 1.442695, %v1419_v59  ;;  %v1446_v10 = vmul.f32 1.442695, %v1417_v41 }
 0x40b   : > { %v1442_v50 = vmul.f32 1.442695, %v1415_v51  ;;  %6238 = vpow2.f32 %v1440_v45 }
 0x40d   : > { %v7516_v52 = vpop.eup %6222  ;;  %6240 = vpow2.f32 %v1442_v50 }
 0x40e   : > { %v7519_v55 = vpop.eup %6224  ;;  %v1458_v40 = vsel %vm1111_vm0, %v7516_v52, 0.0  ;;  %6242 = vpow2.f32 %v1436_v0 }
 0x40f   : > { %v7523_v24 = vpop.eup %6226  ;;  %1459 = vadd.xlane.f32.xlu0 %v1458_v40  ;;  %v1452_v3 = vsel %vm1111_vm0, %v7519_v55, 0.0  ;;  %6244 = vpow2.f32 %v1438_v22 }
 0x410   : > { %v1461_v31 = vsel %vm1111_vm0, %v7523_v24, 0.0  ;;  %v7528_v63 = vpop.eup %6228  ;;  %6246 = vpow2.f32 %v1448_v19 }
 0x411   : > { %1462 = vadd.xlane.f32.xlu1 %v1461_v31  ;;  %v7533_v15 = vpop.eup %6230  ;;  %v1455_v6 = vsel %vm1111_vm0, %v7528_v63, 0.0  ;;  %6248 = vpow2.f32 %v1450_v27 }
 0x412   : > { %v7539_v57 = vpop.eup %6232  ;;  %v1470_v36 = vsel %vm1111_vm0, %v7533_v15, 0.0  ;;  %6250 = vpow2.f32 %v1444_v26 }
 0x413   : > { %1453 = vadd.xlane.f32.xlu0 %v1452_v3  ;;  %v7545_v4 = vpop.eup %6234  ;;  %v1473_v7 = vsel %vm1111_vm0, %v7539_v57, 0.0  ;;  %6252 = vpow2.f32 %v1446_v10 }
 0x414   : > { %v7551_v14 = vpop.eup %6236  ;;  %v1464_v13 = vsel %vm1111_vm0, %v7545_v4, 0.0 }
 0x415   : > { %1456 = vadd.xlane.f32.xlu1 %v1455_v6  ;;  %v7555_v53 = vpop.eup %6238  ;;  %v1467_v58 = vsel %vm1111_vm0, %v7551_v14, 0.0 }
 0x416   : > { %v1482_v62 = vsel %vm1111_vm0, %v7555_v53, 0.0 }
 0x417   : > { %1471 = vadd.xlane.f32.xlu0 %v1470_v36  ;;  %v7559_v42 = vpop.eup %6240 }
 0x418   : > { %v7563_v56 = vpop.eup %6242  ;;  %v1485_v35 = vsel %vm1111_vm0, %v7559_v42, 0.0 }
 0x419   : > { %1474 = vadd.xlane.f32.xlu1 %v1473_v7  ;;  %v7567_v49 = vpop.eup %6244  ;;  %v1476_v23 = vsel %vm1111_vm0, %v7563_v56, 0.0 }
 0x41a   : > { %v7571_v48 = vpop.eup %6246  ;;  %v1479_v25 = vsel %vm1111_vm0, %v7567_v49, 0.0 }
 0x41b   : > { %1465 = vadd.xlane.f32.xlu0 %v1464_v13  ;;  %v7575_v51 = vpop.eup %6248  ;;  %v1494_v54 = vsel %vm1111_vm0, %v7571_v48, 0.0 }
 0x41c   : > { %v7579_v45 = vpop.eup %6250  ;;  %v1497_v40 = vsel %vm1111_vm0, %v7575_v51, 0.0 }
 0x41d   : > { %1468 = vadd.xlane.f32.xlu1 %v1467_v58  ;;  %v7583_v1 = vpop.eup %6252  ;;  %v1488_v50 = vsel %vm1111_vm0, %v7579_v45, 0.0 }
 0x41e   : > { %v1491_v31 = vsel %vm1111_vm0, %v7583_v1, 0.0 }
 0x41f   : > { %1483 = vadd.xlane.f32.xlu0 %v1482_v62 }
 0x421   : > { %1486 = vadd.xlane.f32.xlu1 %v1485_v35 }
 0x423   : > { %1477 = vadd.xlane.f32.xlu0 %v1476_v23 }
 0x425   : > { %1480 = vadd.xlane.f32.xlu1 %v1479_v25 }
 0x427   : > { %1495 = vadd.xlane.f32.xlu0 %v1494_v54 }
 0x429   : > { %1498 = vadd.xlane.f32.xlu1 %v1497_v40 }
 0x42b   : > { %1489 = vadd.xlane.f32.xlu0 %v1488_v50 }
 0x42d   : > { %1492 = vadd.xlane.f32.xlu1 %v1491_v31 }
 0x43e   : > { %1786 = vrot.lane.b32.xlu1 %v7310_v21, %s6793_s8 }
 0x441   : > { %1784 = vrot.lane.b32.xlu0 %v7288_v16, %s6793_s8 }
 0x442   : > { %1778 = vrot.lane.b32.xlu1 %v7285_v9, %s6793_s8 }
 0x445   : > { %1930 = vrot.lane.b32.xlu0 %v7370_v47, %s6793_s8 }
 0x446   : > { %1857 = vrot.lane.b32.xlu1 %v7330_v60, %s6793_s8 }
 0x449   : > { %1859 = vrot.lane.b32.xlu0 %v7354_v29, %s6793_s8 }
 0x44a   : > { %1780 = vrot.lane.b32.xlu1 %v7307_v20, %s6793_s8 }
 0x44d   : > { %1924 = vrot.lane.b32.xlu0 %v7368_v46, %s6793_s8 }
 0x44e   : > { %1932 = vrot.lane.b32.xlu1 %v7386_v38, %s6793_s8 }
 0x451   : > { %1926 = vrot.lane.b32.xlu0 %v7384_v32, %s6793_s8 }
 0x452   : > { %1851 = vrot.lane.b32.xlu1 %v7327_v2, %s6793_s8 }
 0x455   : > { %1853 = vrot.lane.b32.xlu0 %v7351_v28, %s6793_s8 }
 0x456   : > { %2003 = vrot.lane.b32.xlu1 %v7399_v12, %s6793_s8 }
 0x459   : > { %1997 = vrot.lane.b32.xlu0 %v7397_v8, %s6793_s8 }
 0x45a   : > { %2005 = vrot.lane.b32.xlu1 %v7418_v34, %s6793_s8 }
 0x45d   : > { %2254 = vrot.lane.b32.xlu0 %v7292_v18, %s6793_s8 }
 0x45e   : > { %1999 = vrot.lane.b32.xlu1 %v7415_v11, %s6793_s8 }
 0x461   : > { %2380 = vrot.lane.b32.xlu0 %v7334_v5, %s6793_s8 }
 0x462   : > { %2256 = vrot.lane.b32.xlu1 %v7290_v17, %s6793_s8 }
 0x465   : > { %2317 = vrot.lane.b32.xlu0 %v7314_v44, %s6793_s8 }
 0x466   : > { %2382 = vrot.lane.b32.xlu1 %v7332_v61, %s6793_s8 }
 0x469   : > { %2589 = vrot.lane.b32.xlu0 %v7288_v16, %s6794_s1 }
 0x46a   : > { %2319 = vrot.lane.b32.xlu1 %v7312_v43, %s6793_s8 }
 0x46e   : > { %2443 = vrot.lane.b32.xlu1 %v7358_v33, %s6793_s8 }
 0x49c   : > { %v1460_v39 = vpop.xlane.xlu0 %1459 }
 0x49e   : > { %v1463_v0 = vpop.xlane.xlu1 %1462 }
 0x49f   : > { %6254 = vrcp.f32 %v1463_v0 }
 0x4a0   : > { %v1454_v3 = vpop.xlane.xlu0 %1453 }
 0x4a1   : > { %6256 = vrcp.f32 %v1454_v3 }
 0x4a2   : > { %6258 = vrcp.f32 %v1460_v39  ;;  %v1457_v59 = vpop.xlane.xlu1 %1456 }
 0x4a3   : > { %6260 = vrcp.f32 %v1457_v59 }
 0x4a4   : > { %v1472_v22 = vpop.xlane.xlu0 %1471 }
 0x4a6   : > { %v1475_v6 = vpop.xlane.xlu1 %1474 }
 0x4a7   : > { %6262 = vrcp.f32 %v1475_v6 }
 0x4a8   : > { %v1466_v19 = vpop.xlane.xlu0 %1465 }
 0x4a9   : > { %6264 = vrcp.f32 %v1466_v19  ;;  %v6255_v37 = vpop.eup %6254 }
 0x4aa   : > { %6266 = vrcp.f32 %v1472_v22  ;;  %v1469_v36 = vpop.xlane.xlu1 %1468  ;;  %v1519_v13 = vmul.f32 %v6255_v37, %v7523_v24 }
 0x4ab   : > { %v6257_v27 = vpop.eup %6256  ;;  %6268 = vrcp.f32 %v1469_v36 }
 0x4ac   : > { %v6259_v41 = vpop.eup %6258  ;;  %v1484_v7 = vpop.xlane.xlu0 %1483  ;;  %v1516_v58 = vmul.f32 %v6257_v27, %v7519_v55 }
 0x4ad   : > { %v6261_v26 = vpop.eup %6260  ;;  %v1518_v35 = vmul.f32 %v6259_v41, %v7516_v52 }
 0x4ae   : > { %v1487_v10 = vpop.xlane.xlu1 %1486  ;;  %v1517_v62 = vmul.f32 %v6261_v26, %v7528_v63 }
 0x4af   : > { %6270 = vrcp.f32 %v1487_v10  ;;  %v1533_v54 = vpack.c.bf16 %v1519_v13, %v1518_v35 }
 0x4b0   : > { %v1478_v23 = vpop.xlane.xlu0 %1477  ;;  %v1532_v25 = vpack.c.bf16 %v1517_v62, %v1516_v58 }
 0x4b1   : > { %6272 = vrcp.f32 %v1478_v23  ;;  %v6263_v40 = vpop.eup %6262 }
 0x4b2   : > { %6274 = vrcp.f32 %v1484_v7  ;;  %v1481_v50 = vpop.xlane.xlu1 %1480  ;;  %5717 = vmatprep.mubr.msk.bf16.mxu0 %vm1111_vm0, %v1532_v25  ;;  %v1523_v52 = vmul.f32 %v6263_v40, %v7539_v57 }
 0x4b3   : > { %v6265_v31 = vpop.eup %6264  ;;  %6276 = vrcp.f32 %v1481_v50  ;;  %5718 = vmatmul.mubr.msk.bf16.vlgmr.msra.gmra.mrb[36].mxu0 %vm1111_vm0, %v1533_v54 }
 0x4b4   : > { %v6267_v24 = vpop.eup %6266  ;;  %5730 = vmatpush3.bf16.msra.mxu0 %v7334_v5  ;;  %v1496_v55 = vpop.xlane.xlu0 %1495  ;;  %v1520_v0 = vmul.f32 %v6265_v31, %v7545_v4 }
 0x4b5   : > { %v6269_v63 = vpop.eup %6268  ;;  %5731 = vmatprep.subr.bf16.mxu0 %v7332_v61  ;;  %v1522_v59 = vmul.f32 %v6267_v24, %v7533_v15 }
 0x4b6   : > { %v1499_v39 = vpop.xlane.xlu1 %1498  ;;  %v1521_v3 = vmul.f32 %v6269_v63, %v7551_v14 }
 0x4b7   : > { %6278 = vrcp.f32 %v1499_v39  ;;  %v1535_v19 = vpack.c.bf16 %v1523_v52, %v1522_v59 }
 0x4b8   : > { %5732 = vmatpush3.bf16.msra.mxu0 %v7332_v61  ;;  %v1490_v22 = vpop.xlane.xlu0 %1489  ;;  %v1534_v6 = vpack.c.bf16 %v1521_v3, %v1520_v0 }
 0x4b9   : > { %6280 = vrcp.f32 %v1490_v22  ;;  %v6271_v37 = vpop.eup %6270 }
 0x4ba   : > { %6282 = vrcp.f32 %v1496_v55  ;;  %v1493_v36 = vpop.xlane.xlu1 %1492  ;;  %5725 = vmatprep.mubr.msk.bf16.mxu1 %vm1111_vm0, %v1534_v6  ;;  %v1527_v27 = vmul.f32 %v6271_v37, %v7559_v42 }
 0x4bb   : > { %v6273_v57 = vpop.eup %6272  ;;  %6284 = vrcp.f32 %v1493_v36  ;;  %5726 = vmatmul.mubr.msk.bf16.vlgmr.msra.gmra.mrb[28].mxu1 %vm1111_vm0, %v1535_v19 }
 0x4bc   : > { %v6275_v4 = vpop.eup %6274  ;;  %5738 = vmatpush3.bf16.msra.mxu1 %v7358_v33  ;;  %v1785_v15 = vpop.permute.xlu0 %1784  ;;  %v1524_v7 = vmul.f32 %v6273_v57, %v7563_v56 }
 0x4bd   : > { %v6277_v14 = vpop.eup %6276  ;;  %5739 = vmatprep.subr.bf16.mxu1 %v7356_v30  ;;  %v1526_v13 = vmul.f32 %v6275_v4, %v7555_v53  ;;  %v1795_v0 = vsel %vm1111_vm0, %v1785_v15, 0 }
 0x4be   : > { %v1787_v41 = vpop.permute.xlu1 %1786  ;;  %v1525_v26 = vmul.f32 %v6277_v14, %v7567_v49 }
 0x4bf   : > { %v1537_v62 = vpack.c.bf16 %v1527_v27, %v1526_v13  ;;  %v1798_v59 = vsel %vm1111_vm0, %v1787_v41, 0 }
 0x4c0   : > { %5740 = vmatpush3.bf16.msra.mxu1 %v7356_v30  ;;  %v1931_v10 = vpop.permute.xlu0 %1930  ;;  %v1536_v58 = vpack.c.bf16 %v1525_v26, %v1524_v7 }
 0x4c1   : > { %5977 = vmatprep.subr.msk.bf16.mxu1 %vm1111_vm0, %v1785_v15  ;;  %5981 = vmatprep.subr.msk.bf16.mxu0 %vm1111_vm0, %v1931_v10  ;;  %v1941_v42 = vsel %vm1111_vm0, %v1931_v10, 0  ;;  %v6279_v35 = vpop.eup %6278 }
 0x4c2   : > { %v1779_v23 = vpop.permute.xlu1 %1778  ;;  %5733 = vmatprep.mubr.msk.bf16.mxu0 %vm1111_vm0, %v1536_v58  ;;  %v1531_v54 = vmul.f32 %v6279_v35, %v7575_v51 }
 0x4c3   : > { %v6281_v56 = vpop.eup %6280  ;;  %5734 = vmatmul.mubr.msk.bf16.vlgmr.msra.gmra.mrb[40].mxu0 %vm1111_vm0, %v1537_v62 }
 0x4c4   : > { %v6283_v49 = vpop.eup %6282  ;;  %5762 = vmatpush3.bf16.xpose.msra.mxu0 %v1941_v42  ;;  %v1860_v53 = vpop.permute.xlu0 %1859  ;;  %v1528_v50 = vmul.f32 %v6281_v56, %v7579_v45 }
 0x4c5   : > { %v6285_v25 = vpop.eup %6284  ;;  %v1530_v24 = vmul.f32 %v6283_v49, %v7571_v48  ;;  %v1871_v15 = vsel %vm1111_vm0, %v1860_v53, 0 }
 0x4c6   : > { %v1858_v40 = vpop.permute.xlu1 %1857  ;;  %v1529_v31 = vmul.f32 %v6285_v25, %v7583_v1 }
 0x4c7   : > { %v1539_v52 = vpack.c.bf16 %v1531_v54, %v1530_v24  ;;  %v1868_v36 = vsel %vm1111_vm0, %v1858_v40, 0 }
 0x4c8   : > { %v1925_v55 = vpop.permute.xlu0 %1924  ;;  %v1538_v63 = vpack.c.bf16 %v1529_v31, %v1528_v50 }
 0x4c9   : > { %5765 = vmatprep.mubr.msk.bf16.mxu0 %vm1111_vm0, %v1925_v55 }
 0x4ca   : > { %v1781_v39 = vpop.permute.xlu1 %1780  ;;  %5741 = vmatprep.mubr.msk.bf16.mxu1 %vm1111_vm0, %v1538_v63 }
 0x4cb   : > { %5742 = vmatmul.mubr.msk.bf16.vlgmr.msra.gmra.mrb[32].mxu1 %vm1111_vm0, %v1539_v52 }
 0x4cc   : > { %5746 = vmatpush3.bf16.xpose.msra.mxu1 %v1795_v0  ;;  %5749 = vmatprep.mubr.msk.bf16.mxu1 %vm1111_vm0, %v1779_v23  ;;  %v1927_v51 = vpop.permute.xlu0 %1926 }
 0x4cd   : > { %5978 = vmatprep.subr.msk.bf16.mxu1 %vm1111_vm0, %v1787_v41 }
 0x4ce   : > { %v1933_v45 = vpop.permute.xlu1 %1932 }
 0x4cf   : > { %5982 = vmatprep.subr.msk.bf16.mxu0 %vm1111_vm0, %v1933_v45  ;;  %v1944_v48 = vsel %vm1111_vm0, %v1933_v45, 0 }
 0x4d0   : > { %5764 = vmatpush3.bf16.xpose.msra.mxu0 %v1944_v48  ;;  %v1854_v1 = vpop.permute.xlu0 %1853  ;;  %v9105_v48 = vld [vmem:[#allocation21_spill] sm:$0xff] }
 0x4d2   : > { %v1852_v3 = vpop.permute.xlu1 %1851 }
 0x4d4   : > { %5748 = vmatpush3.bf16.xpose.msra.mxu1 %v1798_v59  ;;  %v1998_v22 = vpop.permute.xlu0 %1997 }
 0x4d5   : > { %5979 = vmatprep.subr.msk.bf16.mxu1 %vm1111_vm0, %v1858_v40 }
 0x4d6   : > { %v2004_v6 = vpop.permute.xlu1 %2003 }
 0x4d7   : > { %5766 = vmatmul.mubr.msk.bf16.vlgmr.msra.gmra.mrb[44].mxu0 %vm1111_vm0, %v1927_v51  ;;  %v2014_v27 = vsel %vm1111_vm0, %v2004_v6, 0 }
 0x4d8   : > { %v2255_v19 = vpop.permute.xlu0 %2254 }
 0x4d9   : > { %5777 = vmatprep.subr.bf16.mxu0 %v2255_v19 }
 0x4da   : > { %v2006_v37 = vpop.permute.xlu1 %2005  ;;  %5778 = vmatpush3.bf16.msra.mxu0 %v2255_v19 }
 0x4db   : > { %5750 = vmatmul.mubr.msk.bf16.vlgmr.msra.gmra.mrb[36].mxu1 %vm1111_vm0, %v1781_v39  ;;  %v2017_v41 = vsel %vm1111_vm0, %v2006_v37, 0  ;;  %v9104_v39 = vld [vmem:[#allocation22_spill] sm:$0xff] }
 0x4dc   : > { %5754 = vmatpush3.bf16.xpose.msra.mxu1 %v1868_v36  ;;  %5757 = vmatprep.mubr.msk.bf16.mxu1 %vm1111_vm0, %v1852_v3  ;;  %v7684_v14 = vpop.permute.xlu0 %2380  ;;  %v9106_v3 = vld [vmem:[#allocation24_spill] sm:$0xff] }
 0x4dd   : > { %5980 = vmatprep.subr.msk.bf16.mxu1 %vm1111_vm0, %v1860_v53 }
 0x4de   : > { %v2000_v57 = vpop.permute.xlu1 %1999 }
 0x4e0   : > { %v2318_v7 = vpop.permute.xlu0 %2317 }
 0x4e2   : > { %v2257_v4 = vpop.permute.xlu1 %2256 }
 0x4e3   : > { %5779 = vmatprep.subr.bf16.mxu0 %v2257_v4 }
 0x4e4   : > { %5756 = vmatpush3.bf16.xpose.msra.mxu1 %v1871_v15  ;;  %5780 = vmatpush3.bf16.msra.mxu0 %v2257_v4 }
 0x4e5   : > { %5983 = vmatprep.subr.msk.bf16.mxu1 %vm1111_vm0, %v2004_v6  ;;  %5793 = vmatprep.subr.bf16.mxu0 %v7684_v14 }
 0x4e6   : > { %v7693_v26 = vpop.permute.xlu1 %2382 }
 0x4ea   : > { %v2320_v13 = vpop.permute.xlu1 %2319 }
 0x4eb   : > { %5758 = vmatmul.mubr.msk.bf16.vlgmr.msra.gmra.mrb[40].mxu1 %vm1111_vm0, %v1854_v1 }
 0x4ec   : > { %5770 = vmatpush3.bf16.xpose.msra.mxu1 %v2014_v27  ;;  %5773 = vmatprep.mubr.msk.bf16.mxu1 %vm1111_vm0, %v1998_v22 }
 0x4ed   : > { %5984 = vmatprep.subr.msk.bf16.mxu1 %vm1111_vm0, %v2006_v37  ;;  %v9107_v37 = vld [vmem:[#allocation23_spill] sm:$0xff] }
 0x4ee   : > { %v7696_v10 = vpop.permute.xlu1 %2443 }
 0x4f4   : > { %5772 = vmatpush3.bf16.xpose.msra.mxu1 %v2017_v41 }
 0x4f5   : > { %5785 = vmatprep.subr.bf16.mxu1 %v2318_v7 }
 0x4fb   : > { %5774 = vmatmul.mubr.msk.bf16.vlgmr.msra.gmra.mrb[44].mxu1 %vm1111_vm0, %v2000_v57 }
 0x4fc   : > { %5786 = vmatpush3.bf16.msra.mxu1 %v2318_v7 }
 0x4fd   : > { %5787 = vmatprep.subr.bf16.mxu1 %v2320_v13 }
 0x500   : > { %5788 = vmatpush3.bf16.msra.mxu1 %v2320_v13 }
 0x501   : > { %5801 = vmatprep.subr.bf16.mxu1 %v7696_v10 }
 0x586   : > { %v5719_v58 = vpop.f32.mrb[36].mxu0 }
 0x587   : > { %1762 = vst.msk [vmem:[#allocation2 + $0x10] sm:$0xff] %vm1111_vm0, %v5719_v58  ;;  %v1580_v62 = vpop.f32.mrb[37].mxu0 }
 0x588   : > { %1760 = vst.msk [vmem:[#allocation2] sm:$0xff] %vm1111_vm0, %v1580_v62  ;;  %v5720_v42 = vpop.f32.mrb[38].mxu0 }
 0x589   : > { %1763 = vst.msk [vmem:[#allocation2 + $0x18] sm:$0xff] %vm1111_vm0, %v5720_v42  ;;  %v1583_v35 = vpop.f32.mrb[39].mxu0 }
 0x58a   : > { %1761 = vst.msk [vmem:[#allocation2 + $0x8] sm:$0xff] %vm1111_vm0, %v1583_v35 }
 0x58e   : > { %v5727_v23 = vpop.f32.mrb[28].mxu1 }
 0x58f   : > { %1766 = vst.msk [vmem:[#allocation2 + $0x30] sm:$0xff] %vm1111_vm0, %v5727_v23  ;;  %v1635_v56 = vpop.f32.mrb[29].mxu1 }
 0x590   : > { %1764 = vst.msk [vmem:[#allocation2 + $0x20] sm:$0xff] %vm1111_vm0, %v1635_v56  ;;  %v5728_v49 = vpop.f32.mrb[30].mxu1 }
 0x591   : > { %1767 = vst.msk [vmem:[#allocation2 + $0x38] sm:$0xff] %vm1111_vm0, %v5728_v49  ;;  %v1638_v53 = vpop.f32.mrb[31].mxu1 }
 0x592   : > { %1765 = vst.msk [vmem:[#allocation2 + $0x28] sm:$0xff] %vm1111_vm0, %v1638_v53 }
 0x596   : > { %v5735_v25 = vpop.f32.mrb[40].mxu0 }
 0x597   : > { %1770 = vst.msk [vmem:[#allocation2 + $0x50] sm:$0xff] %vm1111_vm0, %v5735_v25  ;;  %v1690_v54 = vpop.f32.mrb[41].mxu0 }
 0x598   : > { %1768 = vst.msk [vmem:[#allocation2 + $0x40] sm:$0xff] %vm1111_vm0, %v1690_v54  ;;  %v5736_v40 = vpop.f32.mrb[42].mxu0 }
 0x599   : > { %1771 = vst.msk [vmem:[#allocation2 + $0x58] sm:$0xff] %vm1111_vm0, %v5736_v40  ;;  %v1693_v50 = vpop.f32.mrb[43].mxu0 }
 0x59a   : > { %1769 = vst.msk [vmem:[#allocation2 + $0x48] sm:$0xff] %vm1111_vm0, %v1693_v50 }
 0x59e   : > { %v5743_v31 = vpop.f32.mrb[32].mxu1 }
 0x59f   : > { %1774 = vst.msk [vmem:[#allocation2 + $0x70] sm:$0xff] %vm1111_vm0, %v5743_v31  ;;  %v1745_v24 = vpop.f32.mrb[33].mxu1 }
 0x5a0   : > { %1772 = vst.msk [vmem:[#allocation2 + $0x60] sm:$0xff] %vm1111_vm0, %v1745_v24  ;;  %v5744_v55 = vpop.f32.mrb[34].mxu1 }
 0x5a1   : > { %1775 = vst.msk [vmem:[#allocation2 + $0x78] sm:$0xff] %vm1111_vm0, %v5744_v55  ;;  %v1748_v63 = vpop.f32.mrb[35].mxu1 }
 0x5a2   : > { %1773 = vst.msk [vmem:[#allocation2 + $0x68] sm:$0xff] %vm1111_vm0, %v1748_v63 }
 0x5aa   : > { %v5767_v52 = vpop.f32.mrb[44].mxu0 }
 0x5ab   : > { %v7716_v0 = vadd.f32 %v5767_v52, %v9104_v39  ;;  %v1980_v51 = vpop.f32.mrb[45].mxu0 }
 0x5ac   : > { %v5768_v45 = vpop.f32.mrb[46].mxu0  ;;  %v7719_v1 = vadd.f32 %v1980_v51, %v9105_v48 }
 0x5ad   : > { %v7722_v59 = vadd.f32 %v5768_v45, %v9106_v3  ;;  %v1983_v22 = vpop.f32.mrb[47].mxu0  ;;  %v2098_v6 = vsel %vm1111_vm0, %v7716_v0, -inf }
 0x5ae   : > { %v5751_v19 = vpop.f32.mrb[36].mxu1  ;;  %2099 = vmax.xlane.f32.xlu0 %v2098_v6  ;;  %v7727_v36 = vadd.f32 %v1983_v22, %v9107_v37  ;;  %v2092_v7 = vsel %vm1111_vm0, %v7719_v1, -inf }
 0x5af   : > { %v1834_v57 = vpop.f32.mrb[37].mxu1  ;;  %v2101_v4 = vsel %vm1111_vm0, %v7722_v59, -inf  ;;  %v7732_v27 = vadd.f32 %v5751_v19, %v9104_v39 }
 0x5b0   : > { %v5752_v15 = vpop.f32.mrb[38].mxu1  ;;  %2102 = vmax.xlane.f32.xlu1 %v2101_v4  ;;  %v2095_v58 = vsel %vm1111_vm0, %v7727_v36, -inf  ;;  %v7742_v62 = vadd.f32 %v1834_v57, %v9105_v48 }
 0x5b1   : > { %v1837_v41 = vpop.f32.mrb[39].mxu1  ;;  %v2074_v42 = vsel %vm1111_vm0, %v7732_v27, -inf  ;;  %v7749_v23 = vadd.f32 %v5752_v15, %v9106_v3 }
 0x5b2   : > { %2093 = vmax.xlane.f32.xlu0 %v2092_v7  ;;  %v7737_v13 = vadd.f32 %v1837_v41, %v9107_v37  ;;  %v2068_v56 = vsel %vm1111_vm0, %v7742_v62, -inf }
 0x5b3   : > { %v2077_v49 = vsel %vm1111_vm0, %v7749_v23, -inf }
 0x5b4   : > { %2096 = vmax.xlane.f32.xlu1 %v2095_v58  ;;  %v2071_v35 = vsel %vm1111_vm0, %v7737_v13, -inf }
 0x5b6   : > { %2075 = vmax.xlane.f32.xlu0 %v2074_v42 }
 0x5b8   : > { %2072 = vmax.xlane.f32.xlu1 %v2071_v35  ;;  %v7799_v35 = vpop.permute.xlu0 %2589 }
 0x5ba   : > { %2069 = vmax.xlane.f32.xlu0 %v2068_v56 }
 0x5be   : > { %v5759_v53 = vpop.f32.mrb[40].mxu1  ;;  %2078 = vmax.xlane.f32.xlu0 %v2077_v49 }
 0x5bf   : > { %v7756_v25 = vadd.f32 %v5759_v53, %v9104_v39  ;;  %v1907_v54 = vpop.f32.mrb[41].mxu1 }
 0x5c0   : > { %v5760_v40 = vpop.f32.mrb[42].mxu1  ;;  %v7759_v50 = vadd.f32 %v1907_v54, %v9105_v48 }
 0x5c1   : > { %v7762_v31 = vadd.f32 %v5760_v40, %v9106_v3  ;;  %v1910_v24 = vpop.f32.mrb[43].mxu1  ;;  %v2086_v55 = vsel %vm1111_vm0, %v7756_v25, -inf }
 0x5c2   : > { %2087 = vmax.xlane.f32.xlu0 %v2086_v55  ;;  %v7767_v63 = vadd.f32 %v1910_v24, %v9107_v37  ;;  %v2080_v51 = vsel %vm1111_vm0, %v7759_v50, -inf }
 0x5c3   : > { %v2089_v52 = vsel %vm1111_vm0, %v7762_v31, -inf }
 0x5c4   : > { %2090 = vmax.xlane.f32.xlu1 %v2089_v52  ;;  %v2083_v45 = vsel %vm1111_vm0, %v7767_v63, -inf }
 0x5c6   : > { %2081 = vmax.xlane.f32.xlu0 %v2080_v51 }
 0x5c8   : > { %2084 = vmax.xlane.f32.xlu1 %v2083_v45 }
 0x5ce   : > { %v5775_v22 = vpop.f32.mrb[44].mxu1 }
 0x5cf   : > { %v7776_v6 = vadd.f32 %v5775_v22, %v9104_v39  ;;  %v2053_v19 = vpop.f32.mrb[45].mxu1 }
 0x5d0   : > { %v5776_v57 = vpop.f32.mrb[46].mxu1  ;;  %v7779_v4 = vadd.f32 %v2053_v19, %v9105_v48 }
 0x5d1   : > { %v2056_v15 = vpop.f32.mrb[47].mxu1  ;;  %v2110_v41 = vsel %vm1111_vm0, %v7776_v6, -inf  ;;  %v7790_v39 = vadd.f32 %v5776_v57, %v9106_v3 }
 0x5d2   : > { %2111 = vmax.xlane.f32.xlu0 %v2110_v41  ;;  %v2104_v7 = vsel %vm1111_vm0, %v7779_v4, -inf  ;;  %v7793_v48 = vadd.f32 %v2056_v15, %v9107_v37 }
 0x5d3   : > { %v2113_v58 = vsel %vm1111_vm0, %v7790_v39, -inf }
 0x5d4   : > { %v2107_v42 = vsel %vm1111_vm0, %v7793_v48, -inf }
 0x5d6   : > { %2105 = vmax.xlane.f32.xlu0 %v2104_v7 }
 0x5d9   : > { %2591 = vrot.lane.b32.xlu1 %v7310_v21, %s6794_s1 }
 0x5ec   : > { %2445 = vrot.lane.b32.xlu0 %v7356_v30, %s6793_s8 }
 0x5fd   : > { %2114 = vmax.xlane.f32.xlu1 %v2113_v58 }
 0x601   : > { %2108 = vmax.xlane.f32.xlu1 %v2107_v42 }
 0x63b   : > { %v2100_v56 = vpop.xlane.xlu0 %2099 }
 0x63c   : > { %v2126_v49 = vsub.f32 %v7716_v0, %v2100_v56 }
 0x63d   : > { %v2103_v53 = vpop.xlane.xlu1 %2102 }
 0x63e   : > { %v2152_v54 = vmul.f32 1.442695, %v2126_v49  ;;  %v2127_v3 = vsub.f32 %v7722_v59, %v2103_v53 }
 0x63f   : > { %v2094_v40 = vpop.xlane.xlu0 %2093 }
 0x640   : > { %6286 = vpow2.f32 %v2152_v54  ;;  %v2154_v37 = vmul.f32 1.442695, %v2127_v3  ;;  %v2124_v24 = vsub.f32 %v7719_v1, %v2094_v40 }
 0x641   : > { %v2097_v55 = vpop.xlane.xlu1 %2096 }
 0x642   : > { %6288 = vpow2.f32 %v2154_v37  ;;  %v2148_v52 = vmul.f32 1.442695, %v2124_v24  ;;  %v2125_v51 = vsub.f32 %v7727_v36, %v2097_v55 }
 0x643   : > { %v2076_v45 = vpop.xlane.xlu0 %2075 }
 0x644   : > { %6290 = vpow2.f32 %v2148_v52  ;;  %v2150_v22 = vmul.f32 1.442695, %v2125_v51  ;;  %v2118_v19 = vsub.f32 %v7732_v27, %v2076_v45 }
 0x645   : > { %v2073_v57 = vpop.xlane.xlu1 %2072 }
 0x646   : > { %6292 = vpow2.f32 %v2150_v22  ;;  %v2136_v0 = vmul.f32 1.442695, %v2118_v19  ;;  %v2117_v1 = vsub.f32 %v7737_v13, %v2073_v57 }
 0x647   : > { %v2070_v15 = vpop.xlane.xlu0 %2069 }
 0x648   : > { %6294 = vpow2.f32 %v2136_v0  ;;  %v2116_v59 = vsub.f32 %v7742_v62, %v2070_v15  ;;  %v2134_v62 = vmul.f32 1.442695, %v2117_v1 }
 0x64a   : > { %v7807_v41 = vpop.eup %6286  ;;  %v2132_v7 = vmul.f32 1.442695, %v2116_v59 }
 0x64b   : > { %v2079_v58 = vpop.xlane.xlu0 %2078  ;;  %v2194_v36 = vsel %vm1111_vm0, %v7807_v41, 0.0 }
 0x64c   : > { %v7812_v42 = vpop.eup %6288  ;;  %6296 = vpow2.f32 %v2132_v7  ;;  %v2119_v27 = vsub.f32 %v7749_v23, %v2079_v58  ;;  %2195 = vadd.xlane.f32.xlu0 %v2194_v36 }
 0x64d   : > { %v2197_v56 = vsel %vm1111_vm0, %v7812_v42, 0.0 }
 0x64e   : > { %v7817_v49 = vpop.eup %6290  ;;  %v2138_v53 = vmul.f32 1.442695, %v2119_v27  ;;  %2198 = vadd.xlane.f32.xlu1 %v2197_v56 }
 0x64f   : > { %v2088_v13 = vpop.xlane.xlu0 %2087  ;;  %v2188_v54 = vsel %vm1111_vm0, %v7817_v49, 0.0 }
 0x650   : > { %v7821_v3 = vpop.eup %6292  ;;  %6298 = vpow2.f32 %v2138_v53  ;;  %v2122_v40 = vsub.f32 %v7756_v25, %v2088_v13  ;;  %2189 = vadd.xlane.f32.xlu0 %v2188_v54 }
 0x651   : > { %v2191_v23 = vsel %vm1111_vm0, %v7821_v3, 0.0  ;;  %6300 = vpow2.f32 %v2134_v62  ;;  %v2091_v58 = vpop.xlane.xlu1 %2090 }
 0x652   : > { %v7826_v37 = vpop.eup %6294  ;;  %v2144_v24 = vmul.f32 1.442695, %v2122_v40  ;;  %2192 = vadd.xlane.f32.xlu1 %v2191_v23  ;;  %v2123_v36 = vsub.f32 %v7762_v31, %v2091_v58 }
 0x653   : > { %v2082_v55 = vpop.xlane.xlu0 %2081  ;;  %v2170_v52 = vsel %vm1111_vm0, %v7826_v37, 0.0 }
 0x654   : > { %6302 = vpow2.f32 %v2144_v24  ;;  %v2120_v51 = vsub.f32 %v7759_v50, %v2082_v55  ;;  %2171 = vadd.xlane.f32.xlu0 %v2170_v52  ;;  %v2146_v62 = vmul.f32 1.442695, %v2123_v36 }
 0x655   : > { %v2085_v27 = vpop.xlane.xlu1 %2084 }
 0x656   : > { %v7831_v45 = vpop.eup %6296  ;;  %v2140_v25 = vmul.f32 1.442695, %v2120_v51  ;;  %v2121_v53 = vsub.f32 %v7767_v63, %v2085_v27 }
 0x657   : > { %v2164_v22 = vsel %vm1111_vm0, %v7831_v45, 0.0 }
 0x658   : > { %6304 = vpow2.f32 %v2140_v25  ;;  %2165 = vadd.xlane.f32.xlu0 %v2164_v22  ;;  %v2142_v54 = vmul.f32 1.442695, %v2121_v53 }
 0x659   : > { %v7857_v13 = vpop.permute.xlu1 %2591  ;;  %6306 = vpow2.f32 %v2146_v62 }
 0x65a   : > { %v7835_v19 = vpop.eup %6298  ;;  %6308 = vpow2.f32 %v2142_v54 }
 0x65b   : > { %v2173_v0 = vsel %vm1111_vm0, %v7835_v19, 0.0  ;;  %v7839_v57 = vpop.eup %6300 }
 0x65c   : > { %2174 = vadd.xlane.f32.xlu1 %v2173_v0  ;;  %v2167_v50 = vsel %vm1111_vm0, %v7839_v57, 0.0 }
 0x65e   : > { %v7841_v15 = vpop.eup %6302 }
 0x65f   : > { %v2182_v59 = vsel %vm1111_vm0, %v7841_v15, 0.0  ;;  %v2112_v56 = vpop.xlane.xlu0 %2111 }
 0x660   : > { %2168 = vadd.xlane.f32.xlu1 %v2167_v50  ;;  %2183 = vadd.xlane.f32.xlu0 %v2182_v59  ;;  %v2130_v40 = vsub.f32 %v7776_v6, %v2112_v56 }
 0x662   : > { %v7847_v1 = vpop.eup %6304  ;;  %v2160_v52 = vmul.f32 1.442695, %v2130_v40 }
 0x663   : > { %v2176_v7 = vsel %vm1111_vm0, %v7847_v1, 0.0  ;;  %v2106_v23 = vpop.xlane.xlu0 %2105  ;;  %v7863_v63 = vpop.eup %6306 }
 0x664   : > { %2177 = vadd.xlane.f32.xlu0 %v2176_v7  ;;  %v2128_v24 = vsub.f32 %v7779_v4, %v2106_v23  ;;  %6310 = vpow2.f32 %v2160_v52  ;;  %v2185_v6 = vsel %vm1111_vm0, %v7863_v63, 0.0  ;;  %v7867_v4 = vpop.eup %6308 }
 0x665   : > { %v2179_v59 = vsel %vm1111_vm0, %v7867_v4, 0.0 }
 0x666   : > { %v2156_v51 = vmul.f32 1.442695, %v2128_v24 }
 0x667   : > { %v7919_v53 = vpop.permute.xlu0 %2445 }
 0x668   : > { %6312 = vpow2.f32 %v2156_v51 }
 0x66e   : > { %v7871_v7 = vpop.eup %6310 }
 0x671   : > { %2658 = vrot.lane.b32.xlu1 %v7330_v60, %s6794_s1 }
 0x67a   : > { %2585 = vrot.lane.b32.xlu0 %v7285_v9, %s6794_s1 }
 0x68a   : > { %v2115_v55 = vpop.xlane.xlu1 %2114 }
 0x68b   : > { %v2131_v31 = vsub.f32 %v7790_v39, %v2115_v55  ;;  %v7873_v39 = vpop.eup %6312 }
 0x68c   : > { %v2200_v27 = vsel %vm1111_vm0, %v7873_v39, 0.0 }
 0x68d   : > { %v2162_v50 = vmul.f32 1.442695, %v2131_v31 }
 0x68e   : > { %v2109_v25 = vpop.xlane.xlu1 %2108 }
 0x68f   : > { %v2129_v22 = vsub.f32 %v7793_v48, %v2109_v25  ;;  %v2206_v48 = vsel %vm1111_vm0, %v7871_v7, 0.0 }
 0x691   : > { %v2158_v0 = vmul.f32 1.442695, %v2129_v22 }
 0x693   : > { %6314 = vpow2.f32 %v2158_v0 }
 0x694   : > { %6316 = vpow2.f32 %v2162_v50 }
 0x695   : > { %2186 = vadd.xlane.f32.xlu1 %v2185_v6 }
 0x699   : > { %2180 = vadd.xlane.f32.xlu1 %v2179_v59 }
 0x69d   : > { %v7877_v58 = vpop.eup %6314  ;;  %2207 = vadd.xlane.f32.xlu1 %v2206_v48 }
 0x69e   : > { %v2203_v36 = vsel %vm1111_vm0, %v7877_v58, 0.0  ;;  %v7883_v56 = vpop.eup %6316 }
 0x69f   : > { %2204 = vadd.xlane.f32.xlu0 %v2203_v36  ;;  %v2209_v62 = vsel %vm1111_vm0, %v7883_v56, 0.0 }
 0x6a1   : > { %2201 = vadd.xlane.f32.xlu1 %v2200_v27 }
 0x6a5   : > { %2210 = vadd.xlane.f32.xlu1 %v2209_v62 }
 0x6b5   : > { %2727 = vrot.lane.b32.xlu0 %v7370_v47, %s6794_s1 }
 0x6b6   : > { %2587 = vrot.lane.b32.xlu1 %v7307_v20, %s6794_s1 }
 0x6b9   : > { %2660 = vrot.lane.b32.xlu0 %v7354_v29, %s6794_s1 }
 0x6ba   : > { %2729 = vrot.lane.b32.xlu1 %v7386_v38, %s6794_s1 }
 0x6bd   : > { %2723 = vrot.lane.b32.xlu0 %v7368_v46, %s6794_s1 }
 0x6be   : > { %2654 = vrot.lane.b32.xlu1 %v7327_v2, %s6794_s1 }
 0x6c1   : > { %2725 = vrot.lane.b32.xlu0 %v7384_v32, %s6794_s1 }
 0x6c2   : > { %2796 = vrot.lane.b32.xlu1 %v7399_v12, %s6794_s1 }
 0x6c5   : > { %2656 = vrot.lane.b32.xlu0 %v7351_v28, %s6794_s1 }
 0x6c6   : > { %2798 = vrot.lane.b32.xlu1 %v7418_v34, %s6794_s1 }
 0x6c9   : > { %2792 = vrot.lane.b32.xlu0 %v7397_v8, %s6794_s1 }
 0x6ca   : > { %2794 = vrot.lane.b32.xlu1 %v7415_v11, %s6794_s1 }
 0x6cd   : > { %3045 = vrot.lane.b32.xlu0 %v7292_v18, %s6794_s1 }
 0x6ce   : > { %3047 = vrot.lane.b32.xlu1 %v7290_v17, %s6794_s1 }
 0x6d1   : > { %3167 = vrot.lane.b32.xlu0 %v7334_v5, %s6794_s1 }
 0x6d2   : > { %3169 = vrot.lane.b32.xlu1 %v7332_v61, %s6794_s1 }
 0x6d5   : > { %3106 = vrot.lane.b32.xlu0 %v7314_v44, %s6794_s1 }
 0x6d6   : > { %3108 = vrot.lane.b32.xlu1 %v7312_v43, %s6794_s1 }
 0x6d9   : > { %3374 = vrot.lane.b32.xlu0 %v7288_v16, %s6795_s5  ;;  %v2196_v54 = vpop.xlane.xlu0 %2195 }
 0x6da   : > { %3228 = vrot.lane.b32.xlu1 %v7358_v33, %s6794_s1 }
 0x6db   : > { %v2199_v23 = vpop.xlane.xlu1 %2198 }
 0x6dd   : > { %v2190_v40 = vpop.xlane.xlu0 %2189 }
 0x6de   : > { %6318 = vrcp.f32 %v2190_v40 }
 0x6df   : > { %v2193_v55 = vpop.xlane.xlu1 %2192 }
 0x6e0   : > { %6320 = vrcp.f32 %v2193_v55 }
 0x6e1   : > { %v2172_v24 = vpop.xlane.xlu0 %2171 }
 0x6e5   : > { %v2166_v52 = vpop.xlane.xlu0 %2165 }
 0x6e8   : > { %v6319_v31 = vpop.eup %6318 }
 0x6e9   : > { %v2175_v51 = vpop.xlane.xlu1 %2174 }
 0x6ea   : > { %6322 = vrcp.f32 %v2175_v51  ;;  %v6321_v16 = vpop.eup %6320 }
 0x6eb   : > { %6324 = vrcp.f32 %v2166_v52  ;;  %v2237_v27 = vmul.f32 %v6321_v16, %v7821_v3 }
 0x6ec   : > { %6326 = vrcp.f32 %v2172_v24 }
 0x6ed   : > { %v2169_v25 = vpop.xlane.xlu1 %2168  ;;  %v2184_v40 = vpop.xlane.xlu0 %2183 }
 0x6ee   : > { %6328 = vrcp.f32 %v2169_v25 }
 0x6ef   : > { %6330 = vrcp.f32 %v2199_v23  ;;  %v2236_v23 = vmul.f32 %v6319_v31, %v7817_v49 }
 0x6f0   : > { %6332 = vrcp.f32 %v2196_v54 }
 0x6f1   : > { %v2248_v54 = vpack.c.bf16 %v2237_v27, %v2236_v23 }
 0x6f4   : > { %v6323_v22 = vpop.eup %6322 }
 0x6f5   : > { %v6325_v0 = vpop.eup %6324  ;;  %v2231_v59 = vmul.f32 %v6323_v22, %v7835_v19 }
 0x6f6   : > { %v6327_v50 = vpop.eup %6326  ;;  %v2228_v48 = vmul.f32 %v6325_v0, %v7831_v45  ;;  %v2178_v45 = vpop.xlane.xlu0 %2177 }
 0x6f7   : > { %v2230_v62 = vmul.f32 %v6327_v50, %v7826_v37 }
 0x6f8   : > { %v6329_v6 = vpop.eup %6328 }
 0x6f9   : > { %v2229_v36 = vmul.f32 %v6329_v6, %v7839_v57  ;;  %v2245_v55 = vpack.c.bf16 %v2231_v59, %v2230_v62  ;;  %v6331_v52 = vpop.eup %6330 }
 0x6fa   : > { %v6333_v19 = vpop.eup %6332  ;;  %v2239_v3 = vmul.f32 %v6331_v52, %v7812_v42  ;;  %v2586_v57 = vpop.permute.xlu0 %2585 }
 0x6fb   : > { %v2244_v24 = vpack.c.bf16 %v2229_v36, %v2228_v48  ;;  %v2238_v37 = vmul.f32 %v6333_v19, %v7807_v41  ;;  %v2603_v41 = vsel %vm1111_vm0, %v7857_v13, 0 }
 0x6fd   : > { %5781 = vmatprep.mubr.msk.bf16.mxu0 %vm1111_vm0, %v2244_v24  ;;  %v2249_v49 = vpack.c.bf16 %v2239_v3, %v2238_v37 }
 0x6fe   : > { %5782 = vmatmul.mubr.msk.bf16.vlgmr.msra.gmra.mrb[48].mxu0 %vm1111_vm0, %v2245_v55 }
 0x6ff   : > { %5794 = vmatpush3.bf16.msra.mxu0 %v7684_v14  ;;  %5797 = vmatprep.mubr.msk.bf16.mxu0 %vm1111_vm0, %v2248_v54  ;;  %v2600_v14 = vsel %vm1111_vm0, %v7799_v35, 0 }
 0x700   : > { %5795 = vmatprep.subr.bf16.mxu0 %v7693_v26 }
 0x703   : > { %5796 = vmatpush3.bf16.msra.mxu0 %v7693_v26  ;;  %v2659_v26 = vpop.permute.xlu1 %2658 }
 0x704   : > { %5985 = vmatprep.subr.msk.bf16.mxu0 %vm1111_vm0, %v7799_v35 }
 0x706   : > { %5798 = vmatmul.mubr.msk.bf16.vlgmr.msra.gmra.mrb[52].mxu0 %vm1111_vm0, %v2249_v49 }
 0x707   : > { %5813 = vmatprep.mubr.msk.bf16.mxu0 %vm1111_vm0, %v2586_v57 }
 0x70c   : > { %5810 = vmatpush3.bf16.xpose.msra.mxu0 %v2600_v14 }
 0x70d   : > { %5986 = vmatprep.subr.msk.bf16.mxu0 %vm1111_vm0, %v7857_v13 }
 0x714   : > { %5812 = vmatpush3.bf16.xpose.msra.mxu0 %v2603_v41 }
 0x722   : > { %v2187_v42 = vpop.xlane.xlu1 %2186 }
 0x723   : > { %6334 = vrcp.f32 %v2187_v42  ;;  %v2669_v42 = vsel %vm1111_vm0, %v2659_v26, 0 }
 0x724   : > { %6336 = vrcp.f32 %v2178_v45 }
 0x725   : > { %6338 = vrcp.f32 %v2184_v40 }
 0x726   : > { %v2181_v51 = vpop.xlane.xlu1 %2180 }
 0x727   : > { %6340 = vrcp.f32 %v2181_v51 }
 0x72a   : > { %v2208_v25 = vpop.xlane.xlu1 %2207 }
 0x72c   : > { %v2205_v31 = vpop.xlane.xlu0 %2204 }
 0x72d   : > { %6342 = vrcp.f32 %v2205_v31  ;;  %v6335_v16 = vpop.eup %6334 }
 0x72e   : > { %v2202_v35 = vpop.xlane.xlu1 %2201  ;;  %v6337_v22 = vpop.eup %6336  ;;  %v2235_v13 = vmul.f32 %v6335_v16, %v7863_v63 }
 0x72f   : > { %6344 = vrcp.f32 %v2202_v35  ;;  %v6339_v0 = vpop.eup %6338  ;;  %v2232_v48 = vmul.f32 %v6337_v22, %v7847_v1 }
 0x730   : > { %v2728_v50 = vpop.permute.xlu0 %2727  ;;  %6346 = vrcp.f32 %v2208_v25  ;;  %v2234_v27 = vmul.f32 %v6339_v0, %v7841_v15 }
 0x731   : > { %v6341_v6 = vpop.eup %6340  ;;  %5989 = vmatprep.subr.msk.bf16.mxu0 %vm1111_vm0, %v2728_v50  ;;  %v2738_v63 = vsel %vm1111_vm0, %v2728_v50, 0 }
 0x732   : > { %v2211_v59 = vpop.xlane.xlu1 %2210  ;;  %v2233_v36 = vmul.f32 %v6341_v6, %v7867_v4  ;;  %v2247_v24 = vpack.c.bf16 %v2235_v13, %v2234_v27 }
 0x733   : > { %6348 = vrcp.f32 %v2211_v59 }
 0x734   : > { %v2661_v62 = vpop.permute.xlu0 %2660  ;;  %v2246_v40 = vpack.c.bf16 %v2233_v36, %v2232_v48 }
 0x735   : > { %v2672_v25 = vsel %vm1111_vm0, %v2661_v62, 0 }
 0x736   : > { %v2588_v23 = vpop.permute.xlu1 %2587  ;;  %5789 = vmatprep.mubr.msk.bf16.mxu1 %vm1111_vm0, %v2246_v40 }
 0x737   : > { %v6343_v55 = vpop.eup %6342  ;;  %5790 = vmatmul.mubr.msk.bf16.vlgmr.msra.gmra.mrb[48].mxu1 %vm1111_vm0, %v2247_v24  ;;  %5814 = vmatmul.mubr.msk.bf16.vlgmr.msra.gmra.mrb[56].mxu0 %vm1111_vm0, %v2588_v23 }
 0x738   : > { %5802 = vmatpush3.bf16.msra.mxu1 %v7696_v10  ;;  %5826 = vmatpush3.bf16.xpose.msra.mxu0 %v2738_v63  ;;  %v2724_v1 = vpop.permute.xlu0 %2723  ;;  %v2241_v54 = vmul.f32 %v6343_v55, %v7877_v58  ;;  %v8013_v63 = vld [vmem:[#allocation6 + $0x10] sm:$0xff] }
 0x739   : > { %v6345_v4 = vpop.eup %6344  ;;  %5803 = vmatprep.subr.bf16.mxu1 %v7919_v53  ;;  %5829 = vmatprep.mubr.msk.bf16.mxu0 %vm1111_vm0, %v2724_v1 }
 0x73a   : > { %v2730_v15 = vpop.permute.xlu1 %2729  ;;  %v2240_v52 = vmul.f32 %v6345_v4, %v7873_v39  ;;  %v6347_v19 = vpop.eup %6346 }
 0x73b   : > { %5990 = vmatprep.subr.msk.bf16.mxu0 %vm1111_vm0, %v2730_v15  ;;  %v2242_v37 = vmul.f32 %v6347_v19, %v7871_v7  ;;  %v2741_v39 = vsel %vm1111_vm0, %v2730_v15, 0  ;;  %v8022_v19 = vld [vmem:[#allocation6] sm:$0xff] }
 0x73c   : > { %5804 = vmatpush3.bf16.msra.mxu1 %v7919_v53  ;;  %v2726_v3 = vpop.permute.xlu0 %2725  ;;  %v2250_v45 = vpack.c.bf16 %v2241_v54, %v2240_v52 }
 0x73d   : > { %v6349_v10 = vpop.eup %6348  ;;  %5987 = vmatprep.subr.msk.bf16.mxu1 %vm1111_vm0, %v2659_v26 }
 0x73e   : > { %v2243_v49 = vmul.f32 %v6349_v10, %v7883_v56  ;;  %v2655_v57 = vpop.permute.xlu1 %2654  ;;  %5805 = vmatprep.mubr.msk.bf16.mxu1 %vm1111_vm0, %v2250_v45 }
 0x740   : > { %5828 = vmatpush3.bf16.xpose.msra.mxu0 %v2741_v39  ;;  %v2657_v58 = vpop.permute.xlu0 %2656  ;;  %v2251_v14 = vpack.c.bf16 %v2243_v49, %v2242_v37  ;;  %v8031_v49 = vld [vmem:[#allocation6 + $0x8] sm:$0xff] }
 0x742   : > { %v2797_v41 = vpop.permute.xlu1 %2796  ;;  %5806 = vmatmul.mubr.msk.bf16.vlgmr.msra.gmra.mrb[52].mxu1 %vm1111_vm0, %v2251_v14 }
 0x743   : > { %5821 = vmatprep.mubr.msk.bf16.mxu1 %vm1111_vm0, %v2655_v57  ;;  %v2807_v26 = vsel %vm1111_vm0, %v2797_v41, 0 }
 0x744   : > { %v2793_v53 = vpop.permute.xlu0 %2792 }
 0x745   : > { %5818 = vmatpush3.bf16.xpose.msra.mxu1 %v2669_v42 }
 0x746   : > { %5988 = vmatprep.subr.msk.bf16.mxu1 %vm1111_vm0, %v2661_v62  ;;  %v2799_v7 = vpop.permute.xlu1 %2798 }
 0x747   : > { %5830 = vmatmul.mubr.msk.bf16.vlgmr.msra.gmra.mrb[60].mxu0 %vm1111_vm0, %v2726_v3  ;;  %v2810_v35 = vsel %vm1111_vm0, %v2799_v7, 0 }
 0x748   : > { %v3046_v56 = vpop.permute.xlu0 %3045 }
 0x749   : > { %5841 = vmatprep.subr.bf16.mxu0 %v3046_v56 }
 0x74a   : > { %5842 = vmatpush3.bf16.msra.mxu0 %v3046_v56  ;;  %v2795_v51 = vpop.permute.xlu1 %2794 }
 0x74c   : > { %v7981_v16 = vpop.permute.xlu0 %3167 }
 0x74d   : > { %5820 = vmatpush3.bf16.xpose.msra.mxu1 %v2672_v25 }
 0x74e   : > { %5991 = vmatprep.subr.msk.bf16.mxu1 %vm1111_vm0, %v2797_v41  ;;  %v3048_v31 = vpop.permute.xlu1 %3047 }
 0x74f   : > { %5843 = vmatprep.subr.bf16.mxu0 %v3048_v31 }
 0x750   : > { %5844 = vmatpush3.bf16.msra.mxu0 %v3048_v31  ;;  %v3107_v22 = vpop.permute.xlu0 %3106 }
 0x751   : > { %5857 = vmatprep.subr.bf16.mxu0 %v7981_v16 }
 0x752   : > { %v7989_v0 = vpop.permute.xlu1 %3169 }
 0x754   : > { %5822 = vmatmul.mubr.msk.bf16.vlgmr.msra.gmra.mrb[56].mxu1 %vm1111_vm0, %v2657_v58  ;;  %v8038_v58 = vld [vmem:[#allocation6 + $0x18] sm:$0xff] }
 0x755   : > { %5834 = vmatpush3.bf16.xpose.msra.mxu1 %v2807_v26  ;;  %5837 = vmatprep.mubr.msk.bf16.mxu1 %vm1111_vm0, %v2793_v53 }
 0x756   : > { %5992 = vmatprep.subr.msk.bf16.mxu1 %vm1111_vm0, %v2799_v7  ;;  %v3109_v50 = vpop.permute.xlu1 %3108 }
 0x75a   : > { %v7992_v6 = vpop.permute.xlu1 %3228 }
 0x75d   : > { %5836 = vmatpush3.bf16.xpose.msra.mxu1 %v2810_v35 }
 0x75e   : > { %5849 = vmatprep.subr.bf16.mxu1 %v3107_v22 }
 0x764   : > { %5838 = vmatmul.mubr.msk.bf16.vlgmr.msra.gmra.mrb[60].mxu1 %vm1111_vm0, %v2795_v51 }
 0x765   : > { %5850 = vmatpush3.bf16.msra.mxu1 %v3107_v22 }
 0x766   : > { %5851 = vmatprep.subr.bf16.mxu1 %v3109_v50 }
 0x769   : > { %5852 = vmatpush3.bf16.msra.mxu1 %v3109_v50 }
 0x76a   : > { %5865 = vmatprep.subr.bf16.mxu1 %v7992_v6 }
 0x7d1   : > { %v7995_v13 = vpop.f32.mrb[48].mxu0 }
 0x7d2   : > { %v7997_v59 = vpop.f32.mrb[49].mxu0 }
 0x7d3   : > { %v7999_v48 = vpop.f32.mrb[50].mxu0 }
 0x7d4   : > { %v8001_v36 = vpop.f32.mrb[51].mxu0 }
 0x7d9   : > { %v8003_v27 = vpop.f32.mrb[52].mxu0 }
 0x7da   : > { %9108 = vst [vmem:[#allocation22_spill] sm:$0xff] %v8003_v27  ;;  %v8005_v62 = vpop.f32.mrb[53].mxu0 }
 0x7db   : > { %9109 = vst [vmem:[#allocation21_spill] sm:$0xff] %v8005_v62  ;;  %v8007_v40 = vpop.f32.mrb[54].mxu0 }
 0x7dc   : > { %9110 = vst [vmem:[#allocation24_spill] sm:$0xff] %v8007_v40  ;;  %v8009_v24 = vpop.f32.mrb[55].mxu0 }
 0x7dd   : > { %9111 = vst [vmem:[#allocation23_spill] sm:$0xff] %v8009_v24 }
 0x80a   : > { %v8011_v23 = vpop.f32.mrb[48].mxu1  ;;  %v5815_v55 = vpop.f32.mrb[56].mxu0 }
 0x80b   : > { %9112 = vst [vmem:[#allocation25_spill] sm:$0xff] %v8011_v23  ;;  %v8016_v1 = vadd.f32 %v8013_v63, %v5815_v55  ;;  %v8018_v4 = vpop.f32.mrb[49].mxu1  ;;  %v2639_v15 = vpop.f32.mrb[57].mxu0 }
 0x80c   : > { %v8020_v52 = vpop.f32.mrb[50].mxu1  ;;  %v5816_v54 = vpop.f32.mrb[58].mxu0  ;;  %v8025_v3 = vadd.f32 %v8022_v19, %v2639_v15 }
 0x80d   : > { %9113 = vst [vmem:[#allocation26_spill] sm:$0xff] %v8020_v52  ;;  %v8027_v45 = vpop.f32.mrb[51].mxu1  ;;  %v2642_v10 = vpop.f32.mrb[59].mxu0  ;;  %v2867_v37 = vsel %vm1111_vm0, %v8016_v1, -inf  ;;  %v8041_v14 = vadd.f32 %v8038_v58, %v5816_v54 }
 0x80e   : > { %9114 = vst [vmem:[#allocation27_spill] sm:$0xff] %v8027_v45  ;;  %v8034_v57 = vadd.f32 %v8031_v49, %v2642_v10  ;;  %2868 = vmax.xlane.f32.xlu0 %v2867_v37  ;;  %v2861_v41 = vsel %vm1111_vm0, %v8025_v3, -inf }
 0x80f   : > { %v2870_v42 = vsel %vm1111_vm0, %v8041_v14, -inf }
 0x810   : > { %v2864_v39 = vsel %vm1111_vm0, %v8034_v57, -inf }
 0x811   : > { %2865 = vmax.xlane.f32.xlu1 %v2864_v39 }
 0x812   : > { %2862 = vmax.xlane.f32.xlu0 %v2861_v41 }
 0x815   : > { %v8045_v53 = vpop.f32.mrb[52].mxu1 }
 0x816   : > { %9115 = vst [vmem:[#allocation28_spill] sm:$0xff] %v8045_v53  ;;  %2871 = vmax.xlane.f32.xlu0 %v2870_v42  ;;  %v8049_v7 = vpop.f32.mrb[53].mxu1 }
 0x817   : > { %9116 = vst [vmem:[#allocation29_spill] sm:$0xff] %v8049_v7  ;;  %v8051_v56 = vpop.f32.mrb[54].mxu1 }
 0x818   : > { %9117 = vst [vmem:[#allocation30_spill] sm:$0xff] %v8051_v56  ;;  %v8053_v51 = vpop.f32.mrb[55].mxu1 }
 0x819   : > { %9118 = vst [vmem:[#allocation31_spill] sm:$0xff] %v8053_v51 }
 0x81a   : > { %v5831_v25 = vpop.f32.mrb[60].mxu0 }
 0x81b   : > { %v8056_v31 = vadd.f32 %v8013_v63, %v5831_v25  ;;  %v2777_v26 = vpop.f32.mrb[61].mxu0 }
 0x81c   : > { %v5832_v35 = vpop.f32.mrb[62].mxu0  ;;  %v8059_v22 = vadd.f32 %v8022_v19, %v2777_v26 }
 0x81d   : > { %v8062_v50 = vadd.f32 %v8038_v58, %v5832_v35  ;;  %v2780_v55 = vpop.f32.mrb[63].mxu0  ;;  %v2891_v15 = vsel %vm1111_vm0, %v8056_v31, -inf }
 0x81e   : > { %2892 = vmax.xlane.f32.xlu0 %v2891_v15  ;;  %v8067_v54 = vadd.f32 %v8031_v49, %v2780_v55  ;;  %v2885_v37 = vsel %vm1111_vm0, %v8059_v22, -inf }
 0x81f   : > { %v2894_v10 = vsel %vm1111_vm0, %v8062_v50, -inf }
 0x820   : > { %2895 = vmax.xlane.f32.xlu1 %v2894_v10  ;;  %v2888_v39 = vsel %vm1111_vm0, %v8067_v54, -inf }
 0x822   : > { %2886 = vmax.xlane.f32.xlu0 %v2885_v37 }
 0x824   : > { %2889 = vmax.xlane.f32.xlu1 %v2888_v39 }
 0x827   : > { %v5823_v41 = vpop.f32.mrb[56].mxu1 }
 0x828   : > { %v8076_v42 = vadd.f32 %v8013_v63, %v5823_v41  ;;  %v2708_v25 = vpop.f32.mrb[57].mxu1 }
 0x829   : > { %v5824_v26 = vpop.f32.mrb[58].mxu1  ;;  %v8079_v35 = vadd.f32 %v8022_v19, %v2708_v25 }
 0x82a   : > { %v8082_v55 = vadd.f32 %v8038_v58, %v5824_v26  ;;  %v2711_v15 = vpop.f32.mrb[59].mxu1  ;;  %v2879_v10 = vsel %vm1111_vm0, %v8076_v42, -inf }
 0x82b   : > { %2880 = vmax.xlane.f32.xlu0 %v2879_v10  ;;  %v8087_v37 = vadd.f32 %v8031_v49, %v2711_v15  ;;  %v2873_v41 = vsel %vm1111_vm0, %v8079_v35, -inf }
 0x82c   : > { %v2882_v39 = vsel %vm1111_vm0, %v8082_v55, -inf }
 0x82d   : > { %2883 = vmax.xlane.f32.xlu1 %v2882_v39  ;;  %v2876_v25 = vsel %vm1111_vm0, %v8087_v37, -inf }
 0x82f   : > { %2874 = vmax.xlane.f32.xlu0 %v2873_v41 }
 0x831   : > { %2877 = vmax.xlane.f32.xlu1 %v2876_v25 }
 0x837   : > { %v5839_v26 = vpop.f32.mrb[60].mxu1 }
 0x838   : > { %v8096_v56 = vadd.f32 %v8013_v63, %v5839_v26  ;;  %v2846_v10 = vpop.f32.mrb[61].mxu1 }
 0x839   : > { %v5840_v53 = vpop.f32.mrb[62].mxu1  ;;  %v8099_v15 = vadd.f32 %v8022_v19, %v2846_v10  ;;  %v8119_v10 = vpop.permute.xlu0 %3374 }
 0x83a   : > { %v8102_v51 = vadd.f32 %v8038_v58, %v5840_v53  ;;  %v2849_v39 = vpop.f32.mrb[63].mxu1  ;;  %v2903_v41 = vsel %vm1111_vm0, %v8096_v56, -inf }
 0x83b   : > { %2904 = vmax.xlane.f32.xlu0 %v2903_v41  ;;  %v8107_v7 = vadd.f32 %v8031_v49, %v2849_v39  ;;  %v2897_v26 = vsel %vm1111_vm0, %v8099_v15, -inf }
 0x83c   : > { %v2906_v25 = vsel %vm1111_vm0, %v8102_v51, -inf }
 0x83d   : > { %2907 = vmax.xlane.f32.xlu1 %v2906_v25  ;;  %v2900_v53 = vsel %vm1111_vm0, %v8107_v7, -inf }
 0x83f   : > { %2898 = vmax.xlane.f32.xlu0 %v2897_v26 }
 0x841   : > { %2901 = vmax.xlane.f32.xlu1 %v2900_v53 }
 0x852   : > { %3376 = vrot.lane.b32.xlu1 %v7310_v21, %s6795_s5 }
 0x855   : > { %3230 = vrot.lane.b32.xlu0 %v7356_v30, %s6794_s1 }
 0x89b   : > { %v2869_v39 = vpop.xlane.xlu0 %2868 }
 0x89c   : > { %v2911_v41 = vsub.f32 %v8016_v1, %v2869_v39 }
 0x89e   : > { %v2929_v25 = vmul.f32 1.442695, %v2911_v41  ;;  %v2866_v40 = vpop.xlane.xlu1 %2865 }
 0x89f   : > { %v2863_v27 = vpop.xlane.xlu0 %2862  ;;  %v2910_v24 = vsub.f32 %v8034_v57, %v2866_v40 }
 0x8a0   : > { %6350 = vpow2.f32 %v2929_v25  ;;  %v2909_v26 = vsub.f32 %v8025_v3, %v2863_v27 }
 0x8a1   : > { %v2927_v52 = vmul.f32 1.442695, %v2910_v24 }
 0x8a2   : > { %v2925_v53 = vmul.f32 1.442695, %v2909_v26 }
 0x8a3   : > { %v2872_v62 = vpop.xlane.xlu0 %2871 }
 0x8a4   : > { %6352 = vpow2.f32 %v2925_v53  ;;  %v2912_v21 = vsub.f32 %v8041_v14, %v2872_v62 }
 0x8a6   : > { %v2931_v45 = vmul.f32 1.442695, %v2912_v21 }
 0x8a8   : > { %6354 = vpow2.f32 %v2931_v45 }
 0x8a9   : > { %6356 = vpow2.f32 %v2927_v52 }
 0x8aa   : > { %v8125_v23 = vpop.eup %6350 }
 0x8ab   : > { %v2893_v1 = vpop.xlane.xlu0 %2892  ;;  %v2963_v39 = vsel %vm1111_vm0, %v8125_v23, 0.0 }
 0x8ac   : > { %v2919_v41 = vsub.f32 %v8056_v31, %v2893_v1  ;;  %2964 = vadd.xlane.f32.xlu0 %v2963_v39 }
 0x8ad   : > { %v2896_v27 = vpop.xlane.xlu1 %2895 }
 0x8ae   : > { %v8130_v40 = vpop.eup %6352  ;;  %v2945_v3 = vmul.f32 1.442695, %v2919_v41  ;;  %v2920_v57 = vsub.f32 %v8062_v50, %v2896_v27 }
 0x8af   : > { %v2887_v62 = vpop.xlane.xlu0 %2886  ;;  %v2957_v24 = vsel %vm1111_vm0, %v8130_v40, 0.0 }
 0x8b0   : > { %6358 = vpow2.f32 %v2945_v3  ;;  %v2947_v45 = vmul.f32 1.442695, %v2920_v57  ;;  %v2917_v52 = vsub.f32 %v8059_v22, %v2887_v62  ;;  %2958 = vadd.xlane.f32.xlu0 %v2957_v24 }
 0x8b1   : > { %v2890_v14 = vpop.xlane.xlu1 %2889 }
 0x8b2   : > { %v8136_v25 = vpop.eup %6354  ;;  %6360 = vpow2.f32 %v2947_v45  ;;  %v2941_v31 = vmul.f32 1.442695, %v2917_v52  ;;  %v2918_v26 = vsub.f32 %v8067_v54, %v2890_v14 }
 0x8b3   : > { %v2966_v53 = vsel %vm1111_vm0, %v8136_v25, 0.0  ;;  %v8141_v50 = vpop.eup %6356 }
 0x8b4   : > { %6362 = vpow2.f32 %v2941_v31  ;;  %v2943_v21 = vmul.f32 1.442695, %v2918_v26  ;;  %2967 = vadd.xlane.f32.xlu1 %v2966_v53  ;;  %v2960_v22 = vsel %vm1111_vm0, %v8141_v50, 0.0 }
 0x8b6   : > { %6364 = vpow2.f32 %v2943_v21 }
 0x8b8   : > { %v2881_v1 = vpop.xlane.xlu0 %2880  ;;  %2961 = vadd.xlane.f32.xlu1 %v2960_v22 }
 0x8b9   : > { %v2915_v39 = vsub.f32 %v8076_v42, %v2881_v1 }
 0x8ba   : > { %v8146_v41 = vpop.eup %6358  ;;  %v2884_v27 = vpop.xlane.xlu1 %2883 }
 0x8bb   : > { %v2937_v54 = vmul.f32 1.442695, %v2915_v39  ;;  %v2916_v3 = vsub.f32 %v8082_v55, %v2884_v27  ;;  %v2987_v57 = vsel %vm1111_vm0, %v8146_v41, 0.0 }
 0x8bc   : > { %v8151_v62 = vpop.eup %6360  ;;  %2988 = vadd.xlane.f32.xlu0 %v2987_v57  ;;  %v2875_v24 = vpop.xlane.xlu0 %2874 }
 0x8bd   : > { %6366 = vpow2.f32 %v2937_v54  ;;  %v2939_v45 = vmul.f32 1.442695, %v2916_v3  ;;  %v2913_v52 = vsub.f32 %v8079_v35, %v2875_v24  ;;  %v2990_v42 = vsel %vm1111_vm0, %v8151_v62, 0.0 }
 0x8be   : > { %v8156_v14 = vpop.eup %6362  ;;  %v2878_v31 = vpop.xlane.xlu1 %2877  ;;  %2991 = vadd.xlane.f32.xlu1 %v2990_v42 }
 0x8bf   : > { %6368 = vpow2.f32 %v2939_v45  ;;  %v2933_v55 = vmul.f32 1.442695, %v2913_v52  ;;  %v2914_v26 = vsub.f32 %v8087_v37, %v2878_v31  ;;  %v2981_v53 = vsel %vm1111_vm0, %v8156_v14, 0.0 }
 0x8c0   : > { %v8161_v21 = vpop.eup %6364  ;;  %2982 = vadd.xlane.f32.xlu0 %v2981_v53 }
 0x8c1   : > { %6370 = vpow2.f32 %v2933_v55  ;;  %v2935_v22 = vmul.f32 1.442695, %v2914_v26  ;;  %v2984_v35 = vsel %vm1111_vm0, %v8161_v21, 0.0 }
 0x8c2   : > { %2985 = vadd.xlane.f32.xlu1 %v2984_v35 }
 0x8c3   : > { %6372 = vpow2.f32 %v2935_v22 }
 0x8c7   : > { %v8165_v1 = vpop.eup %6366 }
 0x8c8   : > { %v2975_v39 = vsel %vm1111_vm0, %v8165_v1, 0.0  ;;  %v2905_v52 = vpop.xlane.xlu0 %2904 }
 0x8c9   : > { %v8169_v27 = vpop.eup %6368  ;;  %2976 = vadd.xlane.f32.xlu0 %v2975_v39  ;;  %v2923_v55 = vsub.f32 %v8096_v56, %v2905_v52 }
 0x8ca   : > { %v2978_v37 = vsel %vm1111_vm0, %v8169_v27, 0.0  ;;  %v2908_v45 = vpop.xlane.xlu1 %2907 }
 0x8cb   : > { %v8173_v54 = vpop.eup %6370  ;;  %2979 = vadd.xlane.f32.xlu1 %v2978_v37  ;;  %v2953_v22 = vmul.f32 1.442695, %v2923_v55  ;;  %v2924_v39 = vsub.f32 %v8102_v51, %v2908_v45 }
 0x8cc   : > { %v2969_v3 = vsel %vm1111_vm0, %v8173_v54, 0.0  ;;  %v2899_v26 = vpop.xlane.xlu0 %2898 }
 0x8cd   : > { %v8177_v57 = vpop.eup %6372  ;;  %2970 = vadd.xlane.f32.xlu0 %v2969_v3  ;;  %v2921_v35 = vsub.f32 %v8099_v15, %v2899_v26  ;;  %v2955_v37 = vmul.f32 1.442695, %v2924_v39 }
 0x8ce   : > { %v2972_v24 = vsel %vm1111_vm0, %v8177_v57, 0.0  ;;  %v2902_v42 = vpop.xlane.xlu1 %2901 }
 0x8cf   : > { %2973 = vadd.xlane.f32.xlu1 %v2972_v24  ;;  %v2922_v31 = vsub.f32 %v8107_v7, %v2902_v42 }
 0x8d1   : > { %v2951_v53 = vmul.f32 1.442695, %v2922_v31 }
 0x8d3   : > { %6374 = vpow2.f32 %v2951_v53 }
 0x8d4   : > { %6376 = vpow2.f32 %v2953_v22 }
 0x8dd   : > { %v8189_v3 = vpop.eup %6374 }
 0x8de   : > { %v2996_v7 = vsel %vm1111_vm0, %v8189_v3, 0.0 }
 0x8e0   : > { %3372 = vrot.lane.b32.xlu1 %v7307_v20, %s6795_s5  ;;  %v2949_v20 = vmul.f32 1.442695, %v2921_v35 }
 0x8e2   : > { %6378 = vpow2.f32 %v2949_v20 }
 0x8e3   : > { %3370 = vrot.lane.b32.xlu0 %v7285_v9, %s6795_s5  ;;  %6380 = vpow2.f32 %v2955_v37  ;;  %v8191_v9 = vpop.eup %6376 }
 0x8e4   : > { %v2999_v56 = vsel %vm1111_vm0, %v8191_v9, 0.0 }
 0x8ec   : > { %v8197_v15 = vpop.eup %6378 }
 0x8ed   : > { %v2993_v51 = vsel %vm1111_vm0, %v8197_v15, 0.0  ;;  %v8201_v24 = vpop.eup %6380 }
 0x8ee   : > { %v3002_v45 = vsel %vm1111_vm0, %v8201_v24, 0.0 }
 0x902   : > { %2997 = vadd.xlane.f32.xlu0 %v2996_v7 }
 0x904   : > { %3000 = vadd.xlane.f32.xlu1 %v2999_v56 }
 0x908   : > { %2994 = vadd.xlane.f32.xlu1 %v2993_v51 }
 0x90c   : > { %3003 = vadd.xlane.f32.xlu1 %v3002_v45 }
 0x918   : > { %3443 = vrot.lane.b32.xlu0 %v7330_v60, %s6795_s5 }
 0x91c   : > { %3439 = vrot.lane.b32.xlu0 %v7327_v2, %s6795_s5  ;;  %v8229_v2 = vpop.permute.xlu0 %3230 }
 0x91d   : > { %3445 = vrot.lane.b32.xlu1 %v7354_v29, %s6795_s5 }
 0x920   : > { %3512 = vrot.lane.b32.xlu0 %v7370_v47, %s6795_s5 }
 0x921   : > { %3441 = vrot.lane.b32.xlu1 %v7351_v28, %s6795_s5  ;;  %v8231_v28 = vpop.permute.xlu1 %3376 }
 0x924   : > { %3508 = vrot.lane.b32.xlu0 %v7368_v46, %s6795_s5 }
 0x925   : > { %3514 = vrot.lane.b32.xlu1 %v7386_v38, %s6795_s5 }
 0x928   : > { %3581 = vrot.lane.b32.xlu0 %v7399_v12, %s6795_s5 }
 0x929   : > { %3510 = vrot.lane.b32.xlu1 %v7384_v32, %s6795_s5 }
 0x92c   : > { %3577 = vrot.lane.b32.xlu0 %v7397_v8, %s6795_s5 }
 0x92d   : > { %3583 = vrot.lane.b32.xlu1 %v7418_v34, %s6795_s5 }
 0x931   : > { %3579 = vrot.lane.b32.xlu1 %v7415_v11, %s6795_s5 }
 0x939   : > { %v2965_v60 = vpop.xlane.xlu0 %2964 }
 0x93d   : > { %v2959_v29 = vpop.xlane.xlu0 %2958 }
 0x941   : > { %v2968_v46 = vpop.xlane.xlu1 %2967 }
 0x942   : > { %6382 = vrcp.f32 %v2968_v46 }
 0x943   : > { %6384 = vrcp.f32 %v2959_v29 }
 0x944   : > { %6386 = vrcp.f32 %v2965_v60 }
 0x945   : > { %v2962_v47 = vpop.xlane.xlu1 %2961 }
 0x946   : > { %6388 = vrcp.f32 %v2962_v47 }
 0x949   : > { %v2989_v32 = vpop.xlane.xlu0 %2988 }
 0x94b   : > { %v2992_v38 = vpop.xlane.xlu1 %2991 }
 0x94c   : > { %v6383_v8 = vpop.eup %6382  ;;  %6390 = vrcp.f32 %v2992_v38 }
 0x94d   : > { %v2983_v12 = vpop.xlane.xlu0 %2982  ;;  %v6385_v34 = vpop.eup %6384  ;;  %v3024_v31 = vmul.f32 %v6383_v8, %v8136_v25 }
 0x94e   : > { %6392 = vrcp.f32 %v2983_v12  ;;  %v6387_v11 = vpop.eup %6386  ;;  %v3021_v55 = vmul.f32 %v6385_v34, %v8130_v40 }
 0x94f   : > { %6394 = vrcp.f32 %v2989_v32  ;;  %v2986_v52 = vpop.xlane.xlu1 %2985  ;;  %v3023_v53 = vmul.f32 %v6387_v11, %v8125_v23 }
 0x950   : > { %v6389_v42 = vpop.eup %6388  ;;  %6396 = vrcp.f32 %v2986_v52 }
 0x951   : > { %v3022_v26 = vmul.f32 %v6389_v42, %v8141_v50  ;;  %v3038_v35 = vpack.c.bf16 %v3024_v31, %v3023_v53 }
 0x953   : > { %v3037_v22 = vpack.c.bf16 %v3022_v26, %v3021_v55 }
 0x955   : > { %5845 = vmatprep.mubr.msk.bf16.mxu0 %vm1111_vm0, %v3037_v22 }
 0x956   : > { %v2977_v39 = vpop.xlane.xlu0 %2976  ;;  %5846 = vmatmul.mubr.msk.bf16.vlgmr.msra.gmra.mrb[64].mxu0 %vm1111_vm0, %v3038_v35  ;;  %v6391_v20 = vpop.eup %6390 }
 0x957   : > { %5858 = vmatpush3.bf16.msra.mxu0 %v7981_v16  ;;  %v3032_v50 = vmul.f32 %v6391_v20, %v8151_v62 }
 0x958   : > { %v6393_v37 = vpop.eup %6392  ;;  %v2980_v7 = vpop.xlane.xlu1 %2979  ;;  %5859 = vmatprep.subr.bf16.mxu0 %v7989_v0 }
 0x959   : > { %v6395_v25 = vpop.eup %6394  ;;  %6398 = vrcp.f32 %v2980_v7  ;;  %v3029_v56 = vmul.f32 %v6393_v37, %v8156_v14 }
 0x95a   : > { %v6397_v40 = vpop.eup %6396  ;;  %v2971_v23 = vpop.xlane.xlu0 %2970  ;;  %v3031_v45 = vmul.f32 %v6395_v25, %v8146_v41 }
 0x95b   : > { %6400 = vrcp.f32 %v2971_v23  ;;  %5860 = vmatpush3.bf16.msra.mxu0 %v7989_v0  ;;  %v3030_v51 = vmul.f32 %v6397_v40, %v8161_v21  ;;  %v3385_v0 = vsel %vm1111_vm0, %v8119_v10, 0 }
 0x95c   : > { %6402 = vrcp.f32 %v2977_v39  ;;  %v2974_v16 = vpop.xlane.xlu1 %2973  ;;  %5993 = vmatprep.subr.msk.bf16.mxu0 %vm1111_vm0, %v8119_v10  ;;  %v3042_v29 = vpack.c.bf16 %v3032_v50, %v3031_v45  ;;  %v3388_v10 = vsel %vm1111_vm0, %v8231_v28, 0 }
 0x95d   : > { %6404 = vrcp.f32 %v2974_v16  ;;  %v3041_v60 = vpack.c.bf16 %v3030_v51, %v3029_v56 }
 0x95e   : > { %v3371_v62 = vpop.permute.xlu0 %3370 }
 0x95f   : > { %5861 = vmatprep.mubr.msk.bf16.mxu0 %vm1111_vm0, %v3041_v60 }
 0x960   : > { %5862 = vmatmul.mubr.msk.bf16.vlgmr.msra.gmra.mrb[68].mxu0 %vm1111_vm0, %v3042_v29 }
 0x961   : > { %5877 = vmatprep.mubr.msk.bf16.mxu0 %vm1111_vm0, %v3371_v62 }
 0x963   : > { %v6399_v14 = vpop.eup %6398 }
 0x964   : > { %5874 = vmatpush3.bf16.xpose.msra.mxu0 %v3385_v0  ;;  %v3028_v47 = vmul.f32 %v6399_v14, %v8169_v27  ;;  %v3373_v27 = vpop.permute.xlu1 %3372 }
 0x965   : > { %v6401_v41 = vpop.eup %6400  ;;  %5994 = vmatprep.subr.msk.bf16.mxu0 %vm1111_vm0, %v8231_v28 }
 0x966   : > { %v6403_v21 = vpop.eup %6402  ;;  %v3025_v32 = vmul.f32 %v6401_v41, %v8173_v54 }
 0x967   : > { %v6405_v46 = vpop.eup %6404  ;;  %v3027_v8 = vmul.f32 %v6403_v21, %v8165_v1 }
 0x968   : > { %v3026_v38 = vmul.f32 %v6405_v46, %v8177_v57 }
 0x969   : > { %v3040_v34 = vpack.c.bf16 %v3028_v47, %v3027_v8 }
 0x96a   : > { %v3039_v12 = vpack.c.bf16 %v3026_v38, %v3025_v32 }
 0x96c   : > { %5853 = vmatprep.mubr.msk.bf16.mxu1 %vm1111_vm0, %v3039_v12  ;;  %5876 = vmatpush3.bf16.xpose.msra.mxu0 %v3388_v10 }
 0x96d   : > { %5854 = vmatmul.mubr.msk.bf16.vlgmr.msra.gmra.mrb[64].mxu1 %vm1111_vm0, %v3040_v34 }
 0x96e   : > { %5866 = vmatpush3.bf16.msra.mxu1 %v7992_v6 }
 0x96f   : > { %5867 = vmatprep.subr.bf16.mxu1 %v8229_v2 }
 0x972   : > { %5868 = vmatpush3.bf16.msra.mxu1 %v8229_v2 }
 0x973   : > { %5878 = vmatmul.mubr.msk.bf16.vlgmr.msra.gmra.mrb[72].mxu0 %vm1111_vm0, %v3373_v27 }
 0x98f   : > { %v2998_v1 = vpop.xlane.xlu0 %2997 }
 0x990   : > { %6406 = vrcp.f32 %v2998_v1 }
 0x991   : > { %v3001_v54 = vpop.xlane.xlu1 %3000 }
 0x993   : > { %v3444_v57 = vpop.permute.xlu0 %3443 }
 0x994   : > { %5995 = vmatprep.subr.msk.bf16.mxu1 %vm1111_vm0, %v3444_v57 }
 0x995   : > { %v2995_v28 = vpop.xlane.xlu1 %2994 }
 0x996   : > { %6408 = vrcp.f32 %v2995_v28 }
 0x997   : > { %v3440_v11 = vpop.permute.xlu0 %3439  ;;  %6410 = vrcp.f32 %v3001_v54 }
 0x999   : > { %v3004_v52 = vpop.xlane.xlu1 %3003 }
 0x99a   : > { %6412 = vrcp.f32 %v3004_v52  ;;  %v6407_v31 = vpop.eup %6406 }
 0x99b   : > { %v3513_v6 = vpop.permute.xlu0 %3512  ;;  %v3034_v35 = vmul.f32 %v6407_v31, %v8189_v3  ;;  %v3454_v3 = vsel %vm1111_vm0, %v3444_v57, 0 }
 0x99c   : > { %5997 = vmatprep.subr.msk.bf16.mxu0 %vm1111_vm0, %v3513_v6  ;;  %v3523_v42 = vsel %vm1111_vm0, %v3513_v6, 0 }
 0x99d   : > { %v3446_v2 = vpop.permute.xlu1 %3445  ;;  %5890 = vmatpush3.bf16.xpose.msra.mxu0 %v3523_v42 }
 0x99f   : > { %v3509_v55 = vpop.permute.xlu0 %3508 }
 0x9a0   : > { %v6409_v26 = vpop.eup %6408  ;;  %5893 = vmatprep.mubr.msk.bf16.mxu0 %vm1111_vm0, %v3509_v55 }
 0x9a1   : > { %v3442_v53 = vpop.permute.xlu1 %3441  ;;  %v3033_v22 = vmul.f32 %v6409_v26, %v8197_v15  ;;  %v6411_v39 = vpop.eup %6410  ;;  %v3457_v15 = vsel %vm1111_vm0, %v3446_v2, 0 }
 0x9a2   : > { %v3035_v7 = vmul.f32 %v6411_v39, %v8191_v9 }
 0x9a3   : > { %v3043_v20 = vpack.c.bf16 %v3034_v35, %v3033_v22 }
 0x9a4   : > { %v6413_v37 = vpop.eup %6412 }
 0x9a5   : > { %v3036_v25 = vmul.f32 %v6413_v37, %v8201_v24  ;;  %v3515_v40 = vpop.permute.xlu1 %3514  ;;  %5869 = vmatprep.mubr.msk.bf16.mxu1 %vm1111_vm0, %v3043_v20  ;;  %v3582_v24 = vpop.permute.xlu0 %3581 }
 0x9a6   : > { %5998 = vmatprep.subr.msk.bf16.mxu0 %vm1111_vm0, %v3515_v40  ;;  %v3526_v50 = vsel %vm1111_vm0, %v3515_v40, 0  ;;  %v3592_v51 = vsel %vm1111_vm0, %v3582_v24, 0 }
 0x9a7   : > { %5892 = vmatpush3.bf16.xpose.msra.mxu0 %v3526_v50  ;;  %v3044_v23 = vpack.c.bf16 %v3036_v25, %v3035_v7 }
 0x9a9   : > { %5870 = vmatmul.mubr.msk.bf16.vlgmr.msra.gmra.mrb[68].mxu1 %vm1111_vm0, %v3044_v23  ;;  %v3511_v9 = vpop.permute.xlu1 %3510  ;;  %v3578_v56 = vpop.permute.xlu0 %3577 }
 0x9aa   : > { %5882 = vmatpush3.bf16.xpose.msra.mxu1 %v3454_v3  ;;  %5885 = vmatprep.mubr.msk.bf16.mxu1 %vm1111_vm0, %v3440_v11 }
 0x9ab   : > { %5996 = vmatprep.subr.msk.bf16.mxu1 %vm1111_vm0, %v3446_v2 }
 0x9ad   : > { %v3584_v45 = vpop.permute.xlu1 %3583 }
 0x9ae   : > { %5894 = vmatmul.mubr.msk.bf16.vlgmr.msra.gmra.mrb[76].mxu0 %vm1111_vm0, %v3511_v9  ;;  %v3595_v16 = vsel %vm1111_vm0, %v3584_v45, 0 }
 0x9b1   : > { %v3580_v60 = vpop.permute.xlu1 %3579 }
 0x9b2   : > { %5884 = vmatpush3.bf16.xpose.msra.mxu1 %v3457_v15 }
 0x9b3   : > { %5999 = vmatprep.subr.msk.bf16.mxu1 %vm1111_vm0, %v3582_v24 }
 0x9b9   : > { %5886 = vmatmul.mubr.msk.bf16.vlgmr.msra.gmra.mrb[72].mxu1 %vm1111_vm0, %v3442_v53 }
 0x9ba   : > { %5898 = vmatpush3.bf16.xpose.msra.mxu1 %v3592_v51  ;;  %5901 = vmatprep.mubr.msk.bf16.mxu1 %vm1111_vm0, %v3578_v56 }
 0x9bb   : > { %6000 = vmatprep.subr.msk.bf16.mxu1 %vm1111_vm0, %v3584_v45 }
 0x9c2   : > { %5900 = vmatpush3.bf16.xpose.msra.mxu1 %v3595_v16 }
 0x9c9   : > { %5902 = vmatmul.mubr.msk.bf16.vlgmr.msra.gmra.mrb[76].mxu1 %vm1111_vm0, %v3580_v60 }
 0xa29   : > { %v8291_v29 = vpop.f32.mrb[64].mxu0 }
 0xa2a   : > { %v8293_v62 = vpop.f32.mrb[65].mxu0 }
 0xa2b   : > { %v8295_v0 = vpop.f32.mrb[66].mxu0 }
 0xa2c   : > { %v8297_v14 = vpop.f32.mrb[67].mxu0 }
 0xa33   : > { %v8299_v41 = vpop.f32.mrb[68].mxu0 }
 0xa34   : > { %v8301_v21 = vpop.f32.mrb[69].mxu0 }
 0xa35   : > { %v8303_v46 = vpop.f32.mrb[70].mxu0 }
 0xa36   : > { %v8305_v47 = vpop.f32.mrb[71].mxu0 }
 0xa40   : > { %v8307_v32 = vpop.f32.mrb[64].mxu1 }
 0xa41   : > { %v8309_v38 = vpop.f32.mrb[65].mxu1 }
 0xa42   : > { %v8311_v8 = vpop.f32.mrb[66].mxu1 }
 0xa43   : > { %v8313_v12 = vpop.f32.mrb[67].mxu1 }
 0xa46   : > { %v5879_v10 = vpop.f32.mrb[72].mxu0 }
 0xa47   : > { %v8316_v34 = vadd.f32 %v8013_v63, %v5879_v10  ;;  %v3424_v27 = vpop.f32.mrb[73].mxu0 }
 0xa48   : > { %v5880_v1 = vpop.f32.mrb[74].mxu0  ;;  %v8319_v54 = vadd.f32 %v8022_v19, %v3424_v27 }
 0xa49   : > { %v3427_v57 = vpop.f32.mrb[75].mxu0  ;;  %v3652_v28 = vsel %vm1111_vm0, %v8316_v34, -inf  ;;  %v8329_v6 = vadd.f32 %v8038_v58, %v5880_v1 }
 0xa4a   : > { %v8324_v11 = vadd.f32 %v8031_v49, %v3427_v57  ;;  %3653 = vmax.xlane.f32.xlu0 %v3652_v28  ;;  %v3646_v42 = vsel %vm1111_vm0, %v8319_v54, -inf }
 0xa4b   : > { %v3655_v2 = vsel %vm1111_vm0, %v8329_v6, -inf }
 0xa4c   : > { %v3649_v52 = vsel %vm1111_vm0, %v8324_v11, -inf }
 0xa4d   : > { %3650 = vmax.xlane.f32.xlu1 %v3649_v52 }
 0xa4e   : > { %3647 = vmax.xlane.f32.xlu0 %v3646_v42 }
 0xa52   : > { %3656 = vmax.xlane.f32.xlu0 %v3655_v2 }
 0xa7c   : > { %v8335_v31 = vpop.f32.mrb[68].mxu1 }
 0xa7d   : > { %v8337_v55 = vpop.f32.mrb[69].mxu1 }
 0xa7e   : > { %v8339_v26 = vpop.f32.mrb[70].mxu1 }
 0xa7f   : > { %v8341_v53 = vpop.f32.mrb[71].mxu1 }
 0xa81   : > { %v5895_v22 = vpop.f32.mrb[76].mxu0 }
 0xa82   : > { %v8344_v35 = vadd.f32 %v8013_v63, %v5895_v22  ;;  %v3562_v39 = vpop.f32.mrb[77].mxu0 }
 0xa83   : > { %v5896_v20 = vpop.f32.mrb[78].mxu0  ;;  %v8347_v37 = vadd.f32 %v8022_v19, %v3562_v39 }
 0xa84   : > { %v8350_v7 = vadd.f32 %v8038_v58, %v5896_v20  ;;  %v3565_v25 = vpop.f32.mrb[79].mxu0  ;;  %v3676_v40 = vsel %vm1111_vm0, %v8344_v35, -inf }
 0xa85   : > { %3677 = vmax.xlane.f32.xlu0 %v3676_v40  ;;  %v8355_v50 = vadd.f32 %v8031_v49, %v3565_v25  ;;  %v3670_v3 = vsel %vm1111_vm0, %v8347_v37, -inf }
 0xa86   : > { %v3679_v23 = vsel %vm1111_vm0, %v8350_v7, -inf }
 0xa87   : > { %3680 = vmax.xlane.f32.xlu1 %v3679_v23  ;;  %v3673_v9 = vsel %vm1111_vm0, %v8355_v50, -inf }
 0xa89   : > { %3671 = vmax.xlane.f32.xlu0 %v3670_v3 }
 0xa8b   : > { %3674 = vmax.xlane.f32.xlu1 %v3673_v9 }
 0xa8c   : > { %v5887_v15 = vpop.f32.mrb[72].mxu1 }
 0xa8d   : > { %v8364_v24 = vadd.f32 %v8013_v63, %v5887_v15  ;;  %v3493_v56 = vpop.f32.mrb[73].mxu1 }
 0xa8e   : > { %v5888_v51 = vpop.f32.mrb[74].mxu1  ;;  %v8367_v45 = vadd.f32 %v8022_v19, %v3493_v56 }
 0xa8f   : > { %v8370_v16 = vadd.f32 %v8038_v58, %v5888_v51  ;;  %v3496_v60 = vpop.f32.mrb[75].mxu1  ;;  %v3664_v10 = vsel %vm1111_vm0, %v8364_v24, -inf }
 0xa90   : > { %3665 = vmax.xlane.f32.xlu0 %v3664_v10  ;;  %v8375_v27 = vadd.f32 %v8031_v49, %v3496_v60  ;;  %v3658_v57 = vsel %vm1111_vm0, %v8367_v45, -inf }
 0xa91   : > { %v3667_v1 = vsel %vm1111_vm0, %v8370_v16, -inf }
 0xa92   : > { %3668 = vmax.xlane.f32.xlu1 %v3667_v1  ;;  %v3661_v28 = vsel %vm1111_vm0, %v8375_v27, -inf }
 0xa94   : > { %3659 = vmax.xlane.f32.xlu0 %v3658_v57 }
 0xa96   : > { %3662 = vmax.xlane.f32.xlu1 %v3661_v28 }
 0xa9c   : > { %v5903_v52 = vpop.f32.mrb[76].mxu1 }
 0xa9d   : > { %v3631_v42 = vpop.f32.mrb[77].mxu1  ;;  %v8388_v39 = vadd.f32 %v8013_v63, %v5903_v52 }
 0xa9e   : > { %v5904_v2 = vpop.f32.mrb[78].mxu1  ;;  %v8394_v25 = vadd.f32 %v8022_v19, %v3631_v42 }
 0xa9f   : > { %v3634_v22 = vpop.f32.mrb[79].mxu1  ;;  %v8391_v20 = vadd.f32 %v8038_v58, %v5904_v2  ;;  %v3688_v40 = vsel %vm1111_vm0, %v8388_v39, -inf }
 0xaa0   : > { %v8399_v23 = vadd.f32 %v8031_v49, %v3634_v22 }
 0xaa2   : > { %v3685_v63 = vsel %vm1111_vm0, %v8399_v23, -inf }
 0xaa7   : > { %3832 = vrot.lane.b32.xlu1 %v7290_v17, %s6795_s5  ;;  %v3691_v17 = vsel %vm1111_vm0, %v8391_v20, -inf }
 0xaaa   : > { %3830 = vrot.lane.b32.xlu0 %v7292_v18, %s6795_s5  ;;  %v3682_v18 = vsel %vm1111_vm0, %v8394_v25, -inf }
 0xac9   : > { %3689 = vmax.xlane.f32.xlu0 %v3688_v40 }
 0xacb   : > { %3692 = vmax.xlane.f32.xlu1 %v3691_v17 }
 0xacd   : > { %3683 = vmax.xlane.f32.xlu0 %v3682_v18 }
 0xacf   : > { %3686 = vmax.xlane.f32.xlu1 %v3685_v63 }
 0xad7   : > { %v3654_v19 = vpop.xlane.xlu0 %3653 }
 0xad8   : > { %v3696_v3 = vsub.f32 %v8316_v34, %v3654_v19 }
 0xada   : > { %v3651_v15 = vpop.xlane.xlu1 %3650  ;;  %v3714_v56 = vmul.f32 1.442695, %v3696_v3 }
 0xadb   : > { %v3648_v49 = vpop.xlane.xlu0 %3647  ;;  %v3695_v60 = vsub.f32 %v8324_v11, %v3651_v15 }
 0xadc   : > { %v3694_v51 = vsub.f32 %v8319_v54, %v3648_v49  ;;  %6414 = vpow2.f32 %v3714_v56 }
 0xadd   : > { %v3712_v57 = vmul.f32 1.442695, %v3695_v60 }
 0xade   : > { %v3710_v1 = vmul.f32 1.442695, %v3694_v51 }
 0xadf   : > { %v3657_v58 = vpop.xlane.xlu0 %3656 }
 0xae0   : > { %3893 = vrot.lane.b32.xlu1 %v7312_v43, %s6795_s5  ;;  %v3697_v9 = vsub.f32 %v8329_v6, %v3657_v58 }
 0xae2   : > { %v3716_v10 = vmul.f32 1.442695, %v3697_v9 }
 0xae3   : > { %3891 = vrot.lane.b32.xlu0 %v7314_v44, %s6795_s5 }
 0xae4   : > { %6416 = vpow2.f32 %v3716_v10 }
 0xae5   : > { %6418 = vpow2.f32 %v3710_v1 }
 0xae6   : > { %6420 = vpow2.f32 %v3712_v57  ;;  %v8415_v43 = vpop.eup %6414 }
 0xae7   : > { %v3748_v34 = vsel %vm1111_vm0, %v8415_v43, 0.0 }
 0xaee   : > { %v8417_v44 = vpop.eup %6416 }
 0xaef   : > { %v8421_v6 = vpop.eup %6418  ;;  %v3751_v54 = vsel %vm1111_vm0, %v8417_v44, 0.0 }
 0xaf0   : > { %v8425_v11 = vpop.eup %6420  ;;  %v3742_v28 = vsel %vm1111_vm0, %v8421_v6, 0.0 }
 0xaf1   : > { %v3745_v52 = vsel %vm1111_vm0, %v8425_v11, 0.0 }
 0xb02   : > { %3749 = vadd.xlane.f32.xlu0 %v3748_v34 }
 0xb04   : > { %3752 = vadd.xlane.f32.xlu1 %v3751_v54 }
 0xb06   : > { %3743 = vadd.xlane.f32.xlu0 %v3742_v28 }
 0xb08   : > { %3746 = vadd.xlane.f32.xlu1 %v3745_v52 }
 0xb12   : > { %v3678_v42 = vpop.xlane.xlu0 %3677 }
 0xb13   : > { %v3704_v2 = vsub.f32 %v8344_v35, %v3678_v42 }
 0xb14   : > { %v3681_v22 = vpop.xlane.xlu1 %3680 }
 0xb15   : > { %v3730_v40 = vmul.f32 1.442695, %v3704_v2  ;;  %v3705_v17 = vsub.f32 %v8350_v7, %v3681_v22 }
 0xb16   : > { %v3672_v18 = vpop.xlane.xlu0 %3671 }
 0xb17   : > { %6422 = vpow2.f32 %v3730_v40  ;;  %v3702_v63 = vsub.f32 %v8347_v37, %v3672_v18  ;;  %v3732_v49 = vmul.f32 1.442695, %v3705_v17 }
 0xb18   : > { %v3675_v19 = vpop.xlane.xlu1 %3674 }
 0xb19   : > { %v3726_v58 = vmul.f32 1.442695, %v3702_v63  ;;  %v3703_v3 = vsub.f32 %v8355_v50, %v3675_v19 }
 0xb1b   : > { %6424 = vpow2.f32 %v3726_v58  ;;  %v3728_v56 = vmul.f32 1.442695, %v3703_v3 }
 0xb1c   : > { %6426 = vpow2.f32 %v3732_v49 }
 0xb1d   : > { %v3666_v9 = vpop.xlane.xlu0 %3665 }
 0xb1e   : > { %v3700_v15 = vsub.f32 %v8364_v24, %v3666_v9 }
 0xb1f   : > { %v3669_v35 = vpop.xlane.xlu1 %3668 }
 0xb20   : > { %v3722_v51 = vmul.f32 1.442695, %v3700_v15  ;;  %v3701_v60 = vsub.f32 %v8370_v16, %v3669_v35 }
 0xb21   : > { %v8437_v7 = vpop.eup %6422  ;;  %v3660_v10 = vpop.xlane.xlu0 %3659 }
 0xb22   : > { %6428 = vpow2.f32 %v3722_v51  ;;  %v3724_v37 = vmul.f32 1.442695, %v3701_v60  ;;  %v3698_v1 = vsub.f32 %v8367_v45, %v3660_v10  ;;  %v3772_v57 = vsel %vm1111_vm0, %v8437_v7, 0.0 }
 0xb23   : > { %6430 = vpow2.f32 %v3728_v56  ;;  %v3663_v50 = vpop.xlane.xlu1 %3662  ;;  %3773 = vadd.xlane.f32.xlu0 %v3772_v57 }
 0xb24   : > { %6432 = vpow2.f32 %v3724_v37  ;;  %v3718_v24 = vmul.f32 1.442695, %v3698_v1  ;;  %v3699_v34 = vsub.f32 %v8375_v27, %v3663_v50 }
 0xb25   : > { %v8443_v54 = vpop.eup %6424  ;;  %v3831_v16 = vpop.permute.xlu0 %3830 }
 0xb26   : > { %v3720_v28 = vmul.f32 1.442695, %v3699_v34  ;;  %5905 = vmatprep.subr.bf16.mxu0 %v3831_v16  ;;  %v3766_v52 = vsel %vm1111_vm0, %v8443_v54, 0.0  ;;  %v8447_v42 = vpop.eup %6426  ;;  %6434 = vpow2.f32 %v3718_v24 }
 0xb27   : > { %v3833_v45 = vpop.permute.xlu1 %3832  ;;  %5906 = vmatpush3.bf16.msra.mxu0 %v3831_v16  ;;  %3767 = vadd.xlane.f32.xlu1 %v3766_v52  ;;  %v3775_v2 = vsel %vm1111_vm0, %v8447_v42, 0.0 }
 0xb28   : > { %6436 = vpow2.f32 %v3720_v28  ;;  %5907 = vmatprep.subr.bf16.mxu0 %v3833_v45 }
 0xb2b   : > { %5908 = vmatpush3.bf16.msra.mxu0 %v3833_v45  ;;  %3776 = vadd.xlane.f32.xlu1 %v3775_v2 }
 0xb2c   : > { %v8451_v27 = vpop.eup %6428 }
 0xb2d   : > { %v8453_v22 = vpop.eup %6430  ;;  %v3760_v40 = vsel %vm1111_vm0, %v8451_v27, 0.0 }
 0xb2e   : > { %v8457_v17 = vpop.eup %6432  ;;  %3761 = vadd.xlane.f32.xlu0 %v3760_v40  ;;  %v3769_v19 = vsel %vm1111_vm0, %v8453_v22, 0.0 }
 0xb2f   : > { %v3763_v18 = vsel %vm1111_vm0, %v8457_v17, 0.0 }
 0xb30   : > { %3764 = vadd.xlane.f32.xlu1 %v3763_v18  ;;  %v8461_v63 = vpop.eup %6434 }
 0xb31   : > { %v3754_v3 = vsel %vm1111_vm0, %v8461_v63, 0.0 }
 0xb32   : > { %v8465_v49 = vpop.eup %6436  ;;  %3770 = vadd.xlane.f32.xlu0 %v3769_v19 }
 0xb33   : > { %v3757_v58 = vsel %vm1111_vm0, %v8465_v49, 0.0 }
 0xb34   : > { %3758 = vadd.xlane.f32.xlu1 %v3757_v58 }
 0xb36   : > { %3755 = vadd.xlane.f32.xlu0 %v3754_v3 }
 0xb56   : > { %v3690_v9 = vpop.xlane.xlu0 %3689 }
 0xb57   : > { %v3708_v15 = vsub.f32 %v8388_v39, %v3690_v9 }
 0xb58   : > { %v3693_v56 = vpop.xlane.xlu1 %3692 }
 0xb59   : > { %v3738_v35 = vmul.f32 1.442695, %v3708_v15  ;;  %v3709_v51 = vsub.f32 %v8391_v20, %v3693_v56 }
 0xb5a   : > { %v3684_v60 = vpop.xlane.xlu0 %3683 }
 0xb5b   : > { %6438 = vpow2.f32 %v3738_v35  ;;  %v3706_v10 = vsub.f32 %v8394_v25, %v3684_v60  ;;  %v3740_v37 = vmul.f32 1.442695, %v3709_v51 }
 0xb5c   : > { %v3687_v1 = vpop.xlane.xlu1 %3686 }
 0xb5d   : > { %v3734_v57 = vmul.f32 1.442695, %v3706_v10  ;;  %v3707_v50 = vsub.f32 %v8399_v23, %v3687_v1 }
 0xb5e   : > { %v3892_v24 = vpop.permute.xlu0 %3891 }
 0xb5f   : > { %6440 = vpow2.f32 %v3734_v57  ;;  %v3736_v34 = vmul.f32 1.442695, %v3707_v50  ;;  %5913 = vmatprep.subr.bf16.mxu1 %v3892_v24 }
 0xb60   : > { %6442 = vpow2.f32 %v3740_v37  ;;  %v3894_v16 = vpop.permute.xlu1 %3893  ;;  %5914 = vmatpush3.bf16.msra.mxu1 %v3892_v24 }
 0xb61   : > { %6444 = vpow2.f32 %v3736_v34  ;;  %5915 = vmatprep.subr.bf16.mxu1 %v3894_v16 }
 0xb64   : > { %5916 = vmatpush3.bf16.msra.mxu1 %v3894_v16 }
 0xb65   : > { %v8475_v39 = vpop.eup %6438 }
 0xb66   : > { %v3784_v20 = vsel %vm1111_vm0, %v8475_v39, 0.0 }
 0xb67   : > { %3785 = vadd.xlane.f32.xlu0 %v3784_v20 }
 0xb69   : > { %v8479_v25 = vpop.eup %6440 }
 0xb6a   : > { %v8481_v28 = vpop.eup %6442  ;;  %v3778_v23 = vsel %vm1111_vm0, %v8479_v25, 0.0 }
 0xb6b   : > { %v8485_v52 = vpop.eup %6444  ;;  %3779 = vadd.xlane.f32.xlu1 %v3778_v23  ;;  %v3787_v2 = vsel %vm1111_vm0, %v8481_v28, 0.0 }
 0xb6c   : > { %v3781_v45 = vsel %vm1111_vm0, %v8485_v52, 0.0 }
 0xb6d   : > { %3782 = vadd.xlane.f32.xlu0 %v3781_v45 }
 0xb6f   : > { %3788 = vadd.xlane.f32.xlu1 %v3787_v2 }
 0xb80   : > { %3954 = vrot.lane.b32.xlu1 %v7332_v61, %s6795_s5 }
 0xb83   : > { %3952 = vrot.lane.b32.xlu0 %v7334_v5, %s6795_s5 }
 0xb84   : > { %4013 = vrot.lane.b32.xlu1 %v7358_v33, %s6795_s5 }
 0xb87   : > { %2520 = vrot.lane.b32.xlu0 %v7997_v59, %s6795_s5  ;;  %v9120_v59 = vld [vmem:[#allocation27_spill] sm:$0xff] }
 0xb88   : > { %4015 = vrot.lane.b32.xlu1 %v7356_v30, %s6795_s5 }
 0xb8b   : > { %2524 = vrot.lane.b32.xlu0 %v7995_v13, %s6795_s5  ;;  %v9119_v13 = vld [vmem:[#allocation25_spill] sm:$0xff] }
 0xb8c   : > { %2522 = vrot.lane.b32.xlu1 %v8001_v36, %s6795_s5 }
 0xb8f   : > { %3305 = vrot.lane.b32.xlu0 %v8293_v62, %s6794_s1  ;;  %v3750_v61 = vpop.xlane.xlu0 %3749 }
 0xb90   : > { %2526 = vrot.lane.b32.xlu1 %v7999_v48, %s6795_s5 }
 0xb91   : > { %v3753_v5 = vpop.xlane.xlu1 %3752 }
 0xb92   : > { %6446 = vrcp.f32 %v3753_v5 }
 0xb93   : > { %3309 = vrot.lane.b32.xlu0 %v8291_v29, %s6794_s1  ;;  %v3744_v33 = vpop.xlane.xlu0 %3743 }
 0xb94   : > { %6448 = vrcp.f32 %v3744_v33  ;;  %3307 = vrot.lane.b32.xlu1 %v8297_v14, %s6794_s1 }
 0xb95   : > { %6450 = vrcp.f32 %v3750_v61  ;;  %v3747_v30 = vpop.xlane.xlu1 %3746 }
 0xb96   : > { %6452 = vrcp.f32 %v3747_v30 }
 0xb97   : > { %2528 = vrot.lane.b32.xlu0 %v8018_v4, %s6795_s5  ;;  %v9121_v4 = vld [vmem:[#allocation26_spill] sm:$0xff] }
 0xb98   : > { %3311 = vrot.lane.b32.xlu1 %v8295_v0, %s6794_s1 }
 0xb9b   : > { %2532 = vrot.lane.b32.xlu0 %v9119_v13, %s6795_s5 }
 0xb9c   : > { %2530 = vrot.lane.b32.xlu1 %v9120_v59, %s6795_s5  ;;  %v6447_v48 = vpop.eup %6446 }
 0xb9d   : > { %v3809_v14 = vmul.f32 %v6447_v48, %v8417_v44  ;;  %v9122_v44 = vld [vmem:[#allocation21_spill] sm:$0xff] }
 0xb9e   : > { %v6449_v36 = vpop.eup %6448 }
 0xb9f   : > { %v6451_v29 = vpop.eup %6450  ;;  %3313 = vrot.lane.b32.xlu0 %v8309_v38, %s6794_s1  ;;  %v3806_v0 = vmul.f32 %v6449_v36, %v8421_v6 }
 0xba0   : > { %v6453_v62 = vpop.eup %6452  ;;  %2534 = vrot.lane.b32.xlu1 %v9121_v4, %s6795_s5  ;;  %v3808_v18 = vmul.f32 %v6451_v29, %v8415_v43  ;;  %v9123_v43 = vld [vmem:[#allocation23_spill] sm:$0xff] }
 0xba1   : > { %v3807_v40 = vmul.f32 %v6453_v62, %v8425_v11 }
 0xba2   : > { %v3823_v38 = vpack.c.bf16 %v3809_v14, %v3808_v18 }
 0xba3   : > { %3317 = vrot.lane.b32.xlu0 %v8307_v32, %s6794_s1  ;;  %v3822_v19 = vpack.c.bf16 %v3807_v40, %v3806_v0 }
 0xba4   : > { %3315 = vrot.lane.b32.xlu1 %v8313_v12, %s6794_s1 }
 0xba5   : > { %5909 = vmatprep.mubr.msk.bf16.mxu0 %vm1111_vm0, %v3822_v19 }
 0xba6   : > { %5910 = vmatmul.mubr.msk.bf16.vlgmr.msra.gmra.mrb[80].mxu0 %vm1111_vm0, %v3823_v38 }
 0xba7   : > { %2536 = vrot.lane.b32.xlu0 %v9122_v44, %s6795_s5 }
 0xba8   : > { %3319 = vrot.lane.b32.xlu1 %v8311_v8, %s6794_s1 }
 0xbac   : > { %2538 = vrot.lane.b32.xlu1 %v9123_v43, %s6795_s5 }
 0xbb0   : > { %v3774_v32 = vpop.xlane.xlu0 %3773 }
 0xbb4   : > { %v3768_v6 = vpop.xlane.xlu1 %3767 }
 0xbb5   : > { %6454 = vrcp.f32 %v3768_v6 }
 0xbb8   : > { %v3777_v11 = vpop.xlane.xlu1 %3776 }
 0xbbb   : > { %v3762_v58 = vpop.xlane.xlu0 %3761 }
 0xbbd   : > { %v3765_v3 = vpop.xlane.xlu1 %3764 }
 0xbbf   : > { %v3771_v12 = vpop.xlane.xlu0 %3770  ;;  %v6455_v56 = vpop.eup %6454 }
 0xbc0   : > { %6456 = vrcp.f32 %v3771_v12  ;;  %v3814_v51 = vmul.f32 %v6455_v56, %v8443_v54 }
 0xbc1   : > { %6458 = vrcp.f32 %v3765_v3  ;;  %v3759_v9 = vpop.xlane.xlu1 %3758 }
 0xbc2   : > { %6460 = vrcp.f32 %v3759_v9 }
 0xbc3   : > { %6462 = vrcp.f32 %v3762_v58  ;;  %v3756_v15 = vpop.xlane.xlu0 %3755 }
 0xbc4   : > { %6464 = vrcp.f32 %v3756_v15 }
 0xbc5   : > { %6466 = vrcp.f32 %v3777_v11 }
 0xbc6   : > { %6468 = vrcp.f32 %v3774_v32 }
 0xbca   : > { %v6457_v35 = vpop.eup %6456 }
 0xbcb   : > { %v6459_v8 = vpop.eup %6458  ;;  %v3815_v60 = vmul.f32 %v6457_v35, %v8453_v22  ;;  %v6142_v35 = vld [vmem:[#allocation9] sm:$0xff]  }
 0xbcc   : > { %v6461_v10 = vpop.eup %6460  ;;  %v3813_v50 = vmul.f32 %v6459_v8, %v8457_v17  ;;  %v6143_v8 = vld [vmem:[#allocation9 + $0x8] sm:$0xff]  }
 0xbcd   : > { %v6463_v37 = vpop.eup %6462  ;;  %v3826_v1 = vpack.c.bf16 %v3815_v60, %v3814_v51  ;;  %v3811_v34 = vmul.f32 %v6461_v10, %v8465_v49  ;;  %v6144_v51 = vld [vmem:[#allocation9 + $0x10] sm:$0xff]   ;;  %v6145_v60 = vld [vmem:[#allocation9 + $0x18] sm:$0xff]   ;;  %v6146_v10 = vld [vmem:[#allocation9 + $0x20] sm:$0xff]  }
 0xbce   : > { %v6465_v57 = vpop.eup %6464  ;;  %v3812_v16 = vmul.f32 %v6463_v37, %v8451_v27  ;;  %v6147_v37 = vld [vmem:[#allocation9 + $0x28] sm:$0xff]  }
 0xbcf   : > { %5925 = vmatprep.mubr.msk.bf16.mxu0 %vm1111_vm0, %v3826_v1  ;;  %v3810_v24 = vmul.f32 %v6465_v57, %v8461_v63  ;;  %v6467_v63 = vpop.eup %6466  ;;  %v6148_v1 = vld [vmem:[#allocation9 + $0x30] sm:$0xff]   ;;  %v6149_v57 = vld [vmem:[#allocation9 + $0x38] sm:$0xff]  }
 0xbd0   : > { %v3825_v23 = vpack.c.bf16 %v3813_v50, %v3812_v16  ;;  %v6469_v27 = vpop.eup %6468  ;;  %v3817_v61 = vmul.f32 %v6467_v63, %v8447_v42 }
 0xbd1   : > { %v3824_v20 = vpack.c.bf16 %v3811_v34, %v3810_v24  ;;  %v3816_v30 = vmul.f32 %v6469_v27, %v8437_v7 }
 0xbd3   : > { %5917 = vmatprep.mubr.msk.bf16.mxu1 %vm1111_vm0, %v3824_v20  ;;  %v3827_v36 = vpack.c.bf16 %v3817_v61, %v3816_v30  ;;  %v9125_v20 = vld [vmem:[#allocation22_spill] sm:$0xff] }
 0xbd4   : > { %5918 = vmatmul.mubr.msk.bf16.vlgmr.msra.gmra.mrb[80].mxu1 %vm1111_vm0, %v3825_v23  ;;  %v9126_v23 = vld [vmem:[#allocation24_spill] sm:$0xff]  ;;  %v9130_v30 = vld [vmem:[#allocation30_spill] sm:$0xff] }
 0xbf4   : > { %v3786_v54 = vpop.xlane.xlu0 %3785 }
 0xbf8   : > { %v3780_v22 = vpop.xlane.xlu1 %3779 }
 0xbf9   : > { %6470 = vrcp.f32 %v3780_v22 }
 0xbfa   : > { %6472 = vrcp.f32 %v3786_v54  ;;  %v3783_v17 = vpop.xlane.xlu0 %3782 }
 0xbfb   : > { %6474 = vrcp.f32 %v3783_v17 }
 0xbfc   : > { %v3789_v45 = vpop.xlane.xlu1 %3788 }
 0xbfd   : > { %6476 = vrcp.f32 %v3789_v45 }
 0xbfe   : > { %v3953_v49 = vpop.permute.xlu0 %3952 }
 0xbff   : > { %5921 = vmatprep.subr.bf16.mxu0 %v3953_v49 }
 0xc00   : > { %v3955_v2 = vpop.permute.xlu1 %3954  ;;  %5922 = vmatpush3.bf16.msra.mxu0 %v3953_v49 }
 0xc01   : > { %5923 = vmatprep.subr.bf16.mxu0 %v3955_v2 }
 0xc02   : > { %v2521_v5 = vpop.permute.xlu0 %2520 }
 0xc03   : > { %v6471_v33 = vpop.eup %6470  ;;  %2569 = vst.msk [vmem:[#allocation2] sm:$0xff] %vm2568_vm1, %v2521_v5 }
 0xc04   : > { %v6473_v13 = vpop.eup %6472  ;;  %v4014_v59 = vpop.permute.xlu1 %4013  ;;  %5924 = vmatpush3.bf16.msra.mxu0 %v3955_v2  ;;  %v3818_v62 = vmul.f32 %v6471_v33, %v8479_v25  ;;  %v9129_v33 = vld [vmem:[#allocation28_spill] sm:$0xff] }
 0xc05   : > { %v6475_v48 = vpop.eup %6474  ;;  %5929 = vmatprep.subr.bf16.mxu1 %v4014_v59  ;;  %v3820_v7 = vmul.f32 %v6473_v13, %v8475_v39  ;;  %v9124_v39 = vmov 0   ;;  %5937 = vmatprep.subr.bf16.mxu0 %v6142_v35 }
 0xc06   : > { %5930 = vmatpush3.bf16.msra.mxu1 %v4014_v59  ;;  %v2525_v29 = vpop.permute.xlu0 %2524  ;;  %v3819_v14 = vmul.f32 %v6475_v48, %v8485_v52 }
 0xc07   : > { %v6477_v42 = vpop.eup %6476  ;;  %2571 = vst.msk [vmem:[#allocation2 + $0x10] sm:$0xff] %vm2568_vm1, %v2525_v29  ;;  %5926 = vmatmul.mubr.msk.bf16.vlgmr.msra.gmra.mrb[84].mxu0 %vm1111_vm0, %v3827_v36 }
 0xc08   : > { %v3821_v4 = vmul.f32 %v6477_v42, %v8481_v28  ;;  %v4016_v0 = vpop.permute.xlu1 %4015  ;;  %v3828_v40 = vpack.c.bf16 %v3819_v14, %v3818_v62  ;;  %5938 = vmatpush3.bf16.msra.mxu0 %v6142_v35 }
 0xc09   : > { %5931 = vmatprep.subr.bf16.mxu1 %v4016_v0  ;;  %5939 = vmatprep.subr.bf16.mxu0 %v6143_v8 }
 0xc0a   : > { %5932 = vmatpush3.bf16.msra.mxu1 %v4016_v0  ;;  %5933 = vmatprep.mubr.msk.bf16.mxu1 %vm1111_vm0, %v3828_v40  ;;  %v3306_v18 = vpop.permute.xlu0 %3305  ;;  %v3829_v25 = vpack.c.bf16 %v3821_v4, %v3820_v7 }
 0xc0b   : > { %3354 = vst.msk [vmem:[#allocation2] sm:$0xff] %vm3353_vm2, %v3306_v18 }
 0xc0c   : > { %v2523_v52 = vpop.permute.xlu1 %2522  ;;  %5940 = vmatpush3.bf16.msra.mxu0 %v6143_v8 }
 0xc0d   : > { %2570 = vst.msk [vmem:[#allocation2 + $0x8] sm:$0xff] %vm2568_vm1, %v2523_v52  ;;  %5934 = vmatmul.mubr.msk.bf16.vlgmr.msra.gmra.mrb[84].mxu1 %vm1111_vm0, %v3829_v25  ;;  %5941 = vmatprep.subr.bf16.mxu0 %v6144_v51 }
 0xc0e   : > { %v3310_v19 = vpop.permute.xlu0 %3309  ;;  %4733 = vmatprep.mubr.bf16.mxu1 %v9124_v39 }
 0xc0f   : > { %3356 = vst.msk [vmem:[#allocation2 + $0x10] sm:$0xff] %vm3353_vm2, %v3310_v19 }
 0xc10   : > { %v2527_v28 = vpop.permute.xlu1 %2526  ;;  %5942 = vmatpush3.bf16.msra.mxu0 %v6144_v51 }
 0xc11   : > { %2572 = vst.msk [vmem:[#allocation2 + $0x18] sm:$0xff] %vm2568_vm1, %v2527_v28  ;;  %5943 = vmatprep.subr.bf16.mxu0 %v6145_v60 }
 0xc12   : > { %v2529_v38 = vpop.permute.xlu0 %2528 }
 0xc13   : > { %2573 = vst.msk [vmem:[#allocation2 + $0x20] sm:$0xff] %vm2568_vm1, %v2529_v38 }
 0xc14   : > { %v3308_v44 = vpop.permute.xlu1 %3307  ;;  %5944 = vmatpush3.bf16.msra.mxu0 %v6145_v60 }
 0xc15   : > { %3355 = vst.msk [vmem:[#allocation2 + $0x8] sm:$0xff] %vm3353_vm2, %v3308_v44  ;;  %5945 = vmatprep.subr.bf16.mxu0 %v6146_v10 }
 0xc16   : > { %v2533_v43 = vpop.permute.xlu0 %2532 }
 0xc17   : > { %2575 = vst.msk [vmem:[#allocation2 + $0x30] sm:$0xff] %vm2568_vm1, %v2533_v43 }
 0xc18   : > { %v3312_v6 = vpop.permute.xlu1 %3311  ;;  %5946 = vmatpush3.bf16.msra.mxu0 %v6146_v10 }
 0xc19   : > { %3357 = vst.msk [vmem:[#allocation2 + $0x18] sm:$0xff] %vm3353_vm2, %v3312_v6  ;;  %5947 = vmatprep.subr.bf16.mxu0 %v6147_v37 }
 0xc1a   : > { %v3314_v32 = vpop.permute.xlu0 %3313 }
 0xc1b   : > { %3358 = vst.msk [vmem:[#allocation2 + $0x20] sm:$0xff] %vm3353_vm2, %v3314_v32 }
 0xc1c   : > { %v2531_v11 = vpop.permute.xlu1 %2530  ;;  %5948 = vmatpush3.bf16.msra.mxu0 %v6147_v37 }
 0xc1d   : > { %2574 = vst.msk [vmem:[#allocation2 + $0x28] sm:$0xff] %vm2568_vm1, %v2531_v11  ;;  %5949 = vmatprep.subr.bf16.mxu0 %v6148_v1 }
 0xc1e   : > { %v3318_v58 = vpop.permute.xlu0 %3317 }
 0xc1f   : > { %3360 = vst.msk [vmem:[#allocation2 + $0x30] sm:$0xff] %vm3353_vm2, %v3318_v58 }
 0xc20   : > { %v2535_v3 = vpop.permute.xlu1 %2534  ;;  %5950 = vmatpush3.bf16.msra.mxu0 %v6148_v1 }
 0xc21   : > { %2576 = vst.msk [vmem:[#allocation2 + $0x38] sm:$0xff] %vm2568_vm1, %v2535_v3  ;;  %5951 = vmatprep.subr.bf16.mxu0 %v6149_v57 }
 0xc22   : > { %v2537_v12 = vpop.permute.xlu0 %2536 }
 0xc23   : > { %2577 = vst.msk [vmem:[#allocation2 + $0x40] sm:$0xff] %vm2568_vm1, %v2537_v12 }
 0xc24   : > { %v3316_v9 = vpop.permute.xlu1 %3315  ;;  %5952 = vmatpush3.bf16.msra.mxu0 %v6149_v57 }
 0xc25   : > { %3359 = vst.msk [vmem:[#allocation2 + $0x28] sm:$0xff] %vm3353_vm2, %v3316_v9 }
 0xc28   : > { %v3320_v15 = vpop.permute.xlu1 %3319 }
 0xc29   : > { %3361 = vst.msk [vmem:[#allocation2 + $0x38] sm:$0xff] %vm3353_vm2, %v3320_v15 }
 0xc2c   : > { %v2539_v56 = vpop.permute.xlu1 %2538 }
 0xc2d   : > { %2578 = vst.msk [vmem:[#allocation2 + $0x48] sm:$0xff] %vm2568_vm1, %v2539_v56 }
 0xc79   : > { %v5911_v50 = vpop.f32.mrb[80].mxu0 }
 0xc7a   : > { %4094 = vrot.lane.b32.xlu0 %v5911_v50, %s6793_s8  ;;  %v3876_v24 = vpop.f32.mrb[81].mxu0 }
 0xc7b   : > { %v5912_v34 = vpop.f32.mrb[82].mxu0 }
 0xc7c   : > { %4096 = vrot.lane.b32.xlu1 %v5912_v34, %s6793_s8  ;;  %v3879_v16 = vpop.f32.mrb[83].mxu0 }
 0xc7e   : > { %4090 = vrot.lane.b32.xlu0 %v3876_v24, %s6793_s8 }
 0xc80   : > { %4092 = vrot.lane.b32.xlu1 %v3879_v16, %s6793_s8 }
 0xc82   : > { %2540 = vrot.lane.b32.xlu0 %v9125_v20, %s6795_s5 }
 0xc84   : > { %2542 = vrot.lane.b32.xlu1 %v9126_v23, %s6795_s5 }
 0xc86   : > { %3321 = vrot.lane.b32.xlu0 %v8301_v21, %s6794_s1 }
 0xc88   : > { %3323 = vrot.lane.b32.xlu1 %v8305_v47, %s6794_s1 }
 0xca7   : > { %v5919_v54 = vpop.f32.mrb[80].mxu1 }
 0xca8   : > { %4102 = vrot.lane.b32.xlu0 %v5919_v54, %s6793_s8  ;;  %v3937_v22 = vpop.f32.mrb[81].mxu1 }
 0xca9   : > { %v5920_v17 = vpop.f32.mrb[82].mxu1 }
 0xcaa   : > { %4104 = vrot.lane.b32.xlu1 %v5920_v17, %s6793_s8  ;;  %v3940_v45 = vpop.f32.mrb[83].mxu1 }
 0xcac   : > { %4098 = vrot.lane.b32.xlu0 %v3937_v22, %s6793_s8 }
 0xcae   : > { %4100 = vrot.lane.b32.xlu1 %v3940_v45, %s6793_s8 }
 0xcb0   : > { %3325 = vrot.lane.b32.xlu0 %v8299_v41, %s6794_s1  ;;  %v9127_v41 = vld [vmem:[#allocation29_spill] sm:$0xff] }
 0xcb2   : > { %3327 = vrot.lane.b32.xlu1 %v8303_v46, %s6794_s1  ;;  %v9128_v46 = vld [vmem:[#allocation31_spill] sm:$0xff] }
 0xcda   : > { %v5927_v21 = vpop.f32.mrb[84].mxu0 }
 0xcdb   : > { %v3998_v47 = vpop.f32.mrb[85].mxu0 }
 0xcdc   : > { %4106 = vrot.lane.b32.xlu0 %v3998_v47, %s6793_s8  ;;  %v5928_v63 = vpop.f32.mrb[86].mxu0 }
 0xcdd   : > { %v4001_v49 = vpop.f32.mrb[87].mxu0 }
 0xcde   : > { %4108 = vrot.lane.b32.xlu1 %v4001_v49, %s6793_s8  ;;  %v8655_v49 = vld [vmem:[%s9039_s6] ss:$0 sm:$0xff] }
 0xce0   : > { %v5935_v27 = vpop.f32.mrb[84].mxu1  ;;  %4110 = vrot.lane.b32.xlu0 %v5927_v21, %s6793_s8 }
 0xce1   : > { %v4059_v2 = vpop.f32.mrb[85].mxu1 }
 0xce2   : > { %v5936_v61 = vpop.f32.mrb[86].mxu1  ;;  %4112 = vrot.lane.b32.xlu1 %v5928_v63, %s6793_s8 }
 0xce3   : > { %v4062_v5 = vpop.f32.mrb[87].mxu1 }
 0xce4   : > { %2544 = vrot.lane.b32.xlu0 %v9127_v41, %s6795_s5 }
 0xce6   : > { %2546 = vrot.lane.b32.xlu1 %v9128_v46, %s6795_s5 }
 0xce8   : > { %2548 = vrot.lane.b32.xlu0 %v9129_v33, %s6795_s5  ;;  %v6514_v33 = vld [vmem:[%s7117_s18] sm:$0xff] }
 0xcea   : > { %2550 = vrot.lane.b32.xlu1 %v9130_v30, %s6795_s5 }
 0xcec   : > { %3329 = vrot.lane.b32.xlu0 %v8337_v55, %s6794_s1  ;;  %v4095_v13 = vpop.permute.xlu0 %4094 }
 0xced   : > { %4141 = vst.msk [vmem:[#allocation2 + $0x10] sm:$0xff] %vm4138_vm3, %v4095_v13 }
 0xcee   : > { %v4097_v59 = vpop.permute.xlu1 %4096  ;;  %3331 = vrot.lane.b32.xlu1 %v8341_v53, %s6794_s1 }
 0xcef   : > { %4142 = vst.msk [vmem:[#allocation2 + $0x18] sm:$0xff] %vm4138_vm3, %v4097_v59  ;;  %v6515_v59 = vld [vmem:[%s7117_s18 + $0x8] sm:$0xff] }
 0xcf0   : > { %3333 = vrot.lane.b32.xlu0 %v8335_v31, %s6794_s1  ;;  %v4091_v48 = vpop.permute.xlu0 %4090 }
 0xcf1   : > { %4139 = vst.msk [vmem:[#allocation2] sm:$0xff] %vm4138_vm3, %v4091_v48 }
 0xcf2   : > { %v4093_v36 = vpop.permute.xlu1 %4092  ;;  %3335 = vrot.lane.b32.xlu1 %v8339_v26, %s6794_s1 }
 0xcf3   : > { %4140 = vst.msk [vmem:[#allocation2 + $0x8] sm:$0xff] %vm4138_vm3, %v4093_v36  ;;  %v6516_v36 = vld [vmem:[%s7117_s18 + $0x10] sm:$0xff] }
 0xcf4   : > { %4114 = vrot.lane.b32.xlu0 %v4059_v2, %s6793_s8  ;;  %v2541_v55 = vpop.permute.xlu0 %2540  ;;  %v4157_v7 = vld [vmem:[#allocation2 + $0x10] sm:$0xff] }
 0xcf5   : > { %2579 = vst.msk [vmem:[#allocation2 + $0x50] sm:$0xff] %vm2568_vm1, %v2541_v55 }
 0xcf6   : > { %v2543_v53 = vpop.permute.xlu1 %2542  ;;  %4116 = vrot.lane.b32.xlu1 %v4062_v5, %s6793_s8  ;;  %v4158_v29 = vld [vmem:[#allocation2 + $0x18] sm:$0xff] }
 0xcf7   : > { %2580 = vst.msk [vmem:[#allocation2 + $0x58] sm:$0xff] %vm2568_vm1, %v2543_v53  ;;  %v4172_v4 = vpack.c.bf16 %v4158_v29, %v4157_v7 }
 0xcf8   : > { %4118 = vrot.lane.b32.xlu0 %v5935_v27, %s6793_s8  ;;  %v3322_v31 = vpop.permute.xlu0 %3321  ;;  %v4155_v26 = vld [vmem:[#allocation2] sm:$0xff] }
 0xcf9   : > { %3362 = vst.msk [vmem:[#allocation2 + $0x40] sm:$0xff] %vm3353_vm2, %v3322_v31  ;;  %v6517_v31 = vld [vmem:[%s7117_s18 + $0x18] sm:$0xff] }
 0xcfa   : > { %v3324_v62 = vpop.permute.xlu1 %3323  ;;  %4120 = vrot.lane.b32.xlu1 %v5936_v61, %s6793_s8  ;;  %v4156_v14 = vld [vmem:[#allocation2 + $0x8] sm:$0xff]  ;;  %s9133_s8 = sld [smem:[#allocation36_spill]] }
 0xcfb   : > { %3363 = vst.msk [vmem:[#allocation2 + $0x48] sm:$0xff] %vm3353_vm2, %v3324_v62  ;;  %v4171_v42 = vpack.c.bf16 %v4156_v14, %v4155_v26 }
 0xcfd   : > { %5953 = vmatprep.mubr.bf16.mxu0 %v4171_v42 }
 0xcfe   : > { %5954 = vmatmul.mubr.bf16.vlgmr.msra.gmra.mrb[88].mxu0 %v4172_v4 }
 0xd1a   : > { %v4103_v0 = vpop.permute.xlu0 %4102 }
 0xd1b   : > { %4145 = vst.msk [vmem:[#allocation2 + $0x30] sm:$0xff] %vm4138_vm3, %v4103_v0  ;;  %v6518_v0 = vld [vmem:[%s7117_s18 + $0x20] sm:$0xff] }
 0xd1c   : > { %v4105_v40 = vpop.permute.xlu1 %4104 }
 0xd1d   : > { %4146 = vst.msk [vmem:[#allocation2 + $0x38] sm:$0xff] %vm4138_vm3, %v4105_v40 }
 0xd1e   : > { %v4099_v18 = vpop.permute.xlu0 %4098 }
 0xd1f   : > { %4143 = vst.msk [vmem:[#allocation2 + $0x20] sm:$0xff] %vm4138_vm3, %v4099_v18 }
 0xd20   : > { %v4101_v25 = vpop.permute.xlu1 %4100 }
 0xd21   : > { %4144 = vst.msk [vmem:[#allocation2 + $0x28] sm:$0xff] %vm4138_vm3, %v4101_v25 }
 0xd22   : > { %v3326_v52 = vpop.permute.xlu0 %3325  ;;  %v4161_v6 = vld [vmem:[#allocation2 + $0x30] sm:$0xff] }
 0xd23   : > { %3364 = vst.msk [vmem:[#allocation2 + $0x50] sm:$0xff] %vm3353_vm2, %v3326_v52  ;;  %v6519_v52 = vld [vmem:[%s7117_s18 + $0x28] sm:$0xff] }
 0xd24   : > { %v3328_v19 = vpop.permute.xlu1 %3327  ;;  %v4162_v28 = vld [vmem:[#allocation2 + $0x38] sm:$0xff] }
 0xd25   : > { %3365 = vst.msk [vmem:[#allocation2 + $0x58] sm:$0xff] %vm3353_vm2, %v3328_v19  ;;  %v4174_v32 = vpack.c.bf16 %v4162_v28, %v4161_v6  ;;  %v6520_v28 = vld [vmem:[%s7117_s18 + $0x30] sm:$0xff] }
 0xd26   : > { %v4159_v38 = vld [vmem:[#allocation2 + $0x20] sm:$0xff] }
 0xd28   : > { %v4160_v44 = vld [vmem:[#allocation2 + $0x28] sm:$0xff] }
 0xd29   : > { %v4173_v43 = vpack.c.bf16 %v4160_v44, %v4159_v38  ;;  %v6521_v44 = vld [vmem:[%s7117_s18 + $0x38] sm:$0xff] }
 0xd2b   : > { %5957 = vmatprep.mubr.bf16.mxu0 %v4173_v43 }
 0xd2c   : > { %5958 = vmatmul.mubr.bf16.gmra.mrb[92].mxu0 %v4174_v32 }
 0xd4e   : > { %v4107_v11 = vpop.permute.xlu0 %4106 }
 0xd4f   : > { %4147 = vst.msk [vmem:[#allocation2 + $0x40] sm:$0xff] %vm4138_vm3, %v4107_v11 }
 0xd50   : > { %v4109_v58 = vpop.permute.xlu1 %4108 }
 0xd51   : > { %4148 = vst.msk [vmem:[#allocation2 + $0x48] sm:$0xff] %vm4138_vm3, %v4109_v58 }
 0xd52   : > { %v4111_v3 = vpop.permute.xlu0 %4110 }
 0xd53   : > { %4149 = vst.msk [vmem:[#allocation2 + $0x50] sm:$0xff] %vm4138_vm3, %v4111_v3 }
 0xd54   : > { %v4113_v12 = vpop.permute.xlu1 %4112 }
 0xd55   : > { %4150 = vst.msk [vmem:[#allocation2 + $0x58] sm:$0xff] %vm4138_vm3, %v4113_v12 }
 0xd56   : > { %v2545_v9 = vpop.permute.xlu0 %2544  ;;  %v4163_v56 = vld [vmem:[#allocation2 + $0x40] sm:$0xff] }
 0xd57   : > { %2581 = vst.msk [vmem:[#allocation2 + $0x60] sm:$0xff] %vm2568_vm1, %v2545_v9  ;;  %v6522_v9 = vld [vmem:[%s7117_s18 + $0x40] sm:$0xff] }
 0xd58   : > { %v2547_v15 = vpop.permute.xlu1 %2546  ;;  %v4164_v35 = vld [vmem:[#allocation2 + $0x48] sm:$0xff] }
 0xd59   : > { %2582 = vst.msk [vmem:[#allocation2 + $0x68] sm:$0xff] %vm2568_vm1, %v2547_v15  ;;  %v4175_v8 = vpack.c.bf16 %v4164_v35, %v4163_v56 }
 0xd5a   : > { %v2549_v51 = vpop.permute.xlu0 %2548  ;;  %v4165_v10 = vld [vmem:[#allocation2 + $0x50] sm:$0xff] }
 0xd5b   : > { %2583 = vst.msk [vmem:[#allocation2 + $0x70] sm:$0xff] %vm2568_vm1, %v2549_v51  ;;  %5961 = vmatprep.mubr.bf16.mxu0 %v4175_v8  ;;  %v6523_v8 = vld [vmem:[%s7117_s18 + $0x48] sm:$0xff] }
 0xd5c   : > { %v2551_v60 = vpop.permute.xlu1 %2550  ;;  %v4166_v37 = vld [vmem:[#allocation2 + $0x58] sm:$0xff] }
 0xd5d   : > { %2584 = vst.msk [vmem:[#allocation2 + $0x78] sm:$0xff] %vm2568_vm1, %v2551_v60  ;;  %v4176_v1 = vpack.c.bf16 %v4166_v37, %v4165_v10  ;;  %v6524_v60 = vld [vmem:[%s7117_s18 + $0x50] sm:$0xff]  ;;  %v6525_v37 = vld [vmem:[%s7117_s18 + $0x58] sm:$0xff] }
 0xd5e   : > { %v3330_v57 = vpop.permute.xlu0 %3329 }
 0xd5f   : > { %3366 = vst.msk [vmem:[#allocation2 + $0x60] sm:$0xff] %vm3353_vm2, %v3330_v57  ;;  %5962 = vmatmul.mubr.bf16.gmra.mrb[96].mxu0 %v4176_v1 }
 0xd60   : > { %v3332_v50 = vpop.permute.xlu1 %3331 }
 0xd61   : > { %3367 = vst.msk [vmem:[#allocation2 + $0x68] sm:$0xff] %vm3353_vm2, %v3332_v50 }
 0xd62   : > { %v3334_v24 = vpop.permute.xlu0 %3333 }
 0xd63   : > { %3368 = vst.msk [vmem:[#allocation2 + $0x70] sm:$0xff] %vm3353_vm2, %v3334_v24 }
 0xd64   : > { %v3336_v34 = vpop.permute.xlu1 %3335 }
 0xd65   : > { %3369 = vst.msk [vmem:[#allocation2 + $0x78] sm:$0xff] %vm3353_vm2, %v3336_v34 }
 0xd66   : > { %v4115_v16 = vpop.permute.xlu0 %4114 }
 0xd67   : > { %4151 = vst.msk [vmem:[#allocation2 + $0x60] sm:$0xff] %vm4138_vm3, %v4115_v16 }
 0xd68   : > { %v4117_v20 = vpop.permute.xlu1 %4116 }
 0xd69   : > { %4152 = vst.msk [vmem:[#allocation2 + $0x68] sm:$0xff] %vm4138_vm3, %v4117_v20 }
 0xd6a   : > { %v4119_v23 = vpop.permute.xlu0 %4118 }
 0xd6b   : > { %4153 = vst.msk [vmem:[#allocation2 + $0x70] sm:$0xff] %vm4138_vm3, %v4119_v23  ;;  %v6526_v23 = vld [vmem:[%s7117_s18 + $0x60] sm:$0xff] }
 0xd6c   : > { %v4121_v54 = vpop.permute.xlu1 %4120 }
 0xd6d   : > { %4154 = vst.msk [vmem:[#allocation2 + $0x78] sm:$0xff] %vm4138_vm3, %v4121_v54 }
 0xd6e   : > { %v4167_v22 = vld [vmem:[#allocation2 + $0x60] sm:$0xff] }
 0xd70   : > { %v4168_v17 = vld [vmem:[#allocation2 + $0x68] sm:$0xff] }
 0xd71   : > { %v4177_v45 = vpack.c.bf16 %v4168_v17, %v4167_v22 }
 0xd72   : > { %v4169_v21 = vld [vmem:[#allocation2 + $0x70] sm:$0xff] }
 0xd73   : > { %5965 = vmatprep.mubr.bf16.mxu0 %v4177_v45  ;;  %v6527_v45 = vld [vmem:[%s7117_s18 + $0x68] sm:$0xff] }
 0xd74   : > { %v4170_v47 = vld [vmem:[#allocation2 + $0x78] sm:$0xff] }
 0xd75   : > { %v4178_v63 = vpack.c.bf16 %v4170_v47, %v4169_v21  ;;  %v6528_v47 = vld [vmem:[%s7117_s18 + $0x70] sm:$0xff] }
 0xd77   : > { %5966 = vmatmul.mubr.bf16.gmra.mrb[100].mxu0 %v4178_v63 }
 0xdd1   : > { %v5955_v27 = vpop.f32.mrb[88].mxu0 }
 0xdd2   : > { %v4284_v2 = vpop.f32.mrb[89].mxu0  ;;  %v4293_v46 = vadd.f32 %v5955_v27, %v8655_v49  ;;  %v6529_v27 = vld [vmem:[%s7117_s18 + $0x78] sm:$0xff]  ;;  %s9138_s18 = sld [smem:[#allocation38_spill]] }
 0xdd3   : > { %v4285_v61 = vadd.f32 %v8655_v49, %v4284_v2  ;;  %v5956_v5 = vpop.f32.mrb[90].mxu0 }
 0xdd4   : > { %v4287_v41 = vpop.f32.mrb[91].mxu0  ;;  %v8668_v55 = vadd.f32 %v6516_v36, %v4293_v46  ;;  %v4296_v53 = vadd.f32 %v5956_v5, %v8655_v49 }
 0xdd5   : > { %v8660_v30 = vadd.f32 %v6514_v33, %v4285_v61  ;;  %v4288_v13 = vadd.f32 %v8655_v49, %v4287_v41 }
 0xdd6   : > { %v8674_v29 = vadd.f32 %v6517_v31, %v4296_v53  ;;  %v6150_v53 = vld [vmem:[#allocation11] ss:$8 sps:$4 sm:$0xff]   ;;  %v6152_v31 = vld [vmem:[#allocation11 + $0x4] ss:$8 sps:$4 sm:$0xff]  }
 0xdd7   : > { %v8664_v48 = vadd.f32 %v6515_v59, %v4288_v13  ;;  %4363 = vadd.xlane.f32.xlu0 %v8660_v30  ;;  %4701 = vmatprep.subr.bf16.mxu1 %v6152_v31 }
 0xdd8   : > { %4702 = vmatpush1.bf16.msra.mxu1 %v6150_v53  ;;  %s8984_s15 = scalar_lea.hbm %s9138_s18, %s5424_s30 }
 0xdd9   : > { %4365 = vadd.xlane.f32.xlu1 %v8664_v48 }
 0xddb   : > { %4367 = vadd.xlane.f32.xlu0 %v8668_v55 }
 0xddf   : > { %4369 = vadd.xlane.f32.xlu0 %v8674_v29 }
 0xdff   : > { %v5959_v62 = vpop.f32.mrb[92].mxu0 }
 0xe00   : > { %v4300_v26 = vpop.f32.mrb[93].mxu0  ;;  %v4309_v4 = vadd.f32 %v5959_v62, %v8655_v49 }
 0xe01   : > { %v4301_v14 = vadd.f32 %v8655_v49, %v4300_v26  ;;  %v5960_v42 = vpop.f32.mrb[94].mxu0 }
 0xe02   : > { %v4303_v7 = vpop.f32.mrb[95].mxu0  ;;  %v4312_v25 = vadd.f32 %v5960_v42, %v8655_v49  ;;  %v8689_v38 = vadd.f32 %v6520_v28, %v4309_v4  ;;  %v6156_v28 = vld [vmem:[#allocation11 + $0x20] ss:$8 sps:$4 sm:$0xff]  }
 0xe03   : > { %v8680_v40 = vadd.f32 %v6518_v0, %v4301_v14  ;;  %v4304_v18 = vadd.f32 %v8655_v49, %v4303_v7  ;;  %v6155_v14 = vld [vmem:[#allocation11 + $0x14] ss:$8 sps:$4 sm:$0xff]   ;;  %v6153_v0 = vld [vmem:[#allocation11 + $0x10] ss:$8 sps:$4 sm:$0xff]  }
 0xe04   : > { %v8693_v43 = vadd.f32 %v6521_v44, %v4312_v25  ;;  %4703 = vmatprep.subr.bf16.mxu1 %v6155_v14  ;;  %v6161_v44 = vld [vmem:[#allocation11 + $0x34] ss:$8 sps:$4 sm:$0xff]  }
 0xe05   : > { %v8685_v19 = vadd.f32 %v6519_v52, %v4304_v18  ;;  %4371 = vadd.xlane.f32.xlu0 %v8680_v40  ;;  %4704 = vmatpush1.bf16.msra.mxu1 %v6153_v0  ;;  %v6158_v52 = vld [vmem:[#allocation11 + $0x24] ss:$8 sps:$4 sm:$0xff]  }
 0xe06   : > { %4705 = vmatprep.subr.bf16.mxu1 %v6158_v52 }
 0xe07   : > { %4373 = vadd.xlane.f32.xlu1 %v8685_v19 }
 0xe09   : > { %4375 = vadd.xlane.f32.xlu0 %v8689_v38  ;;  %4706 = vmatpush1.bf16.msra.mxu1 %v6156_v28 }
 0xe0a   : > { %4707 = vmatprep.subr.bf16.mxu1 %v6161_v44 }
 0xe0b   : > { %4377 = vadd.xlane.f32.xlu1 %v8693_v43 }
 0xe32   : > { %v5963_v6 = vpop.f32.mrb[96].mxu0 }
 0xe33   : > { %v4316_v32 = vpop.f32.mrb[97].mxu0  ;;  %v4325_v12 = vadd.f32 %v5963_v6, %v8655_v49  ;;  %v6159_v6 = vld [vmem:[#allocation11 + $0x30] ss:$8 sps:$4 sm:$0xff]  }
 0xe34   : > { %v4317_v11 = vadd.f32 %v8655_v49, %v4316_v32  ;;  %v5964_v58 = vpop.f32.mrb[98].mxu0  ;;  %4708 = vmatpush1.bf16.msra.mxu1 %v6159_v6  ;;  %v6164_v32 = vld [vmem:[#allocation11 + $0x44] ss:$8 sps:$4 sm:$0xff]  }
 0xe35   : > { %v4319_v3 = vpop.f32.mrb[99].mxu0  ;;  %v4328_v35 = vadd.f32 %v5964_v58, %v8655_v49  ;;  %v8709_v10 = vadd.f32 %v6524_v60, %v4325_v12  ;;  %4709 = vmatprep.subr.bf16.mxu1 %v6164_v32  ;;  %v6167_v58 = vld [vmem:[#allocation11 + $0x54] ss:$8 sps:$4 sm:$0xff]   ;;  %v6170_v12 = vld [vmem:[#allocation11 + $0x64] ss:$8 sps:$4 sm:$0xff]  }
 0xe36   : > { %v8700_v15 = vadd.f32 %v6522_v9, %v4317_v11  ;;  %v4320_v56 = vadd.f32 %v8655_v49, %v4319_v3  ;;  %v6162_v11 = vld [vmem:[#allocation11 + $0x40] ss:$8 sps:$4 sm:$0xff]   ;;  %v6165_v3 = vld [vmem:[#allocation11 + $0x50] ss:$8 sps:$4 sm:$0xff]  }
 0xe37   : > { %v8713_v1 = vadd.f32 %v6525_v37, %v4328_v35  ;;  %v6168_v9 = vld [vmem:[#allocation11 + $0x60] ss:$8 sps:$4 sm:$0xff]   ;;  %v6171_v35 = vld [vmem:[#allocation11 + $0x70] ss:$8 sps:$4 sm:$0xff]  }
 0xe38   : > { %v8705_v51 = vadd.f32 %v6523_v8, %v4320_v56  ;;  %4379 = vadd.xlane.f32.xlu0 %v8700_v15  ;;  %4710 = vmatpush1.bf16.msra.mxu1 %v6162_v11  ;;  %v6173_v56 = vld [vmem:[#allocation11 + $0x74] ss:$8 sps:$4 sm:$0xff]  }
 0xe39   : > { %4711 = vmatprep.subr.bf16.mxu1 %v6167_v58 }
 0xe3a   : > { %4381 = vadd.xlane.f32.xlu1 %v8705_v51 }
 0xe3c   : > { %4383 = vadd.xlane.f32.xlu0 %v8709_v10  ;;  %4712 = vmatpush1.bf16.msra.mxu1 %v6165_v3 }
 0xe3d   : > { %4713 = vmatprep.subr.bf16.mxu1 %v6170_v12 }
 0xe3e   : > { %4385 = vadd.xlane.f32.xlu1 %v8713_v1 }
 0xe40   : > { %4714 = vmatpush1.bf16.msra.mxu1 %v6168_v9 }
 0xe41   : > { %4715 = vmatprep.subr.bf16.mxu1 %v6173_v56 }
 0xe44   : > { %4716 = vmatpush1.bf16.msra.mxu1 %v6171_v35 }
 0xe4a   : > { %v5967_v57 = vpop.f32.mrb[100].mxu0 }
 0xe4b   : > { %v4332_v50 = vpop.f32.mrb[101].mxu0  ;;  %v4341_v20 = vadd.f32 %v5967_v57, %v8655_v49 }
 0xe4c   : > { %v4333_v24 = vadd.f32 %v8655_v49, %v4332_v50  ;;  %v5968_v34 = vpop.f32.mrb[102].mxu0 }
 0xe4d   : > { %v4335_v16 = vpop.f32.mrb[103].mxu0  ;;  %v4344_v17 = vadd.f32 %v5968_v34, %v8655_v49  ;;  %v8729_v63 = vadd.f32 %v6528_v47, %v4341_v20 }
 0xe4e   : > { %v8720_v54 = vadd.f32 %v6526_v23, %v4333_v24  ;;  %v4336_v22 = vadd.f32 %v8655_v49, %v4335_v16 }
 0xe4f   : > { %v8733_v2 = vadd.f32 %v6529_v27, %v4344_v17 }
 0xe50   : > { %v8725_v21 = vadd.f32 %v6527_v45, %v4336_v22  ;;  %4387 = vadd.xlane.f32.xlu0 %v8720_v54 }
 0xe52   : > { %4389 = vadd.xlane.f32.xlu1 %v8725_v21 }
 0xe54   : > { %4391 = vadd.xlane.f32.xlu0 %v8729_v63 }
 0xe56   : > { %4393 = vadd.xlane.f32.xlu1 %v8733_v2 }
 0xe64   : > { %v4364_v61 = vpop.xlane.xlu0 %4363 }
 0xe65   : > { %v4395_v5 = vmul.f32 0.0078125, %v4364_v61 }
 0xe66   : > { %v4366_v49 = vpop.xlane.xlu1 %4365 }
 0xe67   : > { %v8738_v41 = vsub.f32 %v8660_v30, %v4395_v5  ;;  %v4396_v46 = vmul.f32 0.0078125, %v4366_v49 }
 0xe68   : > { %v4368_v33 = vpop.xlane.xlu0 %4367 }
 0xe69   : > { %v8741_v13 = vsub.f32 %v8664_v48, %v4396_v46  ;;  %v4397_v59 = vmul.f32 0.0078125, %v4368_v33  ;;  %v4427_v36 = vmul.f32 %v8738_v41, %v8738_v41 }
 0xe6b   : > { %v8746_v62 = vsub.f32 %v8668_v55, %v4397_v59  ;;  %4443 = vadd.xlane.f32.xlu0 %v4427_v36  ;;  %v4428_v26 = vmul.f32 %v8741_v13, %v8741_v13 }
 0xe6c   : > { %v4370_v42 = vpop.xlane.xlu0 %4369 }
 0xe6d   : > { %v4398_v7 = vmul.f32 0.0078125, %v4370_v42  ;;  %4445 = vadd.xlane.f32.xlu1 %v4428_v26  ;;  %v4429_v4 = vmul.f32 %v8746_v62, %v8746_v62 }
 0xe6f   : > { %v8753_v18 = vsub.f32 %v8674_v29, %v4398_v7  ;;  %4447 = vadd.xlane.f32.xlu0 %v4429_v4 }
 0xe71   : > { %v4430_v25 = vmul.f32 %v8753_v18, %v8753_v18 }
 0xe73   : > { %4449 = vadd.xlane.f32.xlu1 %v4430_v25 }
 0xe92   : > { %v4372_v8 = vpop.xlane.xlu0 %4371 }
 0xe93   : > { %v4399_v60 = vmul.f32 0.0078125, %v4372_v8 }
 0xe94   : > { %v4374_v37 = vpop.xlane.xlu1 %4373 }
 0xe95   : > { %v8758_v57 = vsub.f32 %v8680_v40, %v4399_v60  ;;  %v4400_v50 = vmul.f32 0.0078125, %v4374_v37 }
 0xe96   : > { %v4376_v24 = vpop.xlane.xlu0 %4375 }
 0xe97   : > { %v8761_v34 = vsub.f32 %v8685_v19, %v4400_v50  ;;  %v4401_v16 = vmul.f32 0.0078125, %v4376_v24  ;;  %v4431_v20 = vmul.f32 %v8758_v57, %v8758_v57 }
 0xe98   : > { %v4378_v23 = vpop.xlane.xlu1 %4377 }
 0xe99   : > { %v8766_v22 = vsub.f32 %v8689_v38, %v4401_v16  ;;  %v4402_v17 = vmul.f32 0.0078125, %v4378_v23  ;;  %4451 = vadd.xlane.f32.xlu0 %v4431_v20  ;;  %v4432_v45 = vmul.f32 %v8761_v34, %v8761_v34 }
 0xe9b   : > { %v8771_v47 = vsub.f32 %v8693_v43, %v4402_v17  ;;  %4453 = vadd.xlane.f32.xlu1 %v4432_v45  ;;  %v4433_v27 = vmul.f32 %v8766_v22, %v8766_v22 }
 0xe9d   : > { %4455 = vadd.xlane.f32.xlu0 %v4433_v27  ;;  %v4434_v61 = vmul.f32 %v8771_v47, %v8771_v47 }
 0xe9f   : > { %4457 = vadd.xlane.f32.xlu1 %v4434_v61 }
 0xec5   : > { %v4380_v5 = vpop.xlane.xlu0 %4379 }
 0xec6   : > { %v4403_v49 = vmul.f32 0.0078125, %v4380_v5 }
 0xec7   : > { %v4382_v46 = vpop.xlane.xlu1 %4381 }
 0xec8   : > { %v8778_v33 = vsub.f32 %v8700_v15, %v4403_v49  ;;  %v4404_v59 = vmul.f32 0.0078125, %v4382_v46 }
 0xec9   : > { %v4384_v36 = vpop.xlane.xlu0 %4383 }
 0xeca   : > { %v8781_v53 = vsub.f32 %v8705_v51, %v4404_v59  ;;  %v4405_v31 = vmul.f32 0.0078125, %v4384_v36  ;;  %v4435_v26 = vmul.f32 %v8778_v33, %v8778_v33 }
 0xecb   : > { %v4386_v14 = vpop.xlane.xlu1 %4385 }
 0xecc   : > { %v8786_v42 = vsub.f32 %v8709_v10, %v4405_v31  ;;  %v4406_v7 = vmul.f32 0.0078125, %v4386_v14  ;;  %4459 = vadd.xlane.f32.xlu0 %v4435_v26  ;;  %v4436_v4 = vmul.f32 %v8781_v53, %v8781_v53  ;;  %v8820_v26 = vld [vmem:[%s9131_s20] ss:$0 sm:$0xff] }
 0xece   : > { %v8791_v0 = vsub.f32 %v8713_v1, %v4406_v7  ;;  %4461 = vadd.xlane.f32.xlu1 %v4436_v4  ;;  %v4437_v25 = vmul.f32 %v8786_v42, %v8786_v42 }
 0xed0   : > { %4463 = vadd.xlane.f32.xlu0 %v4437_v25  ;;  %v4438_v52 = vmul.f32 %v8791_v0, %v8791_v0 }
 0xed2   : > { %4465 = vadd.xlane.f32.xlu1 %v4438_v52 }
 0xedd   : > { %v4388_v28 = vpop.xlane.xlu0 %4387 }
 0xede   : > { %v4407_v44 = vmul.f32 0.0078125, %v4388_v28  ;;  %v8828_v28 = vld [vmem:[%s9132_s13] ss:$0 sm:$0xff]  ;;  %s6700_s13 = scalar_lea.vmem %s8986_s19, 2048 }
 0xedf   : > { %v4390_v6 = vpop.xlane.xlu1 %4389  ;;  %p6701_p2 = scmp.ne.s32.totalorder %s8986_s19, %s6700_s13 }
 0xee0   : > { %v8798_v32 = vsub.f32 %v8720_v54, %v4407_v44  ;;  %v4408_v11 = vmul.f32 0.0078125, %v4390_v6 }
 0xee1   : > { %v4392_v58 = vpop.xlane.xlu0 %4391  ;;  %p6702_p10 = pnand %p6701_p2, %p9139_p7 }
 0xee2   : > { %v8801_v3 = vsub.f32 %v8725_v21, %v4408_v11  ;;  %v4409_v12 = vmul.f32 0.0078125, %v4392_v58  ;;  %v4439_v9 = vmul.f32 %v8798_v32, %v8798_v32 }
 0xee3   : > { %v4394_v56 = vpop.xlane.xlu1 %4393  ;;  %p6703_p1 = pneg %p6702_p10 }
 0xee4   : > { %v8806_v35 = vsub.f32 %v8729_v63, %v4409_v12  ;;  %v4410_v8 = vmul.f32 0.0078125, %v4394_v56  ;;  %4467 = vadd.xlane.f32.xlu0 %v4439_v9  ;;  %v4440_v60 = vmul.f32 %v8801_v3, %v8801_v3 }
 0xee6   : > { %v8811_v37 = vsub.f32 %v8733_v2, %v4410_v8  ;;  %4469 = vadd.xlane.f32.xlu1 %v4440_v60  ;;  %v4441_v50 = vmul.f32 %v8806_v35, %v8806_v35  ;;  %v6174_v8 = vld [vmem:[#allocation12 + $0x40] sm:$0xff]  }
 0xee7   : > { %v6175_v60 = vld [vmem:[#allocation12] sm:$0xff]   ;;  %5585 = vmatprep.subr.bf16.mxu0 %v6174_v8 }
 0xee8   : > { %4471 = vadd.xlane.f32.xlu0 %v4441_v50  ;;  %v4442_v24 = vmul.f32 %v8811_v37, %v8811_v37  ;;  %v6176_v50 = vld [vmem:[#allocation12 + $0x48] sm:$0xff]   ;;  %5586 = vmatpush3.bf16.msra.mxu0 %v6175_v60 }
 0xee9   : > { %5587 = vmatprep.subr.bf16.mxu0 %v6176_v50 }
 0xeea   : > { %4473 = vadd.xlane.f32.xlu1 %v4442_v24 }
 0xef8   : > { %v4444_v16 = vpop.xlane.xlu0 %4443 }
 0xef9   : > { %v4475_v20 = vmul.f32 0.0078125, %v4444_v16 }
 0xefa   : > { %v4446_v23 = vpop.xlane.xlu1 %4445 }
 0xefb   : > { %v4491_v17 = vadd.f32 1e-06, %v4475_v20  ;;  %v4476_v45 = vmul.f32 0.0078125, %v4446_v23  ;;  %v6178_v20 = vld [vmem:[#allocation12 + $0x50] sm:$0xff]  }
 0xefc   : > { %v4448_v27 = vpop.xlane.xlu0 %4447  ;;  %v6179_v23 = vld [vmem:[#allocation12 + $0x10] sm:$0xff]  }
 0xefd   : > { %6478 = vrsqrt.f32 %v4491_v17  ;;  %v4492_v61 = vadd.f32 1e-06, %v4476_v45  ;;  %v4477_v5 = vmul.f32 0.0078125, %v4448_v27  ;;  %v6180_v17 = vld [vmem:[#allocation12 + $0x58] sm:$0xff]   ;;  %v6182_v27 = vld [vmem:[#allocation12 + $0x60] sm:$0xff]  }
 0xefe   : > { %v6181_v45 = vld [vmem:[#allocation12 + $0x18] sm:$0xff]  }
 0xeff   : > { %6480 = vrsqrt.f32 %v4492_v61  ;;  %v4493_v49 = vadd.f32 1e-06, %v4477_v5  ;;  %v6183_v61 = vld [vmem:[#allocation12 + $0x20] sm:$0xff]   ;;  %v6184_v5 = vld [vmem:[#allocation12 + $0x68] sm:$0xff]  }
 0xf00   : > { %v4450_v46 = vpop.xlane.xlu1 %4449 }
 0xf01   : > { %6482 = vrsqrt.f32 %v4493_v49  ;;  %v4478_v59 = vmul.f32 0.0078125, %v4450_v46 }
 0xf03   : > { %v4494_v36 = vadd.f32 1e-06, %v4478_v59 }
 0xf05   : > { %6484 = vrsqrt.f32 %v4494_v36 }
 0xf07   : > { %v6479_v31 = vpop.eup %6478 }
 0xf08   : > { %v4523_v14 = vmul.f32 %v6479_v31, %v8738_v41 }
 0xf09   : > { %v6481_v7 = vpop.eup %6480 }
 0xf0a   : > { %v4524_v4 = vmul.f32 %v6481_v7, %v8741_v13  ;;  %v4546_v25 = vmul.f32 %v8820_v26, %v4523_v14 }
 0xf0b   : > { %v6483_v52 = vpop.eup %6482 }
 0xf0c   : > { %v4547_v44 = vmul.f32 %v8820_v26, %v4524_v4  ;;  %v4569_v6 = vadd.f32 %v8828_v28, %v4546_v25  ;;  %v4525_v58 = vmul.f32 %v6483_v52, %v8746_v62  ;;  %v6177_v62 = vld [vmem:[#allocation12 + $0x8] sm:$0xff]  }
 0xf0d   : > { %5588 = vmatpush3.bf16.msra.mxu0 %v6177_v62 }
 0xf0e   : > { %v4570_v11 = vadd.f32 %v8828_v28, %v4547_v44  ;;  %v4548_v9 = vmul.f32 %v8820_v26, %v4525_v58  ;;  %5589 = vmatprep.subr.bf16.mxu0 %v6178_v20 }
 0xf0f   : > { %v6485_v41 = vpop.eup %6484 }
 0xf10   : > { %v4585_v12 = vpack.c.bf16 %v4570_v11, %v4569_v6  ;;  %v4526_v13 = vmul.f32 %v6485_v41, %v8753_v18  ;;  %v4571_v16 = vadd.f32 %v8828_v28, %v4548_v9 }
 0xf11   : > { %5590 = vmatpush3.bf16.msra.mxu0 %v6179_v23 }
 0xf12   : > { %4734 = vmatmul.mubr.bf16.vlgmr.msra.gmra.mrb[88].mxu1 %v4585_v12  ;;  %v4549_v56 = vmul.f32 %v8820_v26, %v4526_v13  ;;  %5591 = vmatprep.subr.bf16.mxu0 %v6180_v17 }
 0xf13   : > { %4743 = vmatprep.mubr.bf16.mxu1 %v9124_v39 }
 0xf14   : > { %v4572_v24 = vadd.f32 %v8828_v28, %v4549_v56 }
 0xf15   : > { %5592 = vmatpush3.bf16.msra.mxu0 %v6181_v45 }
 0xf16   : > { %v4586_v18 = vpack.c.bf16 %v4572_v24, %v4571_v16  ;;  %5593 = vmatprep.subr.bf16.mxu0 %v6182_v27 }
 0xf19   : > { %5594 = vmatpush3.bf16.msra.mxu0 %v6183_v61 }
 0xf1a   : > { %4744 = vmatmul.mubr.bf16.gmra.mrb[92].mxu1 %v4586_v18  ;;  %5595 = vmatprep.subr.bf16.mxu0 %v6184_v5 }
 0xf1b   : > { %4753 = vmatprep.mubr.bf16.mxu1 %v9124_v39 }
 0xf26   : > { %v4452_v49 = vpop.xlane.xlu0 %4451 }
 0xf27   : > { %v4479_v46 = vmul.f32 0.0078125, %v4452_v49 }
 0xf28   : > { %v4454_v59 = vpop.xlane.xlu1 %4453 }
 0xf29   : > { %v4495_v36 = vadd.f32 1e-06, %v4479_v46  ;;  %v4480_v31 = vmul.f32 0.0078125, %v4454_v59 }
 0xf2a   : > { %v4456_v14 = vpop.xlane.xlu0 %4455 }
 0xf2b   : > { %6486 = vrsqrt.f32 %v4495_v36  ;;  %v4496_v7 = vadd.f32 1e-06, %v4480_v31  ;;  %v4481_v4 = vmul.f32 0.0078125, %v4456_v14  ;;  %v6185_v14 = vld [vmem:[#allocation12 + $0x28] sm:$0xff]  }
 0xf2c   : > { %v4458_v25 = vpop.xlane.xlu1 %4457  ;;  %5596 = vmatpush3.bf16.msra.mxu0 %v6185_v14 }
 0xf2d   : > { %6488 = vrsqrt.f32 %v4496_v7  ;;  %v4497_v52 = vadd.f32 1e-06, %v4481_v4  ;;  %v4482_v44 = vmul.f32 0.0078125, %v4458_v25  ;;  %v6186_v7 = vld [vmem:[#allocation12 + $0x70] sm:$0xff]  }
 0xf2e   : > { %v6187_v4 = vld [vmem:[#allocation12 + $0x30] sm:$0xff]   ;;  %5597 = vmatprep.subr.bf16.mxu0 %v6186_v7 }
 0xf2f   : > { %6490 = vrsqrt.f32 %v4497_v52  ;;  %v4498_v6 = vadd.f32 1e-06, %v4482_v44 }
 0xf30   : > { %5598 = vmatpush3.bf16.msra.mxu0 %v6187_v4 }
 0xf31   : > { %6492 = vrsqrt.f32 %v4498_v6  ;;  %v6188_v6 = vld [vmem:[#allocation12 + $0x78] sm:$0xff]  }
 0xf32   : > { %5599 = vmatprep.subr.bf16.mxu0 %v6188_v6 }
 0xf35   : > { %v6487_v11 = vpop.eup %6486 }
 0xf36   : > { %v4527_v58 = vmul.f32 %v6487_v11, %v8758_v57 }
 0xf37   : > { %v6489_v41 = vpop.eup %6488 }
 0xf38   : > { %v4528_v12 = vmul.f32 %v6489_v41, %v8761_v34  ;;  %v4550_v13 = vmul.f32 %v8820_v26, %v4527_v58  ;;  %v6189_v41 = vld [vmem:[#allocation12 + $0x38] sm:$0xff]  }
 0xf39   : > { %v6491_v9 = vpop.eup %6490  ;;  %5600 = vmatpush3.bf16.msra.mxu0 %v6189_v41 }
 0xf3a   : > { %v4551_v56 = vmul.f32 %v8820_v26, %v4528_v12  ;;  %v4573_v60 = vadd.f32 %v8828_v28, %v4550_v13  ;;  %v4529_v24 = vmul.f32 %v6491_v9, %v8766_v22 }
 0xf3b   : > { %v6493_v8 = vpop.eup %6492 }
 0xf3c   : > { %v4574_v50 = vadd.f32 %v8828_v28, %v4551_v56  ;;  %v4530_v16 = vmul.f32 %v6493_v8, %v8771_v47  ;;  %v4552_v34 = vmul.f32 %v8820_v26, %v4529_v24 }
 0xf3e   : > { %v4587_v62 = vpack.c.bf16 %v4574_v50, %v4573_v60  ;;  %v4553_v57 = vmul.f32 %v8820_v26, %v4530_v16  ;;  %v4575_v18 = vadd.f32 %v8828_v28, %v4552_v34 }
 0xf40   : > { %4754 = vmatmul.mubr.bf16.gmra.mrb[96].mxu1 %v4587_v62  ;;  %v4576_v20 = vadd.f32 %v8828_v28, %v4553_v57 }
 0xf41   : > { %4763 = vmatprep.mubr.bf16.mxu1 %v9124_v39 }
 0xf42   : > { %v4588_v23 = vpack.c.bf16 %v4576_v20, %v4575_v18 }
 0xf48   : > { %4764 = vmatmul.mubr.bf16.gmra.mrb[100].mxu1 %v4588_v23 }
 0xf49   : > { %4773 = vmatprep.mubr.bf16.mxu1 %v9124_v39 }
 0xf59   : > { %v4460_v17 = vpop.xlane.xlu0 %4459 }
 0xf5a   : > { %v4483_v22 = vmul.f32 0.0078125, %v4460_v17 }
 0xf5b   : > { %v4462_v45 = vpop.xlane.xlu1 %4461 }
 0xf5c   : > { %v4499_v47 = vadd.f32 1e-06, %v4483_v22  ;;  %v4484_v27 = vmul.f32 0.0078125, %v4462_v45 }
 0xf5d   : > { %v4464_v61 = vpop.xlane.xlu0 %4463 }
 0xf5e   : > { %6494 = vrsqrt.f32 %v4499_v47  ;;  %v4500_v5 = vadd.f32 1e-06, %v4484_v27  ;;  %v4485_v49 = vmul.f32 0.0078125, %v4464_v61 }
 0xf5f   : > { %v4466_v46 = vpop.xlane.xlu1 %4465 }
 0xf60   : > { %6496 = vrsqrt.f32 %v4500_v5  ;;  %v4501_v59 = vadd.f32 1e-06, %v4485_v49  ;;  %v4486_v36 = vmul.f32 0.0078125, %v4466_v46 }
 0xf62   : > { %6498 = vrsqrt.f32 %v4501_v59  ;;  %v4502_v31 = vadd.f32 1e-06, %v4486_v36 }
 0xf64   : > { %6500 = vrsqrt.f32 %v4502_v31 }
 0xf68   : > { %v6495_v25 = vpop.eup %6494 }
 0xf69   : > { %v4531_v52 = vmul.f32 %v6495_v25, %v8778_v33 }
 0xf6a   : > { %v6497_v44 = vpop.eup %6496 }
 0xf6b   : > { %v4532_v11 = vmul.f32 %v6497_v44, %v8781_v53  ;;  %v4554_v58 = vmul.f32 %v8820_v26, %v4531_v52 }
 0xf6c   : > { %v6499_v12 = vpop.eup %6498 }
 0xf6d   : > { %v4555_v13 = vmul.f32 %v8820_v26, %v4532_v11  ;;  %v4577_v56 = vadd.f32 %v8828_v28, %v4554_v58  ;;  %v4533_v33 = vmul.f32 %v6499_v12, %v8786_v42  ;;  %v9134_v12 = vld [vmem:[#allocation20_spill] sm:$0xff] }
 0xf6e   : > { %v6501_v9 = vpop.eup %6500 }
 0xf6f   : > { %v4578_v8 = vadd.f32 %v8828_v28, %v4555_v13  ;;  %v4534_v60 = vmul.f32 %v6501_v9, %v8791_v0  ;;  %v4556_v57 = vmul.f32 %v8820_v26, %v4533_v33  ;;  %v9136_v9 = vsub.s32 1, %v9134_v12 }
 0xf71   : > { %v4468_v50 = vpop.xlane.xlu0 %4467  ;;  %v4589_v24 = vpack.c.bf16 %v4578_v8, %v4577_v56  ;;  %v4557_v53 = vmul.f32 %v8820_v26, %v4534_v60  ;;  %v4579_v22 = vadd.f32 %v8828_v28, %v4556_v57 }
 0xf72   : > { %v4487_v16 = vmul.f32 0.0078125, %v4468_v50 }
 0xf73   : > { %v4470_v62 = vpop.xlane.xlu1 %4469  ;;  %4774 = vmatmul.mubr.bf16.gmra.mrb[104].mxu1 %v4589_v24  ;;  %v4580_v23 = vadd.f32 %v8828_v28, %v4557_v53 }
 0xf74   : > { %v4503_v34 = vadd.f32 1e-06, %v4487_v16  ;;  %v4488_v20 = vmul.f32 0.0078125, %v4470_v62  ;;  %4783 = vmatprep.mubr.bf16.mxu1 %v9124_v39 }
 0xf75   : > { %v4472_v18 = vpop.xlane.xlu0 %4471  ;;  %v4590_v27 = vpack.c.bf16 %v4580_v23, %v4579_v22 }
 0xf76   : > { %6502 = vrsqrt.f32 %v4503_v34  ;;  %v4504_v42 = vadd.f32 1e-06, %v4488_v20  ;;  %v4489_v17 = vmul.f32 0.0078125, %v4472_v18 }
 0xf77   : > { %v4474_v0 = vpop.xlane.xlu1 %4473 }
 0xf78   : > { %6504 = vrsqrt.f32 %v4504_v42  ;;  %v4505_v45 = vadd.f32 1e-06, %v4489_v17  ;;  %v4490_v47 = vmul.f32 0.0078125, %v4474_v0 }
 0xf7a   : > { %6506 = vrsqrt.f32 %v4505_v45  ;;  %v4506_v61 = vadd.f32 1e-06, %v4490_v47 }
 0xf7b   : > { %4784 = vmatmul.mubr.bf16.gmra.mrb[108].mxu1 %v4590_v27 }
 0xf7c   : > { %6508 = vrsqrt.f32 %v4506_v61  ;;  %4793 = vmatprep.mubr.bf16.mxu1 %v9124_v39 }
 0xf80   : > { %v6503_v5 = vpop.eup %6502 }
 0xf81   : > { %v4535_v49 = vmul.f32 %v6503_v5, %v8798_v32 }
 0xf82   : > { %v6505_v46 = vpop.eup %6504 }
 0xf83   : > { %v4536_v59 = vmul.f32 %v6505_v46, %v8801_v3  ;;  %v4558_v36 = vmul.f32 %v8820_v26, %v4535_v49 }
 0xf84   : > { %v6507_v31 = vpop.eup %6506 }
 0xf85   : > { %v4559_v14 = vmul.f32 %v8820_v26, %v4536_v59  ;;  %v4581_v4 = vadd.f32 %v8828_v28, %v4558_v36  ;;  %v4537_v52 = vmul.f32 %v6507_v31, %v8806_v35  ;;  %v4609_v35 = vld [vmem:[%s9133_s8] sm:$0x3]  ;;  %s6706_s8 = scalar_lea.vmem %s6705_s12, 4096 }
 0xf86   : > { %v6509_v7 = vpop.eup %6508  ;;  %v8891_v56 = vrot.slane %v4609_v35, %v9136_v9  ;;  %p6708_p12 = scmp.lt.s32.totalorder %s6706_s8, %s6700_s13 }
 0xf87   : > { %v4582_v25 = vadd.f32 %v8828_v28, %v4559_v14  ;;  %v4538_v44 = vmul.f32 %v6509_v7, %v8811_v37  ;;  %v4560_v3 = vmul.f32 %v8820_v26, %v4537_v52  ;;  %v9135_v37 = vsub.s32 0, %v9134_v12 }
 0xf88   : > { %p6709_p13 = por %p6708_p12, %p6707_p11 }
 0xf89   : > { %v4591_v6 = vpack.c.bf16 %v4582_v25, %v4581_v4  ;;  %v4561_v32 = vmul.f32 %v8820_v26, %v4538_v44  ;;  %v4583_v58 = vadd.f32 %v8828_v28, %v4560_v3  ;;  %v8887_v13 = vrot.slane %v4609_v35, %v9135_v37 }
 0xf8a   : > { %p6710_p8 = pnand %p6709_p13, %p6703_p1 }
 0xf8b   : > { %4794 = vmatmul.mubr.bf16.gmra.mrb[112].mxu1 %v4591_v6  ;;  %v4584_v11 = vadd.f32 %v8828_v28, %v4561_v32 }
 0xf8c   : > { %4803 = vmatprep.mubr.bf16.mxu1 %v9124_v39 }
 0xf8d   : > { %v4592_v41 = vpack.c.bf16 %v4584_v11, %v4583_v58 }
 0xf93   : > { %4804 = vmatmul.mubr.bf16.gmra.mrb[116].mxu1 %v4592_v41 }
 0xfe5   : > { %v4735_v26 = vpop.f32.mrb[88].mxu1 }
 0xfe6   : > { %v4736_v39 = vadd.f32 %v4735_v26, %v8887_v13  ;;  %v4737_v8 = vpop.f32.mrb[89].mxu1 }
 0xfe7   : > { %v4738_v28 = vadd.f32 %v4737_v8, %v8891_v56  ;;  %v4739_v33 = vpop.f32.mrb[90].mxu1 }
 0xfe8   : > { %v4740_v60 = vadd.f32 %v4739_v33, %v8887_v13  ;;  %v4741_v50 = vpop.f32.mrb[91].mxu1  ;;  %v4814_v53 = vmax.f32 %v4736_v39, 0.0 }
 0xfe9   : > { %v4742_v24 = vadd.f32 %v4741_v50, %v8891_v56  ;;  %v4815_v62 = vmax.f32 %v4738_v28, 0.0 }
 0xfea   : > { %v4816_v16 = vmax.f32 %v4740_v60, 0.0 }
 0xfeb   : > { %v4817_v57 = vmax.f32 %v4742_v24, 0.0 }
 0xfec   : > { %v4846_v34 = vpack.c.bf16 %v4816_v16, %v4814_v53 }
 0xfed   : > { %v4847_v20 = vpack.c.bf16 %v4817_v57, %v4815_v62  ;;  %v4745_v18 = vpop.f32.mrb[92].mxu1 }
 0xfee   : > { %v4746_v23 = vadd.f32 %v4745_v18, %v8887_v13  ;;  %v4747_v42 = vpop.f32.mrb[93].mxu1 }
 0xfef   : > { %v4748_v17 = vadd.f32 %v4747_v42, %v8891_v56  ;;  %v4749_v0 = vpop.f32.mrb[94].mxu1  ;;  %5029 = vmatprep.mubr.bf16.mxu0 %v4847_v20 }
 0xff0   : > { %v4750_v22 = vadd.f32 %v4749_v0, %v8887_v13  ;;  %v4751_v45 = vpop.f32.mrb[95].mxu1  ;;  %5030 = vmatmul.mubr.bf16.vlgmr.msra.gmra.mrb[104].mxu0 %v4846_v34  ;;  %v4818_v27 = vmax.f32 %v4746_v23, 0.0 }
 0xff1   : > { %v4752_v47 = vadd.f32 %v4751_v45, %v8891_v56  ;;  %v4819_v5 = vmax.f32 %v4748_v17, 0.0 }
 0xff2   : > { %v4820_v61 = vmax.f32 %v4750_v22, 0.0 }
 0xff3   : > { %v4821_v49 = vmax.f32 %v4752_v47, 0.0 }
 0xff4   : > { %v4848_v46 = vpack.c.bf16 %v4820_v61, %v4818_v27 }
 0xff5   : > { %v4849_v59 = vpack.c.bf16 %v4821_v49, %v4819_v5 }
 0xff7   : > { %5037 = vmatprep.mubr.bf16.mxu0 %v4849_v59 }
 0xff8   : > { %5038 = vmatmul.mubr.bf16.gmra.mrb[108].mxu0 %v4848_v46 }
0x1013   : > { %v4755_v36 = vpop.f32.mrb[96].mxu1 }
0x1014   : > { %v4756_v31 = vadd.f32 %v4755_v36, %v8887_v13  ;;  %v4757_v14 = vpop.f32.mrb[97].mxu1 }
0x1015   : > { %v4758_v7 = vadd.f32 %v4757_v14, %v8891_v56  ;;  %v4759_v4 = vpop.f32.mrb[98].mxu1 }
0x1016   : > { %v4760_v25 = vadd.f32 %v4759_v4, %v8887_v13  ;;  %v4761_v52 = vpop.f32.mrb[99].mxu1  ;;  %v4822_v6 = vmax.f32 %v4756_v31, 0.0 }
0x1017   : > { %v4762_v44 = vadd.f32 %v4761_v52, %v8891_v56  ;;  %v4823_v3 = vmax.f32 %v4758_v7, 0.0 }
0x1018   : > { %v4824_v32 = vmax.f32 %v4760_v25, 0.0 }
0x1019   : > { %v4825_v11 = vmax.f32 %v4762_v44, 0.0 }
0x101a   : > { %v4850_v58 = vpack.c.bf16 %v4824_v32, %v4822_v6 }
0x101b   : > { %v4851_v41 = vpack.c.bf16 %v4825_v11, %v4823_v3  ;;  %v4765_v35 = vpop.f32.mrb[100].mxu1 }
0x101c   : > { %v4766_v12 = vadd.f32 %v4765_v35, %v8887_v13  ;;  %v4767_v37 = vpop.f32.mrb[101].mxu1 }
0x101d   : > { %v4768_v9 = vadd.f32 %v4767_v37, %v8891_v56  ;;  %v4769_v26 = vpop.f32.mrb[102].mxu1  ;;  %5045 = vmatprep.mubr.bf16.mxu0 %v4851_v41 }
0x101e   : > { %v4770_v39 = vadd.f32 %v4769_v26, %v8887_v13  ;;  %v4771_v8 = vpop.f32.mrb[103].mxu1  ;;  %5046 = vmatmul.mubr.bf16.gmra.mrb[112].mxu0 %v4850_v58  ;;  %v4826_v33 = vmax.f32 %v4766_v12, 0.0 }
0x101f   : > { %v4772_v28 = vadd.f32 %v4771_v8, %v8891_v56  ;;  %v4827_v50 = vmax.f32 %v4768_v9, 0.0 }
0x1020   : > { %v4828_v60 = vmax.f32 %v4770_v39, 0.0 }
0x1021   : > { %v4829_v24 = vmax.f32 %v4772_v28, 0.0 }
0x1022   : > { %v4852_v53 = vpack.c.bf16 %v4828_v60, %v4826_v33 }
0x1023   : > { %v4853_v16 = vpack.c.bf16 %v4829_v24, %v4827_v50 }
0x1025   : > { %5053 = vmatprep.mubr.bf16.mxu0 %v4853_v16 }
0x1026   : > { %5054 = vmatmul.mubr.bf16.gmra.mrb[116].mxu0 %v4852_v53 }
0x1046   : > { %v4775_v62 = vpop.f32.mrb[104].mxu1 }
0x1047   : > { %v4776_v57 = vadd.f32 %v4775_v62, %v8887_v13  ;;  %v4777_v34 = vpop.f32.mrb[105].mxu1 }
0x1048   : > { %v4778_v20 = vadd.f32 %v4777_v34, %v8891_v56  ;;  %v4779_v18 = vpop.f32.mrb[106].mxu1 }
0x1049   : > { %v4780_v23 = vadd.f32 %v4779_v18, %v8887_v13  ;;  %v4781_v42 = vpop.f32.mrb[107].mxu1  ;;  %v4830_v0 = vmax.f32 %v4776_v57, 0.0 }
0x104a   : > { %v4782_v17 = vadd.f32 %v4781_v42, %v8891_v56  ;;  %v4831_v45 = vmax.f32 %v4778_v20, 0.0 }
0x104b   : > { %v4832_v22 = vmax.f32 %v4780_v23, 0.0 }
0x104c   : > { %v4833_v47 = vmax.f32 %v4782_v17, 0.0 }
0x104d   : > { %v4854_v27 = vpack.c.bf16 %v4832_v22, %v4830_v0 }
0x104e   : > { %v4855_v61 = vpack.c.bf16 %v4833_v47, %v4831_v45  ;;  %v4785_v5 = vpop.f32.mrb[108].mxu1  ;;  %v8928_v47 = vld [vmem:[%s9137_s22] ss:$0 sm:$0xff] }
0x104f   : > { %v4786_v49 = vadd.f32 %v4785_v5, %v8887_v13  ;;  %v4787_v46 = vpop.f32.mrb[109].mxu1 }
0x1050   : > { %v4788_v59 = vadd.f32 %v4787_v46, %v8891_v56  ;;  %v4789_v36 = vpop.f32.mrb[110].mxu1  ;;  %5061 = vmatprep.mubr.bf16.mxu0 %v4855_v61 }
0x1051   : > { %v4790_v31 = vadd.f32 %v4789_v36, %v8887_v13  ;;  %v4791_v14 = vpop.f32.mrb[111].mxu1  ;;  %5062 = vmatmul.mubr.bf16.gmra.mrb[120].mxu0 %v4854_v27  ;;  %v4834_v4 = vmax.f32 %v4786_v49, 0.0 }
0x1052   : > { %v4792_v7 = vadd.f32 %v4791_v14, %v8891_v56  ;;  %v4835_v52 = vmax.f32 %v4788_v59, 0.0 }
0x1053   : > { %v4836_v25 = vmax.f32 %v4790_v31, 0.0 }
0x1054   : > { %v4837_v44 = vmax.f32 %v4792_v7, 0.0 }
0x1055   : > { %v4856_v6 = vpack.c.bf16 %v4836_v25, %v4834_v4 }
0x1056   : > { %v4857_v32 = vpack.c.bf16 %v4837_v44, %v4835_v52 }
0x1058   : > { %5069 = vmatprep.mubr.bf16.mxu0 %v4857_v32 }
0x1059   : > { %5070 = vmatmul.mubr.bf16.gmra.mrb[124].mxu0 %v4856_v6 }
0x105e   : > { %v4795_v3 = vpop.f32.mrb[112].mxu1 }
0x105f   : > { %v4796_v11 = vadd.f32 %v4795_v3, %v8887_v13  ;;  %v4797_v58 = vpop.f32.mrb[113].mxu1 }
0x1060   : > { %v4798_v41 = vadd.f32 %v4797_v58, %v8891_v56  ;;  %v4799_v35 = vpop.f32.mrb[114].mxu1 }
0x1061   : > { %v4800_v12 = vadd.f32 %v4799_v35, %v8887_v13  ;;  %v4801_v37 = vpop.f32.mrb[115].mxu1  ;;  %v4838_v26 = vmax.f32 %v4796_v11, 0.0 }
0x1062   : > { %v4802_v9 = vadd.f32 %v4801_v37, %v8891_v56  ;;  %v4839_v8 = vmax.f32 %v4798_v41, 0.0 }
0x1063   : > { %v4840_v39 = vmax.f32 %v4800_v12, 0.0 }
0x1064   : > { %v4841_v28 = vmax.f32 %v4802_v9, 0.0 }
0x1065   : > { %v4858_v33 = vpack.c.bf16 %v4840_v39, %v4838_v26 }
0x1066   : > { %v4859_v60 = vpack.c.bf16 %v4841_v28, %v4839_v8  ;;  %v4805_v50 = vpop.f32.mrb[116].mxu1 }
0x1067   : > { %v4806_v24 = vadd.f32 %v4805_v50, %v8887_v13  ;;  %v4807_v53 = vpop.f32.mrb[117].mxu1 }
0x1068   : > { %v4808_v16 = vadd.f32 %v4807_v53, %v8891_v56  ;;  %v4809_v62 = vpop.f32.mrb[118].mxu1  ;;  %5077 = vmatprep.mubr.bf16.mxu0 %v4859_v60 }
0x1069   : > { %v4810_v57 = vadd.f32 %v4809_v62, %v8887_v13  ;;  %v4811_v34 = vpop.f32.mrb[119].mxu1  ;;  %5078 = vmatmul.mubr.bf16.gmra.mrb[128].mxu0 %v4858_v33  ;;  %v4842_v18 = vmax.f32 %v4806_v24, 0.0 }
0x106a   : > { %v4812_v20 = vadd.f32 %v4811_v34, %v8891_v56  ;;  %v4843_v42 = vmax.f32 %v4808_v16, 0.0 }
0x106b   : > { %v4844_v23 = vmax.f32 %v4810_v57, 0.0 }
0x106c   : > { %v4845_v17 = vmax.f32 %v4812_v20, 0.0 }
0x106d   : > { %v4860_v0 = vpack.c.bf16 %v4844_v23, %v4842_v18 }
0x106e   : > { %v4861_v22 = vpack.c.bf16 %v4845_v17, %v4843_v42 }
0x1070   : > { %5085 = vmatprep.mubr.bf16.mxu0 %v4861_v22 }
0x1071   : > { %5086 = vmatmul.mubr.bf16.gmra.mrb[132].mxu0 %v4860_v0 }
0x10c3   : > { %v5601_v45 = vpop.f32.mrb[104].mxu0 }
0x10c4   : > { %v5602_v13 = vpop.f32.mrb[105].mxu0 }
0x10c5   : > { %v5603_v27 = vadd.f32 %v5602_v13, %v5601_v45  ;;  %v5604_v61 = vpop.f32.mrb[106].mxu0 }
0x10c6   : > { %v5605_v5 = vpop.f32.mrb[107].mxu0 }
0x10c7   : > { %v5032_v56 = vadd.f32 %v5603_v27, %v8928_v47  ;;  %v5606_v49 = vadd.f32 %v5605_v5, %v5604_v61 }
0x10c9   : > { %v5094_v46 = vadd.f32 %v5032_v56, %v8660_v30  ;;  %v5035_v59 = vadd.f32 %v5606_v49, %v8928_v47 }
0x10cb   : > { %5110 = vst [vmem:[%s8935_s24] sm:$0xff] %v5094_v46  ;;  %v5095_v36 = vadd.f32 %v5035_v59, %v8664_v48  ;;  %v5607_v31 = vpop.f32.mrb[108].mxu0 }
0x10cc   : > { %v5608_v14 = vpop.f32.mrb[109].mxu0 }
0x10cd   : > { %5111 = vst [vmem:[%s8935_s24 + $0x8] sm:$0xff] %v5095_v36  ;;  %v5609_v7 = vadd.f32 %v5608_v14, %v5607_v31  ;;  %v5610_v4 = vpop.f32.mrb[110].mxu0 }
0x10ce   : > { %v5611_v25 = vpop.f32.mrb[111].mxu0 }
0x10cf   : > { %v5040_v30 = vadd.f32 %v5609_v7, %v8928_v47  ;;  %v5612_v52 = vadd.f32 %v5611_v25, %v5610_v4 }
0x10d1   : > { %v5096_v44 = vadd.f32 %v5040_v30, %v8668_v55  ;;  %v5043_v6 = vadd.f32 %v5612_v52, %v8928_v47 }
0x10d3   : > { %5112 = vst [vmem:[%s8935_s24 + $0x10] sm:$0xff] %v5096_v44  ;;  %v5097_v32 = vadd.f32 %v5043_v6, %v8674_v29 }
0x10d5   : > { %5113 = vst [vmem:[%s8935_s24 + $0x18] sm:$0xff] %v5097_v32 }
0x10f1   : > { %v5613_v48 = vpop.f32.mrb[112].mxu0 }
0x10f2   : > { %v5614_v3 = vpop.f32.mrb[113].mxu0 }
0x10f3   : > { %v5615_v11 = vadd.f32 %v5614_v3, %v5613_v48  ;;  %v5616_v58 = vpop.f32.mrb[114].mxu0 }
0x10f4   : > { %v5617_v41 = vpop.f32.mrb[115].mxu0 }
0x10f5   : > { %v5048_v35 = vadd.f32 %v5615_v11, %v8928_v47  ;;  %v5618_v12 = vadd.f32 %v5617_v41, %v5616_v58 }
0x10f7   : > { %v5098_v37 = vadd.f32 %v5048_v35, %v8680_v40  ;;  %v5051_v55 = vadd.f32 %v5618_v12, %v8928_v47 }
0x10f9   : > { %5114 = vst [vmem:[%s8935_s24 + $0x20] sm:$0xff] %v5098_v37  ;;  %v5099_v9 = vadd.f32 %v5051_v55, %v8685_v19  ;;  %v5619_v26 = vpop.f32.mrb[116].mxu0 }
0x10fa   : > { %v5620_v29 = vpop.f32.mrb[117].mxu0 }
0x10fb   : > { %5115 = vst [vmem:[%s8935_s24 + $0x28] sm:$0xff] %v5099_v9  ;;  %v5621_v39 = vadd.f32 %v5620_v29, %v5619_v26  ;;  %v5622_v8 = vpop.f32.mrb[118].mxu0 }
0x10fc   : > { %v5623_v28 = vpop.f32.mrb[119].mxu0 }
0x10fd   : > { %v5056_v33 = vadd.f32 %v5621_v39, %v8928_v47  ;;  %v5624_v60 = vadd.f32 %v5623_v28, %v5622_v8 }
0x10ff   : > { %v5100_v50 = vadd.f32 %v5056_v33, %v8689_v38  ;;  %v5059_v40 = vadd.f32 %v5624_v60, %v8928_v47 }
0x1101   : > { %5116 = vst [vmem:[%s8935_s24 + $0x30] sm:$0xff] %v5100_v50  ;;  %v5101_v24 = vadd.f32 %v5059_v40, %v8693_v43 }
0x1103   : > { %5117 = vst [vmem:[%s8935_s24 + $0x38] sm:$0xff] %v5101_v24 }
0x1124   : > { %v5625_v19 = vpop.f32.mrb[120].mxu0 }
0x1125   : > { %v5626_v53 = vpop.f32.mrb[121].mxu0 }
0x1126   : > { %v5627_v16 = vadd.f32 %v5626_v53, %v5625_v19  ;;  %v5628_v62 = vpop.f32.mrb[122].mxu0 }
0x1127   : > { %v5629_v57 = vpop.f32.mrb[123].mxu0 }
0x1128   : > { %v5064_v34 = vadd.f32 %v5627_v16, %v8928_v47  ;;  %v5630_v20 = vadd.f32 %v5629_v57, %v5628_v62 }
0x112a   : > { %v5102_v18 = vadd.f32 %v5064_v34, %v8700_v15  ;;  %v5067_v38 = vadd.f32 %v5630_v20, %v8928_v47 }
0x112c   : > { %5118 = vst [vmem:[%s8935_s24 + $0x40] sm:$0xff] %v5102_v18  ;;  %v5103_v23 = vadd.f32 %v5067_v38, %v8705_v51  ;;  %v5631_v42 = vpop.f32.mrb[124].mxu0 }
0x112d   : > { %v5632_v43 = vpop.f32.mrb[125].mxu0 }
0x112e   : > { %5119 = vst [vmem:[%s8935_s24 + $0x48] sm:$0xff] %v5103_v23  ;;  %v5633_v17 = vadd.f32 %v5632_v43, %v5631_v42  ;;  %v5634_v0 = vpop.f32.mrb[126].mxu0 }
0x112f   : > { %v5635_v22 = vpop.f32.mrb[127].mxu0 }
0x1130   : > { %v5072_v45 = vadd.f32 %v5633_v17, %v8928_v47  ;;  %v5636_v13 = vadd.f32 %v5635_v22, %v5634_v0 }
0x1132   : > { %v5104_v27 = vadd.f32 %v5072_v45, %v8709_v10  ;;  %v5075_v15 = vadd.f32 %v5636_v13, %v8928_v47 }
0x1134   : > { %5120 = vst [vmem:[%s8935_s24 + $0x50] sm:$0xff] %v5104_v27  ;;  %v5105_v61 = vadd.f32 %v5075_v15, %v8713_v1 }
0x1136   : > { %5121 = vst [vmem:[%s8935_s24 + $0x58] sm:$0xff] %v5105_v61 }
0x113c   : > { %v5637_v51 = vpop.f32.mrb[128].mxu0 }
0x113d   : > { %v5638_v5 = vpop.f32.mrb[129].mxu0 }
0x113e   : > { %v5639_v56 = vadd.f32 %v5638_v5, %v5637_v51  ;;  %v5640_v49 = vpop.f32.mrb[130].mxu0 }
0x113f   : > { %v5641_v46 = vpop.f32.mrb[131].mxu0 }
0x1140   : > { %v5080_v59 = vadd.f32 %v5639_v56, %v8928_v47  ;;  %v5642_v36 = vadd.f32 %v5641_v46, %v5640_v49 }
0x1142   : > { %v5106_v31 = vadd.f32 %v5080_v59, %v8720_v54  ;;  %v5083_v10 = vadd.f32 %v5642_v36, %v8928_v47 }
0x1144   : > { %5122 = vst [vmem:[%s8935_s24 + $0x60] sm:$0xff] %v5106_v31  ;;  %v5107_v14 = vadd.f32 %v5083_v10, %v8725_v21  ;;  %v5643_v1 = vpop.f32.mrb[132].mxu0 }
0x1145   : > { %v5644_v7 = vpop.f32.mrb[133].mxu0 }
0x1146   : > { %5123 = vst [vmem:[%s8935_s24 + $0x68] sm:$0xff] %v5107_v14  ;;  %v5645_v4 = vadd.f32 %v5644_v7, %v5643_v1  ;;  %v5646_v25 = vpop.f32.mrb[134].mxu0 }
0x1147   : > { %v5647_v30 = vpop.f32.mrb[135].mxu0 }
0x1148   : > { %v5088_v52 = vadd.f32 %v5645_v4, %v8928_v47  ;;  %v5648_v44 = vadd.f32 %v5647_v30, %v5646_v25 }
0x114a   : > { %v5108_v54 = vadd.f32 %v5088_v52, %v8729_v63  ;;  %v5091_v6 = vadd.f32 %v5648_v44, %v8928_v47 }
0x114c   : > { %5124 = vst [vmem:[%s8935_s24 + $0x70] sm:$0xff] %v5108_v54  ;;  %v5109_v21 = vadd.f32 %v5091_v6, %v8733_v2 }
0x114e   : > { %5125 = vst [vmem:[%s8935_s24 + $0x78] sm:$0xff] %v5109_v21 }
0x114f   : > { %6713 = shalt.err (!%p6710_p8)
}
0x1150   : > { %s6714_s1 = scalar_lea.hbm %s8984_s15, 2048  ;;  %s6718_s24 = scalar_lea.hbm %s9138_s18, 4096 }
0x1151   : > { %p6715_p6 = scmp.ne.s32.totalorder %s8984_s15, %s6714_s1  ;;  %p6719_p3 = scmp.lt.u32.totalorder %s8984_s15, %s9138_s18 }
0x1152   : > { %p6720_p0 = scmp.lt.u32.totalorder %s6718_s24, %s6714_s1  ;;  %p6722_p2 = scmp.lt.u32.totalorder %s6714_s1, %s8984_s15 }
0x1153   : > { %p6716_p9 = pnand %p6715_p6, %p9139_p7 }
0x1154   : > { %p6721_p5 = por %p6720_p0, %p6719_p3 }
0x1155   : > { %p6717_p4 = pneg %p6716_p9 }
0x1156   : > { %p6723_p10 = por %p6722_p2, %p6721_p5 }
0x1158   : > { %p6724_p1 = pnand %p6723_p10, %p6717_p4 }
0x115a   : > { %6727 = shalt.err (!%p6724_p1)
}
0x115b   : > { %s6797_s20 = smov 128   ;;  %s6798_s13 = smov 8  }
0x115c   : > { %6023 = dma.vmem_to_hbm [thread:$0]  (%p9139_p7), %s8986_s19, 2048, %s8984_s15, %s5127_s14, %s6797_s20, %s6797_s20, %s6798_s13  }
0x115d PF: > { %s5156_s10 = sand.u32 1, %s6766_s25   ;;  %p9140_p11 = scmp.ne.s32.totalorder %s9090_s23, 0 }
0x115e   : > { %p9141_p12 = scmp.ge.s32.totalorder %s6778_s28, 2  ;;  %s5157_s12 = scalar_lea.sflag [#allocation5], %s5156_s10 }
0x1160   : > { %p6046_p13 = pnand %p9141_p12, %p9140_p11 }
0x1162   : > { %6761 = dma.done.wait (!%p6046_p13), %s5157_s12, 2048  }
0x1163   : > { %6763 = vsyncadd (!%p6046_p13), %s5157_s12, 4294965248  ;;  %p29_p8 = scmp.ge.s32.totalorder %s7035_s16, 4   ;;  %s9142_s25 = smov %s6770_s26 }
0x1164   : > { %s9143_s26 = smov %s6774_s27  ;;  %s9144_s27 = smov %s7047_s17 }
0x1165   : > { %s9145_s28 = smov %s7035_s16  ;;  %31 = sbr.rel (!%p29_p8) target bundleno = 16 (0x10), region = 137 }
0x116c   :  { %5162 = vsyncpa [#allocation4], 1 }
0x116d   :  { %5164 = vsyncpa [#allocation4 + $0x1], 1 }
0x116e   :  { %5165 = vsyncpa [#allocation7], 1 }
0x116f   :  { %5166 = vsyncpa [#allocation10], 1 }
0x1170   :  { %5167 = vsyncpa [#allocation13], 1 }
0x1171   :  { %5168 = vsyncpa [#allocation5], 1 }
0x1172   :  { %5170 = vsyncpa [#allocation5 + $0x1], 1 }

// kernel: tpu_custom_call.1
= control target key start
LH: loop header
LB: loop body
LE: loop exit
PB: predicated region body
PF: predicated region fallthrough
CT: control target
= control target key end

     0   :  { %s9033_s0 = inlined_call_operand.hbm [shape: f32[8,32,128], index: 0, kind: input, shape index: {}]   ;;  %s9034_s1 = inlined_call_operand.hbm [shape: f32[1,32,32], index: 1, kind: input, shape index: {}]   ;;  %s9035_s2 = inlined_call_operand.vmem [shape: f32[1,128], index: 2, kind: input, shape index: {}]   ;;  %s9036_s3 = inlined_call_operand.hbm [shape: bf16[128,384], index: 3, kind: input, shape index: {}]   ;;  %s9037_s4 = inlined_call_operand.vmem [shape: f32[1,384], index: 4, kind: input, shape index: {}]   ;;  %s9038_s5 = inlined_call_operand.hbm [shape: bf16[128,128], index: 5, kind: input, shape index: {}]   ;;  %s9039_s6 = inlined_call_operand.vmem [shape: f32[1,128], index: 6, kind: input, shape index: {}]   ;;  %s9040_s7 = inlined_call_operand.vmem [shape: f32[1,128], index: 7, kind: input, shape index: {}]   ;;  %s9041_s8 = inlined_call_operand.vmem [shape: f32[1,128], index: 8, kind: input, shape index: {}]   ;;  %s9042_s9 = inlined_call_operand.hbm [shape: bf16[128,256], index: 9, kind: input, shape index: {}]   ;;  %s9043_s10 = inlined_call_operand.vmem [shape: f32[1,256], index: 10, kind: input, shape index: {}]   ;;  %s9044_s11 = inlined_call_operand.hbm [shape: bf16[256,128], index: 11, kind: input, shape index: {}]   ;;  %s9045_s12 = inlined_call_operand.vmem [shape: f32[1,128], index: 12, kind: input, shape index: {}]   ;;  %s9046_s13 = inlined_call_operand.hbm [shape: f32[8,32,128], index: 13, kind: output, shape index: {}]  }
   0x1   :  { %9071 = sst [smem:[#allocation32_spill]] %s9034_s1 }
   0x2   :  { %9072 = sst [smem:[#allocation33_spill]] %s9038_s5 }
   0x3   :  { %9073 = sst [smem:[#allocation34_spill]] %s9040_s7 }
   0x4   :  { %9074 = sst [smem:[#allocation35_spill]] %s9041_s8 }
   0x5   :  { %9075 = sst [smem:[#allocation36_spill]] %s9043_s10 }
   0x6   :  { %9076 = sst [smem:[#allocation37_spill]] %s9045_s12 }
   0x7   :  { %9077 = sst [smem:[#allocation38_spill]] %s9046_s13 }
   0x8   :  { %18 = vsyncpa [#allocation4], 0 }
   0x9   :  { %20 = vsyncpa [#allocation4 + $0x1], 0 }
   0xa   :  { %21 = vsyncpa [#allocation7], 0 }
   0xb   :  { %22 = vsyncpa [#allocation10], 0 }
   0xc   :  { %23 = vsyncpa [#allocation13], 0 }
   0xd   :  { %24 = vsyncpa [#allocation5], 0 }
   0xe   :  { %26 = vsyncpa [#allocation5 + $0x1], 0  ;;  %s6869_s25 = smov 0   ;;  %s6871_s26 = smov 0  }
   0xf   :  { %s6873_s27 = smov 0   ;;  %s6875_s28 = smov 0  }
  0x10 LB: > { %s6780_s29 = smov [#allocation6]   ;;  %s6890_s14 = sadd.s32 4294967295, %s6778_s28   ;;  %s6778_s28 = sphi %s6875_s28, %s9145_s28   ;;  %s6774_s27 = sphi %s6873_s27, %s9144_s27   ;;  %s6770_s26 = sphi %s6871_s26, %s9143_s26   ;;  %s6766_s25 = sphi %s6869_s25, %s9142_s25  }
  0x11   : > { %s353_s30 = sshll.u32 %s6780_s29, 4  ;;  %p5263_p0 = scmp.ge.s32.totalorder %s6778_s28, 1  ;;  %s6895_s30 = int_to_ptr.vmem [resolvable:$true] %s353_s30 }
  0x12   : > { %p9050_p1 = scmp.eq.s32.totalorder %s6890_s14, 0  ;;  %p341_p2 = scmp.lt.s32.totalorder %s6778_s28, 3 }
  0x13   : > { %s6781_s16 = smov [#allocation9]   ;;  %s6782_s19 = smov [#allocation8]  }
  0x14   : > { %p6897_p3 = pnand %p5263_p0, %p341_p2  ;;  %s385_s17 = sshll.u32 %s6781_s16, 4  ;;  %s6910_s17 = int_to_ptr.vmem [resolvable:$true] %s385_s17 }
  0x15   : > { %s6912_s20 = sshll.u32 %s6782_s19, 4  ;;  %s9080_s1 = sld [smem:[#allocation32_spill]]  ;;  %s370_s20 = int_to_ptr.vmem [resolvable:$true] %s6912_s20 }
  0x16   : > { %s9078_s15 = scalar_select %p6897_p3, 1, 0 }
  0x17   : > { %p6025_p5 = pneg %p6897_p3 }
  0x19   : > { %p6906_p6 = pnand %p6025_p5, %p9050_p1 }
  0x1b   : > { %s6530_s23 = scalar_lea.hbm %s9080_s1, 512  ;;  %p6922_p8 = pneg %p6906_p6 }
  0x1c   : > { %p6531_p7 = scmp.ne.s32.totalorder %s9080_s1, %s6530_s23  ;;  %p6537_p11 = scmp.lt.u32.totalorder %s6530_s23, %s9080_s1 }
  0x1e   : > { %p6533_p9 = pnand %p6922_p8, %p6531_p7 }
  0x20   : > { %p6534_p10 = pneg %p6533_p9 }
  0x22   : > { %p6539_p12 = pnand %p6537_p11, %p6534_p10 }
  0x24   : > { %6542 = shalt.err (!%p6539_p12)
}
  0x25   : > { %s6543_s21 = scalar_lea.vmem %s6895_s30, 512  ;;  %p6551_p5 = scmp.lt.s32.totalorder %s6895_s30, %s6895_s30 }
  0x26   : > { %p6544_p13 = scmp.ne.s32.totalorder %s6895_s30, %s6543_s21  ;;  %p6552_p4 = scmp.lt.s32.totalorder %s6543_s21, %s6543_s21 }
  0x28   : > { %p6546_p0 = pnand %p6544_p13, %p6922_p8  ;;  %p6553_p7 = por %p6552_p4, %p6551_p5 }
  0x2a   : > { %p6547_p2 = pneg %p6546_p0 }
  0x2c   : > { %p6554_p9 = pnand %p6553_p7, %p6547_p2 }
  0x2e   : > { %6557 = shalt.err (!%p6554_p9)
}
  0x2f   : > { %s9048_s22 = smov 128   ;;  %s9054_s13 = smov 8  }
  0x30   : > { %6028 = dma.hbm_to_vmem [thread:$0]  (!%p6906_p6), %s9080_s1, 512, %s6895_s30, [#allocation7], %s9048_s22, %s9048_s22, %s9054_s13  }
  0x31   : > { %s9082_s5 = sld [smem:[#allocation33_spill]] }
  0x37   : > { %s6558_s21 = scalar_lea.hbm %s9082_s5, 1024 }
  0x38   : > { %p6559_p4 = scmp.ne.s32.totalorder %s9082_s5, %s6558_s21  ;;  %p6565_p12 = scmp.lt.u32.totalorder %s6558_s21, %s9082_s5 }
  0x3a   : > { %p6561_p10 = pnand %p6559_p4, %p6922_p8 }
  0x3c   : > { %p6562_p11 = pneg %p6561_p10 }
  0x3e   : > { %p6567_p13 = pnand %p6565_p12, %p6562_p11 }
  0x40   : > { %6570 = shalt.err (!%p6567_p13)
}
  0x41   : > { %s6571_s30 = scalar_lea.vmem %s6910_s17, 1024  ;;  %p6579_p7 = scmp.lt.s32.totalorder %s6910_s17, %s6910_s17 }
  0x42   : > { %p6572_p0 = scmp.ne.s32.totalorder %s6910_s17, %s6571_s30  ;;  %p6580_p9 = scmp.lt.s32.totalorder %s6571_s30, %s6571_s30 }
  0x44   : > { %p6574_p2 = pnand %p6572_p0, %p6922_p8  ;;  %p6581_p4 = por %p6580_p9, %p6579_p7 }
  0x46   : > { %p6575_p5 = pneg %p6574_p2 }
  0x48   : > { %p6582_p10 = pnand %p6581_p4, %p6575_p5 }
  0x4a   : > { %6585 = shalt.err (!%p6582_p10)
}
  0x4b   : > { %s9052_s10 = smov 64   ;;  %s9053_s7 = smov 4  }
  0x4c   : > { %6034 = dma.hbm_to_vmem [thread:$0]  (!%p6906_p6), %s9082_s5, 1024, %s6910_s17, [#allocation10], %s9052_s10, %s9052_s10, %s9053_s7  }
  0x4d   : > { %s6586_s29 = scalar_lea.hbm %s9036_s3, 3072 }
  0x4e   : > { %p6587_p11 = scmp.ne.s32.totalorder %s9036_s3, %s6586_s29  ;;  %p6593_p0 = scmp.lt.u32.totalorder %s6586_s29, %s9036_s3 }
  0x50   : > { %p6589_p12 = pnand %p6587_p11, %p6922_p8 }
  0x52   : > { %p6590_p13 = pneg %p6589_p12 }
  0x54   : > { %p6595_p2 = pnand %p6593_p0, %p6590_p13 }
  0x56   : > { %6598 = shalt.err (!%p6595_p2)
}
  0x57   : > { %s6599_s8 = scalar_lea.vmem %s370_s20, 3072  ;;  %p6607_p4 = scmp.lt.s32.totalorder %s370_s20, %s370_s20 }
  0x58   : > { %p6600_p5 = scmp.ne.s32.totalorder %s370_s20, %s6599_s8  ;;  %p6608_p10 = scmp.lt.s32.totalorder %s6599_s8, %s6599_s8 }
  0x5a   : > { %p6602_p7 = pnand %p6600_p5, %p6922_p8  ;;  %p6609_p1 = por %p6608_p10, %p6607_p4 }
  0x5c   : > { %p6603_p9 = pneg %p6602_p7 }
  0x5e   : > { %p6610_p3 = pnand %p6609_p1, %p6603_p9 }
  0x60   : > { %6613 = shalt.err (!%p6610_p3)
}
  0x61   : > { %s6787_s17 = smov 192   ;;  %s6788_s12 = smov 12  }
  0x62   : > { %6031 = dma.hbm_to_vmem [thread:$0]  (!%p6906_p6), %s9036_s3, 3072, %s370_s20, [#allocation7], %s6787_s17, %s6787_s17, %s6788_s12  }
  0x63   : > { %s6789_s24 = smov [#allocation11]   ;;  %s6790_s19 = smov [#allocation12]  }
  0x64   : > { %s407_s29 = sshll.u32 %s6789_s24, 4  ;;  %s423_s21 = sshll.u32 %s6790_s19, 4  ;;  %s408_s29 = int_to_ptr.vmem [resolvable:$true] %s407_s29  ;;  %s424_s21 = int_to_ptr.vmem [resolvable:$true] %s423_s21 }
  0x65   : > { %s6614_s8 = scalar_lea.hbm %s9042_s9, 2048 }
  0x66   : > { %p6615_p1 = scmp.ne.s32.totalorder %s9042_s9, %s6614_s8  ;;  %p6621_p12 = scmp.lt.u32.totalorder %s6614_s8, %s9042_s9 }
  0x68   : > { %p6617_p3 = pnand %p6615_p1, %p6922_p8 }
  0x6a   : > { %p6618_p11 = pneg %p6617_p3 }
  0x6c   : > { %p6623_p13 = pnand %p6621_p12, %p6618_p11 }
  0x6e   : > { %6626 = shalt.err (!%p6623_p13)
}
  0x6f   : > { %s6627_s20 = scalar_lea.vmem %s408_s29, 2048  ;;  %p6635_p7 = scmp.lt.s32.totalorder %s408_s29, %s408_s29 }
  0x70   : > { %p6628_p0 = scmp.ne.s32.totalorder %s408_s29, %s6627_s20  ;;  %p6636_p9 = scmp.lt.s32.totalorder %s6627_s20, %s6627_s20 }
  0x72   : > { %p6630_p2 = pnand %p6628_p0, %p6922_p8  ;;  %p6637_p4 = por %p6636_p9, %p6635_p7 }
  0x74   : > { %p6631_p5 = pneg %p6630_p2 }
  0x76   : > { %p6638_p10 = pnand %p6637_p4, %p6631_p5 }
  0x78   : > { %6641 = shalt.err (!%p6638_p10)
}
  0x79   : > { %s9083_s13 = smov 8   ;;  %s9084_s10 = smov 128  }
  0x7a   : > { %6037 = dma.hbm_to_vmem [thread:$0]  (!%p6906_p6), %s9042_s9, 2048, %s408_s29, [#allocation10], %s9084_s10, %s9084_s10, %s9083_s13  }
  0x7b   : > { %s6642_s12 = scalar_lea.hbm %s9044_s11, 2048 }
  0x7c   : > { %p6643_p1 = scmp.ne.s32.totalorder %s9044_s11, %s6642_s12  ;;  %p6649_p12 = scmp.lt.u32.totalorder %s6642_s12, %s9044_s11 }
  0x7e   : > { %p6645_p3 = pnand %p6643_p1, %p6922_p8 }
  0x80   : > { %p6646_p11 = pneg %p6645_p3 }
  0x82   : > { %p6651_p13 = pnand %p6649_p12, %p6646_p11 }
  0x84   : > { %6654 = shalt.err (!%p6651_p13)
}
  0x85   : > { %s6655_s30 = scalar_lea.vmem %s424_s21, 2048  ;;  %p6663_p7 = scmp.lt.s32.totalorder %s424_s21, %s424_s21 }
  0x86   : > { %p6656_p0 = scmp.ne.s32.totalorder %s424_s21, %s6655_s30  ;;  %p6664_p9 = scmp.lt.s32.totalorder %s6655_s30, %s6655_s30 }
  0x88   : > { %p6658_p2 = pnand %p6656_p0, %p6922_p8  ;;  %p6665_p4 = por %p6664_p9, %p6663_p7 }
  0x8a   : > { %p6659_p5 = pneg %p6658_p2 }
  0x8c   : > { %p6666_p10 = pnand %p6665_p4, %p6659_p5 }
  0x8e   : > { %6669 = shalt.err (!%p6666_p10)
}
  0x8f   : > { %s9085_s29 = smov 4   ;;  %s9086_s8 = smov 64  }
  0x90   : > { %6040 = dma.hbm_to_vmem [thread:$0]  (!%p6906_p6), %s9044_s11, 2048, %s424_s21, [#allocation13], %s9086_s8, %s9086_s8, %s9085_s29  }
  0x91   : > { %s5262_s18 = sadd.s32 4294967294, %s6778_s28   ;;  %s7035_s16 = sadd.s32 1, %s6778_s28  }
  0x92   : > { %s39_s5 = sadd.s32 1, %s6774_s27  ;;  %s36_s7 = ssub.s32 %s6778_s28, %s7035_s16 }
  0x93   : > { %p46_p8 = scmp.ne.s32.totalorder %s6774_s27, %s6770_s26  ;;  %p37_p1 = scmp.eq.s32.totalorder %s36_s7, 0 }
  0x94   : > { %p47_p3 = scmp.eq.s32.totalorder %s6778_s28, 0  ;;  %p52_p11 = scmp.ne.s32.totalorder %s6770_s26, %s6766_s25 }
  0x95   : > { %p328_p12 = scmp.eq.s32.totalorder %s6890_s14, 1  ;;  %p9087_p0 = scmp.eq.s32.totalorder %s6890_s14, 0 }
  0x96   : > { %s7047_s17 = scalar_select %p37_p1, %s6774_s27, %s39_s5  }
  0x97   : > { %p48_p13 = por %p47_p3, %p46_p8  ;;  %p7051_p2 = por %p9087_p0, %p52_p11 }
  0x98   : > { %p7055_p6 = por %p328_p12, %p46_p8  ;;  %p334_p5 = scmp.eq.s32.totalorder %s5262_s18, 1 }
  0x99   : > { %p6054_p7 = scmp.lt.s32.totalorder %s6778_s28, 2  ;;  %s440_s22 = sand.u32 1, %s6774_s27  }
  0x9a   : > { %s9089_s21 = scalar_select %p7055_p6, 1, 0 }
  0x9b   : > { %p7061_p9 = por %p334_p5, %p52_p11  ;;  %s5270_s24 = sshll.u32 %s440_s22, 7 }
  0x9c   : > { %s5422_s19 = sshll.u32 %s6778_s28, 11  ;;  %s444_s20 = scalar_lea.vmem [#allocation3], %s5270_s24 }
  0x9d   : > { %s9090_s23 = scalar_select %p7061_p9, 1, 0 }
  0x9e   : > { %s7069_s8 = scalar_lea.hbm %s9033_s0, %s5422_s19  ;;  %s452_s1 = sshll.u32 %s444_s20, 4  ;;  %s7075_s1 = int_to_ptr.vmem [resolvable:$true] %s452_s1 }
  0x9f   : > { %p7071_p4 = pnand %p6054_p7, %p48_p13  ;;  %s7077_s5 = scalar_lea.sflag [#allocation4], %s440_s22 }
  0xa0   : > { %s6670_s7 = scalar_lea.hbm %s7069_s8, 2048  ;;  %s6675_s30 = scalar_lea.hbm %s9033_s0, 4096 }
  0xa1   : > { %p6671_p10 = scmp.ne.s32.totalorder %s7069_s8, %s6670_s7  ;;  %p6672_p8 = pneg %p7071_p4 }
  0xa2   : > { %p6676_p11 = scmp.lt.u32.totalorder %s7069_s8, %s9033_s0  ;;  %p6677_p12 = scmp.lt.u32.totalorder %s6675_s30, %s6670_s7 }
  0xa3   : > { %p6673_p1 = pnand %p6672_p8, %p6671_p10  ;;  %p6679_p0 = scmp.lt.u32.totalorder %s6670_s7, %s7069_s8 }
  0xa4   : > { %p6678_p13 = por %p6677_p12, %p6676_p11 }
  0xa5   : > { %p6674_p3 = pneg %p6673_p1 }
  0xa6   : > { %p6680_p5 = por %p6679_p0, %p6678_p13 }
  0xa8   : > { %p6681_p7 = pnand %p6680_p5, %p6674_p3 }
  0xaa   : > { %6684 = shalt.err (!%p6681_p7)
}
  0xab   : > { %s6685_s22 = scalar_lea.vmem %s7075_s1, 2048  ;;  %s6791_s24 = smov [#allocation3]  }
  0xac   : > { %p6686_p10 = scmp.ne.s32.totalorder %s7075_s1, %s6685_s22  ;;  %s6690_s19 = sshll.u32 %s6791_s24, 4  ;;  %s6691_s19 = int_to_ptr.vmem [resolvable:$false] %s6690_s19 }
  0xad   : > { %s6692_s29 = scalar_lea.vmem %s6691_s19, 4096  ;;  %p6693_p6 = scmp.lt.s32.totalorder %s7075_s1, %s6691_s19 }
  0xae   : > { %p6688_p1 = pnand %p6686_p10, %p6672_p8  ;;  %p6694_p11 = scmp.lt.s32.totalorder %s6692_s29, %s6685_s22 }
  0xb0   : > { %p6689_p9 = pneg %p6688_p1  ;;  %p6695_p12 = por %p6694_p11, %p6693_p6 }
  0xb2   : > { %p6696_p13 = pnand %p6695_p12, %p6689_p9 }
  0xb4   : > { %6699 = shalt.err (!%p6696_p13)
}
  0xb5   : > { %6044 = dma.hbm_to_vmem [thread:$0]  (!%p7071_p4), %s7069_s8, 2048, %s7075_s1, %s7077_s5, %s9084_s10, %s9084_s10, %s9083_s13  }
  0xb6   : > { %p9092_p8 = scmp.ne.s32.totalorder %s9078_s15, 0 }
  0xb8   : > { %464 = sbr.rel (%p9092_p8) target bundleno = 4445 (0x115d), region = 72 }
  0xbf   : > { %s7111_s7 = sand.u32 1, %s6770_s26  }
  0xc0   : > { %s5275_s30 = sshll.u32 %s7111_s7, 7  ;;  %s467_s20 = scalar_lea.sflag [#allocation4], %s7111_s7 }
  0xc1   : > { %s7117_s18 = scalar_lea.vmem [#allocation3], %s5275_s30 }
  0xc2   : > { %6745 = dma.done.wait (%p7051_p2), %s467_s20, 2048  }
  0xc3   : > { %6747 = vsyncadd (%p7051_p2), %s467_s20, 4294965248  ;;  %p9093_p6 = scmp.eq.s32.totalorder %s6890_s14, 0 }
  0xc5   : > { %6749 = dma.done.wait (%p9093_p6), [#allocation7], 3584   ;;  %p9094_p9 = pmov %p9093_p6 }
  0xc6   : > { %p9095_p4 = pmov %p9093_p6 }
  0xc7   : > { %6751 = vsyncadd (%p9094_p9), [#allocation7], 4294963712 }
  0xc8   : > { %6753 = dma.done.wait (%p9095_p4), [#allocation10], 3072   ;;  %p9096_p3 = pmov %p9095_p4 }
  0xca   : > { %6755 = vsyncadd (%p9096_p3), [#allocation10], 4294964224  ;;  %p9097_p0 = pmov %p9096_p3 }
  0xcc   : > { %6757 = dma.done.wait (%p9097_p0), [#allocation13], 2048   ;;  %p9098_p5 = pmov %p9097_p0 }
  0xcd   : > { %v7136_v0 = vld [vmem:[%s7117_s18] sm:$0xff]  ;;  %v7139_v1 = vld [vmem:[%s7117_s18 + $0x10] sm:$0xff]  ;;  %v7142_v2 = vld [vmem:[%s7117_s18 + $0x8] sm:$0xff]  ;;  %v9059_v54 = vmov 0   ;;  %vm1111_vm0 = vcmask 261120   ;;  %s6793_s8 = smov 96  }
  0xce   : > { %6759 = vsyncadd (%p9098_p5), [#allocation13], 4294965248  ;;  %v552_v3 = vmul.f32 %v7136_v0, %v7136_v0  ;;  %v554_v4 = vmul.f32 %v7139_v1, %v7139_v1  ;;  %v7149_v5 = vld [vmem:[%s7117_s18 + $0x18] sm:$0xff]  ;;  %v553_v6 = vmul.f32 %v7142_v2, %v7142_v2  ;;  %v7156_v8 = vld [vmem:[%s7117_s18 + $0x28] sm:$0xff]  ;;  %905 = vmatprep.mubr.bf16.mxu0 %v9059_v54  ;;  %s6794_s1 = smov 64   ;;  %s6795_s5 = smov 32  }
  0xcf   : > { %v555_v7 = vmul.f32 %v7149_v5, %v7149_v5  ;;  %v7159_v9 = vld [vmem:[%s7117_s18 + $0x20] sm:$0xff]  ;;  %v7162_v10 = vld [vmem:[%s7117_s18 + $0x38] sm:$0xff]  ;;  %v7165_v11 = vld [vmem:[%s7117_s18 + $0x30] sm:$0xff]  ;;  %v557_v14 = vmul.f32 %v7156_v8, %v7156_v8  ;;  %vm2568_vm1 = vcmask 523520   ;;  %vm3353_vm2 = vcmask 785920   ;;  %s9131_s20 = sld [smem:[#allocation34_spill]] }
  0xd0   : > { %568 = vadd.xlane.f32.xlu0 %v552_v3  ;;  %572 = vadd.xlane.f32.xlu1 %v554_v4  ;;  %v6110_v12 = vld [vmem:[#allocation8 + $0x4] ss:$12 sps:$4 sm:$0xff]   ;;  %v6112_v13 = vld [vmem:[#allocation8] ss:$12 sps:$4 sm:$0xff]   ;;  %v556_v15 = vmul.f32 %v7159_v9, %v7159_v9  ;;  %v6113_v16 = vld [vmem:[#allocation8 + $0x8] ss:$12 sps:$4 sm:$0xff]   ;;  %v559_v22 = vmul.f32 %v7162_v10, %v7162_v10  ;;  %v558_v23 = vmul.f32 %v7165_v11, %v7165_v11 }
  0xd1   : > { %873 = vmatprep.subr.bf16.mxu0 %v6110_v12  ;;  %v6114_v17 = vld [vmem:[#allocation8 + $0x1c] ss:$12 sps:$4 sm:$0xff]   ;;  %v6116_v18 = vld [vmem:[#allocation8 + $0x18] ss:$12 sps:$4 sm:$0xff]   ;;  %5649 = vmatprep.subr.bf16.mxu1 %v6113_v16  ;;  %v6117_v19 = vld [vmem:[#allocation8 + $0x20] ss:$12 sps:$4 sm:$0xff]  }
  0xd2   : > { %874 = vmatpush1.bf16.msra.mxu0 %v6112_v13  ;;  %v7172_v20 = vld [vmem:[%s7117_s18 + $0x48] sm:$0xff]  ;;  %v7175_v21 = vld [vmem:[%s7117_s18 + $0x40] sm:$0xff]  ;;  %5650 = vmatpush3.bf16.msra.mxu1 %v6113_v16  ;;  %v7182_v24 = vld [vmem:[%s7117_s18 + $0x58] sm:$0xff]  ;;  %vm4138_vm3 = vcmask 1048320   ;;  %s9132_s13 = sld [smem:[#allocation35_spill]]  ;;  %s9137_s22 = sld [smem:[#allocation37_spill]] }
  0xd3   : > { %875 = vmatprep.subr.bf16.mxu0 %v6114_v17  ;;  %5651 = vmatprep.subr.bf16.mxu1 %v6117_v19  ;;  %v7185_v25 = vld [vmem:[%s7117_s18 + $0x50] sm:$0xff]  ;;  %v561_v26 = vmul.f32 %v7172_v20, %v7172_v20  ;;  %v560_v27 = vmul.f32 %v7175_v21, %v7175_v21  ;;  %v6121_v30 = vld [vmem:[#allocation8 + $0x38] ss:$12 sps:$4 sm:$0xff]   ;;  %v7192_v31 = vld [vmem:[%s7117_s18 + $0x68] sm:$0xff]  ;;  %v563_v33 = vmul.f32 %v7182_v24, %v7182_v24  ;;  %s8935_s24 = scalar_lea.vmem [#allocation14], %s5275_s30  ;;  %s5424_s30 = sshll.u32 %s6890_s14, 11 }
  0xd4   : > { %570 = vadd.xlane.f32.xlu0 %v553_v6  ;;  %574 = vadd.xlane.f32.xlu1 %v555_v7  ;;  %v6118_v28 = vld [vmem:[#allocation8 + $0x34] ss:$12 sps:$4 sm:$0xff]   ;;  %v6120_v29 = vld [vmem:[#allocation8 + $0x30] ss:$12 sps:$4 sm:$0xff]   ;;  %v562_v34 = vmul.f32 %v7185_v25, %v7185_v25  ;;  %v6122_v35 = vld [vmem:[#allocation8 + $0x4c] ss:$12 sps:$4 sm:$0xff]   ;;  %v565_v40 = vmul.f32 %v7192_v31, %v7192_v31 }
  0xd5   : > { %v7195_v32 = vld [vmem:[%s7117_s18 + $0x60] sm:$0xff]  ;;  %v6124_v36 = vld [vmem:[#allocation8 + $0x48] ss:$12 sps:$4 sm:$0xff]   ;;  %v6125_v37 = vld [vmem:[#allocation8 + $0x50] ss:$12 sps:$4 sm:$0xff]   ;;  %s5141_s19 = sshll.u32 %s8935_s24, 4  ;;  %s8986_s19 = int_to_ptr.vmem [resolvable:$true] %s5141_s19 }
  0xd6   : > { %876 = vmatpush1.bf16.msra.mxu0 %v6116_v18  ;;  %5652 = vmatpush3.bf16.msra.mxu1 %v6117_v19  ;;  %v7202_v38 = vld [vmem:[%s7117_s18 + $0x78] sm:$0xff]  ;;  %v7205_v39 = vld [vmem:[%s7117_s18 + $0x70] sm:$0xff]  ;;  %v564_v41 = vmul.f32 %v7195_v32, %v7195_v32  ;;  %v6128_v43 = vld [vmem:[#allocation8 + $0x60] ss:$12 sps:$4 sm:$0xff]   ;;  %s5127_s14 = scalar_lea.sflag [#allocation5], %s7111_s7  ;;  %p9139_p7 = scmp.ne.s32.totalorder %s9089_s21, 0 }
  0xd7   : > { %877 = vmatprep.subr.bf16.mxu0 %v6118_v28  ;;  %5653 = vmatprep.subr.bf16.mxu1 %v6121_v30  ;;  %v6126_v42 = vld [vmem:[#allocation8 + $0x64] ss:$12 sps:$4 sm:$0xff]   ;;  %v6129_v44 = vld [vmem:[#allocation8 + $0x68] ss:$12 sps:$4 sm:$0xff]   ;;  %v6133_v46 = vld [vmem:[#allocation8 + $0x80] ss:$12 sps:$4 sm:$0xff]   ;;  %v567_v47 = vmul.f32 %v7202_v38, %v7202_v38  ;;  %v566_v48 = vmul.f32 %v7205_v39, %v7205_v39 }
  0xd8   : > { %578 = vadd.xlane.f32.xlu1 %v557_v14  ;;  %576 = vadd.xlane.f32.xlu0 %v556_v15  ;;  %v6130_v45 = vld [vmem:[#allocation8 + $0x7c] ss:$12 sps:$4 sm:$0xff]   ;;  %v6132_v49 = vld [vmem:[#allocation8 + $0x78] ss:$12 sps:$4 sm:$0xff]   ;;  %v6134_v50 = vld [vmem:[#allocation8 + $0x94] ss:$12 sps:$4 sm:$0xff]  }
  0xd9   : > { %v6136_v51 = vld [vmem:[#allocation8 + $0x90] ss:$12 sps:$4 sm:$0xff]   ;;  %v6137_v52 = vld [vmem:[#allocation8 + $0x98] ss:$12 sps:$4 sm:$0xff]   ;;  %v6140_v56 = vld [vmem:[#allocation8 + $0xa8] ss:$12 sps:$4 sm:$0xff]  }
  0xda   : > { %878 = vmatpush1.bf16.msra.mxu0 %v6120_v29  ;;  %5654 = vmatpush3.bf16.msra.mxu1 %v6121_v30  ;;  %v6138_v53 = vld [vmem:[#allocation8 + $0xac] ss:$12 sps:$4 sm:$0xff]   ;;  %v6141_v55 = vld [vmem:[#allocation8 + $0xb0] ss:$12 sps:$4 sm:$0xff]   ;;  %s6796_s10 = smov [#allocation14]  }
  0xdb   : > { %879 = vmatprep.subr.bf16.mxu0 %v6122_v35  ;;  %5655 = vmatprep.subr.bf16.mxu1 %v6125_v37  ;;  %s6704_s12 = sshll.u32 %s6796_s10, 4  ;;  %s6705_s12 = int_to_ptr.vmem [resolvable:$false] %s6704_s12 }
  0xdc   : > { %582 = vadd.xlane.f32.xlu1 %v559_v22  ;;  %580 = vadd.xlane.f32.xlu0 %v558_v23  ;;  %p6707_p11 = scmp.lt.s32.totalorder %s8986_s19, %s6705_s12 }
  0xde   : > { %880 = vmatpush1.bf16.msra.mxu0 %v6124_v36  ;;  %5656 = vmatpush3.bf16.msra.mxu1 %v6125_v37 }
  0xdf   : > { %881 = vmatprep.subr.bf16.mxu0 %v6126_v42  ;;  %5657 = vmatprep.subr.bf16.mxu1 %v6129_v44  ;;  %v7221_v42 = vld [vmem:[%s9035_s2] ss:$0 sm:$0xff] }
  0xe0   : > { %586 = vadd.xlane.f32.xlu1 %v561_v26  ;;  %584 = vadd.xlane.f32.xlu0 %v560_v27 }
  0xe2   : > { %882 = vmatpush1.bf16.msra.mxu0 %v6128_v43  ;;  %5658 = vmatpush3.bf16.msra.mxu1 %v6129_v44 }
  0xe3   : > { %883 = vmatprep.subr.bf16.mxu0 %v6130_v45  ;;  %5659 = vmatprep.subr.bf16.mxu1 %v6133_v46 }
  0xe4   : > { %590 = vadd.xlane.f32.xlu1 %v563_v33  ;;  %588 = vadd.xlane.f32.xlu0 %v562_v34 }
  0xe6   : > { %884 = vmatpush1.bf16.msra.mxu0 %v6132_v49  ;;  %5660 = vmatpush3.bf16.msra.mxu1 %v6133_v46 }
  0xe7   : > { %885 = vmatprep.subr.bf16.mxu0 %v6134_v50  ;;  %5661 = vmatprep.subr.bf16.mxu1 %v6137_v52 }
  0xe8   : > { %594 = vadd.xlane.f32.xlu1 %v565_v40  ;;  %592 = vadd.xlane.f32.xlu0 %v564_v41 }
  0xea   : > { %886 = vmatpush1.bf16.msra.mxu0 %v6136_v51  ;;  %5662 = vmatpush3.bf16.msra.mxu1 %v6137_v52 }
  0xeb   : > { %887 = vmatprep.subr.bf16.mxu0 %v6138_v53  ;;  %5663 = vmatprep.subr.bf16.mxu1 %v6141_v55 }
  0xec   : > { %598 = vadd.xlane.f32.xlu1 %v567_v47  ;;  %596 = vadd.xlane.f32.xlu0 %v566_v48 }
  0xee   : > { %888 = vmatpush1.bf16.msra.mxu0 %v6140_v56  ;;  %5664 = vmatpush3.bf16.msra.mxu1 %v6141_v55 }
 0x15d   : > { %v569_v57 = vpop.xlane.xlu0 %568  ;;  %v573_v58 = vpop.xlane.xlu1 %572 }
 0x15e   : > { %v601_v59 = vmul.f32 0.0078125, %v569_v57  ;;  %v603_v60 = vmul.f32 0.0078125, %v573_v58 }
 0x160   : > { %v617_v61 = vadd.f32 1e-06, %v601_v59  ;;  %v619_v62 = vadd.f32 1e-06, %v603_v60 }
 0x161   : > { %v571_v63 = vpop.xlane.xlu0 %570  ;;  %v575_v3 = vpop.xlane.xlu1 %574 }
 0x162   : > { %6190 = vrsqrt.f32 %v617_v61  ;;  %v602_v4 = vmul.f32 0.0078125, %v571_v63  ;;  %v604_v6 = vmul.f32 0.0078125, %v575_v3 }
 0x163   : > { %6192 = vrsqrt.f32 %v619_v62 }
 0x164   : > { %v618_v7 = vadd.f32 1e-06, %v602_v4  ;;  %v620_v12 = vadd.f32 1e-06, %v604_v6 }
 0x165   : > { %v579_v13 = vpop.xlane.xlu1 %578  ;;  %v577_v14 = vpop.xlane.xlu0 %576 }
 0x166   : > { %6194 = vrsqrt.f32 %v618_v7  ;;  %v606_v15 = vmul.f32 0.0078125, %v579_v13  ;;  %v605_v16 = vmul.f32 0.0078125, %v577_v14 }
 0x167   : > { %6196 = vrsqrt.f32 %v620_v12 }
 0x168   : > { %v622_v17 = vadd.f32 1e-06, %v606_v15  ;;  %v621_v18 = vadd.f32 1e-06, %v605_v16 }
 0x169   : > { %v583_v19 = vpop.xlane.xlu1 %582  ;;  %v581_v22 = vpop.xlane.xlu0 %580 }
 0x16a   : > { %6198 = vrsqrt.f32 %v622_v17  ;;  %v608_v23 = vmul.f32 0.0078125, %v583_v19  ;;  %v607_v26 = vmul.f32 0.0078125, %v581_v22 }
 0x16b   : > { %6200 = vrsqrt.f32 %v621_v18 }
 0x16c   : > { %v6191_v27 = vpop.eup %6190  ;;  %v624_v28 = vadd.f32 1e-06, %v608_v23  ;;  %v623_v29 = vadd.f32 1e-06, %v607_v26 }
 0x16d   : > { %v6193_v30 = vpop.eup %6192  ;;  %v587_v33 = vpop.xlane.xlu1 %586  ;;  %v649_v40 = vmul.f32 %v6191_v27, %v7136_v0 }
 0x16e   : > { %v585_v34 = vpop.xlane.xlu0 %584  ;;  %6202 = vrsqrt.f32 %v624_v28  ;;  %v651_v35 = vmul.f32 %v6193_v30, %v7139_v1  ;;  %v610_v36 = vmul.f32 0.0078125, %v587_v33 }
 0x16f   : > { %v609_v37 = vmul.f32 0.0078125, %v585_v34  ;;  %6204 = vrsqrt.f32 %v623_v29  ;;  %v672_v51 = vmul.f32 %v7221_v42, %v649_v40 }
 0x170   : > { %v6195_v41 = vpop.eup %6194  ;;  %v626_v43 = vadd.f32 1e-06, %v610_v36  ;;  %v674_v47 = vmul.f32 %v7221_v42, %v651_v35 }
 0x171   : > { %v625_v44 = vadd.f32 1e-06, %v609_v37  ;;  %v6197_v45 = vpop.eup %6196  ;;  %v650_v46 = vmul.f32 %v6195_v41, %v7142_v2  ;;  %v591_v48 = vpop.xlane.xlu1 %590 }
 0x172   : > { %v589_v1 = vpop.xlane.xlu0 %588  ;;  %v652_v49 = vmul.f32 %v6197_v45, %v7149_v5  ;;  %6206 = vrsqrt.f32 %v626_v43  ;;  %v612_v50 = vmul.f32 0.0078125, %v591_v48 }
 0x173   : > { %v611_v0 = vmul.f32 0.0078125, %v589_v1  ;;  %v673_v52 = vmul.f32 %v7221_v42, %v650_v46  ;;  %6208 = vrsqrt.f32 %v625_v44 }
 0x174   : > { %v6199_v53 = vpop.eup %6198  ;;  %v675_v55 = vmul.f32 %v7221_v42, %v652_v49  ;;  %v628_v56 = vadd.f32 1e-06, %v612_v50 }
 0x175   : > { %v627_v57 = vadd.f32 1e-06, %v611_v0  ;;  %v6201_v2 = vpop.eup %6200  ;;  %v688_v58 = vpack.c.bf16 %v673_v52, %v672_v51  ;;  %v654_v59 = vmul.f32 %v6199_v53, %v7156_v8  ;;  %v595_v60 = vpop.xlane.xlu1 %594  ;;  %v728_v53 = vld [vmem:[%s9037_s4] sm:$0x7] }
 0x176   : > { %v593_v61 = vpop.xlane.xlu0 %592  ;;  %v689_v5 = vpack.c.bf16 %v675_v55, %v674_v47  ;;  %v653_v62 = vmul.f32 %v6201_v2, %v7159_v9  ;;  %6210 = vrsqrt.f32 %v628_v56  ;;  %v614_v63 = vmul.f32 0.0078125, %v595_v60 }
 0x177   : > { %906 = vmatmul.mubr.bf16.vlgmr.msra.gmra.mrb[0].mxu0 %v688_v58  ;;  %5665 = vmatprep.mubr.bf16.mxu1 %v688_v58  ;;  %v677_v3 = vmul.f32 %v7221_v42, %v654_v59  ;;  %6212 = vrsqrt.f32 %v627_v57  ;;  %v613_v4 = vmul.f32 0.0078125, %v593_v61 }
 0x178   : > { %v6203_v6 = vpop.eup %6202  ;;  %5666 = vmatmul.mubr.bf16.vlgmr.msra.gmra.mrb[0].mxu1 %v689_v5  ;;  %915 = vmatprep.mubr.bf16.mxu0 %v9059_v54  ;;  %v676_v7 = vmul.f32 %v7221_v42, %v653_v62  ;;  %v630_v8 = vadd.f32 1e-06, %v614_v63 }
 0x179   : > { %v6205_v12 = vpop.eup %6204  ;;  %v656_v13 = vmul.f32 %v6203_v6, %v7162_v10  ;;  %v629_v14 = vadd.f32 1e-06, %v613_v4  ;;  %v599_v9 = vpop.xlane.xlu1 %598 }
 0x17a   : > { %v597_v15 = vpop.xlane.xlu0 %596  ;;  %v690_v16 = vpack.c.bf16 %v677_v3, %v676_v7  ;;  %v655_v17 = vmul.f32 %v6205_v12, %v7165_v11  ;;  %6214 = vrsqrt.f32 %v630_v8  ;;  %v616_v18 = vmul.f32 0.0078125, %v599_v9 }
 0x17b   : > { %v679_v19 = vmul.f32 %v7221_v42, %v656_v13  ;;  %6216 = vrsqrt.f32 %v629_v14  ;;  %v615_v22 = vmul.f32 0.0078125, %v597_v15 }
 0x17c   : > { %v6207_v23 = vpop.eup %6206  ;;  %5669 = vmatprep.mubr.bf16.mxu1 %v690_v16  ;;  %v678_v26 = vmul.f32 %v7221_v42, %v655_v17  ;;  %v632_v27 = vadd.f32 1e-06, %v616_v18 }
 0x17d   : > { %v6209_v28 = vpop.eup %6208  ;;  %v658_v10 = vmul.f32 %v6207_v23, %v7172_v20  ;;  %v631_v29 = vadd.f32 1e-06, %v615_v22 }
 0x17e   : > { %v691_v30 = vpack.c.bf16 %v679_v19, %v678_v26  ;;  %v657_v33 = vmul.f32 %v6209_v28, %v7175_v21  ;;  %6218 = vrsqrt.f32 %v632_v27 }
 0x17f   : > { %916 = vmatmul.mubr.bf16.gmra.mrb[4].mxu0 %v689_v5  ;;  %v681_v11 = vmul.f32 %v7221_v42, %v658_v10  ;;  %6220 = vrsqrt.f32 %v631_v29 }
 0x180   : > { %v6211_v34 = vpop.eup %6210  ;;  %925 = vmatprep.mubr.bf16.mxu0 %v9059_v54  ;;  %5670 = vmatmul.mubr.bf16.gmra.mrb[4].mxu1 %v691_v30  ;;  %v680_v35 = vmul.f32 %v7221_v42, %v657_v33 }
 0x181   : > { %v6213_v36 = vpop.eup %6212  ;;  %v660_v37 = vmul.f32 %v6211_v34, %v7182_v24 }
 0x182   : > { %v692_v40 = vpack.c.bf16 %v681_v11, %v680_v35  ;;  %v659_v20 = vmul.f32 %v6213_v36, %v7185_v25 }
 0x183   : > { %v683_v41 = vmul.f32 %v7221_v42, %v660_v37 }
 0x184   : > { %v6215_v21 = vpop.eup %6214  ;;  %5673 = vmatprep.mubr.bf16.mxu1 %v692_v40  ;;  %v682_v43 = vmul.f32 %v7221_v42, %v659_v20 }
 0x185   : > { %v6217_v44 = vpop.eup %6216  ;;  %v662_v45 = vmul.f32 %v6215_v21, %v7192_v31 }
 0x186   : > { %v693_v46 = vpack.c.bf16 %v683_v41, %v682_v43  ;;  %v661_v47 = vmul.f32 %v6217_v44, %v7195_v32 }
 0x187   : > { %926 = vmatmul.mubr.bf16.gmra.mrb[8].mxu0 %v690_v16  ;;  %v685_v48 = vmul.f32 %v7221_v42, %v662_v45 }
 0x188   : > { %v6219_v1 = vpop.eup %6218  ;;  %935 = vmatprep.mubr.bf16.mxu0 %v9059_v54  ;;  %v684_v24 = vmul.f32 %v7221_v42, %v661_v47  ;;  %5674 = vmatmul.mubr.bf16.gmra.mrb[8].mxu1 %v693_v46 }
 0x189   : > { %v6221_v25 = vpop.eup %6220  ;;  %v664_v49 = vmul.f32 %v6219_v1, %v7202_v38  ;;  %v730_v38 = vlaneseq }
 0x18a   : > { %v694_v50 = vpack.c.bf16 %v685_v48, %v684_v24  ;;  %v663_v0 = vmul.f32 %v6221_v25, %v7205_v39 }
 0x18b   : > { %v687_v31 = vmul.f32 %v7221_v42, %v664_v49  ;;  %v7260_v39 = vshrl.u32 %v730_v38, 7 }
 0x18c   : > { %v686_v51 = vmul.f32 %v7221_v42, %v663_v0  ;;  %5677 = vmatprep.mubr.bf16.mxu1 %v694_v50 }
 0x18d   : > { %9099 = vst [vmem:[#allocation20_spill] sm:$0xff] %v7260_v39  ;;  %v740_v42 = vsub.s32 2, %v7260_v39  ;;  %v9058_v52 = vsub.s32 0, %v7260_v39  ;;  %v9057_v55 = vsub.s32 1, %v7260_v39 }
 0x18e   : > { %v695_v32 = vpack.c.bf16 %v687_v31, %v686_v51 }
 0x18f   : > { %936 = vmatmul.mubr.bf16.gmra.mrb[12].mxu0 %v691_v30  ;;  %v7268_v56 = vrot.slane %v728_v53, %v740_v42  ;;  %v7272_v57 = vrot.slane %v728_v53, %v9058_v52  ;;  %v7276_v58 = vrot.slane %v728_v53, %v9057_v55 }
 0x190   : > { %945 = vmatprep.mubr.bf16.mxu0 %v9059_v54  ;;  %5678 = vmatmul.mubr.bf16.gmra.mrb[12].mxu1 %v695_v32 }
 0x197   : > { %946 = vmatmul.mubr.bf16.gmra.mrb[16].mxu0 %v692_v40 }
 0x198   : > { %955 = vmatprep.mubr.bf16.mxu0 %v9059_v54 }
 0x19f   : > { %956 = vmatmul.mubr.bf16.gmra.mrb[20].mxu0 %v693_v46 }
 0x1a0   : > { %965 = vmatprep.mubr.bf16.mxu0 %v9059_v54 }
 0x1a7   : > { %966 = vmatmul.mubr.bf16.gmra.mrb[24].mxu0 %v694_v50 }
 0x1a8   : > { %975 = vmatprep.mubr.bf16.mxu0 %v9059_v54 }
 0x1af   : > { %976 = vmatmul.mubr.bf16.gmra.mrb[28].mxu0 %v695_v32 }
 0x24a   : > { %v907_v2 = vpop.f32.mrb[0].mxu0 }
 0x24b   : > { %v909_v59 = vpop.f32.mrb[1].mxu0  ;;  %v5667_v60 = vpop.f32.mrb[0].mxu1  ;;  %v908_v63 = vadd.f32 %v907_v2, %v7272_v57 }
 0x24c   : > { %v1029_v61 = vadd.f32 %v5667_v60, %v7268_v56  ;;  %v911_v5 = vpop.f32.mrb[2].mxu0  ;;  %v1020_v62 = vpop.f32.mrb[1].mxu1  ;;  %v910_v8 = vadd.f32 %v909_v59, %v7276_v58 }
 0x24d   : > { %v912_v3 = vadd.f32 %v911_v5, %v7272_v57  ;;  %v1021_v4 = vadd.f32 %v1020_v62, %v7268_v56  ;;  %v913_v6 = vpop.f32.mrb[3].mxu0  ;;  %v5668_v7 = vpop.f32.mrb[2].mxu1 }
 0x24e   : > { %v914_v12 = vadd.f32 %v913_v6, %v7276_v58  ;;  %v1032_v13 = vadd.f32 %v5668_v7, %v7268_v56  ;;  %v1023_v14 = vpop.f32.mrb[3].mxu1 }
 0x24f   : > { %v7285_v9 = vpack.c.bf16 %v912_v3, %v908_v63  ;;  %v1024_v15 = vadd.f32 %v1023_v14, %v7268_v56 }
 0x250   : > { %v7288_v16 = vpack.c.bf16 %v914_v12, %v910_v8  ;;  %v7290_v17 = vpack.c.bf16 %v1032_v13, %v1029_v61 }
 0x251   : > { %v7292_v18 = vpack.c.bf16 %v1024_v15, %v1021_v4  ;;  %5685 = vmatprep.mubr.msk.bf16.mxu1 %vm1111_vm0, %v7285_v9 }
 0x252   : > { %v917_v19 = vpop.f32.mrb[4].mxu0  ;;  %5969 = vmatprep.subr.msk.bf16.mxu1 %vm1111_vm0, %v7288_v16  ;;  %v1119_v22 = vsel %vm1111_vm0, %v7288_v16, 0 }
 0x253   : > { %v919_v23 = vpop.f32.mrb[5].mxu0  ;;  %5682 = vmatpush3.bf16.xpose.msra.mxu1 %v1119_v22  ;;  %v5671_v26 = vpop.f32.mrb[4].mxu1  ;;  %v918_v29 = vadd.f32 %v917_v19, %v7272_v57 }
 0x254   : > { %v921_v27 = vpop.f32.mrb[6].mxu0  ;;  %v1045_v28 = vadd.f32 %v5671_v26, %v7268_v56  ;;  %v1036_v10 = vpop.f32.mrb[5].mxu1  ;;  %v920_v35 = vadd.f32 %v919_v23, %v7276_v58 }
 0x255   : > { %v922_v30 = vadd.f32 %v921_v27, %v7272_v57  ;;  %v923_v33 = vpop.f32.mrb[7].mxu0  ;;  %v1037_v11 = vadd.f32 %v1036_v10, %v7268_v56  ;;  %v5672_v34 = vpop.f32.mrb[6].mxu1 }
 0x256   : > { %v924_v36 = vadd.f32 %v923_v33, %v7276_v58  ;;  %v1048_v37 = vadd.f32 %v5672_v34, %v7268_v56  ;;  %v1039_v40 = vpop.f32.mrb[7].mxu1 }
 0x257   : > { %v7307_v20 = vpack.c.bf16 %v922_v30, %v918_v29  ;;  %v1040_v41 = vadd.f32 %v1039_v40, %v7268_v56 }
 0x258   : > { %v7310_v21 = vpack.c.bf16 %v924_v36, %v920_v35  ;;  %v7312_v43 = vpack.c.bf16 %v1048_v37, %v1045_v28 }
 0x259   : > { %v7314_v44 = vpack.c.bf16 %v1040_v41, %v1037_v11 }
 0x25a   : > { %v927_v45 = vpop.f32.mrb[8].mxu0  ;;  %5970 = vmatprep.subr.msk.bf16.mxu1 %vm1111_vm0, %v7310_v21  ;;  %v1122_v46 = vsel %vm1111_vm0, %v7310_v21, 0 }
 0x25b   : > { %v929_v47 = vpop.f32.mrb[9].mxu0  ;;  %5684 = vmatpush3.bf16.xpose.msra.mxu1 %v1122_v46  ;;  %v5675_v48 = vpop.f32.mrb[8].mxu1  ;;  %v928_v49 = vadd.f32 %v927_v45, %v7272_v57 }
 0x25c   : > { %v931_v1 = vpop.f32.mrb[10].mxu0  ;;  %v1061_v24 = vadd.f32 %v5675_v48, %v7268_v56  ;;  %v1052_v25 = vpop.f32.mrb[9].mxu1  ;;  %v930_v32 = vadd.f32 %v929_v47, %v7276_v58 }
 0x25d   : > { %v932_v50 = vadd.f32 %v931_v1, %v7272_v57  ;;  %v933_v0 = vpop.f32.mrb[11].mxu0  ;;  %v1053_v31 = vadd.f32 %v1052_v25, %v7268_v56  ;;  %v5676_v51 = vpop.f32.mrb[10].mxu1 }
 0x25e   : > { %v934_v38 = vadd.f32 %v933_v0, %v7276_v58  ;;  %v1064_v42 = vadd.f32 %v5676_v51, %v7268_v56  ;;  %v1055_v53 = vpop.f32.mrb[11].mxu1 }
 0x25f   : > { %v7327_v2 = vpack.c.bf16 %v932_v50, %v928_v49  ;;  %v1056_v59 = vadd.f32 %v1055_v53, %v7268_v56 }
 0x260   : > { %v7330_v60 = vpack.c.bf16 %v934_v38, %v930_v32  ;;  %v7332_v61 = vpack.c.bf16 %v1064_v42, %v1061_v24 }
 0x261   : > { %v7334_v5 = vpack.c.bf16 %v1056_v59, %v1053_v31 }
 0x262   : > { %v937_v62 = vpop.f32.mrb[12].mxu0  ;;  %5686 = vmatmul.mubr.msk.bf16.vlgmr.msra.gmra.mrb[16].mxu1 %vm1111_vm0, %v7307_v20  ;;  %5971 = vmatprep.subr.msk.bf16.mxu1 %vm1111_vm0, %v7330_v60  ;;  %v1180_v63 = vsel %vm1111_vm0, %v7330_v60, 0 }
 0x263   : > { %v939_v3 = vpop.f32.mrb[13].mxu0  ;;  %5690 = vmatpush3.bf16.xpose.msra.mxu1 %v1180_v63  ;;  %5693 = vmatprep.mubr.msk.bf16.mxu1 %vm1111_vm0, %v7327_v2  ;;  %v5679_v4 = vpop.f32.mrb[12].mxu1  ;;  %v938_v12 = vadd.f32 %v937_v62, %v7272_v57 }
 0x264   : > { %v941_v6 = vpop.f32.mrb[14].mxu0  ;;  %v1077_v7 = vadd.f32 %v5679_v4, %v7268_v56  ;;  %v1068_v8 = vpop.f32.mrb[13].mxu1  ;;  %v940_v22 = vadd.f32 %v939_v3, %v7276_v58 }
 0x265   : > { %v942_v13 = vadd.f32 %v941_v6, %v7272_v57  ;;  %v943_v14 = vpop.f32.mrb[15].mxu0  ;;  %v1069_v15 = vadd.f32 %v1068_v8, %v7268_v56  ;;  %v5680_v19 = vpop.f32.mrb[14].mxu1 }
 0x266   : > { %v944_v23 = vadd.f32 %v943_v14, %v7276_v58  ;;  %v1080_v26 = vadd.f32 %v5680_v19, %v7268_v56  ;;  %v1071_v27 = vpop.f32.mrb[15].mxu1 }
 0x267   : > { %v7351_v28 = vpack.c.bf16 %v942_v13, %v938_v12  ;;  %v1072_v10 = vadd.f32 %v1071_v27, %v7268_v56 }
 0x268   : > { %v7354_v29 = vpack.c.bf16 %v944_v23, %v940_v22  ;;  %v7356_v30 = vpack.c.bf16 %v1080_v26, %v1077_v7 }
 0x269   : > { %v7358_v33 = vpack.c.bf16 %v1072_v10, %v1069_v15 }
 0x26a   : > { %v947_v11 = vpop.f32.mrb[16].mxu0  ;;  %5972 = vmatprep.subr.msk.bf16.mxu1 %vm1111_vm0, %v7354_v29  ;;  %v1183_v34 = vsel %vm1111_vm0, %v7354_v29, 0 }
 0x26b   : > { %v949_v35 = vpop.f32.mrb[17].mxu0  ;;  %5692 = vmatpush3.bf16.xpose.msra.mxu1 %v1183_v34  ;;  %v948_v37 = vadd.f32 %v947_v11, %v7272_v57 }
 0x26c   : > { %v951_v36 = vpop.f32.mrb[18].mxu0  ;;  %v950_v41 = vadd.f32 %v949_v35, %v7276_v58 }
 0x26d   : > { %v952_v56 = vadd.f32 %v951_v36, %v7272_v57  ;;  %v953_v40 = vpop.f32.mrb[19].mxu0 }
 0x26e   : > { %v954_v45 = vadd.f32 %v953_v40, %v7276_v58  ;;  %v7432_v40 = vld [vmem:[#allocation6] sm:$0xff] }
 0x26f   : > { %v7368_v46 = vpack.c.bf16 %v952_v56, %v948_v37  ;;  %9100 = vst [vmem:[#allocation21_spill] sm:$0xff] %v7432_v40 }
 0x270   : > { %v7370_v47 = vpack.c.bf16 %v954_v45, %v950_v41 }
 0x271   : > { %5701 = vmatprep.mubr.msk.bf16.mxu0 %vm1111_vm0, %v7368_v46 }
 0x272   : > { %v957_v48 = vpop.f32.mrb[20].mxu0  ;;  %5694 = vmatmul.mubr.msk.bf16.vlgmr.msra.gmra.mrb[20].mxu1 %vm1111_vm0, %v7351_v28  ;;  %5973 = vmatprep.subr.msk.bf16.mxu0 %vm1111_vm0, %v7370_v47  ;;  %v1241_v1 = vsel %vm1111_vm0, %v7370_v47, 0 }
 0x273   : > { %v959_v24 = vpop.f32.mrb[21].mxu0  ;;  %5698 = vmatpush3.bf16.xpose.msra.mxu0 %v1241_v1  ;;  %v958_v49 = vadd.f32 %v957_v48, %v7272_v57  ;;  %v7437_v1 = vld [vmem:[#allocation6 + $0x10] sm:$0xff] }
 0x274   : > { %v961_v25 = vpop.f32.mrb[22].mxu0  ;;  %v960_v31 = vadd.f32 %v959_v24, %v7276_v58  ;;  %9101 = vst [vmem:[#allocation22_spill] sm:$0xff] %v7437_v1  ;;  %v7439_v24 = vld [vmem:[#allocation6 + $0x8] sm:$0xff] }
 0x275   : > { %v962_v50 = vadd.f32 %v961_v25, %v7272_v57  ;;  %v963_v0 = vpop.f32.mrb[23].mxu0  ;;  %9102 = vst [vmem:[#allocation23_spill] sm:$0xff] %v7439_v24 }
 0x276   : > { %v964_v51 = vadd.f32 %v963_v0, %v7276_v58 }
 0x277   : > { %v7384_v32 = vpack.c.bf16 %v962_v50, %v958_v49 }
 0x278   : > { %v7386_v38 = vpack.c.bf16 %v964_v51, %v960_v31  ;;  %v7449_v31 = vld [vmem:[#allocation6 + $0x18] sm:$0xff] }
 0x279   : > { %9103 = vst [vmem:[#allocation24_spill] sm:$0xff] %v7449_v31 }
 0x27a   : > { %v967_v42 = vpop.f32.mrb[24].mxu0  ;;  %5974 = vmatprep.subr.msk.bf16.mxu0 %vm1111_vm0, %v7386_v38  ;;  %v1244_v53 = vsel %vm1111_vm0, %v7386_v38, 0 }
 0x27b   : > { %v969_v59 = vpop.f32.mrb[25].mxu0  ;;  %5700 = vmatpush3.bf16.xpose.msra.mxu0 %v1244_v53  ;;  %v968_v63 = vadd.f32 %v967_v42, %v7272_v57 }
 0x27c   : > { %v971_v62 = vpop.f32.mrb[26].mxu0  ;;  %5713 = vmatprep.subr.bf16.mxu0 %v7292_v18  ;;  %v970_v6 = vadd.f32 %v969_v59, %v7276_v58 }
 0x27d   : > { %v972_v3 = vadd.f32 %v971_v62, %v7272_v57  ;;  %v973_v4 = vpop.f32.mrb[27].mxu0 }
 0x27e   : > { %v974_v7 = vadd.f32 %v973_v4, %v7276_v58 }
 0x27f   : > { %v7397_v8 = vpack.c.bf16 %v972_v3, %v968_v63 }
 0x280   : > { %v7399_v12 = vpack.c.bf16 %v974_v7, %v970_v6 }
 0x281   : > { %5709 = vmatprep.mubr.msk.bf16.mxu1 %vm1111_vm0, %v7397_v8 }
 0x282   : > { %v977_v13 = vpop.f32.mrb[28].mxu0  ;;  %5702 = vmatmul.mubr.msk.bf16.vlgmr.msra.gmra.mrb[32].mxu0 %vm1111_vm0, %v7384_v32  ;;  %5975 = vmatprep.subr.msk.bf16.mxu1 %vm1111_vm0, %v7399_v12  ;;  %v1302_v14 = vsel %vm1111_vm0, %v7399_v12, 0 }
 0x283   : > { %v978_v15 = vadd.f32 %v977_v13, %v7272_v57  ;;  %v979_v19 = vpop.f32.mrb[29].mxu0  ;;  %5706 = vmatpush3.bf16.xpose.msra.mxu1 %v1302_v14  ;;  %5714 = vmatpush3.bf16.msra.mxu0 %v7292_v18 }
 0x284   : > { %v981_v22 = vpop.f32.mrb[30].mxu0  ;;  %5715 = vmatprep.subr.bf16.mxu0 %v7290_v17  ;;  %v980_v27 = vadd.f32 %v979_v19, %v7276_v58 }
 0x285   : > { %v982_v23 = vadd.f32 %v981_v22, %v7272_v57  ;;  %v983_v26 = vpop.f32.mrb[31].mxu0 }
 0x286   : > { %v984_v10 = vadd.f32 %v983_v26, %v7276_v58 }
 0x287   : > { %v7415_v11 = vpack.c.bf16 %v982_v23, %v978_v15  ;;  %5716 = vmatpush3.bf16.msra.mxu0 %v7290_v17 }
 0x288   : > { %v7418_v34 = vpack.c.bf16 %v984_v10, %v980_v27  ;;  %5729 = vmatprep.subr.bf16.mxu0 %v7334_v5 }
 0x28a   : > { %5976 = vmatprep.subr.msk.bf16.mxu1 %vm1111_vm0, %v7418_v34  ;;  %v1305_v35 = vsel %vm1111_vm0, %v7418_v34, 0 }
 0x28b   : > { %5708 = vmatpush3.bf16.xpose.msra.mxu1 %v1305_v35 }
 0x28c   : > { %5721 = vmatprep.subr.bf16.mxu1 %v7314_v44 }
 0x292   : > { %5710 = vmatmul.mubr.msk.bf16.vlgmr.msra.gmra.mrb[24].mxu1 %vm1111_vm0, %v7415_v11 }
 0x293   : > { %5722 = vmatpush3.bf16.msra.mxu1 %v7314_v44 }
 0x294   : > { %5723 = vmatprep.subr.bf16.mxu1 %v7312_v43 }
 0x297   : > { %5724 = vmatpush3.bf16.msra.mxu1 %v7312_v43 }
 0x298   : > { %5737 = vmatprep.subr.bf16.mxu1 %v7358_v33 }
 0x335   : > { %v5687_v57 = vpop.f32.mrb[16].mxu1 }
 0x336   : > { %v1158_v58 = vpop.f32.mrb[17].mxu1 }
 0x337   : > { %v5688_v36 = vpop.f32.mrb[18].mxu1  ;;  %v1159_v53 = vadd.f32 %v1158_v58, %v7432_v40 }
 0x338   : > { %v1161_v37 = vpop.f32.mrb[19].mxu1 }
 0x339   : > { %v7460_v62 = vadd.f32 %v1161_v37, %v7439_v24  ;;  %v1356_v3 = vsel %vm1111_vm0, %v1159_v53, -inf }
 0x33b   : > { %v1359_v4 = vsel %vm1111_vm0, %v7460_v62, -inf }
 0x345   : > { %v5695_v56 = vpop.f32.mrb[20].mxu1 }
 0x346   : > { %v1219_v41 = vpop.f32.mrb[21].mxu1  ;;  %v7442_v49 = vadd.f32 %v5695_v56, %v7437_v1  ;;  %v1167_v56 = vadd.f32 %v5687_v57, %v7437_v1 }
 0x347   : > { %v7435_v45 = vadd.f32 %v1219_v41, %v7432_v40  ;;  %v5696_v48 = vpop.f32.mrb[22].mxu1 }
 0x348   : > { %v1222_v25 = vpop.f32.mrb[23].mxu1  ;;  %v7452_v51 = vadd.f32 %v5696_v48, %v7449_v31  ;;  %v1374_v59 = vsel %vm1111_vm0, %v7442_v49, -inf  ;;  %v1170_v48 = vadd.f32 %v5688_v36, %v7449_v31 }
 0x349   : > { %v7445_v50 = vadd.f32 %v1222_v25, %v7439_v24  ;;  %v1368_v0 = vsel %vm1111_vm0, %v7435_v45, -inf }
 0x34a   : > { %1369 = vmax.xlane.f32.xlu0 %v1368_v0  ;;  %v1377_v63 = vsel %vm1111_vm0, %v7452_v51, -inf  ;;  %v1365_v57 = vsel %vm1111_vm0, %v1170_v48, -inf }
 0x34b   : > { %v1371_v42 = vsel %vm1111_vm0, %v7445_v50, -inf }
 0x34c   : > { %1372 = vmax.xlane.f32.xlu1 %v1371_v42  ;;  %v1362_v42 = vsel %vm1111_vm0, %v1167_v56, -inf }
 0x34e   : > { %1375 = vmax.xlane.f32.xlu0 %v1374_v59 }
 0x350   : > { %1378 = vmax.xlane.f32.xlu1 %v1377_v63 }
 0x352   : > { %1357 = vmax.xlane.f32.xlu0 %v1356_v3 }
 0x354   : > { %1360 = vmax.xlane.f32.xlu1 %v1359_v4 }
 0x355   : > { %v5703_v6 = vpop.f32.mrb[32].mxu0 }
 0x356   : > { %v1280_v7 = vpop.f32.mrb[33].mxu0  ;;  %v1289_v63 = vadd.f32 %v5703_v6, %v7437_v1 }
 0x357   : > { %v5704_v13 = vpop.f32.mrb[34].mxu0  ;;  %v7490_v0 = vadd.f32 %v1280_v7, %v7432_v40 }
 0x358   : > { %v1283_v14 = vpop.f32.mrb[35].mxu0  ;;  %v1292_v3 = vadd.f32 %v5704_v13, %v7449_v31  ;;  %v1386_v7 = vsel %vm1111_vm0, %v1289_v63, -inf }
 0x359   : > { %v7494_v59 = vadd.f32 %v1283_v14, %v7439_v24  ;;  %v1380_v36 = vsel %vm1111_vm0, %v7490_v0, -inf }
 0x35a   : > { %v1389_v14 = vsel %vm1111_vm0, %v1292_v3, -inf }
 0x35b   : > { %v1383_v4 = vsel %vm1111_vm0, %v7494_v59, -inf }
 0x365   : > { %v5711_v15 = vpop.f32.mrb[24].mxu1 }
 0x366   : > { %v7468_v19 = vadd.f32 %v5711_v15, %v7437_v1  ;;  %v1341_v22 = vpop.f32.mrb[25].mxu1 }
 0x367   : > { %v5712_v23 = vpop.f32.mrb[26].mxu1  ;;  %v7471_v26 = vadd.f32 %v1341_v22, %v7432_v40 }
 0x368   : > { %v7474_v27 = vadd.f32 %v5712_v23, %v7449_v31  ;;  %v1344_v10 = vpop.f32.mrb[27].mxu1  ;;  %v1398_v35 = vsel %vm1111_vm0, %v7468_v19, -inf }
 0x369   : > { %1399 = vmax.xlane.f32.xlu0 %v1398_v35  ;;  %v7479_v58 = vadd.f32 %v1344_v10, %v7439_v24  ;;  %v1392_v41 = vsel %vm1111_vm0, %v7471_v26, -inf }
 0x36a   : > { %v1401_v37 = vsel %vm1111_vm0, %v7474_v27, -inf }
 0x36b   : > { %1402 = vmax.xlane.f32.xlu1 %v1401_v37  ;;  %v1395_v25 = vsel %vm1111_vm0, %v7479_v58, -inf }
 0x36d   : > { %1393 = vmax.xlane.f32.xlu0 %v1392_v41 }
 0x36f   : > { %1396 = vmax.xlane.f32.xlu1 %v1395_v25 }
 0x371   : > { %1363 = vmax.xlane.f32.xlu0 %v1362_v42 }
 0x373   : > { %1366 = vmax.xlane.f32.xlu1 %v1365_v57 }
 0x375   : > { %1381 = vmax.xlane.f32.xlu0 %v1380_v36 }
 0x377   : > { %1384 = vmax.xlane.f32.xlu1 %v1383_v4 }
 0x379   : > { %1387 = vmax.xlane.f32.xlu0 %v1386_v7 }
 0x37b   : > { %1390 = vmax.xlane.f32.xlu1 %v1389_v14 }
 0x3d7   : > { %v1370_v15 = vpop.xlane.xlu0 %1369 }
 0x3d9   : > { %v1373_v22 = vpop.xlane.xlu1 %1372 }
 0x3db   : > { %v1376_v23 = vpop.xlane.xlu0 %1375 }
 0x3dc   : > { %v1410_v55 = vsub.f32 %v7442_v49, %v1376_v23 }
 0x3dd   : > { %v1379_v6 = vpop.xlane.xlu1 %1378 }
 0x3de   : > { %v1411_v24 = vsub.f32 %v7452_v51, %v1379_v6  ;;  %v1432_v1 = vmul.f32 1.442695, %v1410_v55 }
 0x3df   : > { %v1358_v10 = vpop.xlane.xlu0 %1357 }
 0x3e0   : > { %v1404_v25 = vsub.f32 %v1159_v53, %v1358_v10  ;;  %v1408_v10 = vsub.f32 %v7435_v45, %v1370_v15 }
 0x3e1   : > { %v1361_v35 = vpop.xlane.xlu1 %1360 }
 0x3e2   : > { %v1405_v36 = vsub.f32 %v7460_v62, %v1361_v35  ;;  %v1420_v7 = vmul.f32 1.442695, %v1404_v25  ;;  %v1434_v35 = vmul.f32 1.442695, %v1411_v24  ;;  %v1428_v23 = vmul.f32 1.442695, %v1408_v10 }
 0x3e4   : > { %v1422_v31 = vmul.f32 1.442695, %v1405_v36 }
 0x3f6   : > { %v1400_v37 = vpop.xlane.xlu0 %1399 }
 0x3f8   : > { %v7505_v41 = vpop.xlane.xlu1 %1402 }
 0x3fa   : > { %v7507_v13 = vpop.xlane.xlu0 %1393 }
 0x3fc   : > { %v7509_v42 = vpop.xlane.xlu1 %1396 }
 0x3fe   : > { %v1364_v57 = vpop.xlane.xlu0 %1363 }
 0x3ff   : > { %v1406_v4 = vsub.f32 %v1167_v56, %v1364_v57  ;;  %v1409_v56 = vsub.f32 %v7445_v50, %v1373_v22 }
 0x400   : > { %v1367_v14 = vpop.xlane.xlu1 %1366 }
 0x401   : > { %v1424_v52 = vmul.f32 1.442695, %v1406_v4  ;;  %v1407_v54 = vsub.f32 %v1170_v48, %v1367_v14  ;;  %v1430_v25 = vmul.f32 1.442695, %v1409_v56 }
 0x402   : > { %v1382_v39 = vpop.xlane.xlu0 %1381 }
 0x403   : > { %6222 = vpow2.f32 %v1424_v52  ;;  %v1426_v40 = vmul.f32 1.442695, %v1407_v54  ;;  %v1412_v54 = vsub.f32 %v7490_v0, %v1382_v39  ;;  %v1418_v39 = vsub.f32 %v7468_v19, %v1400_v37 }
 0x404   : > { %6224 = vpow2.f32 %v1420_v7  ;;  %v1385_v53 = vpop.xlane.xlu1 %1384  ;;  %v1416_v37 = vsub.f32 %v7471_v26, %v7507_v13 }
 0x405   : > { %6226 = vpow2.f32 %v1426_v40  ;;  %v1436_v0 = vmul.f32 1.442695, %v1412_v54  ;;  %v1448_v19 = vmul.f32 1.442695, %v1418_v39 }
 0x406   : > { %v1388_v62 = vpop.xlane.xlu0 %1387  ;;  %6228 = vpow2.f32 %v1422_v31  ;;  %v1444_v26 = vmul.f32 1.442695, %v1416_v37 }
 0x407   : > { %6230 = vpow2.f32 %v1432_v1  ;;  %v1414_v48 = vsub.f32 %v1289_v63, %v1388_v62  ;;  %v1413_v1 = vsub.f32 %v7494_v59, %v1385_v53  ;;  %v1419_v59 = vsub.f32 %v7474_v27, %v7505_v41 }
 0x408   : > { %v1391_v49 = vpop.xlane.xlu1 %1390  ;;  %6232 = vpow2.f32 %v1434_v35  ;;  %v1417_v41 = vsub.f32 %v7479_v58, %v7509_v42 }
 0x409   : > { %v1415_v51 = vsub.f32 %v1292_v3, %v1391_v49  ;;  %6234 = vpow2.f32 %v1428_v23  ;;  %v1440_v45 = vmul.f32 1.442695, %v1414_v48  ;;  %v1438_v22 = vmul.f32 1.442695, %v1413_v1 }
 0x40a   : > { %6236 = vpow2.f32 %v1430_v25  ;;  %v1450_v27 = vmul.f32 1.442695, %v1419_v59  ;;  %v1446_v10 = vmul.f32 1.442695, %v1417_v41 }
 0x40b   : > { %v1442_v50 = vmul.f32 1.442695, %v1415_v51  ;;  %6238 = vpow2.f32 %v1440_v45 }
 0x40d   : > { %v7516_v52 = vpop.eup %6222  ;;  %6240 = vpow2.f32 %v1442_v50 }
 0x40e   : > { %v7519_v55 = vpop.eup %6224  ;;  %v1458_v40 = vsel %vm1111_vm0, %v7516_v52, 0.0  ;;  %6242 = vpow2.f32 %v1436_v0 }
 0x40f   : > { %v7523_v24 = vpop.eup %6226  ;;  %1459 = vadd.xlane.f32.xlu0 %v1458_v40  ;;  %v1452_v3 = vsel %vm1111_vm0, %v7519_v55, 0.0  ;;  %6244 = vpow2.f32 %v1438_v22 }
 0x410   : > { %v1461_v31 = vsel %vm1111_vm0, %v7523_v24, 0.0  ;;  %v7528_v63 = vpop.eup %6228  ;;  %6246 = vpow2.f32 %v1448_v19 }
 0x411   : > { %1462 = vadd.xlane.f32.xlu1 %v1461_v31  ;;  %v7533_v15 = vpop.eup %6230  ;;  %v1455_v6 = vsel %vm1111_vm0, %v7528_v63, 0.0  ;;  %6248 = vpow2.f32 %v1450_v27 }
 0x412   : > { %v7539_v57 = vpop.eup %6232  ;;  %v1470_v36 = vsel %vm1111_vm0, %v7533_v15, 0.0  ;;  %6250 = vpow2.f32 %v1444_v26 }
 0x413   : > { %1453 = vadd.xlane.f32.xlu0 %v1452_v3  ;;  %v7545_v4 = vpop.eup %6234  ;;  %v1473_v7 = vsel %vm1111_vm0, %v7539_v57, 0.0  ;;  %6252 = vpow2.f32 %v1446_v10 }
 0x414   : > { %v7551_v14 = vpop.eup %6236  ;;  %v1464_v13 = vsel %vm1111_vm0, %v7545_v4, 0.0 }
 0x415   : > { %1456 = vadd.xlane.f32.xlu1 %v1455_v6  ;;  %v7555_v53 = vpop.eup %6238  ;;  %v1467_v58 = vsel %vm1111_vm0, %v7551_v14, 0.0 }
 0x416   : > { %v1482_v62 = vsel %vm1111_vm0, %v7555_v53, 0.0 }
 0x417   : > { %1471 = vadd.xlane.f32.xlu0 %v1470_v36  ;;  %v7559_v42 = vpop.eup %6240 }
 0x418   : > { %v7563_v56 = vpop.eup %6242  ;;  %v1485_v35 = vsel %vm1111_vm0, %v7559_v42, 0.0 }
 0x419   : > { %1474 = vadd.xlane.f32.xlu1 %v1473_v7  ;;  %v7567_v49 = vpop.eup %6244  ;;  %v1476_v23 = vsel %vm1111_vm0, %v7563_v56, 0.0 }
 0x41a   : > { %v7571_v48 = vpop.eup %6246  ;;  %v1479_v25 = vsel %vm1111_vm0, %v7567_v49, 0.0 }
 0x41b   : > { %1465 = vadd.xlane.f32.xlu0 %v1464_v13  ;;  %v7575_v51 = vpop.eup %6248  ;;  %v1494_v54 = vsel %vm1111_vm0, %v7571_v48, 0.0 }
 0x41c   : > { %v7579_v45 = vpop.eup %6250  ;;  %v1497_v40 = vsel %vm1111_vm0, %v7575_v51, 0.0 }
 0x41d   : > { %1468 = vadd.xlane.f32.xlu1 %v1467_v58  ;;  %v7583_v1 = vpop.eup %6252  ;;  %v1488_v50 = vsel %vm1111_vm0, %v7579_v45, 0.0 }
 0x41e   : > { %v1491_v31 = vsel %vm1111_vm0, %v7583_v1, 0.0 }
 0x41f   : > { %1483 = vadd.xlane.f32.xlu0 %v1482_v62 }
 0x421   : > { %1486 = vadd.xlane.f32.xlu1 %v1485_v35 }
 0x423   : > { %1477 = vadd.xlane.f32.xlu0 %v1476_v23 }
 0x425   : > { %1480 = vadd.xlane.f32.xlu1 %v1479_v25 }
 0x427   : > { %1495 = vadd.xlane.f32.xlu0 %v1494_v54 }
 0x429   : > { %1498 = vadd.xlane.f32.xlu1 %v1497_v40 }
 0x42b   : > { %1489 = vadd.xlane.f32.xlu0 %v1488_v50 }
 0x42d   : > { %1492 = vadd.xlane.f32.xlu1 %v1491_v31 }
 0x43e   : > { %1786 = vrot.lane.b32.xlu1 %v7310_v21, %s6793_s8 }
 0x441   : > { %1784 = vrot.lane.b32.xlu0 %v7288_v16, %s6793_s8 }
 0x442   : > { %1778 = vrot.lane.b32.xlu1 %v7285_v9, %s6793_s8 }
 0x445   : > { %1930 = vrot.lane.b32.xlu0 %v7370_v47, %s6793_s8 }
 0x446   : > { %1857 = vrot.lane.b32.xlu1 %v7330_v60, %s6793_s8 }
 0x449   : > { %1859 = vrot.lane.b32.xlu0 %v7354_v29, %s6793_s8 }
 0x44a   : > { %1780 = vrot.lane.b32.xlu1 %v7307_v20, %s6793_s8 }
 0x44d   : > { %1924 = vrot.lane.b32.xlu0 %v7368_v46, %s6793_s8 }
 0x44e   : > { %1932 = vrot.lane.b32.xlu1 %v7386_v38, %s6793_s8 }
 0x451   : > { %1926 = vrot.lane.b32.xlu0 %v7384_v32, %s6793_s8 }
 0x452   : > { %1851 = vrot.lane.b32.xlu1 %v7327_v2, %s6793_s8 }
 0x455   : > { %1853 = vrot.lane.b32.xlu0 %v7351_v28, %s6793_s8 }
 0x456   : > { %2003 = vrot.lane.b32.xlu1 %v7399_v12, %s6793_s8 }
 0x459   : > { %1997 = vrot.lane.b32.xlu0 %v7397_v8, %s6793_s8 }
 0x45a   : > { %2005 = vrot.lane.b32.xlu1 %v7418_v34, %s6793_s8 }
 0x45d   : > { %2254 = vrot.lane.b32.xlu0 %v7292_v18, %s6793_s8 }
 0x45e   : > { %1999 = vrot.lane.b32.xlu1 %v7415_v11, %s6793_s8 }
 0x461   : > { %2380 = vrot.lane.b32.xlu0 %v7334_v5, %s6793_s8 }
 0x462   : > { %2256 = vrot.lane.b32.xlu1 %v7290_v17, %s6793_s8 }
 0x465   : > { %2317 = vrot.lane.b32.xlu0 %v7314_v44, %s6793_s8 }
 0x466   : > { %2382 = vrot.lane.b32.xlu1 %v7332_v61, %s6793_s8 }
 0x469   : > { %2589 = vrot.lane.b32.xlu0 %v7288_v16, %s6794_s1 }
 0x46a   : > { %2319 = vrot.lane.b32.xlu1 %v7312_v43, %s6793_s8 }
 0x46e   : > { %2443 = vrot.lane.b32.xlu1 %v7358_v33, %s6793_s8 }
 0x49c   : > { %v1460_v39 = vpop.xlane.xlu0 %1459 }
 0x49e   : > { %v1463_v0 = vpop.xlane.xlu1 %1462 }
 0x49f   : > { %6254 = vrcp.f32 %v1463_v0 }
 0x4a0   : > { %v1454_v3 = vpop.xlane.xlu0 %1453 }
 0x4a1   : > { %6256 = vrcp.f32 %v1454_v3 }
 0x4a2   : > { %6258 = vrcp.f32 %v1460_v39  ;;  %v1457_v59 = vpop.xlane.xlu1 %1456 }
 0x4a3   : > { %6260 = vrcp.f32 %v1457_v59 }
 0x4a4   : > { %v1472_v22 = vpop.xlane.xlu0 %1471 }
 0x4a6   : > { %v1475_v6 = vpop.xlane.xlu1 %1474 }
 0x4a7   : > { %6262 = vrcp.f32 %v1475_v6 }
 0x4a8   : > { %v1466_v19 = vpop.xlane.xlu0 %1465 }
 0x4a9   : > { %6264 = vrcp.f32 %v1466_v19  ;;  %v6255_v37 = vpop.eup %6254 }
 0x4aa   : > { %6266 = vrcp.f32 %v1472_v22  ;;  %v1469_v36 = vpop.xlane.xlu1 %1468  ;;  %v1519_v13 = vmul.f32 %v6255_v37, %v7523_v24 }
 0x4ab   : > { %v6257_v27 = vpop.eup %6256  ;;  %6268 = vrcp.f32 %v1469_v36 }
 0x4ac   : > { %v6259_v41 = vpop.eup %6258  ;;  %v1484_v7 = vpop.xlane.xlu0 %1483  ;;  %v1516_v58 = vmul.f32 %v6257_v27, %v7519_v55 }
 0x4ad   : > { %v6261_v26 = vpop.eup %6260  ;;  %v1518_v35 = vmul.f32 %v6259_v41, %v7516_v52 }
 0x4ae   : > { %v1487_v10 = vpop.xlane.xlu1 %1486  ;;  %v1517_v62 = vmul.f32 %v6261_v26, %v7528_v63 }
 0x4af   : > { %6270 = vrcp.f32 %v1487_v10  ;;  %v1533_v54 = vpack.c.bf16 %v1519_v13, %v1518_v35 }
 0x4b0   : > { %v1478_v23 = vpop.xlane.xlu0 %1477  ;;  %v1532_v25 = vpack.c.bf16 %v1517_v62, %v1516_v58 }
 0x4b1   : > { %6272 = vrcp.f32 %v1478_v23  ;;  %v6263_v40 = vpop.eup %6262 }
 0x4b2   : > { %6274 = vrcp.f32 %v1484_v7  ;;  %v1481_v50 = vpop.xlane.xlu1 %1480  ;;  %5717 = vmatprep.mubr.msk.bf16.mxu0 %vm1111_vm0, %v1532_v25  ;;  %v1523_v52 = vmul.f32 %v6263_v40, %v7539_v57 }
 0x4b3   : > { %v6265_v31 = vpop.eup %6264  ;;  %6276 = vrcp.f32 %v1481_v50  ;;  %5718 = vmatmul.mubr.msk.bf16.vlgmr.msra.gmra.mrb[36].mxu0 %vm1111_vm0, %v1533_v54 }
 0x4b4   : > { %v6267_v24 = vpop.eup %6266  ;;  %5730 = vmatpush3.bf16.msra.mxu0 %v7334_v5  ;;  %v1496_v55 = vpop.xlane.xlu0 %1495  ;;  %v1520_v0 = vmul.f32 %v6265_v31, %v7545_v4 }
 0x4b5   : > { %v6269_v63 = vpop.eup %6268  ;;  %5731 = vmatprep.subr.bf16.mxu0 %v7332_v61  ;;  %v1522_v59 = vmul.f32 %v6267_v24, %v7533_v15 }
 0x4b6   : > { %v1499_v39 = vpop.xlane.xlu1 %1498  ;;  %v1521_v3 = vmul.f32 %v6269_v63, %v7551_v14 }
 0x4b7   : > { %6278 = vrcp.f32 %v1499_v39  ;;  %v1535_v19 = vpack.c.bf16 %v1523_v52, %v1522_v59 }
 0x4b8   : > { %5732 = vmatpush3.bf16.msra.mxu0 %v7332_v61  ;;  %v1490_v22 = vpop.xlane.xlu0 %1489  ;;  %v1534_v6 = vpack.c.bf16 %v1521_v3, %v1520_v0 }
 0x4b9   : > { %6280 = vrcp.f32 %v1490_v22  ;;  %v6271_v37 = vpop.eup %6270 }
 0x4ba   : > { %6282 = vrcp.f32 %v1496_v55  ;;  %v1493_v36 = vpop.xlane.xlu1 %1492  ;;  %5725 = vmatprep.mubr.msk.bf16.mxu1 %vm1111_vm0, %v1534_v6  ;;  %v1527_v27 = vmul.f32 %v6271_v37, %v7559_v42 }
 0x4bb   : > { %v6273_v57 = vpop.eup %6272  ;;  %6284 = vrcp.f32 %v1493_v36  ;;  %5726 = vmatmul.mubr.msk.bf16.vlgmr.msra.gmra.mrb[28].mxu1 %vm1111_vm0, %v1535_v19 }
 0x4bc   : > { %v6275_v4 = vpop.eup %6274  ;;  %5738 = vmatpush3.bf16.msra.mxu1 %v7358_v33  ;;  %v1785_v15 = vpop.permute.xlu0 %1784  ;;  %v1524_v7 = vmul.f32 %v6273_v57, %v7563_v56 }
 0x4bd   : > { %v6277_v14 = vpop.eup %6276  ;;  %5739 = vmatprep.subr.bf16.mxu1 %v7356_v30  ;;  %v1526_v13 = vmul.f32 %v6275_v4, %v7555_v53  ;;  %v1795_v0 = vsel %vm1111_vm0, %v1785_v15, 0 }
 0x4be   : > { %v1787_v41 = vpop.permute.xlu1 %1786  ;;  %v1525_v26 = vmul.f32 %v6277_v14, %v7567_v49 }
 0x4bf   : > { %v1537_v62 = vpack.c.bf16 %v1527_v27, %v1526_v13  ;;  %v1798_v59 = vsel %vm1111_vm0, %v1787_v41, 0 }
 0x4c0   : > { %5740 = vmatpush3.bf16.msra.mxu1 %v7356_v30  ;;  %v1931_v10 = vpop.permute.xlu0 %1930  ;;  %v1536_v58 = vpack.c.bf16 %v1525_v26, %v1524_v7 }
 0x4c1   : > { %5977 = vmatprep.subr.msk.bf16.mxu1 %vm1111_vm0, %v1785_v15  ;;  %5981 = vmatprep.subr.msk.bf16.mxu0 %vm1111_vm0, %v1931_v10  ;;  %v1941_v42 = vsel %vm1111_vm0, %v1931_v10, 0  ;;  %v6279_v35 = vpop.eup %6278 }
 0x4c2   : > { %v1779_v23 = vpop.permute.xlu1 %1778  ;;  %5733 = vmatprep.mubr.msk.bf16.mxu0 %vm1111_vm0, %v1536_v58  ;;  %v1531_v54 = vmul.f32 %v6279_v35, %v7575_v51 }
 0x4c3   : > { %v6281_v56 = vpop.eup %6280  ;;  %5734 = vmatmul.mubr.msk.bf16.vlgmr.msra.gmra.mrb[40].mxu0 %vm1111_vm0, %v1537_v62 }
 0x4c4   : > { %v6283_v49 = vpop.eup %6282  ;;  %5762 = vmatpush3.bf16.xpose.msra.mxu0 %v1941_v42  ;;  %v1860_v53 = vpop.permute.xlu0 %1859  ;;  %v1528_v50 = vmul.f32 %v6281_v56, %v7579_v45 }
 0x4c5   : > { %v6285_v25 = vpop.eup %6284  ;;  %v1530_v24 = vmul.f32 %v6283_v49, %v7571_v48  ;;  %v1871_v15 = vsel %vm1111_vm0, %v1860_v53, 0 }
 0x4c6   : > { %v1858_v40 = vpop.permute.xlu1 %1857  ;;  %v1529_v31 = vmul.f32 %v6285_v25, %v7583_v1 }
 0x4c7   : > { %v1539_v52 = vpack.c.bf16 %v1531_v54, %v1530_v24  ;;  %v1868_v36 = vsel %vm1111_vm0, %v1858_v40, 0 }
 0x4c8   : > { %v1925_v55 = vpop.permute.xlu0 %1924  ;;  %v1538_v63 = vpack.c.bf16 %v1529_v31, %v1528_v50 }
 0x4c9   : > { %5765 = vmatprep.mubr.msk.bf16.mxu0 %vm1111_vm0, %v1925_v55 }
 0x4ca   : > { %v1781_v39 = vpop.permute.xlu1 %1780  ;;  %5741 = vmatprep.mubr.msk.bf16.mxu1 %vm1111_vm0, %v1538_v63 }
 0x4cb   : > { %5742 = vmatmul.mubr.msk.bf16.vlgmr.msra.gmra.mrb[32].mxu1 %vm1111_vm0, %v1539_v52 }
 0x4cc   : > { %5746 = vmatpush3.bf16.xpose.msra.mxu1 %v1795_v0  ;;  %5749 = vmatprep.mubr.msk.bf16.mxu1 %vm1111_vm0, %v1779_v23  ;;  %v1927_v51 = vpop.permute.xlu0 %1926 }
 0x4cd   : > { %5978 = vmatprep.subr.msk.bf16.mxu1 %vm1111_vm0, %v1787_v41 }
 0x4ce   : > { %v1933_v45 = vpop.permute.xlu1 %1932 }
 0x4cf   : > { %5982 = vmatprep.subr.msk.bf16.mxu0 %vm1111_vm0, %v1933_v45  ;;  %v1944_v48 = vsel %vm1111_vm0, %v1933_v45, 0 }
 0x4d0   : > { %5764 = vmatpush3.bf16.xpose.msra.mxu0 %v1944_v48  ;;  %v1854_v1 = vpop.permute.xlu0 %1853  ;;  %v9105_v48 = vld [vmem:[#allocation21_spill] sm:$0xff] }
 0x4d2   : > { %v1852_v3 = vpop.permute.xlu1 %1851 }
 0x4d4   : > { %5748 = vmatpush3.bf16.xpose.msra.mxu1 %v1798_v59  ;;  %v1998_v22 = vpop.permute.xlu0 %1997 }
 0x4d5   : > { %5979 = vmatprep.subr.msk.bf16.mxu1 %vm1111_vm0, %v1858_v40 }
 0x4d6   : > { %v2004_v6 = vpop.permute.xlu1 %2003 }
 0x4d7   : > { %5766 = vmatmul.mubr.msk.bf16.vlgmr.msra.gmra.mrb[44].mxu0 %vm1111_vm0, %v1927_v51  ;;  %v2014_v27 = vsel %vm1111_vm0, %v2004_v6, 0 }
 0x4d8   : > { %v2255_v19 = vpop.permute.xlu0 %2254 }
 0x4d9   : > { %5777 = vmatprep.subr.bf16.mxu0 %v2255_v19 }
 0x4da   : > { %v2006_v37 = vpop.permute.xlu1 %2005  ;;  %5778 = vmatpush3.bf16.msra.mxu0 %v2255_v19 }
 0x4db   : > { %5750 = vmatmul.mubr.msk.bf16.vlgmr.msra.gmra.mrb[36].mxu1 %vm1111_vm0, %v1781_v39  ;;  %v2017_v41 = vsel %vm1111_vm0, %v2006_v37, 0  ;;  %v9104_v39 = vld [vmem:[#allocation22_spill] sm:$0xff] }
 0x4dc   : > { %5754 = vmatpush3.bf16.xpose.msra.mxu1 %v1868_v36  ;;  %5757 = vmatprep.mubr.msk.bf16.mxu1 %vm1111_vm0, %v1852_v3  ;;  %v7684_v14 = vpop.permute.xlu0 %2380  ;;  %v9106_v3 = vld [vmem:[#allocation24_spill] sm:$0xff] }
 0x4dd   : > { %5980 = vmatprep.subr.msk.bf16.mxu1 %vm1111_vm0, %v1860_v53 }
 0x4de   : > { %v2000_v57 = vpop.permute.xlu1 %1999 }
 0x4e0   : > { %v2318_v7 = vpop.permute.xlu0 %2317 }
 0x4e2   : > { %v2257_v4 = vpop.permute.xlu1 %2256 }
 0x4e3   : > { %5779 = vmatprep.subr.bf16.mxu0 %v2257_v4 }
 0x4e4   : > { %5756 = vmatpush3.bf16.xpose.msra.mxu1 %v1871_v15  ;;  %5780 = vmatpush3.bf16.msra.mxu0 %v2257_v4 }
 0x4e5   : > { %5983 = vmatprep.subr.msk.bf16.mxu1 %vm1111_vm0, %v2004_v6  ;;  %5793 = vmatprep.subr.bf16.mxu0 %v7684_v14 }
 0x4e6   : > { %v7693_v26 = vpop.permute.xlu1 %2382 }
 0x4ea   : > { %v2320_v13 = vpop.permute.xlu1 %2319 }
 0x4eb   : > { %5758 = vmatmul.mubr.msk.bf16.vlgmr.msra.gmra.mrb[40].mxu1 %vm1111_vm0, %v1854_v1 }
 0x4ec   : > { %5770 = vmatpush3.bf16.xpose.msra.mxu1 %v2014_v27  ;;  %5773 = vmatprep.mubr.msk.bf16.mxu1 %vm1111_vm0, %v1998_v22 }
 0x4ed   : > { %5984 = vmatprep.subr.msk.bf16.mxu1 %vm1111_vm0, %v2006_v37  ;;  %v9107_v37 = vld [vmem:[#allocation23_spill] sm:$0xff] }
 0x4ee   : > { %v7696_v10 = vpop.permute.xlu1 %2443 }
 0x4f4   : > { %5772 = vmatpush3.bf16.xpose.msra.mxu1 %v2017_v41 }
 0x4f5   : > { %5785 = vmatprep.subr.bf16.mxu1 %v2318_v7 }
 0x4fb   : > { %5774 = vmatmul.mubr.msk.bf16.vlgmr.msra.gmra.mrb[44].mxu1 %vm1111_vm0, %v2000_v57 }
 0x4fc   : > { %5786 = vmatpush3.bf16.msra.mxu1 %v2318_v7 }
 0x4fd   : > { %5787 = vmatprep.subr.bf16.mxu1 %v2320_v13 }
 0x500   : > { %5788 = vmatpush3.bf16.msra.mxu1 %v2320_v13 }
 0x501   : > { %5801 = vmatprep.subr.bf16.mxu1 %v7696_v10 }
 0x586   : > { %v5719_v58 = vpop.f32.mrb[36].mxu0 }
 0x587   : > { %1762 = vst.msk [vmem:[#allocation2 + $0x10] sm:$0xff] %vm1111_vm0, %v5719_v58  ;;  %v1580_v62 = vpop.f32.mrb[37].mxu0 }
 0x588   : > { %1760 = vst.msk [vmem:[#allocation2] sm:$0xff] %vm1111_vm0, %v1580_v62  ;;  %v5720_v42 = vpop.f32.mrb[38].mxu0 }
 0x589   : > { %1763 = vst.msk [vmem:[#allocation2 + $0x18] sm:$0xff] %vm1111_vm0, %v5720_v42  ;;  %v1583_v35 = vpop.f32.mrb[39].mxu0 }
 0x58a   : > { %1761 = vst.msk [vmem:[#allocation2 + $0x8] sm:$0xff] %vm1111_vm0, %v1583_v35 }
 0x58e   : > { %v5727_v23 = vpop.f32.mrb[28].mxu1 }
 0x58f   : > { %1766 = vst.msk [vmem:[#allocation2 + $0x30] sm:$0xff] %vm1111_vm0, %v5727_v23  ;;  %v1635_v56 = vpop.f32.mrb[29].mxu1 }
 0x590   : > { %1764 = vst.msk [vmem:[#allocation2 + $0x20] sm:$0xff] %vm1111_vm0, %v1635_v56  ;;  %v5728_v49 = vpop.f32.mrb[30].mxu1 }
 0x591   : > { %1767 = vst.msk [vmem:[#allocation2 + $0x38] sm:$0xff] %vm1111_vm0, %v5728_v49  ;;  %v1638_v53 = vpop.f32.mrb[31].mxu1 }
 0x592   : > { %1765 = vst.msk [vmem:[#allocation2 + $0x28] sm:$0xff] %vm1111_vm0, %v1638_v53 }
 0x596   : > { %v5735_v25 = vpop.f32.mrb[40].mxu0 }
 0x597   : > { %1770 = vst.msk [vmem:[#allocation2 + $0x50] sm:$0xff] %vm1111_vm0, %v5735_v25  ;;  %v1690_v54 = vpop.f32.mrb[41].mxu0 }
 0x598   : > { %1768 = vst.msk [vmem:[#allocation2 + $0x40] sm:$0xff] %vm1111_vm0, %v1690_v54  ;;  %v5736_v40 = vpop.f32.mrb[42].mxu0 }
 0x599   : > { %1771 = vst.msk [vmem:[#allocation2 + $0x58] sm:$0xff] %vm1111_vm0, %v5736_v40  ;;  %v1693_v50 = vpop.f32.mrb[43].mxu0 }
 0x59a   : > { %1769 = vst.msk [vmem:[#allocation2 + $0x48] sm:$0xff] %vm1111_vm0, %v1693_v50 }
 0x59e   : > { %v5743_v31 = vpop.f32.mrb[32].mxu1 }
 0x59f   : > { %1774 = vst.msk [vmem:[#allocation2 + $0x70] sm:$0xff] %vm1111_vm0, %v5743_v31  ;;  %v1745_v24 = vpop.f32.mrb[33].mxu1 }
 0x5a0   : > { %1772 = vst.msk [vmem:[#allocation2 + $0x60] sm:$0xff] %vm1111_vm0, %v1745_v24  ;;  %v5744_v55 = vpop.f32.mrb[34].mxu1 }
 0x5a1   : > { %1775 = vst.msk [vmem:[#allocation2 + $0x78] sm:$0xff] %vm1111_vm0, %v5744_v55  ;;  %v1748_v63 = vpop.f32.mrb[35].mxu1 }
 0x5a2   : > { %1773 = vst.msk [vmem:[#allocation2 + $0x68] sm:$0xff] %vm1111_vm0, %v1748_v63 }
 0x5aa   : > { %v5767_v52 = vpop.f32.mrb[44].mxu0 }
 0x5ab   : > { %v7716_v0 = vadd.f32 %v5767_v52, %v9104_v39  ;;  %v1980_v51 = vpop.f32.mrb[45].mxu0 }
 0x5ac   : > { %v5768_v45 = vpop.f32.mrb[46].mxu0  ;;  %v7719_v1 = vadd.f32 %v1980_v51, %v9105_v48 }
 0x5ad   : > { %v7722_v59 = vadd.f32 %v5768_v45, %v9106_v3  ;;  %v1983_v22 = vpop.f32.mrb[47].mxu0  ;;  %v2098_v6 = vsel %vm1111_vm0, %v7716_v0, -inf }
 0x5ae   : > { %v5751_v19 = vpop.f32.mrb[36].mxu1  ;;  %2099 = vmax.xlane.f32.xlu0 %v2098_v6  ;;  %v7727_v36 = vadd.f32 %v1983_v22, %v9107_v37  ;;  %v2092_v7 = vsel %vm1111_vm0, %v7719_v1, -inf }
 0x5af   : > { %v1834_v57 = vpop.f32.mrb[37].mxu1  ;;  %v2101_v4 = vsel %vm1111_vm0, %v7722_v59, -inf  ;;  %v7732_v27 = vadd.f32 %v5751_v19, %v9104_v39 }
 0x5b0   : > { %v5752_v15 = vpop.f32.mrb[38].mxu1  ;;  %2102 = vmax.xlane.f32.xlu1 %v2101_v4  ;;  %v2095_v58 = vsel %vm1111_vm0, %v7727_v36, -inf  ;;  %v7742_v62 = vadd.f32 %v1834_v57, %v9105_v48 }
 0x5b1   : > { %v1837_v41 = vpop.f32.mrb[39].mxu1  ;;  %v2074_v42 = vsel %vm1111_vm0, %v7732_v27, -inf  ;;  %v7749_v23 = vadd.f32 %v5752_v15, %v9106_v3 }
 0x5b2   : > { %2093 = vmax.xlane.f32.xlu0 %v2092_v7  ;;  %v7737_v13 = vadd.f32 %v1837_v41, %v9107_v37  ;;  %v2068_v56 = vsel %vm1111_vm0, %v7742_v62, -inf }
 0x5b3   : > { %v2077_v49 = vsel %vm1111_vm0, %v7749_v23, -inf }
 0x5b4   : > { %2096 = vmax.xlane.f32.xlu1 %v2095_v58  ;;  %v2071_v35 = vsel %vm1111_vm0, %v7737_v13, -inf }
 0x5b6   : > { %2075 = vmax.xlane.f32.xlu0 %v2074_v42 }
 0x5b8   : > { %2072 = vmax.xlane.f32.xlu1 %v2071_v35  ;;  %v7799_v35 = vpop.permute.xlu0 %2589 }
 0x5ba   : > { %2069 = vmax.xlane.f32.xlu0 %v2068_v56 }
 0x5be   : > { %v5759_v53 = vpop.f32.mrb[40].mxu1  ;;  %2078 = vmax.xlane.f32.xlu0 %v2077_v49 }
 0x5bf   : > { %v7756_v25 = vadd.f32 %v5759_v53, %v9104_v39  ;;  %v1907_v54 = vpop.f32.mrb[41].mxu1 }
 0x5c0   : > { %v5760_v40 = vpop.f32.mrb[42].mxu1  ;;  %v7759_v50 = vadd.f32 %v1907_v54, %v9105_v48 }
 0x5c1   : > { %v7762_v31 = vadd.f32 %v5760_v40, %v9106_v3  ;;  %v1910_v24 = vpop.f32.mrb[43].mxu1  ;;  %v2086_v55 = vsel %vm1111_vm0, %v7756_v25, -inf }
 0x5c2   : > { %2087 = vmax.xlane.f32.xlu0 %v2086_v55  ;;  %v7767_v63 = vadd.f32 %v1910_v24, %v9107_v37  ;;  %v2080_v51 = vsel %vm1111_vm0, %v7759_v50, -inf }
 0x5c3   : > { %v2089_v52 = vsel %vm1111_vm0, %v7762_v31, -inf }
 0x5c4   : > { %2090 = vmax.xlane.f32.xlu1 %v2089_v52  ;;  %v2083_v45 = vsel %vm1111_vm0, %v7767_v63, -inf }
 0x5c6   : > { %2081 = vmax.xlane.f32.xlu0 %v2080_v51 }
 0x5c8   : > { %2084 = vmax.xlane.f32.xlu1 %v2083_v45 }
 0x5ce   : > { %v5775_v22 = vpop.f32.mrb[44].mxu1 }
 0x5cf   : > { %v7776_v6 = vadd.f32 %v5775_v22, %v9104_v39  ;;  %v2053_v19 = vpop.f32.mrb[45].mxu1 }
 0x5d0   : > { %v5776_v57 = vpop.f32.mrb[46].mxu1  ;;  %v7779_v4 = vadd.f32 %v2053_v19, %v9105_v48 }
 0x5d1   : > { %v2056_v15 = vpop.f32.mrb[47].mxu1  ;;  %v2110_v41 = vsel %vm1111_vm0, %v7776_v6, -inf  ;;  %v7790_v39 = vadd.f32 %v5776_v57, %v9106_v3 }
 0x5d2   : > { %2111 = vmax.xlane.f32.xlu0 %v2110_v41  ;;  %v2104_v7 = vsel %vm1111_vm0, %v7779_v4, -inf  ;;  %v7793_v48 = vadd.f32 %v2056_v15, %v9107_v37 }
 0x5d3   : > { %v2113_v58 = vsel %vm1111_vm0, %v7790_v39, -inf }
 0x5d4   : > { %v2107_v42 = vsel %vm1111_vm0, %v7793_v48, -inf }
 0x5d6   : > { %2105 = vmax.xlane.f32.xlu0 %v2104_v7 }
 0x5d9   : > { %2591 = vrot.lane.b32.xlu1 %v7310_v21, %s6794_s1 }
 0x5ec   : > { %2445 = vrot.lane.b32.xlu0 %v7356_v30, %s6793_s8 }
 0x5fd   : > { %2114 = vmax.xlane.f32.xlu1 %v2113_v58 }
 0x601   : > { %2108 = vmax.xlane.f32.xlu1 %v2107_v42 }
 0x63b   : > { %v2100_v56 = vpop.xlane.xlu0 %2099 }
 0x63c   : > { %v2126_v49 = vsub.f32 %v7716_v0, %v2100_v56 }
 0x63d   : > { %v2103_v53 = vpop.xlane.xlu1 %2102 }
 0x63e   : > { %v2152_v54 = vmul.f32 1.442695, %v2126_v49  ;;  %v2127_v3 = vsub.f32 %v7722_v59, %v2103_v53 }
 0x63f   : > { %v2094_v40 = vpop.xlane.xlu0 %2093 }
 0x640   : > { %6286 = vpow2.f32 %v2152_v54  ;;  %v2154_v37 = vmul.f32 1.442695, %v2127_v3  ;;  %v2124_v24 = vsub.f32 %v7719_v1, %v2094_v40 }
 0x641   : > { %v2097_v55 = vpop.xlane.xlu1 %2096 }
 0x642   : > { %6288 = vpow2.f32 %v2154_v37  ;;  %v2148_v52 = vmul.f32 1.442695, %v2124_v24  ;;  %v2125_v51 = vsub.f32 %v7727_v36, %v2097_v55 }
 0x643   : > { %v2076_v45 = vpop.xlane.xlu0 %2075 }
 0x644   : > { %6290 = vpow2.f32 %v2148_v52  ;;  %v2150_v22 = vmul.f32 1.442695, %v2125_v51  ;;  %v2118_v19 = vsub.f32 %v7732_v27, %v2076_v45 }
 0x645   : > { %v2073_v57 = vpop.xlane.xlu1 %2072 }
 0x646   : > { %6292 = vpow2.f32 %v2150_v22  ;;  %v2136_v0 = vmul.f32 1.442695, %v2118_v19  ;;  %v2117_v1 = vsub.f32 %v7737_v13, %v2073_v57 }
 0x647   : > { %v2070_v15 = vpop.xlane.xlu0 %2069 }
 0x648   : > { %6294 = vpow2.f32 %v2136_v0  ;;  %v2116_v59 = vsub.f32 %v7742_v62, %v2070_v15  ;;  %v2134_v62 = vmul.f32 1.442695, %v2117_v1 }
 0x64a   : > { %v7807_v41 = vpop.eup %6286  ;;  %v2132_v7 = vmul.f32 1.442695, %v2116_v59 }
 0x64b   : > { %v2079_v58 = vpop.xlane.xlu0 %2078  ;;  %v2194_v36 = vsel %vm1111_vm0, %v7807_v41, 0.0 }
 0x64c   : > { %v7812_v42 = vpop.eup %6288  ;;  %6296 = vpow2.f32 %v2132_v7  ;;  %v2119_v27 = vsub.f32 %v7749_v23, %v2079_v58  ;;  %2195 = vadd.xlane.f32.xlu0 %v2194_v36 }
 0x64d   : > { %v2197_v56 = vsel %vm1111_vm0, %v7812_v42, 0.0 }
 0x64e   : > { %v7817_v49 = vpop.eup %6290  ;;  %v2138_v53 = vmul.f32 1.442695, %v2119_v27  ;;  %2198 = vadd.xlane.f32.xlu1 %v2197_v56 }
 0x64f   : > { %v2088_v13 = vpop.xlane.xlu0 %2087  ;;  %v2188_v54 = vsel %vm1111_vm0, %v7817_v49, 0.0 }
 0x650   : > { %v7821_v3 = vpop.eup %6292  ;;  %6298 = vpow2.f32 %v2138_v53  ;;  %v2122_v40 = vsub.f32 %v7756_v25, %v2088_v13  ;;  %2189 = vadd.xlane.f32.xlu0 %v2188_v54 }
 0x651   : > { %v2191_v23 = vsel %vm1111_vm0, %v7821_v3, 0.0  ;;  %6300 = vpow2.f32 %v2134_v62  ;;  %v2091_v58 = vpop.xlane.xlu1 %2090 }
 0x652   : > { %v7826_v37 = vpop.eup %6294  ;;  %v2144_v24 = vmul.f32 1.442695, %v2122_v40  ;;  %2192 = vadd.xlane.f32.xlu1 %v2191_v23  ;;  %v2123_v36 = vsub.f32 %v7762_v31, %v2091_v58 }
 0x653   : > { %v2082_v55 = vpop.xlane.xlu0 %2081  ;;  %v2170_v52 = vsel %vm1111_vm0, %v7826_v37, 0.0 }
 0x654   : > { %6302 = vpow2.f32 %v2144_v24  ;;  %v2120_v51 = vsub.f32 %v7759_v50, %v2082_v55  ;;  %2171 = vadd.xlane.f32.xlu0 %v2170_v52  ;;  %v2146_v62 = vmul.f32 1.442695, %v2123_v36 }
 0x655   : > { %v2085_v27 = vpop.xlane.xlu1 %2084 }
 0x656   : > { %v7831_v45 = vpop.eup %6296  ;;  %v2140_v25 = vmul.f32 1.442695, %v2120_v51  ;;  %v2121_v53 = vsub.f32 %v7767_v63, %v2085_v27 }
 0x657   : > { %v2164_v22 = vsel %vm1111_vm0, %v7831_v45, 0.0 }
 0x658   : > { %6304 = vpow2.f32 %v2140_v25  ;;  %2165 = vadd.xlane.f32.xlu0 %v2164_v22  ;;  %v2142_v54 = vmul.f32 1.442695, %v2121_v53 }
 0x659   : > { %v7857_v13 = vpop.permute.xlu1 %2591  ;;  %6306 = vpow2.f32 %v2146_v62 }
 0x65a   : > { %v7835_v19 = vpop.eup %6298  ;;  %6308 = vpow2.f32 %v2142_v54 }
 0x65b   : > { %v2173_v0 = vsel %vm1111_vm0, %v7835_v19, 0.0  ;;  %v7839_v57 = vpop.eup %6300 }
 0x65c   : > { %2174 = vadd.xlane.f32.xlu1 %v2173_v0  ;;  %v2167_v50 = vsel %vm1111_vm0, %v7839_v57, 0.0 }
 0x65e   : > { %v7841_v15 = vpop.eup %6302 }
 0x65f   : > { %v2182_v59 = vsel %vm1111_vm0, %v7841_v15, 0.0  ;;  %v2112_v56 = vpop.xlane.xlu0 %2111 }
 0x660   : > { %2168 = vadd.xlane.f32.xlu1 %v2167_v50  ;;  %2183 = vadd.xlane.f32.xlu0 %v2182_v59  ;;  %v2130_v40 = vsub.f32 %v7776_v6, %v2112_v56 }
 0x662   : > { %v7847_v1 = vpop.eup %6304  ;;  %v2160_v52 = vmul.f32 1.442695, %v2130_v40 }
 0x663   : > { %v2176_v7 = vsel %vm1111_vm0, %v7847_v1, 0.0  ;;  %v2106_v23 = vpop.xlane.xlu0 %2105  ;;  %v7863_v63 = vpop.eup %6306 }
 0x664   : > { %2177 = vadd.xlane.f32.xlu0 %v2176_v7  ;;  %v2128_v24 = vsub.f32 %v7779_v4, %v2106_v23  ;;  %6310 = vpow2.f32 %v2160_v52  ;;  %v2185_v6 = vsel %vm1111_vm0, %v7863_v63, 0.0  ;;  %v7867_v4 = vpop.eup %6308 }
 0x665   : > { %v2179_v59 = vsel %vm1111_vm0, %v7867_v4, 0.0 }
 0x666   : > { %v2156_v51 = vmul.f32 1.442695, %v2128_v24 }
 0x667   : > { %v7919_v53 = vpop.permute.xlu0 %2445 }
 0x668   : > { %6312 = vpow2.f32 %v2156_v51 }
 0x66e   : > { %v7871_v7 = vpop.eup %6310 }
 0x671   : > { %2658 = vrot.lane.b32.xlu1 %v7330_v60, %s6794_s1 }
 0x67a   : > { %2585 = vrot.lane.b32.xlu0 %v7285_v9, %s6794_s1 }
 0x68a   : > { %v2115_v55 = vpop.xlane.xlu1 %2114 }
 0x68b   : > { %v2131_v31 = vsub.f32 %v7790_v39, %v2115_v55  ;;  %v7873_v39 = vpop.eup %6312 }
 0x68c   : > { %v2200_v27 = vsel %vm1111_vm0, %v7873_v39, 0.0 }
 0x68d   : > { %v2162_v50 = vmul.f32 1.442695, %v2131_v31 }
 0x68e   : > { %v2109_v25 = vpop.xlane.xlu1 %2108 }
 0x68f   : > { %v2129_v22 = vsub.f32 %v7793_v48, %v2109_v25  ;;  %v2206_v48 = vsel %vm1111_vm0, %v7871_v7, 0.0 }
 0x691   : > { %v2158_v0 = vmul.f32 1.442695, %v2129_v22 }
 0x693   : > { %6314 = vpow2.f32 %v2158_v0 }
 0x694   : > { %6316 = vpow2.f32 %v2162_v50 }
 0x695   : > { %2186 = vadd.xlane.f32.xlu1 %v2185_v6 }
 0x699   : > { %2180 = vadd.xlane.f32.xlu1 %v2179_v59 }
 0x69d   : > { %v7877_v58 = vpop.eup %6314  ;;  %2207 = vadd.xlane.f32.xlu1 %v2206_v48 }
 0x69e   : > { %v2203_v36 = vsel %vm1111_vm0, %v7877_v58, 0.0  ;;  %v7883_v56 = vpop.eup %6316 }
 0x69f   : > { %2204 = vadd.xlane.f32.xlu0 %v2203_v36  ;;  %v2209_v62 = vsel %vm1111_vm0, %v7883_v56, 0.0 }
 0x6a1   : > { %2201 = vadd.xlane.f32.xlu1 %v2200_v27 }
 0x6a5   : > { %2210 = vadd.xlane.f32.xlu1 %v2209_v62 }
 0x6b5   : > { %2727 = vrot.lane.b32.xlu0 %v7370_v47, %s6794_s1 }
 0x6b6   : > { %2587 = vrot.lane.b32.xlu1 %v7307_v20, %s6794_s1 }
 0x6b9   : > { %2660 = vrot.lane.b32.xlu0 %v7354_v29, %s6794_s1 }
 0x6ba   : > { %2729 = vrot.lane.b32.xlu1 %v7386_v38, %s6794_s1 }
 0x6bd   : > { %2723 = vrot.lane.b32.xlu0 %v7368_v46, %s6794_s1 }
 0x6be   : > { %2654 = vrot.lane.b32.xlu1 %v7327_v2, %s6794_s1 }
 0x6c1   : > { %2725 = vrot.lane.b32.xlu0 %v7384_v32, %s6794_s1 }
 0x6c2   : > { %2796 = vrot.lane.b32.xlu1 %v7399_v12, %s6794_s1 }
 0x6c5   : > { %2656 = vrot.lane.b32.xlu0 %v7351_v28, %s6794_s1 }
 0x6c6   : > { %2798 = vrot.lane.b32.xlu1 %v7418_v34, %s6794_s1 }
 0x6c9   : > { %2792 = vrot.lane.b32.xlu0 %v7397_v8, %s6794_s1 }
 0x6ca   : > { %2794 = vrot.lane.b32.xlu1 %v7415_v11, %s6794_s1 }
 0x6cd   : > { %3045 = vrot.lane.b32.xlu0 %v7292_v18, %s6794_s1 }
 0x6ce   : > { %3047 = vrot.lane.b32.xlu1 %v7290_v17, %s6794_s1 }
 0x6d1   : > { %3167 = vrot.lane.b32.xlu0 %v7334_v5, %s6794_s1 }
 0x6d2   : > { %3169 = vrot.lane.b32.xlu1 %v7332_v61, %s6794_s1 }
 0x6d5   : > { %3106 = vrot.lane.b32.xlu0 %v7314_v44, %s6794_s1 }
 0x6d6   : > { %3108 = vrot.lane.b32.xlu1 %v7312_v43, %s6794_s1 }
 0x6d9   : > { %3374 = vrot.lane.b32.xlu0 %v7288_v16, %s6795_s5  ;;  %v2196_v54 = vpop.xlane.xlu0 %2195 }
 0x6da   : > { %3228 = vrot.lane.b32.xlu1 %v7358_v33, %s6794_s1 }
 0x6db   : > { %v2199_v23 = vpop.xlane.xlu1 %2198 }
 0x6dd   : > { %v2190_v40 = vpop.xlane.xlu0 %2189 }
 0x6de   : > { %6318 = vrcp.f32 %v2190_v40 }
 0x6df   : > { %v2193_v55 = vpop.xlane.xlu1 %2192 }
 0x6e0   : > { %6320 = vrcp.f32 %v2193_v55 }
 0x6e1   : > { %v2172_v24 = vpop.xlane.xlu0 %2171 }
 0x6e5   : > { %v2166_v52 = vpop.xlane.xlu0 %2165 }
 0x6e8   : > { %v6319_v31 = vpop.eup %6318 }
 0x6e9   : > { %v2175_v51 = vpop.xlane.xlu1 %2174 }
 0x6ea   : > { %6322 = vrcp.f32 %v2175_v51  ;;  %v6321_v16 = vpop.eup %6320 }
 0x6eb   : > { %6324 = vrcp.f32 %v2166_v52  ;;  %v2237_v27 = vmul.f32 %v6321_v16, %v7821_v3 }
 0x6ec   : > { %6326 = vrcp.f32 %v2172_v24 }
 0x6ed   : > { %v2169_v25 = vpop.xlane.xlu1 %2168  ;;  %v2184_v40 = vpop.xlane.xlu0 %2183 }
 0x6ee   : > { %6328 = vrcp.f32 %v2169_v25 }
 0x6ef   : > { %6330 = vrcp.f32 %v2199_v23  ;;  %v2236_v23 = vmul.f32 %v6319_v31, %v7817_v49 }
 0x6f0   : > { %6332 = vrcp.f32 %v2196_v54 }
 0x6f1   : > { %v2248_v54 = vpack.c.bf16 %v2237_v27, %v2236_v23 }
 0x6f4   : > { %v6323_v22 = vpop.eup %6322 }
 0x6f5   : > { %v6325_v0 = vpop.eup %6324  ;;  %v2231_v59 = vmul.f32 %v6323_v22, %v7835_v19 }
 0x6f6   : > { %v6327_v50 = vpop.eup %6326  ;;  %v2228_v48 = vmul.f32 %v6325_v0, %v7831_v45  ;;  %v2178_v45 = vpop.xlane.xlu0 %2177 }
 0x6f7   : > { %v2230_v62 = vmul.f32 %v6327_v50, %v7826_v37 }
 0x6f8   : > { %v6329_v6 = vpop.eup %6328 }
 0x6f9   : > { %v2229_v36 = vmul.f32 %v6329_v6, %v7839_v57  ;;  %v2245_v55 = vpack.c.bf16 %v2231_v59, %v2230_v62  ;;  %v6331_v52 = vpop.eup %6330 }
 0x6fa   : > { %v6333_v19 = vpop.eup %6332  ;;  %v2239_v3 = vmul.f32 %v6331_v52, %v7812_v42  ;;  %v2586_v57 = vpop.permute.xlu0 %2585 }
 0x6fb   : > { %v2244_v24 = vpack.c.bf16 %v2229_v36, %v2228_v48  ;;  %v2238_v37 = vmul.f32 %v6333_v19, %v7807_v41  ;;  %v2603_v41 = vsel %vm1111_vm0, %v7857_v13, 0 }
 0x6fd   : > { %5781 = vmatprep.mubr.msk.bf16.mxu0 %vm1111_vm0, %v2244_v24  ;;  %v2249_v49 = vpack.c.bf16 %v2239_v3, %v2238_v37 }
 0x6fe   : > { %5782 = vmatmul.mubr.msk.bf16.vlgmr.msra.gmra.mrb[48].mxu0 %vm1111_vm0, %v2245_v55 }
 0x6ff   : > { %5794 = vmatpush3.bf16.msra.mxu0 %v7684_v14  ;;  %5797 = vmatprep.mubr.msk.bf16.mxu0 %vm1111_vm0, %v2248_v54  ;;  %v2600_v14 = vsel %vm1111_vm0, %v7799_v35, 0 }
 0x700   : > { %5795 = vmatprep.subr.bf16.mxu0 %v7693_v26 }
 0x703   : > { %5796 = vmatpush3.bf16.msra.mxu0 %v7693_v26  ;;  %v2659_v26 = vpop.permute.xlu1 %2658 }
 0x704   : > { %5985 = vmatprep.subr.msk.bf16.mxu0 %vm1111_vm0, %v7799_v35 }
 0x706   : > { %5798 = vmatmul.mubr.msk.bf16.vlgmr.msra.gmra.mrb[52].mxu0 %vm1111_vm0, %v2249_v49 }
 0x707   : > { %5813 = vmatprep.mubr.msk.bf16.mxu0 %vm1111_vm0, %v2586_v57 }
 0x70c   : > { %5810 = vmatpush3.bf16.xpose.msra.mxu0 %v2600_v14 }
 0x70d   : > { %5986 = vmatprep.subr.msk.bf16.mxu0 %vm1111_vm0, %v7857_v13 }
 0x714   : > { %5812 = vmatpush3.bf16.xpose.msra.mxu0 %v2603_v41 }
 0x722   : > { %v2187_v42 = vpop.xlane.xlu1 %2186 }
 0x723   : > { %6334 = vrcp.f32 %v2187_v42  ;;  %v2669_v42 = vsel %vm1111_vm0, %v2659_v26, 0 }
 0x724   : > { %6336 = vrcp.f32 %v2178_v45 }
 0x725   : > { %6338 = vrcp.f32 %v2184_v40 }
 0x726   : > { %v2181_v51 = vpop.xlane.xlu1 %2180 }
 0x727   : > { %6340 = vrcp.f32 %v2181_v51 }
 0x72a   : > { %v2208_v25 = vpop.xlane.xlu1 %2207 }
 0x72c   : > { %v2205_v31 = vpop.xlane.xlu0 %2204 }
 0x72d   : > { %6342 = vrcp.f32 %v2205_v31  ;;  %v6335_v16 = vpop.eup %6334 }
 0x72e   : > { %v2202_v35 = vpop.xlane.xlu1 %2201  ;;  %v6337_v22 = vpop.eup %6336  ;;  %v2235_v13 = vmul.f32 %v6335_v16, %v7863_v63 }
 0x72f   : > { %6344 = vrcp.f32 %v2202_v35  ;;  %v6339_v0 = vpop.eup %6338  ;;  %v2232_v48 = vmul.f32 %v6337_v22, %v7847_v1 }
 0x730   : > { %v2728_v50 = vpop.permute.xlu0 %2727  ;;  %6346 = vrcp.f32 %v2208_v25  ;;  %v2234_v27 = vmul.f32 %v6339_v0, %v7841_v15 }
 0x731   : > { %v6341_v6 = vpop.eup %6340  ;;  %5989 = vmatprep.subr.msk.bf16.mxu0 %vm1111_vm0, %v2728_v50  ;;  %v2738_v63 = vsel %vm1111_vm0, %v2728_v50, 0 }
 0x732   : > { %v2211_v59 = vpop.xlane.xlu1 %2210  ;;  %v2233_v36 = vmul.f32 %v6341_v6, %v7867_v4  ;;  %v2247_v24 = vpack.c.bf16 %v2235_v13, %v2234_v27 }
 0x733   : > { %6348 = vrcp.f32 %v2211_v59 }
 0x734   : > { %v2661_v62 = vpop.permute.xlu0 %2660  ;;  %v2246_v40 = vpack.c.bf16 %v2233_v36, %v2232_v48 }
 0x735   : > { %v2672_v25 = vsel %vm1111_vm0, %v2661_v62, 0 }
 0x736   : > { %v2588_v23 = vpop.permute.xlu1 %2587  ;;  %5789 = vmatprep.mubr.msk.bf16.mxu1 %vm1111_vm0, %v2246_v40 }
 0x737   : > { %v6343_v55 = vpop.eup %6342  ;;  %5790 = vmatmul.mubr.msk.bf16.vlgmr.msra.gmra.mrb[48].mxu1 %vm1111_vm0, %v2247_v24  ;;  %5814 = vmatmul.mubr.msk.bf16.vlgmr.msra.gmra.mrb[56].mxu0 %vm1111_vm0, %v2588_v23 }
 0x738   : > { %5802 = vmatpush3.bf16.msra.mxu1 %v7696_v10  ;;  %5826 = vmatpush3.bf16.xpose.msra.mxu0 %v2738_v63  ;;  %v2724_v1 = vpop.permute.xlu0 %2723  ;;  %v2241_v54 = vmul.f32 %v6343_v55, %v7877_v58  ;;  %v8013_v63 = vld [vmem:[#allocation6 + $0x10] sm:$0xff] }
 0x739   : > { %v6345_v4 = vpop.eup %6344  ;;  %5803 = vmatprep.subr.bf16.mxu1 %v7919_v53  ;;  %5829 = vmatprep.mubr.msk.bf16.mxu0 %vm1111_vm0, %v2724_v1 }
 0x73a   : > { %v2730_v15 = vpop.permute.xlu1 %2729  ;;  %v2240_v52 = vmul.f32 %v6345_v4, %v7873_v39  ;;  %v6347_v19 = vpop.eup %6346 }
 0x73b   : > { %5990 = vmatprep.subr.msk.bf16.mxu0 %vm1111_vm0, %v2730_v15  ;;  %v2242_v37 = vmul.f32 %v6347_v19, %v7871_v7  ;;  %v2741_v39 = vsel %vm1111_vm0, %v2730_v15, 0  ;;  %v8022_v19 = vld [vmem:[#allocation6] sm:$0xff] }
 0x73c   : > { %5804 = vmatpush3.bf16.msra.mxu1 %v7919_v53  ;;  %v2726_v3 = vpop.permute.xlu0 %2725  ;;  %v2250_v45 = vpack.c.bf16 %v2241_v54, %v2240_v52 }
 0x73d   : > { %v6349_v10 = vpop.eup %6348  ;;  %5987 = vmatprep.subr.msk.bf16.mxu1 %vm1111_vm0, %v2659_v26 }
 0x73e   : > { %v2243_v49 = vmul.f32 %v6349_v10, %v7883_v56  ;;  %v2655_v57 = vpop.permute.xlu1 %2654  ;;  %5805 = vmatprep.mubr.msk.bf16.mxu1 %vm1111_vm0, %v2250_v45 }
 0x740   : > { %5828 = vmatpush3.bf16.xpose.msra.mxu0 %v2741_v39  ;;  %v2657_v58 = vpop.permute.xlu0 %2656  ;;  %v2251_v14 = vpack.c.bf16 %v2243_v49, %v2242_v37  ;;  %v8031_v49 = vld [vmem:[#allocation6 + $0x8] sm:$0xff] }
 0x742   : > { %v2797_v41 = vpop.permute.xlu1 %2796  ;;  %5806 = vmatmul.mubr.msk.bf16.vlgmr.msra.gmra.mrb[52].mxu1 %vm1111_vm0, %v2251_v14 }
 0x743   : > { %5821 = vmatprep.mubr.msk.bf16.mxu1 %vm1111_vm0, %v2655_v57  ;;  %v2807_v26 = vsel %vm1111_vm0, %v2797_v41, 0 }
 0x744   : > { %v2793_v53 = vpop.permute.xlu0 %2792 }
 0x745   : > { %5818 = vmatpush3.bf16.xpose.msra.mxu1 %v2669_v42 }
 0x746   : > { %5988 = vmatprep.subr.msk.bf16.mxu1 %vm1111_vm0, %v2661_v62  ;;  %v2799_v7 = vpop.permute.xlu1 %2798 }
 0x747   : > { %5830 = vmatmul.mubr.msk.bf16.vlgmr.msra.gmra.mrb[60].mxu0 %vm1111_vm0, %v2726_v3  ;;  %v2810_v35 = vsel %vm1111_vm0, %v2799_v7, 0 }
 0x748   : > { %v3046_v56 = vpop.permute.xlu0 %3045 }
 0x749   : > { %5841 = vmatprep.subr.bf16.mxu0 %v3046_v56 }
 0x74a   : > { %5842 = vmatpush3.bf16.msra.mxu0 %v3046_v56  ;;  %v2795_v51 = vpop.permute.xlu1 %2794 }
 0x74c   : > { %v7981_v16 = vpop.permute.xlu0 %3167 }
 0x74d   : > { %5820 = vmatpush3.bf16.xpose.msra.mxu1 %v2672_v25 }
 0x74e   : > { %5991 = vmatprep.subr.msk.bf16.mxu1 %vm1111_vm0, %v2797_v41  ;;  %v3048_v31 = vpop.permute.xlu1 %3047 }
 0x74f   : > { %5843 = vmatprep.subr.bf16.mxu0 %v3048_v31 }
 0x750   : > { %5844 = vmatpush3.bf16.msra.mxu0 %v3048_v31  ;;  %v3107_v22 = vpop.permute.xlu0 %3106 }
 0x751   : > { %5857 = vmatprep.subr.bf16.mxu0 %v7981_v16 }
 0x752   : > { %v7989_v0 = vpop.permute.xlu1 %3169 }
 0x754   : > { %5822 = vmatmul.mubr.msk.bf16.vlgmr.msra.gmra.mrb[56].mxu1 %vm1111_vm0, %v2657_v58  ;;  %v8038_v58 = vld [vmem:[#allocation6 + $0x18] sm:$0xff] }
 0x755   : > { %5834 = vmatpush3.bf16.xpose.msra.mxu1 %v2807_v26  ;;  %5837 = vmatprep.mubr.msk.bf16.mxu1 %vm1111_vm0, %v2793_v53 }
 0x756   : > { %5992 = vmatprep.subr.msk.bf16.mxu1 %vm1111_vm0, %v2799_v7  ;;  %v3109_v50 = vpop.permute.xlu1 %3108 }
 0x75a   : > { %v7992_v6 = vpop.permute.xlu1 %3228 }
 0x75d   : > { %5836 = vmatpush3.bf16.xpose.msra.mxu1 %v2810_v35 }
 0x75e   : > { %5849 = vmatprep.subr.bf16.mxu1 %v3107_v22 }
 0x764   : > { %5838 = vmatmul.mubr.msk.bf16.vlgmr.msra.gmra.mrb[60].mxu1 %vm1111_vm0, %v2795_v51 }
 0x765   : > { %5850 = vmatpush3.bf16.msra.mxu1 %v3107_v22 }
 0x766   : > { %5851 = vmatprep.subr.bf16.mxu1 %v3109_v50 }
 0x769   : > { %5852 = vmatpush3.bf16.msra.mxu1 %v3109_v50 }
 0x76a   : > { %5865 = vmatprep.subr.bf16.mxu1 %v7992_v6 }
 0x7d1   : > { %v7995_v13 = vpop.f32.mrb[48].mxu0 }
 0x7d2   : > { %v7997_v59 = vpop.f32.mrb[49].mxu0 }
 0x7d3   : > { %v7999_v48 = vpop.f32.mrb[50].mxu0 }
 0x7d4   : > { %v8001_v36 = vpop.f32.mrb[51].mxu0 }
 0x7d9   : > { %v8003_v27 = vpop.f32.mrb[52].mxu0 }
 0x7da   : > { %9108 = vst [vmem:[#allocation22_spill] sm:$0xff] %v8003_v27  ;;  %v8005_v62 = vpop.f32.mrb[53].mxu0 }
 0x7db   : > { %9109 = vst [vmem:[#allocation21_spill] sm:$0xff] %v8005_v62  ;;  %v8007_v40 = vpop.f32.mrb[54].mxu0 }
 0x7dc   : > { %9110 = vst [vmem:[#allocation24_spill] sm:$0xff] %v8007_v40  ;;  %v8009_v24 = vpop.f32.mrb[55].mxu0 }
 0x7dd   : > { %9111 = vst [vmem:[#allocation23_spill] sm:$0xff] %v8009_v24 }
 0x80a   : > { %v8011_v23 = vpop.f32.mrb[48].mxu1  ;;  %v5815_v55 = vpop.f32.mrb[56].mxu0 }
 0x80b   : > { %9112 = vst [vmem:[#allocation25_spill] sm:$0xff] %v8011_v23  ;;  %v8016_v1 = vadd.f32 %v8013_v63, %v5815_v55  ;;  %v8018_v4 = vpop.f32.mrb[49].mxu1  ;;  %v2639_v15 = vpop.f32.mrb[57].mxu0 }
 0x80c   : > { %v8020_v52 = vpop.f32.mrb[50].mxu1  ;;  %v5816_v54 = vpop.f32.mrb[58].mxu0  ;;  %v8025_v3 = vadd.f32 %v8022_v19, %v2639_v15 }
 0x80d   : > { %9113 = vst [vmem:[#allocation26_spill] sm:$0xff] %v8020_v52  ;;  %v8027_v45 = vpop.f32.mrb[51].mxu1  ;;  %v2642_v10 = vpop.f32.mrb[59].mxu0  ;;  %v2867_v37 = vsel %vm1111_vm0, %v8016_v1, -inf  ;;  %v8041_v14 = vadd.f32 %v8038_v58, %v5816_v54 }
 0x80e   : > { %9114 = vst [vmem:[#allocation27_spill] sm:$0xff] %v8027_v45  ;;  %v8034_v57 = vadd.f32 %v8031_v49, %v2642_v10  ;;  %2868 = vmax.xlane.f32.xlu0 %v2867_v37  ;;  %v2861_v41 = vsel %vm1111_vm0, %v8025_v3, -inf }
 0x80f   : > { %v2870_v42 = vsel %vm1111_vm0, %v8041_v14, -inf }
 0x810   : > { %v2864_v39 = vsel %vm1111_vm0, %v8034_v57, -inf }
 0x811   : > { %2865 = vmax.xlane.f32.xlu1 %v2864_v39 }
 0x812   : > { %2862 = vmax.xlane.f32.xlu0 %v2861_v41 }
 0x815   : > { %v8045_v53 = vpop.f32.mrb[52].mxu1 }
 0x816   : > { %9115 = vst [vmem:[#allocation28_spill] sm:$0xff] %v8045_v53  ;;  %2871 = vmax.xlane.f32.xlu0 %v2870_v42  ;;  %v8049_v7 = vpop.f32.mrb[53].mxu1 }
 0x817   : > { %9116 = vst [vmem:[#allocation29_spill] sm:$0xff] %v8049_v7  ;;  %v8051_v56 = vpop.f32.mrb[54].mxu1 }
 0x818   : > { %9117 = vst [vmem:[#allocation30_spill] sm:$0xff] %v8051_v56  ;;  %v8053_v51 = vpop.f32.mrb[55].mxu1 }
 0x819   : > { %9118 = vst [vmem:[#allocation31_spill] sm:$0xff] %v8053_v51 }
 0x81a   : > { %v5831_v25 = vpop.f32.mrb[60].mxu0 }
 0x81b   : > { %v8056_v31 = vadd.f32 %v8013_v63, %v5831_v25  ;;  %v2777_v26 = vpop.f32.mrb[61].mxu0 }
 0x81c   : > { %v5832_v35 = vpop.f32.mrb[62].mxu0  ;;  %v8059_v22 = vadd.f32 %v8022_v19, %v2777_v26 }
 0x81d   : > { %v8062_v50 = vadd.f32 %v8038_v58, %v5832_v35  ;;  %v2780_v55 = vpop.f32.mrb[63].mxu0  ;;  %v2891_v15 = vsel %vm1111_vm0, %v8056_v31, -inf }
 0x81e   : > { %2892 = vmax.xlane.f32.xlu0 %v2891_v15  ;;  %v8067_v54 = vadd.f32 %v8031_v49, %v2780_v55  ;;  %v2885_v37 = vsel %vm1111_vm0, %v8059_v22, -inf }
 0x81f   : > { %v2894_v10 = vsel %vm1111_vm0, %v8062_v50, -inf }
 0x820   : > { %2895 = vmax.xlane.f32.xlu1 %v2894_v10  ;;  %v2888_v39 = vsel %vm1111_vm0, %v8067_v54, -inf }
 0x822   : > { %2886 = vmax.xlane.f32.xlu0 %v2885_v37 }
 0x824   : > { %2889 = vmax.xlane.f32.xlu1 %v2888_v39 }
 0x827   : > { %v5823_v41 = vpop.f32.mrb[56].mxu1 }
 0x828   : > { %v8076_v42 = vadd.f32 %v8013_v63, %v5823_v41  ;;  %v2708_v25 = vpop.f32.mrb[57].mxu1 }
 0x829   : > { %v5824_v26 = vpop.f32.mrb[58].mxu1  ;;  %v8079_v35 = vadd.f32 %v8022_v19, %v2708_v25 }
 0x82a   : > { %v8082_v55 = vadd.f32 %v8038_v58, %v5824_v26  ;;  %v2711_v15 = vpop.f32.mrb[59].mxu1  ;;  %v2879_v10 = vsel %vm1111_vm0, %v8076_v42, -inf }
 0x82b   : > { %2880 = vmax.xlane.f32.xlu0 %v2879_v10  ;;  %v8087_v37 = vadd.f32 %v8031_v49, %v2711_v15  ;;  %v2873_v41 = vsel %vm1111_vm0, %v8079_v35, -inf }
 0x82c   : > { %v2882_v39 = vsel %vm1111_vm0, %v8082_v55, -inf }
 0x82d   : > { %2883 = vmax.xlane.f32.xlu1 %v2882_v39  ;;  %v2876_v25 = vsel %vm1111_vm0, %v8087_v37, -inf }
 0x82f   : > { %2874 = vmax.xlane.f32.xlu0 %v2873_v41 }
 0x831   : > { %2877 = vmax.xlane.f32.xlu1 %v2876_v25 }
 0x837   : > { %v5839_v26 = vpop.f32.mrb[60].mxu1 }
 0x838   : > { %v8096_v56 = vadd.f32 %v8013_v63, %v5839_v26  ;;  %v2846_v10 = vpop.f32.mrb[61].mxu1 }
 0x839   : > { %v5840_v53 = vpop.f32.mrb[62].mxu1  ;;  %v8099_v15 = vadd.f32 %v8022_v19, %v2846_v10  ;;  %v8119_v10 = vpop.permute.xlu0 %3374 }
 0x83a   : > { %v8102_v51 = vadd.f32 %v8038_v58, %v5840_v53  ;;  %v2849_v39 = vpop.f32.mrb[63].mxu1  ;;  %v2903_v41 = vsel %vm1111_vm0, %v8096_v56, -inf }
 0x83b   : > { %2904 = vmax.xlane.f32.xlu0 %v2903_v41  ;;  %v8107_v7 = vadd.f32 %v8031_v49, %v2849_v39  ;;  %v2897_v26 = vsel %vm1111_vm0, %v8099_v15, -inf }
 0x83c   : > { %v2906_v25 = vsel %vm1111_vm0, %v8102_v51, -inf }
 0x83d   : > { %2907 = vmax.xlane.f32.xlu1 %v2906_v25  ;;  %v2900_v53 = vsel %vm1111_vm0, %v8107_v7, -inf }
 0x83f   : > { %2898 = vmax.xlane.f32.xlu0 %v2897_v26 }
 0x841   : > { %2901 = vmax.xlane.f32.xlu1 %v2900_v53 }
 0x852   : > { %3376 = vrot.lane.b32.xlu1 %v7310_v21, %s6795_s5 }
 0x855   : > { %3230 = vrot.lane.b32.xlu0 %v7356_v30, %s6794_s1 }
 0x89b   : > { %v2869_v39 = vpop.xlane.xlu0 %2868 }
 0x89c   : > { %v2911_v41 = vsub.f32 %v8016_v1, %v2869_v39 }
 0x89e   : > { %v2929_v25 = vmul.f32 1.442695, %v2911_v41  ;;  %v2866_v40 = vpop.xlane.xlu1 %2865 }
 0x89f   : > { %v2863_v27 = vpop.xlane.xlu0 %2862  ;;  %v2910_v24 = vsub.f32 %v8034_v57, %v2866_v40 }
 0x8a0   : > { %6350 = vpow2.f32 %v2929_v25  ;;  %v2909_v26 = vsub.f32 %v8025_v3, %v2863_v27 }
 0x8a1   : > { %v2927_v52 = vmul.f32 1.442695, %v2910_v24 }
 0x8a2   : > { %v2925_v53 = vmul.f32 1.442695, %v2909_v26 }
 0x8a3   : > { %v2872_v62 = vpop.xlane.xlu0 %2871 }
 0x8a4   : > { %6352 = vpow2.f32 %v2925_v53  ;;  %v2912_v21 = vsub.f32 %v8041_v14, %v2872_v62 }
 0x8a6   : > { %v2931_v45 = vmul.f32 1.442695, %v2912_v21 }
 0x8a8   : > { %6354 = vpow2.f32 %v2931_v45 }
 0x8a9   : > { %6356 = vpow2.f32 %v2927_v52 }
 0x8aa   : > { %v8125_v23 = vpop.eup %6350 }
 0x8ab   : > { %v2893_v1 = vpop.xlane.xlu0 %2892  ;;  %v2963_v39 = vsel %vm1111_vm0, %v8125_v23, 0.0 }
 0x8ac   : > { %v2919_v41 = vsub.f32 %v8056_v31, %v2893_v1  ;;  %2964 = vadd.xlane.f32.xlu0 %v2963_v39 }
 0x8ad   : > { %v2896_v27 = vpop.xlane.xlu1 %2895 }
 0x8ae   : > { %v8130_v40 = vpop.eup %6352  ;;  %v2945_v3 = vmul.f32 1.442695, %v2919_v41  ;;  %v2920_v57 = vsub.f32 %v8062_v50, %v2896_v27 }
 0x8af   : > { %v2887_v62 = vpop.xlane.xlu0 %2886  ;;  %v2957_v24 = vsel %vm1111_vm0, %v8130_v40, 0.0 }
 0x8b0   : > { %6358 = vpow2.f32 %v2945_v3  ;;  %v2947_v45 = vmul.f32 1.442695, %v2920_v57  ;;  %v2917_v52 = vsub.f32 %v8059_v22, %v2887_v62  ;;  %2958 = vadd.xlane.f32.xlu0 %v2957_v24 }
 0x8b1   : > { %v2890_v14 = vpop.xlane.xlu1 %2889 }
 0x8b2   : > { %v8136_v25 = vpop.eup %6354  ;;  %6360 = vpow2.f32 %v2947_v45  ;;  %v2941_v31 = vmul.f32 1.442695, %v2917_v52  ;;  %v2918_v26 = vsub.f32 %v8067_v54, %v2890_v14 }
 0x8b3   : > { %v2966_v53 = vsel %vm1111_vm0, %v8136_v25, 0.0  ;;  %v8141_v50 = vpop.eup %6356 }
 0x8b4   : > { %6362 = vpow2.f32 %v2941_v31  ;;  %v2943_v21 = vmul.f32 1.442695, %v2918_v26  ;;  %2967 = vadd.xlane.f32.xlu1 %v2966_v53  ;;  %v2960_v22 = vsel %vm1111_vm0, %v8141_v50, 0.0 }
 0x8b6   : > { %6364 = vpow2.f32 %v2943_v21 }
 0x8b8   : > { %v2881_v1 = vpop.xlane.xlu0 %2880  ;;  %2961 = vadd.xlane.f32.xlu1 %v2960_v22 }
 0x8b9   : > { %v2915_v39 = vsub.f32 %v8076_v42, %v2881_v1 }
 0x8ba   : > { %v8146_v41 = vpop.eup %6358  ;;  %v2884_v27 = vpop.xlane.xlu1 %2883 }
 0x8bb   : > { %v2937_v54 = vmul.f32 1.442695, %v2915_v39  ;;  %v2916_v3 = vsub.f32 %v8082_v55, %v2884_v27  ;;  %v2987_v57 = vsel %vm1111_vm0, %v8146_v41, 0.0 }
 0x8bc   : > { %v8151_v62 = vpop.eup %6360  ;;  %2988 = vadd.xlane.f32.xlu0 %v2987_v57  ;;  %v2875_v24 = vpop.xlane.xlu0 %2874 }
 0x8bd   : > { %6366 = vpow2.f32 %v2937_v54  ;;  %v2939_v45 = vmul.f32 1.442695, %v2916_v3  ;;  %v2913_v52 = vsub.f32 %v8079_v35, %v2875_v24  ;;  %v2990_v42 = vsel %vm1111_vm0, %v8151_v62, 0.0 }
 0x8be   : > { %v8156_v14 = vpop.eup %6362  ;;  %v2878_v31 = vpop.xlane.xlu1 %2877  ;;  %2991 = vadd.xlane.f32.xlu1 %v2990_v42 }
 0x8bf   : > { %6368 = vpow2.f32 %v2939_v45  ;;  %v2933_v55 = vmul.f32 1.442695, %v2913_v52  ;;  %v2914_v26 = vsub.f32 %v8087_v37, %v2878_v31  ;;  %v2981_v53 = vsel %vm1111_vm0, %v8156_v14, 0.0 }
 0x8c0   : > { %v8161_v21 = vpop.eup %6364  ;;  %2982 = vadd.xlane.f32.xlu0 %v2981_v53 }
 0x8c1   : > { %6370 = vpow2.f32 %v2933_v55  ;;  %v2935_v22 = vmul.f32 1.442695, %v2914_v26  ;;  %v2984_v35 = vsel %vm1111_vm0, %v8161_v21, 0.0 }
 0x8c2   : > { %2985 = vadd.xlane.f32.xlu1 %v2984_v35 }
 0x8c3   : > { %6372 = vpow2.f32 %v2935_v22 }
 0x8c7   : > { %v8165_v1 = vpop.eup %6366 }
 0x8c8   : > { %v2975_v39 = vsel %vm1111_vm0, %v8165_v1, 0.0  ;;  %v2905_v52 = vpop.xlane.xlu0 %2904 }
 0x8c9   : > { %v8169_v27 = vpop.eup %6368  ;;  %2976 = vadd.xlane.f32.xlu0 %v2975_v39  ;;  %v2923_v55 = vsub.f32 %v8096_v56, %v2905_v52 }
 0x8ca   : > { %v2978_v37 = vsel %vm1111_vm0, %v8169_v27, 0.0  ;;  %v2908_v45 = vpop.xlane.xlu1 %2907 }
 0x8cb   : > { %v8173_v54 = vpop.eup %6370  ;;  %2979 = vadd.xlane.f32.xlu1 %v2978_v37  ;;  %v2953_v22 = vmul.f32 1.442695, %v2923_v55  ;;  %v2924_v39 = vsub.f32 %v8102_v51, %v2908_v45 }
 0x8cc   : > { %v2969_v3 = vsel %vm1111_vm0, %v8173_v54, 0.0  ;;  %v2899_v26 = vpop.xlane.xlu0 %2898 }
 0x8cd   : > { %v8177_v57 = vpop.eup %6372  ;;  %2970 = vadd.xlane.f32.xlu0 %v2969_v3  ;;  %v2921_v35 = vsub.f32 %v8099_v15, %v2899_v26  ;;  %v2955_v37 = vmul.f32 1.442695, %v2924_v39 }
 0x8ce   : > { %v2972_v24 = vsel %vm1111_vm0, %v8177_v57, 0.0  ;;  %v2902_v42 = vpop.xlane.xlu1 %2901 }
 0x8cf   : > { %2973 = vadd.xlane.f32.xlu1 %v2972_v24  ;;  %v2922_v31 = vsub.f32 %v8107_v7, %v2902_v42 }
 0x8d1   : > { %v2951_v53 = vmul.f32 1.442695, %v2922_v31 }
 0x8d3   : > { %6374 = vpow2.f32 %v2951_v53 }
 0x8d4   : > { %6376 = vpow2.f32 %v2953_v22 }
 0x8dd   : > { %v8189_v3 = vpop.eup %6374 }
 0x8de   : > { %v2996_v7 = vsel %vm1111_vm0, %v8189_v3, 0.0 }
 0x8e0   : > { %3372 = vrot.lane.b32.xlu1 %v7307_v20, %s6795_s5  ;;  %v2949_v20 = vmul.f32 1.442695, %v2921_v35 }
 0x8e2   : > { %6378 = vpow2.f32 %v2949_v20 }
 0x8e3   : > { %3370 = vrot.lane.b32.xlu0 %v7285_v9, %s6795_s5  ;;  %6380 = vpow2.f32 %v2955_v37  ;;  %v8191_v9 = vpop.eup %6376 }
 0x8e4   : > { %v2999_v56 = vsel %vm1111_vm0, %v8191_v9, 0.0 }
 0x8ec   : > { %v8197_v15 = vpop.eup %6378 }
 0x8ed   : > { %v2993_v51 = vsel %vm1111_vm0, %v8197_v15, 0.0  ;;  %v8201_v24 = vpop.eup %6380 }
 0x8ee   : > { %v3002_v45 = vsel %vm1111_vm0, %v8201_v24, 0.0 }
 0x902   : > { %2997 = vadd.xlane.f32.xlu0 %v2996_v7 }
 0x904   : > { %3000 = vadd.xlane.f32.xlu1 %v2999_v56 }
 0x908   : > { %2994 = vadd.xlane.f32.xlu1 %v2993_v51 }
 0x90c   : > { %3003 = vadd.xlane.f32.xlu1 %v3002_v45 }
 0x918   : > { %3443 = vrot.lane.b32.xlu0 %v7330_v60, %s6795_s5 }
 0x91c   : > { %3439 = vrot.lane.b32.xlu0 %v7327_v2, %s6795_s5  ;;  %v8229_v2 = vpop.permute.xlu0 %3230 }
 0x91d   : > { %3445 = vrot.lane.b32.xlu1 %v7354_v29, %s6795_s5 }
 0x920   : > { %3512 = vrot.lane.b32.xlu0 %v7370_v47, %s6795_s5 }
 0x921   : > { %3441 = vrot.lane.b32.xlu1 %v7351_v28, %s6795_s5  ;;  %v8231_v28 = vpop.permute.xlu1 %3376 }
 0x924   : > { %3508 = vrot.lane.b32.xlu0 %v7368_v46, %s6795_s5 }
 0x925   : > { %3514 = vrot.lane.b32.xlu1 %v7386_v38, %s6795_s5 }
 0x928   : > { %3581 = vrot.lane.b32.xlu0 %v7399_v12, %s6795_s5 }
 0x929   : > { %3510 = vrot.lane.b32.xlu1 %v7384_v32, %s6795_s5 }
 0x92c   : > { %3577 = vrot.lane.b32.xlu0 %v7397_v8, %s6795_s5 }
 0x92d   : > { %3583 = vrot.lane.b32.xlu1 %v7418_v34, %s6795_s5 }
 0x931   : > { %3579 = vrot.lane.b32.xlu1 %v7415_v11, %s6795_s5 }
 0x939   : > { %v2965_v60 = vpop.xlane.xlu0 %2964 }
 0x93d   : > { %v2959_v29 = vpop.xlane.xlu0 %2958 }
 0x941   : > { %v2968_v46 = vpop.xlane.xlu1 %2967 }
 0x942   : > { %6382 = vrcp.f32 %v2968_v46 }
 0x943   : > { %6384 = vrcp.f32 %v2959_v29 }
 0x944   : > { %6386 = vrcp.f32 %v2965_v60 }
 0x945   : > { %v2962_v47 = vpop.xlane.xlu1 %2961 }
 0x946   : > { %6388 = vrcp.f32 %v2962_v47 }
 0x949   : > { %v2989_v32 = vpop.xlane.xlu0 %2988 }
 0x94b   : > { %v2992_v38 = vpop.xlane.xlu1 %2991 }
 0x94c   : > { %v6383_v8 = vpop.eup %6382  ;;  %6390 = vrcp.f32 %v2992_v38 }
 0x94d   : > { %v2983_v12 = vpop.xlane.xlu0 %2982  ;;  %v6385_v34 = vpop.eup %6384  ;;  %v3024_v31 = vmul.f32 %v6383_v8, %v8136_v25 }
 0x94e   : > { %6392 = vrcp.f32 %v2983_v12  ;;  %v6387_v11 = vpop.eup %6386  ;;  %v3021_v55 = vmul.f32 %v6385_v34, %v8130_v40 }
 0x94f   : > { %6394 = vrcp.f32 %v2989_v32  ;;  %v2986_v52 = vpop.xlane.xlu1 %2985  ;;  %v3023_v53 = vmul.f32 %v6387_v11, %v8125_v23 }
 0x950   : > { %v6389_v42 = vpop.eup %6388  ;;  %6396 = vrcp.f32 %v2986_v52 }
 0x951   : > { %v3022_v26 = vmul.f32 %v6389_v42, %v8141_v50  ;;  %v3038_v35 = vpack.c.bf16 %v3024_v31, %v3023_v53 }
 0x953   : > { %v3037_v22 = vpack.c.bf16 %v3022_v26, %v3021_v55 }
 0x955   : > { %5845 = vmatprep.mubr.msk.bf16.mxu0 %vm1111_vm0, %v3037_v22 }
 0x956   : > { %v2977_v39 = vpop.xlane.xlu0 %2976  ;;  %5846 = vmatmul.mubr.msk.bf16.vlgmr.msra.gmra.mrb[64].mxu0 %vm1111_vm0, %v3038_v35  ;;  %v6391_v20 = vpop.eup %6390 }
 0x957   : > { %5858 = vmatpush3.bf16.msra.mxu0 %v7981_v16  ;;  %v3032_v50 = vmul.f32 %v6391_v20, %v8151_v62 }
 0x958   : > { %v6393_v37 = vpop.eup %6392  ;;  %v2980_v7 = vpop.xlane.xlu1 %2979  ;;  %5859 = vmatprep.subr.bf16.mxu0 %v7989_v0 }
 0x959   : > { %v6395_v25 = vpop.eup %6394  ;;  %6398 = vrcp.f32 %v2980_v7  ;;  %v3029_v56 = vmul.f32 %v6393_v37, %v8156_v14 }
 0x95a   : > { %v6397_v40 = vpop.eup %6396  ;;  %v2971_v23 = vpop.xlane.xlu0 %2970  ;;  %v3031_v45 = vmul.f32 %v6395_v25, %v8146_v41 }
 0x95b   : > { %6400 = vrcp.f32 %v2971_v23  ;;  %5860 = vmatpush3.bf16.msra.mxu0 %v7989_v0  ;;  %v3030_v51 = vmul.f32 %v6397_v40, %v8161_v21  ;;  %v3385_v0 = vsel %vm1111_vm0, %v8119_v10, 0 }
 0x95c   : > { %6402 = vrcp.f32 %v2977_v39  ;;  %v2974_v16 = vpop.xlane.xlu1 %2973  ;;  %5993 = vmatprep.subr.msk.bf16.mxu0 %vm1111_vm0, %v8119_v10  ;;  %v3042_v29 = vpack.c.bf16 %v3032_v50, %v3031_v45  ;;  %v3388_v10 = vsel %vm1111_vm0, %v8231_v28, 0 }
 0x95d   : > { %6404 = vrcp.f32 %v2974_v16  ;;  %v3041_v60 = vpack.c.bf16 %v3030_v51, %v3029_v56 }
 0x95e   : > { %v3371_v62 = vpop.permute.xlu0 %3370 }
 0x95f   : > { %5861 = vmatprep.mubr.msk.bf16.mxu0 %vm1111_vm0, %v3041_v60 }
 0x960   : > { %5862 = vmatmul.mubr.msk.bf16.vlgmr.msra.gmra.mrb[68].mxu0 %vm1111_vm0, %v3042_v29 }
 0x961   : > { %5877 = vmatprep.mubr.msk.bf16.mxu0 %vm1111_vm0, %v3371_v62 }
 0x963   : > { %v6399_v14 = vpop.eup %6398 }
 0x964   : > { %5874 = vmatpush3.bf16.xpose.msra.mxu0 %v3385_v0  ;;  %v3028_v47 = vmul.f32 %v6399_v14, %v8169_v27  ;;  %v3373_v27 = vpop.permute.xlu1 %3372 }
 0x965   : > { %v6401_v41 = vpop.eup %6400  ;;  %5994 = vmatprep.subr.msk.bf16.mxu0 %vm1111_vm0, %v8231_v28 }
 0x966   : > { %v6403_v21 = vpop.eup %6402  ;;  %v3025_v32 = vmul.f32 %v6401_v41, %v8173_v54 }
 0x967   : > { %v6405_v46 = vpop.eup %6404  ;;  %v3027_v8 = vmul.f32 %v6403_v21, %v8165_v1 }
 0x968   : > { %v3026_v38 = vmul.f32 %v6405_v46, %v8177_v57 }
 0x969   : > { %v3040_v34 = vpack.c.bf16 %v3028_v47, %v3027_v8 }
 0x96a   : > { %v3039_v12 = vpack.c.bf16 %v3026_v38, %v3025_v32 }
 0x96c   : > { %5853 = vmatprep.mubr.msk.bf16.mxu1 %vm1111_vm0, %v3039_v12  ;;  %5876 = vmatpush3.bf16.xpose.msra.mxu0 %v3388_v10 }
 0x96d   : > { %5854 = vmatmul.mubr.msk.bf16.vlgmr.msra.gmra.mrb[64].mxu1 %vm1111_vm0, %v3040_v34 }
 0x96e   : > { %5866 = vmatpush3.bf16.msra.mxu1 %v7992_v6 }
 0x96f   : > { %5867 = vmatprep.subr.bf16.mxu1 %v8229_v2 }
 0x972   : > { %5868 = vmatpush3.bf16.msra.mxu1 %v8229_v2 }
 0x973   : > { %5878 = vmatmul.mubr.msk.bf16.vlgmr.msra.gmra.mrb[72].mxu0 %vm1111_vm0, %v3373_v27 }
 0x98f   : > { %v2998_v1 = vpop.xlane.xlu0 %2997 }
 0x990   : > { %6406 = vrcp.f32 %v2998_v1 }
 0x991   : > { %v3001_v54 = vpop.xlane.xlu1 %3000 }
 0x993   : > { %v3444_v57 = vpop.permute.xlu0 %3443 }
 0x994   : > { %5995 = vmatprep.subr.msk.bf16.mxu1 %vm1111_vm0, %v3444_v57 }
 0x995   : > { %v2995_v28 = vpop.xlane.xlu1 %2994 }
 0x996   : > { %6408 = vrcp.f32 %v2995_v28 }
 0x997   : > { %v3440_v11 = vpop.permute.xlu0 %3439  ;;  %6410 = vrcp.f32 %v3001_v54 }
 0x999   : > { %v3004_v52 = vpop.xlane.xlu1 %3003 }
 0x99a   : > { %6412 = vrcp.f32 %v3004_v52  ;;  %v6407_v31 = vpop.eup %6406 }
 0x99b   : > { %v3513_v6 = vpop.permute.xlu0 %3512  ;;  %v3034_v35 = vmul.f32 %v6407_v31, %v8189_v3  ;;  %v3454_v3 = vsel %vm1111_vm0, %v3444_v57, 0 }
 0x99c   : > { %5997 = vmatprep.subr.msk.bf16.mxu0 %vm1111_vm0, %v3513_v6  ;;  %v3523_v42 = vsel %vm1111_vm0, %v3513_v6, 0 }
 0x99d   : > { %v3446_v2 = vpop.permute.xlu1 %3445  ;;  %5890 = vmatpush3.bf16.xpose.msra.mxu0 %v3523_v42 }
 0x99f   : > { %v3509_v55 = vpop.permute.xlu0 %3508 }
 0x9a0   : > { %v6409_v26 = vpop.eup %6408  ;;  %5893 = vmatprep.mubr.msk.bf16.mxu0 %vm1111_vm0, %v3509_v55 }
 0x9a1   : > { %v3442_v53 = vpop.permute.xlu1 %3441  ;;  %v3033_v22 = vmul.f32 %v6409_v26, %v8197_v15  ;;  %v6411_v39 = vpop.eup %6410  ;;  %v3457_v15 = vsel %vm1111_vm0, %v3446_v2, 0 }
 0x9a2   : > { %v3035_v7 = vmul.f32 %v6411_v39, %v8191_v9 }
 0x9a3   : > { %v3043_v20 = vpack.c.bf16 %v3034_v35, %v3033_v22 }
 0x9a4   : > { %v6413_v37 = vpop.eup %6412 }
 0x9a5   : > { %v3036_v25 = vmul.f32 %v6413_v37, %v8201_v24  ;;  %v3515_v40 = vpop.permute.xlu1 %3514  ;;  %5869 = vmatprep.mubr.msk.bf16.mxu1 %vm1111_vm0, %v3043_v20  ;;  %v3582_v24 = vpop.permute.xlu0 %3581 }
 0x9a6   : > { %5998 = vmatprep.subr.msk.bf16.mxu0 %vm1111_vm0, %v3515_v40  ;;  %v3526_v50 = vsel %vm1111_vm0, %v3515_v40, 0  ;;  %v3592_v51 = vsel %vm1111_vm0, %v3582_v24, 0 }
 0x9a7   : > { %5892 = vmatpush3.bf16.xpose.msra.mxu0 %v3526_v50  ;;  %v3044_v23 = vpack.c.bf16 %v3036_v25, %v3035_v7 }
 0x9a9   : > { %5870 = vmatmul.mubr.msk.bf16.vlgmr.msra.gmra.mrb[68].mxu1 %vm1111_vm0, %v3044_v23  ;;  %v3511_v9 = vpop.permute.xlu1 %3510  ;;  %v3578_v56 = vpop.permute.xlu0 %3577 }
 0x9aa   : > { %5882 = vmatpush3.bf16.xpose.msra.mxu1 %v3454_v3  ;;  %5885 = vmatprep.mubr.msk.bf16.mxu1 %vm1111_vm0, %v3440_v11 }
 0x9ab   : > { %5996 = vmatprep.subr.msk.bf16.mxu1 %vm1111_vm0, %v3446_v2 }
 0x9ad   : > { %v3584_v45 = vpop.permute.xlu1 %3583 }
 0x9ae   : > { %5894 = vmatmul.mubr.msk.bf16.vlgmr.msra.gmra.mrb[76].mxu0 %vm1111_vm0, %v3511_v9  ;;  %v3595_v16 = vsel %vm1111_vm0, %v3584_v45, 0 }
 0x9b1   : > { %v3580_v60 = vpop.permute.xlu1 %3579 }
 0x9b2   : > { %5884 = vmatpush3.bf16.xpose.msra.mxu1 %v3457_v15 }
 0x9b3   : > { %5999 = vmatprep.subr.msk.bf16.mxu1 %vm1111_vm0, %v3582_v24 }
 0x9b9   : > { %5886 = vmatmul.mubr.msk.bf16.vlgmr.msra.gmra.mrb[72].mxu1 %vm1111_vm0, %v3442_v53 }
 0x9ba   : > { %5898 = vmatpush3.bf16.xpose.msra.mxu1 %v3592_v51  ;;  %5901 = vmatprep.mubr.msk.bf16.mxu1 %vm1111_vm0, %v3578_v56 }
 0x9bb   : > { %6000 = vmatprep.subr.msk.bf16.mxu1 %vm1111_vm0, %v3584_v45 }
 0x9c2   : > { %5900 = vmatpush3.bf16.xpose.msra.mxu1 %v3595_v16 }
 0x9c9   : > { %5902 = vmatmul.mubr.msk.bf16.vlgmr.msra.gmra.mrb[76].mxu1 %vm1111_vm0, %v3580_v60 }
 0xa29   : > { %v8291_v29 = vpop.f32.mrb[64].mxu0 }
 0xa2a   : > { %v8293_v62 = vpop.f32.mrb[65].mxu0 }
 0xa2b   : > { %v8295_v0 = vpop.f32.mrb[66].mxu0 }
 0xa2c   : > { %v8297_v14 = vpop.f32.mrb[67].mxu0 }
 0xa33   : > { %v8299_v41 = vpop.f32.mrb[68].mxu0 }
 0xa34   : > { %v8301_v21 = vpop.f32.mrb[69].mxu0 }
 0xa35   : > { %v8303_v46 = vpop.f32.mrb[70].mxu0 }
 0xa36   : > { %v8305_v47 = vpop.f32.mrb[71].mxu0 }
 0xa40   : > { %v8307_v32 = vpop.f32.mrb[64].mxu1 }
 0xa41   : > { %v8309_v38 = vpop.f32.mrb[65].mxu1 }
 0xa42   : > { %v8311_v8 = vpop.f32.mrb[66].mxu1 }
 0xa43   : > { %v8313_v12 = vpop.f32.mrb[67].mxu1 }
 0xa46   : > { %v5879_v10 = vpop.f32.mrb[72].mxu0 }
 0xa47   : > { %v8316_v34 = vadd.f32 %v8013_v63, %v5879_v10  ;;  %v3424_v27 = vpop.f32.mrb[73].mxu0 }
 0xa48   : > { %v5880_v1 = vpop.f32.mrb[74].mxu0  ;;  %v8319_v54 = vadd.f32 %v8022_v19, %v3424_v27 }
 0xa49   : > { %v3427_v57 = vpop.f32.mrb[75].mxu0  ;;  %v3652_v28 = vsel %vm1111_vm0, %v8316_v34, -inf  ;;  %v8329_v6 = vadd.f32 %v8038_v58, %v5880_v1 }
 0xa4a   : > { %v8324_v11 = vadd.f32 %v8031_v49, %v3427_v57  ;;  %3653 = vmax.xlane.f32.xlu0 %v3652_v28  ;;  %v3646_v42 = vsel %vm1111_vm0, %v8319_v54, -inf }
 0xa4b   : > { %v3655_v2 = vsel %vm1111_vm0, %v8329_v6, -inf }
 0xa4c   : > { %v3649_v52 = vsel %vm1111_vm0, %v8324_v11, -inf }
 0xa4d   : > { %3650 = vmax.xlane.f32.xlu1 %v3649_v52 }
 0xa4e   : > { %3647 = vmax.xlane.f32.xlu0 %v3646_v42 }
 0xa52   : > { %3656 = vmax.xlane.f32.xlu0 %v3655_v2 }
 0xa7c   : > { %v8335_v31 = vpop.f32.mrb[68].mxu1 }
 0xa7d   : > { %v8337_v55 = vpop.f32.mrb[69].mxu1 }
 0xa7e   : > { %v8339_v26 = vpop.f32.mrb[70].mxu1 }
 0xa7f   : > { %v8341_v53 = vpop.f32.mrb[71].mxu1 }
 0xa81   : > { %v5895_v22 = vpop.f32.mrb[76].mxu0 }
 0xa82   : > { %v8344_v35 = vadd.f32 %v8013_v63, %v5895_v22  ;;  %v3562_v39 = vpop.f32.mrb[77].mxu0 }
 0xa83   : > { %v5896_v20 = vpop.f32.mrb[78].mxu0  ;;  %v8347_v37 = vadd.f32 %v8022_v19, %v3562_v39 }
 0xa84   : > { %v8350_v7 = vadd.f32 %v8038_v58, %v5896_v20  ;;  %v3565_v25 = vpop.f32.mrb[79].mxu0  ;;  %v3676_v40 = vsel %vm1111_vm0, %v8344_v35, -inf }
 0xa85   : > { %3677 = vmax.xlane.f32.xlu0 %v3676_v40  ;;  %v8355_v50 = vadd.f32 %v8031_v49, %v3565_v25  ;;  %v3670_v3 = vsel %vm1111_vm0, %v8347_v37, -inf }
 0xa86   : > { %v3679_v23 = vsel %vm1111_vm0, %v8350_v7, -inf }
 0xa87   : > { %3680 = vmax.xlane.f32.xlu1 %v3679_v23  ;;  %v3673_v9 = vsel %vm1111_vm0, %v8355_v50, -inf }
 0xa89   : > { %3671 = vmax.xlane.f32.xlu0 %v3670_v3 }
 0xa8b   : > { %3674 = vmax.xlane.f32.xlu1 %v3673_v9 }
 0xa8c   : > { %v5887_v15 = vpop.f32.mrb[72].mxu1 }
 0xa8d   : > { %v8364_v24 = vadd.f32 %v8013_v63, %v5887_v15  ;;  %v3493_v56 = vpop.f32.mrb[73].mxu1 }
 0xa8e   : > { %v5888_v51 = vpop.f32.mrb[74].mxu1  ;;  %v8367_v45 = vadd.f32 %v8022_v19, %v3493_v56 }
 0xa8f   : > { %v8370_v16 = vadd.f32 %v8038_v58, %v5888_v51  ;;  %v3496_v60 = vpop.f32.mrb[75].mxu1  ;;  %v3664_v10 = vsel %vm1111_vm0, %v8364_v24, -inf }
 0xa90   : > { %3665 = vmax.xlane.f32.xlu0 %v3664_v10  ;;  %v8375_v27 = vadd.f32 %v8031_v49, %v3496_v60  ;;  %v3658_v57 = vsel %vm1111_vm0, %v8367_v45, -inf }
 0xa91   : > { %v3667_v1 = vsel %vm1111_vm0, %v8370_v16, -inf }
 0xa92   : > { %3668 = vmax.xlane.f32.xlu1 %v3667_v1  ;;  %v3661_v28 = vsel %vm1111_vm0, %v8375_v27, -inf }
 0xa94   : > { %3659 = vmax.xlane.f32.xlu0 %v3658_v57 }
 0xa96   : > { %3662 = vmax.xlane.f32.xlu1 %v3661_v28 }
 0xa9c   : > { %v5903_v52 = vpop.f32.mrb[76].mxu1 }
 0xa9d   : > { %v3631_v42 = vpop.f32.mrb[77].mxu1  ;;  %v8388_v39 = vadd.f32 %v8013_v63, %v5903_v52 }
 0xa9e   : > { %v5904_v2 = vpop.f32.mrb[78].mxu1  ;;  %v8394_v25 = vadd.f32 %v8022_v19, %v3631_v42 }
 0xa9f   : > { %v3634_v22 = vpop.f32.mrb[79].mxu1  ;;  %v8391_v20 = vadd.f32 %v8038_v58, %v5904_v2  ;;  %v3688_v40 = vsel %vm1111_vm0, %v8388_v39, -inf }
 0xaa0   : > { %v8399_v23 = vadd.f32 %v8031_v49, %v3634_v22 }
 0xaa2   : > { %v3685_v63 = vsel %vm1111_vm0, %v8399_v23, -inf }
 0xaa7   : > { %3832 = vrot.lane.b32.xlu1 %v7290_v17, %s6795_s5  ;;  %v3691_v17 = vsel %vm1111_vm0, %v8391_v20, -inf }
 0xaaa   : > { %3830 = vrot.lane.b32.xlu0 %v7292_v18, %s6795_s5  ;;  %v3682_v18 = vsel %vm1111_vm0, %v8394_v25, -inf }
 0xac9   : > { %3689 = vmax.xlane.f32.xlu0 %v3688_v40 }
 0xacb   : > { %3692 = vmax.xlane.f32.xlu1 %v3691_v17 }
 0xacd   : > { %3683 = vmax.xlane.f32.xlu0 %v3682_v18 }
 0xacf   : > { %3686 = vmax.xlane.f32.xlu1 %v3685_v63 }
 0xad7   : > { %v3654_v19 = vpop.xlane.xlu0 %3653 }
 0xad8   : > { %v3696_v3 = vsub.f32 %v8316_v34, %v3654_v19 }
 0xada   : > { %v3651_v15 = vpop.xlane.xlu1 %3650  ;;  %v3714_v56 = vmul.f32 1.442695, %v3696_v3 }
 0xadb   : > { %v3648_v49 = vpop.xlane.xlu0 %3647  ;;  %v3695_v60 = vsub.f32 %v8324_v11, %v3651_v15 }
 0xadc   : > { %v3694_v51 = vsub.f32 %v8319_v54, %v3648_v49  ;;  %6414 = vpow2.f32 %v3714_v56 }
 0xadd   : > { %v3712_v57 = vmul.f32 1.442695, %v3695_v60 }
 0xade   : > { %v3710_v1 = vmul.f32 1.442695, %v3694_v51 }
 0xadf   : > { %v3657_v58 = vpop.xlane.xlu0 %3656 }
 0xae0   : > { %3893 = vrot.lane.b32.xlu1 %v7312_v43, %s6795_s5  ;;  %v3697_v9 = vsub.f32 %v8329_v6, %v3657_v58 }
 0xae2   : > { %v3716_v10 = vmul.f32 1.442695, %v3697_v9 }
 0xae3   : > { %3891 = vrot.lane.b32.xlu0 %v7314_v44, %s6795_s5 }
 0xae4   : > { %6416 = vpow2.f32 %v3716_v10 }
 0xae5   : > { %6418 = vpow2.f32 %v3710_v1 }
 0xae6   : > { %6420 = vpow2.f32 %v3712_v57  ;;  %v8415_v43 = vpop.eup %6414 }
 0xae7   : > { %v3748_v34 = vsel %vm1111_vm0, %v8415_v43, 0.0 }
 0xaee   : > { %v8417_v44 = vpop.eup %6416 }
 0xaef   : > { %v8421_v6 = vpop.eup %6418  ;;  %v3751_v54 = vsel %vm1111_vm0, %v8417_v44, 0.0 }
 0xaf0   : > { %v8425_v11 = vpop.eup %6420  ;;  %v3742_v28 = vsel %vm1111_vm0, %v8421_v6, 0.0 }
 0xaf1   : > { %v3745_v52 = vsel %vm1111_vm0, %v8425_v11, 0.0 }
 0xb02   : > { %3749 = vadd.xlane.f32.xlu0 %v3748_v34 }
 0xb04   : > { %3752 = vadd.xlane.f32.xlu1 %v3751_v54 }
 0xb06   : > { %3743 = vadd.xlane.f32.xlu0 %v3742_v28 }
 0xb08   : > { %3746 = vadd.xlane.f32.xlu1 %v3745_v52 }
 0xb12   : > { %v3678_v42 = vpop.xlane.xlu0 %3677 }
 0xb13   : > { %v3704_v2 = vsub.f32 %v8344_v35, %v3678_v42 }
 0xb14   : > { %v3681_v22 = vpop.xlane.xlu1 %3680 }
 0xb15   : > { %v3730_v40 = vmul.f32 1.442695, %v3704_v2  ;;  %v3705_v17 = vsub.f32 %v8350_v7, %v3681_v22 }
 0xb16   : > { %v3672_v18 = vpop.xlane.xlu0 %3671 }
 0xb17   : > { %6422 = vpow2.f32 %v3730_v40  ;;  %v3702_v63 = vsub.f32 %v8347_v37, %v3672_v18  ;;  %v3732_v49 = vmul.f32 1.442695, %v3705_v17 }
 0xb18   : > { %v3675_v19 = vpop.xlane.xlu1 %3674 }
 0xb19   : > { %v3726_v58 = vmul.f32 1.442695, %v3702_v63  ;;  %v3703_v3 = vsub.f32 %v8355_v50, %v3675_v19 }
 0xb1b   : > { %6424 = vpow2.f32 %v3726_v58  ;;  %v3728_v56 = vmul.f32 1.442695, %v3703_v3 }
 0xb1c   : > { %6426 = vpow2.f32 %v3732_v49 }
 0xb1d   : > { %v3666_v9 = vpop.xlane.xlu0 %3665 }
 0xb1e   : > { %v3700_v15 = vsub.f32 %v8364_v24, %v3666_v9 }
 0xb1f   : > { %v3669_v35 = vpop.xlane.xlu1 %3668 }
 0xb20   : > { %v3722_v51 = vmul.f32 1.442695, %v3700_v15  ;;  %v3701_v60 = vsub.f32 %v8370_v16, %v3669_v35 }
 0xb21   : > { %v8437_v7 = vpop.eup %6422  ;;  %v3660_v10 = vpop.xlane.xlu0 %3659 }
 0xb22   : > { %6428 = vpow2.f32 %v3722_v51  ;;  %v3724_v37 = vmul.f32 1.442695, %v3701_v60  ;;  %v3698_v1 = vsub.f32 %v8367_v45, %v3660_v10  ;;  %v3772_v57 = vsel %vm1111_vm0, %v8437_v7, 0.0 }
 0xb23   : > { %6430 = vpow2.f32 %v3728_v56  ;;  %v3663_v50 = vpop.xlane.xlu1 %3662  ;;  %3773 = vadd.xlane.f32.xlu0 %v3772_v57 }
 0xb24   : > { %6432 = vpow2.f32 %v3724_v37  ;;  %v3718_v24 = vmul.f32 1.442695, %v3698_v1  ;;  %v3699_v34 = vsub.f32 %v8375_v27, %v3663_v50 }
 0xb25   : > { %v8443_v54 = vpop.eup %6424  ;;  %v3831_v16 = vpop.permute.xlu0 %3830 }
 0xb26   : > { %v3720_v28 = vmul.f32 1.442695, %v3699_v34  ;;  %5905 = vmatprep.subr.bf16.mxu0 %v3831_v16  ;;  %v3766_v52 = vsel %vm1111_vm0, %v8443_v54, 0.0  ;;  %v8447_v42 = vpop.eup %6426  ;;  %6434 = vpow2.f32 %v3718_v24 }
 0xb27   : > { %v3833_v45 = vpop.permute.xlu1 %3832  ;;  %5906 = vmatpush3.bf16.msra.mxu0 %v3831_v16  ;;  %3767 = vadd.xlane.f32.xlu1 %v3766_v52  ;;  %v3775_v2 = vsel %vm1111_vm0, %v8447_v42, 0.0 }
 0xb28   : > { %6436 = vpow2.f32 %v3720_v28  ;;  %5907 = vmatprep.subr.bf16.mxu0 %v3833_v45 }
 0xb2b   : > { %5908 = vmatpush3.bf16.msra.mxu0 %v3833_v45  ;;  %3776 = vadd.xlane.f32.xlu1 %v3775_v2 }
 0xb2c   : > { %v8451_v27 = vpop.eup %6428 }
 0xb2d   : > { %v8453_v22 = vpop.eup %6430  ;;  %v3760_v40 = vsel %vm1111_vm0, %v8451_v27, 0.0 }
 0xb2e   : > { %v8457_v17 = vpop.eup %6432  ;;  %3761 = vadd.xlane.f32.xlu0 %v3760_v40  ;;  %v3769_v19 = vsel %vm1111_vm0, %v8453_v22, 0.0 }
 0xb2f   : > { %v3763_v18 = vsel %vm1111_vm0, %v8457_v17, 0.0 }
 0xb30   : > { %3764 = vadd.xlane.f32.xlu1 %v3763_v18  ;;  %v8461_v63 = vpop.eup %6434 }
 0xb31   : > { %v3754_v3 = vsel %vm1111_vm0, %v8461_v63, 0.0 }
 0xb32   : > { %v8465_v49 = vpop.eup %6436  ;;  %3770 = vadd.xlane.f32.xlu0 %v3769_v19 }
 0xb33   : > { %v3757_v58 = vsel %vm1111_vm0, %v8465_v49, 0.0 }
 0xb34   : > { %3758 = vadd.xlane.f32.xlu1 %v3757_v58 }
 0xb36   : > { %3755 = vadd.xlane.f32.xlu0 %v3754_v3 }
 0xb56   : > { %v3690_v9 = vpop.xlane.xlu0 %3689 }
 0xb57   : > { %v3708_v15 = vsub.f32 %v8388_v39, %v3690_v9 }
 0xb58   : > { %v3693_v56 = vpop.xlane.xlu1 %3692 }
 0xb59   : > { %v3738_v35 = vmul.f32 1.442695, %v3708_v15  ;;  %v3709_v51 = vsub.f32 %v8391_v20, %v3693_v56 }
 0xb5a   : > { %v3684_v60 = vpop.xlane.xlu0 %3683 }
 0xb5b   : > { %6438 = vpow2.f32 %v3738_v35  ;;  %v3706_v10 = vsub.f32 %v8394_v25, %v3684_v60  ;;  %v3740_v37 = vmul.f32 1.442695, %v3709_v51 }
 0xb5c   : > { %v3687_v1 = vpop.xlane.xlu1 %3686 }
 0xb5d   : > { %v3734_v57 = vmul.f32 1.442695, %v3706_v10  ;;  %v3707_v50 = vsub.f32 %v8399_v23, %v3687_v1 }
 0xb5e   : > { %v3892_v24 = vpop.permute.xlu0 %3891 }
 0xb5f   : > { %6440 = vpow2.f32 %v3734_v57  ;;  %v3736_v34 = vmul.f32 1.442695, %v3707_v50  ;;  %5913 = vmatprep.subr.bf16.mxu1 %v3892_v24 }
 0xb60   : > { %6442 = vpow2.f32 %v3740_v37  ;;  %v3894_v16 = vpop.permute.xlu1 %3893  ;;  %5914 = vmatpush3.bf16.msra.mxu1 %v3892_v24 }
 0xb61   : > { %6444 = vpow2.f32 %v3736_v34  ;;  %5915 = vmatprep.subr.bf16.mxu1 %v3894_v16 }
 0xb64   : > { %5916 = vmatpush3.bf16.msra.mxu1 %v3894_v16 }
 0xb65   : > { %v8475_v39 = vpop.eup %6438 }
 0xb66   : > { %v3784_v20 = vsel %vm1111_vm0, %v8475_v39, 0.0 }
 0xb67   : > { %3785 = vadd.xlane.f32.xlu0 %v3784_v20 }
 0xb69   : > { %v8479_v25 = vpop.eup %6440 }
 0xb6a   : > { %v8481_v28 = vpop.eup %6442  ;;  %v3778_v23 = vsel %vm1111_vm0, %v8479_v25, 0.0 }
 0xb6b   : > { %v8485_v52 = vpop.eup %6444  ;;  %3779 = vadd.xlane.f32.xlu1 %v3778_v23  ;;  %v3787_v2 = vsel %vm1111_vm0, %v8481_v28, 0.0 }
 0xb6c   : > { %v3781_v45 = vsel %vm1111_vm0, %v8485_v52, 0.0 }
 0xb6d   : > { %3782 = vadd.xlane.f32.xlu0 %v3781_v45 }
 0xb6f   : > { %3788 = vadd.xlane.f32.xlu1 %v3787_v2 }
 0xb80   : > { %3954 = vrot.lane.b32.xlu1 %v7332_v61, %s6795_s5 }
 0xb83   : > { %3952 = vrot.lane.b32.xlu0 %v7334_v5, %s6795_s5 }
 0xb84   : > { %4013 = vrot.lane.b32.xlu1 %v7358_v33, %s6795_s5 }
 0xb87   : > { %2520 = vrot.lane.b32.xlu0 %v7997_v59, %s6795_s5  ;;  %v9120_v59 = vld [vmem:[#allocation27_spill] sm:$0xff] }
 0xb88   : > { %4015 = vrot.lane.b32.xlu1 %v7356_v30, %s6795_s5 }
 0xb8b   : > { %2524 = vrot.lane.b32.xlu0 %v7995_v13, %s6795_s5  ;;  %v9119_v13 = vld [vmem:[#allocation25_spill] sm:$0xff] }
 0xb8c   : > { %2522 = vrot.lane.b32.xlu1 %v8001_v36, %s6795_s5 }
 0xb8f   : > { %3305 = vrot.lane.b32.xlu0 %v8293_v62, %s6794_s1  ;;  %v3750_v61 = vpop.xlane.xlu0 %3749 }
 0xb90   : > { %2526 = vrot.lane.b32.xlu1 %v7999_v48, %s6795_s5 }
 0xb91   : > { %v3753_v5 = vpop.xlane.xlu1 %3752 }
 0xb92   : > { %6446 = vrcp.f32 %v3753_v5 }
 0xb93   : > { %3309 = vrot.lane.b32.xlu0 %v8291_v29, %s6794_s1  ;;  %v3744_v33 = vpop.xlane.xlu0 %3743 }
 0xb94   : > { %6448 = vrcp.f32 %v3744_v33  ;;  %3307 = vrot.lane.b32.xlu1 %v8297_v14, %s6794_s1 }
 0xb95   : > { %6450 = vrcp.f32 %v3750_v61  ;;  %v3747_v30 = vpop.xlane.xlu1 %3746 }
 0xb96   : > { %6452 = vrcp.f32 %v3747_v30 }
 0xb97   : > { %2528 = vrot.lane.b32.xlu0 %v8018_v4, %s6795_s5  ;;  %v9121_v4 = vld [vmem:[#allocation26_spill] sm:$0xff] }
 0xb98   : > { %3311 = vrot.lane.b32.xlu1 %v8295_v0, %s6794_s1 }
 0xb9b   : > { %2532 = vrot.lane.b32.xlu0 %v9119_v13, %s6795_s5 }
 0xb9c   : > { %2530 = vrot.lane.b32.xlu1 %v9120_v59, %s6795_s5  ;;  %v6447_v48 = vpop.eup %6446 }
 0xb9d   : > { %v3809_v14 = vmul.f32 %v6447_v48, %v8417_v44  ;;  %v9122_v44 = vld [vmem:[#allocation21_spill] sm:$0xff] }
 0xb9e   : > { %v6449_v36 = vpop.eup %6448 }
 0xb9f   : > { %v6451_v29 = vpop.eup %6450  ;;  %3313 = vrot.lane.b32.xlu0 %v8309_v38, %s6794_s1  ;;  %v3806_v0 = vmul.f32 %v6449_v36, %v8421_v6 }
 0xba0   : > { %v6453_v62 = vpop.eup %6452  ;;  %2534 = vrot.lane.b32.xlu1 %v9121_v4, %s6795_s5  ;;  %v3808_v18 = vmul.f32 %v6451_v29, %v8415_v43  ;;  %v9123_v43 = vld [vmem:[#allocation23_spill] sm:$0xff] }
 0xba1   : > { %v3807_v40 = vmul.f32 %v6453_v62, %v8425_v11 }
 0xba2   : > { %v3823_v38 = vpack.c.bf16 %v3809_v14, %v3808_v18 }
 0xba3   : > { %3317 = vrot.lane.b32.xlu0 %v8307_v32, %s6794_s1  ;;  %v3822_v19 = vpack.c.bf16 %v3807_v40, %v3806_v0 }
 0xba4   : > { %3315 = vrot.lane.b32.xlu1 %v8313_v12, %s6794_s1 }
 0xba5   : > { %5909 = vmatprep.mubr.msk.bf16.mxu0 %vm1111_vm0, %v3822_v19 }
 0xba6   : > { %5910 = vmatmul.mubr.msk.bf16.vlgmr.msra.gmra.mrb[80].mxu0 %vm1111_vm0, %v3823_v38 }
 0xba7   : > { %2536 = vrot.lane.b32.xlu0 %v9122_v44, %s6795_s5 }
 0xba8   : > { %3319 = vrot.lane.b32.xlu1 %v8311_v8, %s6794_s1 }
 0xbac   : > { %2538 = vrot.lane.b32.xlu1 %v9123_v43, %s6795_s5 }
 0xbb0   : > { %v3774_v32 = vpop.xlane.xlu0 %3773 }
 0xbb4   : > { %v3768_v6 = vpop.xlane.xlu1 %3767 }
 0xbb5   : > { %6454 = vrcp.f32 %v3768_v6 }
 0xbb8   : > { %v3777_v11 = vpop.xlane.xlu1 %3776 }
 0xbbb   : > { %v3762_v58 = vpop.xlane.xlu0 %3761 }
 0xbbd   : > { %v3765_v3 = vpop.xlane.xlu1 %3764 }
 0xbbf   : > { %v3771_v12 = vpop.xlane.xlu0 %3770  ;;  %v6455_v56 = vpop.eup %6454 }
 0xbc0   : > { %6456 = vrcp.f32 %v3771_v12  ;;  %v3814_v51 = vmul.f32 %v6455_v56, %v8443_v54 }
 0xbc1   : > { %6458 = vrcp.f32 %v3765_v3  ;;  %v3759_v9 = vpop.xlane.xlu1 %3758 }
 0xbc2   : > { %6460 = vrcp.f32 %v3759_v9 }
 0xbc3   : > { %6462 = vrcp.f32 %v3762_v58  ;;  %v3756_v15 = vpop.xlane.xlu0 %3755 }
 0xbc4   : > { %6464 = vrcp.f32 %v3756_v15 }
 0xbc5   : > { %6466 = vrcp.f32 %v3777_v11 }
 0xbc6   : > { %6468 = vrcp.f32 %v3774_v32 }
 0xbca   : > { %v6457_v35 = vpop.eup %6456 }
 0xbcb   : > { %v6459_v8 = vpop.eup %6458  ;;  %v3815_v60 = vmul.f32 %v6457_v35, %v8453_v22  ;;  %v6142_v35 = vld [vmem:[#allocation9] sm:$0xff]  }
 0xbcc   : > { %v6461_v10 = vpop.eup %6460  ;;  %v3813_v50 = vmul.f32 %v6459_v8, %v8457_v17  ;;  %v6143_v8 = vld [vmem:[#allocation9 + $0x8] sm:$0xff]  }
 0xbcd   : > { %v6463_v37 = vpop.eup %6462  ;;  %v3826_v1 = vpack.c.bf16 %v3815_v60, %v3814_v51  ;;  %v3811_v34 = vmul.f32 %v6461_v10, %v8465_v49  ;;  %v6144_v51 = vld [vmem:[#allocation9 + $0x10] sm:$0xff]   ;;  %v6145_v60 = vld [vmem:[#allocation9 + $0x18] sm:$0xff]   ;;  %v6146_v10 = vld [vmem:[#allocation9 + $0x20] sm:$0xff]  }
 0xbce   : > { %v6465_v57 = vpop.eup %6464  ;;  %v3812_v16 = vmul.f32 %v6463_v37, %v8451_v27  ;;  %v6147_v37 = vld [vmem:[#allocation9 + $0x28] sm:$0xff]  }
 0xbcf   : > { %5925 = vmatprep.mubr.msk.bf16.mxu0 %vm1111_vm0, %v3826_v1  ;;  %v3810_v24 = vmul.f32 %v6465_v57, %v8461_v63  ;;  %v6467_v63 = vpop.eup %6466  ;;  %v6148_v1 = vld [vmem:[#allocation9 + $0x30] sm:$0xff]   ;;  %v6149_v57 = vld [vmem:[#allocation9 + $0x38] sm:$0xff]  }
 0xbd0   : > { %v3825_v23 = vpack.c.bf16 %v3813_v50, %v3812_v16  ;;  %v6469_v27 = vpop.eup %6468  ;;  %v3817_v61 = vmul.f32 %v6467_v63, %v8447_v42 }
 0xbd1   : > { %v3824_v20 = vpack.c.bf16 %v3811_v34, %v3810_v24  ;;  %v3816_v30 = vmul.f32 %v6469_v27, %v8437_v7 }
 0xbd3   : > { %5917 = vmatprep.mubr.msk.bf16.mxu1 %vm1111_vm0, %v3824_v20  ;;  %v3827_v36 = vpack.c.bf16 %v3817_v61, %v3816_v30  ;;  %v9125_v20 = vld [vmem:[#allocation22_spill] sm:$0xff] }
 0xbd4   : > { %5918 = vmatmul.mubr.msk.bf16.vlgmr.msra.gmra.mrb[80].mxu1 %vm1111_vm0, %v3825_v23  ;;  %v9126_v23 = vld [vmem:[#allocation24_spill] sm:$0xff]  ;;  %v9130_v30 = vld [vmem:[#allocation30_spill] sm:$0xff] }
 0xbf4   : > { %v3786_v54 = vpop.xlane.xlu0 %3785 }
 0xbf8   : > { %v3780_v22 = vpop.xlane.xlu1 %3779 }
 0xbf9   : > { %6470 = vrcp.f32 %v3780_v22 }
 0xbfa   : > { %6472 = vrcp.f32 %v3786_v54  ;;  %v3783_v17 = vpop.xlane.xlu0 %3782 }
 0xbfb   : > { %6474 = vrcp.f32 %v3783_v17 }
 0xbfc   : > { %v3789_v45 = vpop.xlane.xlu1 %3788 }
 0xbfd   : > { %6476 = vrcp.f32 %v3789_v45 }
 0xbfe   : > { %v3953_v49 = vpop.permute.xlu0 %3952 }
 0xbff   : > { %5921 = vmatprep.subr.bf16.mxu0 %v3953_v49 }
 0xc00   : > { %v3955_v2 = vpop.permute.xlu1 %3954  ;;  %5922 = vmatpush3.bf16.msra.mxu0 %v3953_v49 }
 0xc01   : > { %5923 = vmatprep.subr.bf16.mxu0 %v3955_v2 }
 0xc02   : > { %v2521_v5 = vpop.permute.xlu0 %2520 }
 0xc03   : > { %v6471_v33 = vpop.eup %6470  ;;  %2569 = vst.msk [vmem:[#allocation2] sm:$0xff] %vm2568_vm1, %v2521_v5 }
 0xc04   : > { %v6473_v13 = vpop.eup %6472  ;;  %v4014_v59 = vpop.permute.xlu1 %4013  ;;  %5924 = vmatpush3.bf16.msra.mxu0 %v3955_v2  ;;  %v3818_v62 = vmul.f32 %v6471_v33, %v8479_v25  ;;  %v9129_v33 = vld [vmem:[#allocation28_spill] sm:$0xff] }
 0xc05   : > { %v6475_v48 = vpop.eup %6474  ;;  %5929 = vmatprep.subr.bf16.mxu1 %v4014_v59  ;;  %v3820_v7 = vmul.f32 %v6473_v13, %v8475_v39  ;;  %v9124_v39 = vmov 0   ;;  %5937 = vmatprep.subr.bf16.mxu0 %v6142_v35 }
 0xc06   : > { %5930 = vmatpush3.bf16.msra.mxu1 %v4014_v59  ;;  %v2525_v29 = vpop.permute.xlu0 %2524  ;;  %v3819_v14 = vmul.f32 %v6475_v48, %v8485_v52 }
 0xc07   : > { %v6477_v42 = vpop.eup %6476  ;;  %2571 = vst.msk [vmem:[#allocation2 + $0x10] sm:$0xff] %vm2568_vm1, %v2525_v29  ;;  %5926 = vmatmul.mubr.msk.bf16.vlgmr.msra.gmra.mrb[84].mxu0 %vm1111_vm0, %v3827_v36 }
 0xc08   : > { %v3821_v4 = vmul.f32 %v6477_v42, %v8481_v28  ;;  %v4016_v0 = vpop.permute.xlu1 %4015  ;;  %v3828_v40 = vpack.c.bf16 %v3819_v14, %v3818_v62  ;;  %5938 = vmatpush3.bf16.msra.mxu0 %v6142_v35 }
 0xc09   : > { %5931 = vmatprep.subr.bf16.mxu1 %v4016_v0  ;;  %5939 = vmatprep.subr.bf16.mxu0 %v6143_v8 }
 0xc0a   : > { %5932 = vmatpush3.bf16.msra.mxu1 %v4016_v0  ;;  %5933 = vmatprep.mubr.msk.bf16.mxu1 %vm1111_vm0, %v3828_v40  ;;  %v3306_v18 = vpop.permute.xlu0 %3305  ;;  %v3829_v25 = vpack.c.bf16 %v3821_v4, %v3820_v7 }
 0xc0b   : > { %3354 = vst.msk [vmem:[#allocation2] sm:$0xff] %vm3353_vm2, %v3306_v18 }
 0xc0c   : > { %v2523_v52 = vpop.permute.xlu1 %2522  ;;  %5940 = vmatpush3.bf16.msra.mxu0 %v6143_v8 }
 0xc0d   : > { %2570 = vst.msk [vmem:[#allocation2 + $0x8] sm:$0xff] %vm2568_vm1, %v2523_v52  ;;  %5934 = vmatmul.mubr.msk.bf16.vlgmr.msra.gmra.mrb[84].mxu1 %vm1111_vm0, %v3829_v25  ;;  %5941 = vmatprep.subr.bf16.mxu0 %v6144_v51 }
 0xc0e   : > { %v3310_v19 = vpop.permute.xlu0 %3309  ;;  %4733 = vmatprep.mubr.bf16.mxu1 %v9124_v39 }
 0xc0f   : > { %3356 = vst.msk [vmem:[#allocation2 + $0x10] sm:$0xff] %vm3353_vm2, %v3310_v19 }
 0xc10   : > { %v2527_v28 = vpop.permute.xlu1 %2526  ;;  %5942 = vmatpush3.bf16.msra.mxu0 %v6144_v51 }
 0xc11   : > { %2572 = vst.msk [vmem:[#allocation2 + $0x18] sm:$0xff] %vm2568_vm1, %v2527_v28  ;;  %5943 = vmatprep.subr.bf16.mxu0 %v6145_v60 }
 0xc12   : > { %v2529_v38 = vpop.permute.xlu0 %2528 }
 0xc13   : > { %2573 = vst.msk [vmem:[#allocation2 + $0x20] sm:$0xff] %vm2568_vm1, %v2529_v38 }
 0xc14   : > { %v3308_v44 = vpop.permute.xlu1 %3307  ;;  %5944 = vmatpush3.bf16.msra.mxu0 %v6145_v60 }
 0xc15   : > { %3355 = vst.msk [vmem:[#allocation2 + $0x8] sm:$0xff] %vm3353_vm2, %v3308_v44  ;;  %5945 = vmatprep.subr.bf16.mxu0 %v6146_v10 }
 0xc16   : > { %v2533_v43 = vpop.permute.xlu0 %2532 }
 0xc17   : > { %2575 = vst.msk [vmem:[#allocation2 + $0x30] sm:$0xff] %vm2568_vm1, %v2533_v43 }
 0xc18   : > { %v3312_v6 = vpop.permute.xlu1 %3311  ;;  %5946 = vmatpush3.bf16.msra.mxu0 %v6146_v10 }
 0xc19   : > { %3357 = vst.msk [vmem:[#allocation2 + $0x18] sm:$0xff] %vm3353_vm2, %v3312_v6  ;;  %5947 = vmatprep.subr.bf16.mxu0 %v6147_v37 }
 0xc1a   : > { %v3314_v32 = vpop.permute.xlu0 %3313 }
 0xc1b   : > { %3358 = vst.msk [vmem:[#allocation2 + $0x20] sm:$0xff] %vm3353_vm2, %v3314_v32 }
 0xc1c   : > { %v2531_v11 = vpop.permute.xlu1 %2530  ;;  %5948 = vmatpush3.bf16.msra.mxu0 %v6147_v37 }
 0xc1d   : > { %2574 = vst.msk [vmem:[#allocation2 + $0x28] sm:$0xff] %vm2568_vm1, %v2531_v11  ;;  %5949 = vmatprep.subr.bf16.mxu0 %v6148_v1 }
 0xc1e   : > { %v3318_v58 = vpop.permute.xlu0 %3317 }
 0xc1f   : > { %3360 = vst.msk [vmem:[#allocation2 + $0x30] sm:$0xff] %vm3353_vm2, %v3318_v58 }
 0xc20   : > { %v2535_v3 = vpop.permute.xlu1 %2534  ;;  %5950 = vmatpush3.bf16.msra.mxu0 %v6148_v1 }
 0xc21   : > { %2576 = vst.msk [vmem:[#allocation2 + $0x38] sm:$0xff] %vm2568_vm1, %v2535_v3  ;;  %5951 = vmatprep.subr.bf16.mxu0 %v6149_v57 }
 0xc22   : > { %v2537_v12 = vpop.permute.xlu0 %2536 }
 0xc23   : > { %2577 = vst.msk [vmem:[#allocation2 + $0x40] sm:$0xff] %vm2568_vm1, %v2537_v12 }
 0xc24   : > { %v3316_v9 = vpop.permute.xlu1 %3315  ;;  %5952 = vmatpush3.bf16.msra.mxu0 %v6149_v57 }
 0xc25   : > { %3359 = vst.msk [vmem:[#allocation2 + $0x28] sm:$0xff] %vm3353_vm2, %v3316_v9 }
 0xc28   : > { %v3320_v15 = vpop.permute.xlu1 %3319 }
 0xc29   : > { %3361 = vst.msk [vmem:[#allocation2 + $0x38] sm:$0xff] %vm3353_vm2, %v3320_v15 }
 0xc2c   : > { %v2539_v56 = vpop.permute.xlu1 %2538 }
 0xc2d   : > { %2578 = vst.msk [vmem:[#allocation2 + $0x48] sm:$0xff] %vm2568_vm1, %v2539_v56 }
 0xc79   : > { %v5911_v50 = vpop.f32.mrb[80].mxu0 }
 0xc7a   : > { %4094 = vrot.lane.b32.xlu0 %v5911_v50, %s6793_s8  ;;  %v3876_v24 = vpop.f32.mrb[81].mxu0 }
 0xc7b   : > { %v5912_v34 = vpop.f32.mrb[82].mxu0 }
 0xc7c   : > { %4096 = vrot.lane.b32.xlu1 %v5912_v34, %s6793_s8  ;;  %v3879_v16 = vpop.f32.mrb[83].mxu0 }
 0xc7e   : > { %4090 = vrot.lane.b32.xlu0 %v3876_v24, %s6793_s8 }
 0xc80   : > { %4092 = vrot.lane.b32.xlu1 %v3879_v16, %s6793_s8 }
 0xc82   : > { %2540 = vrot.lane.b32.xlu0 %v9125_v20, %s6795_s5 }
 0xc84   : > { %2542 = vrot.lane.b32.xlu1 %v9126_v23, %s6795_s5 }
 0xc86   : > { %3321 = vrot.lane.b32.xlu0 %v8301_v21, %s6794_s1 }
 0xc88   : > { %3323 = vrot.lane.b32.xlu1 %v8305_v47, %s6794_s1 }
 0xca7   : > { %v5919_v54 = vpop.f32.mrb[80].mxu1 }
 0xca8   : > { %4102 = vrot.lane.b32.xlu0 %v5919_v54, %s6793_s8  ;;  %v3937_v22 = vpop.f32.mrb[81].mxu1 }
 0xca9   : > { %v5920_v17 = vpop.f32.mrb[82].mxu1 }
 0xcaa   : > { %4104 = vrot.lane.b32.xlu1 %v5920_v17, %s6793_s8  ;;  %v3940_v45 = vpop.f32.mrb[83].mxu1 }
 0xcac   : > { %4098 = vrot.lane.b32.xlu0 %v3937_v22, %s6793_s8 }
 0xcae   : > { %4100 = vrot.lane.b32.xlu1 %v3940_v45, %s6793_s8 }
 0xcb0   : > { %3325 = vrot.lane.b32.xlu0 %v8299_v41, %s6794_s1  ;;  %v9127_v41 = vld [vmem:[#allocation29_spill] sm:$0xff] }
 0xcb2   : > { %3327 = vrot.lane.b32.xlu1 %v8303_v46, %s6794_s1  ;;  %v9128_v46 = vld [vmem:[#allocation31_spill] sm:$0xff] }
 0xcda   : > { %v5927_v21 = vpop.f32.mrb[84].mxu0 }
 0xcdb   : > { %v3998_v47 = vpop.f32.mrb[85].mxu0 }
 0xcdc   : > { %4106 = vrot.lane.b32.xlu0 %v3998_v47, %s6793_s8  ;;  %v5928_v63 = vpop.f32.mrb[86].mxu0 }
 0xcdd   : > { %v4001_v49 = vpop.f32.mrb[87].mxu0 }
 0xcde   : > { %4108 = vrot.lane.b32.xlu1 %v4001_v49, %s6793_s8  ;;  %v8655_v49 = vld [vmem:[%s9039_s6] ss:$0 sm:$0xff] }
 0xce0   : > { %v5935_v27 = vpop.f32.mrb[84].mxu1  ;;  %4110 = vrot.lane.b32.xlu0 %v5927_v21, %s6793_s8 }
 0xce1   : > { %v4059_v2 = vpop.f32.mrb[85].mxu1 }
 0xce2   : > { %v5936_v61 = vpop.f32.mrb[86].mxu1  ;;  %4112 = vrot.lane.b32.xlu1 %v5928_v63, %s6793_s8 }
 0xce3   : > { %v4062_v5 = vpop.f32.mrb[87].mxu1 }
 0xce4   : > { %2544 = vrot.lane.b32.xlu0 %v9127_v41, %s6795_s5 }
 0xce6   : > { %2546 = vrot.lane.b32.xlu1 %v9128_v46, %s6795_s5 }
 0xce8   : > { %2548 = vrot.lane.b32.xlu0 %v9129_v33, %s6795_s5  ;;  %v6514_v33 = vld [vmem:[%s7117_s18] sm:$0xff] }
 0xcea   : > { %2550 = vrot.lane.b32.xlu1 %v9130_v30, %s6795_s5 }
 0xcec   : > { %3329 = vrot.lane.b32.xlu0 %v8337_v55, %s6794_s1  ;;  %v4095_v13 = vpop.permute.xlu0 %4094 }
 0xced   : > { %4141 = vst.msk [vmem:[#allocation2 + $0x10] sm:$0xff] %vm4138_vm3, %v4095_v13 }
 0xcee   : > { %v4097_v59 = vpop.permute.xlu1 %4096  ;;  %3331 = vrot.lane.b32.xlu1 %v8341_v53, %s6794_s1 }
 0xcef   : > { %4142 = vst.msk [vmem:[#allocation2 + $0x18] sm:$0xff] %vm4138_vm3, %v4097_v59  ;;  %v6515_v59 = vld [vmem:[%s7117_s18 + $0x8] sm:$0xff] }
 0xcf0   : > { %3333 = vrot.lane.b32.xlu0 %v8335_v31, %s6794_s1  ;;  %v4091_v48 = vpop.permute.xlu0 %4090 }
 0xcf1   : > { %4139 = vst.msk [vmem:[#allocation2] sm:$0xff] %vm4138_vm3, %v4091_v48 }
 0xcf2   : > { %v4093_v36 = vpop.permute.xlu1 %4092  ;;  %3335 = vrot.lane.b32.xlu1 %v8339_v26, %s6794_s1 }
 0xcf3   : > { %4140 = vst.msk [vmem:[#allocation2 + $0x8] sm:$0xff] %vm4138_vm3, %v4093_v36  ;;  %v6516_v36 = vld [vmem:[%s7117_s18 + $0x10] sm:$0xff] }
 0xcf4   : > { %4114 = vrot.lane.b32.xlu0 %v4059_v2, %s6793_s8  ;;  %v2541_v55 = vpop.permute.xlu0 %2540  ;;  %v4157_v7 = vld [vmem:[#allocation2 + $0x10] sm:$0xff] }
 0xcf5   : > { %2579 = vst.msk [vmem:[#allocation2 + $0x50] sm:$0xff] %vm2568_vm1, %v2541_v55 }
 0xcf6   : > { %v2543_v53 = vpop.permute.xlu1 %2542  ;;  %4116 = vrot.lane.b32.xlu1 %v4062_v5, %s6793_s8  ;;  %v4158_v29 = vld [vmem:[#allocation2 + $0x18] sm:$0xff] }
 0xcf7   : > { %2580 = vst.msk [vmem:[#allocation2 + $0x58] sm:$0xff] %vm2568_vm1, %v2543_v53  ;;  %v4172_v4 = vpack.c.bf16 %v4158_v29, %v4157_v7 }
 0xcf8   : > { %4118 = vrot.lane.b32.xlu0 %v5935_v27, %s6793_s8  ;;  %v3322_v31 = vpop.permute.xlu0 %3321  ;;  %v4155_v26 = vld [vmem:[#allocation2] sm:$0xff] }
 0xcf9   : > { %3362 = vst.msk [vmem:[#allocation2 + $0x40] sm:$0xff] %vm3353_vm2, %v3322_v31  ;;  %v6517_v31 = vld [vmem:[%s7117_s18 + $0x18] sm:$0xff] }
 0xcfa   : > { %v3324_v62 = vpop.permute.xlu1 %3323  ;;  %4120 = vrot.lane.b32.xlu1 %v5936_v61, %s6793_s8  ;;  %v4156_v14 = vld [vmem:[#allocation2 + $0x8] sm:$0xff]  ;;  %s9133_s8 = sld [smem:[#allocation36_spill]] }
 0xcfb   : > { %3363 = vst.msk [vmem:[#allocation2 + $0x48] sm:$0xff] %vm3353_vm2, %v3324_v62  ;;  %v4171_v42 = vpack.c.bf16 %v4156_v14, %v4155_v26 }
 0xcfd   : > { %5953 = vmatprep.mubr.bf16.mxu0 %v4171_v42 }
 0xcfe   : > { %5954 = vmatmul.mubr.bf16.vlgmr.msra.gmra.mrb[88].mxu0 %v4172_v4 }
 0xd1a   : > { %v4103_v0 = vpop.permute.xlu0 %4102 }
 0xd1b   : > { %4145 = vst.msk [vmem:[#allocation2 + $0x30] sm:$0xff] %vm4138_vm3, %v4103_v0  ;;  %v6518_v0 = vld [vmem:[%s7117_s18 + $0x20] sm:$0xff] }
 0xd1c   : > { %v4105_v40 = vpop.permute.xlu1 %4104 }
 0xd1d   : > { %4146 = vst.msk [vmem:[#allocation2 + $0x38] sm:$0xff] %vm4138_vm3, %v4105_v40 }
 0xd1e   : > { %v4099_v18 = vpop.permute.xlu0 %4098 }
 0xd1f   : > { %4143 = vst.msk [vmem:[#allocation2 + $0x20] sm:$0xff] %vm4138_vm3, %v4099_v18 }
 0xd20   : > { %v4101_v25 = vpop.permute.xlu1 %4100 }
 0xd21   : > { %4144 = vst.msk [vmem:[#allocation2 + $0x28] sm:$0xff] %vm4138_vm3, %v4101_v25 }
 0xd22   : > { %v3326_v52 = vpop.permute.xlu0 %3325  ;;  %v4161_v6 = vld [vmem:[#allocation2 + $0x30] sm:$0xff] }
 0xd23   : > { %3364 = vst.msk [vmem:[#allocation2 + $0x50] sm:$0xff] %vm3353_vm2, %v3326_v52  ;;  %v6519_v52 = vld [vmem:[%s7117_s18 + $0x28] sm:$0xff] }
 0xd24   : > { %v3328_v19 = vpop.permute.xlu1 %3327  ;;  %v4162_v28 = vld [vmem:[#allocation2 + $0x38] sm:$0xff] }
 0xd25   : > { %3365 = vst.msk [vmem:[#allocation2 + $0x58] sm:$0xff] %vm3353_vm2, %v3328_v19  ;;  %v4174_v32 = vpack.c.bf16 %v4162_v28, %v4161_v6  ;;  %v6520_v28 = vld [vmem:[%s7117_s18 + $0x30] sm:$0xff] }
 0xd26   : > { %v4159_v38 = vld [vmem:[#allocation2 + $0x20] sm:$0xff] }
 0xd28   : > { %v4160_v44 = vld [vmem:[#allocation2 + $0x28] sm:$0xff] }
 0xd29   : > { %v4173_v43 = vpack.c.bf16 %v4160_v44, %v4159_v38  ;;  %v6521_v44 = vld [vmem:[%s7117_s18 + $0x38] sm:$0xff] }
 0xd2b   : > { %5957 = vmatprep.mubr.bf16.mxu0 %v4173_v43 }
 0xd2c   : > { %5958 = vmatmul.mubr.bf16.gmra.mrb[92].mxu0 %v4174_v32 }
 0xd4e   : > { %v4107_v11 = vpop.permute.xlu0 %4106 }
 0xd4f   : > { %4147 = vst.msk [vmem:[#allocation2 + $0x40] sm:$0xff] %vm4138_vm3, %v4107_v11 }
 0xd50   : > { %v4109_v58 = vpop.permute.xlu1 %4108 }
 0xd51   : > { %4148 = vst.msk [vmem:[#allocation2 + $0x48] sm:$0xff] %vm4138_vm3, %v4109_v58 }
 0xd52   : > { %v4111_v3 = vpop.permute.xlu0 %4110 }
 0xd53   : > { %4149 = vst.msk [vmem:[#allocation2 + $0x50] sm:$0xff] %vm4138_vm3, %v4111_v3 }
 0xd54   : > { %v4113_v12 = vpop.permute.xlu1 %4112 }
 0xd55   : > { %4150 = vst.msk [vmem:[#allocation2 + $0x58] sm:$0xff] %vm4138_vm3, %v4113_v12 }
 0xd56   : > { %v2545_v9 = vpop.permute.xlu0 %2544  ;;  %v4163_v56 = vld [vmem:[#allocation2 + $0x40] sm:$0xff] }
 0xd57   : > { %2581 = vst.msk [vmem:[#allocation2 + $0x60] sm:$0xff] %vm2568_vm1, %v2545_v9  ;;  %v6522_v9 = vld [vmem:[%s7117_s18 + $0x40] sm:$0xff] }
 0xd58   : > { %v2547_v15 = vpop.permute.xlu1 %2546  ;;  %v4164_v35 = vld [vmem:[#allocation2 + $0x48] sm:$0xff] }
 0xd59   : > { %2582 = vst.msk [vmem:[#allocation2 + $0x68] sm:$0xff] %vm2568_vm1, %v2547_v15  ;;  %v4175_v8 = vpack.c.bf16 %v4164_v35, %v4163_v56 }
 0xd5a   : > { %v2549_v51 = vpop.permute.xlu0 %2548  ;;  %v4165_v10 = vld [vmem:[#allocation2 + $0x50] sm:$0xff] }
 0xd5b   : > { %2583 = vst.msk [vmem:[#allocation2 + $0x70] sm:$0xff] %vm2568_vm1, %v2549_v51  ;;  %5961 = vmatprep.mubr.bf16.mxu0 %v4175_v8  ;;  %v6523_v8 = vld [vmem:[%s7117_s18 + $0x48] sm:$0xff] }
 0xd5c   : > { %v2551_v60 = vpop.permute.xlu1 %2550  ;;  %v4166_v37 = vld [vmem:[#allocation2 + $0x58] sm:$0xff] }
 0xd5d   : > { %2584 = vst.msk [vmem:[#allocation2 + $0x78] sm:$0xff] %vm2568_vm1, %v2551_v60  ;;  %v4176_v1 = vpack.c.bf16 %v4166_v37, %v4165_v10  ;;  %v6524_v60 = vld [vmem:[%s7117_s18 + $0x50] sm:$0xff]  ;;  %v6525_v37 = vld [vmem:[%s7117_s18 + $0x58] sm:$0xff] }
 0xd5e   : > { %v3330_v57 = vpop.permute.xlu0 %3329 }
 0xd5f   : > { %3366 = vst.msk [vmem:[#allocation2 + $0x60] sm:$0xff] %vm3353_vm2, %v3330_v57  ;;  %5962 = vmatmul.mubr.bf16.gmra.mrb[96].mxu0 %v4176_v1 }
 0xd60   : > { %v3332_v50 = vpop.permute.xlu1 %3331 }
 0xd61   : > { %3367 = vst.msk [vmem:[#allocation2 + $0x68] sm:$0xff] %vm3353_vm2, %v3332_v50 }
 0xd62   : > { %v3334_v24 = vpop.permute.xlu0 %3333 }
 0xd63   : > { %3368 = vst.msk [vmem:[#allocation2 + $0x70] sm:$0xff] %vm3353_vm2, %v3334_v24 }
 0xd64   : > { %v3336_v34 = vpop.permute.xlu1 %3335 }
 0xd65   : > { %3369 = vst.msk [vmem:[#allocation2 + $0x78] sm:$0xff] %vm3353_vm2, %v3336_v34 }
 0xd66   : > { %v4115_v16 = vpop.permute.xlu0 %4114 }
 0xd67   : > { %4151 = vst.msk [vmem:[#allocation2 + $0x60] sm:$0xff] %vm4138_vm3, %v4115_v16 }
 0xd68   : > { %v4117_v20 = vpop.permute.xlu1 %4116 }
 0xd69   : > { %4152 = vst.msk [vmem:[#allocation2 + $0x68] sm:$0xff] %vm4138_vm3, %v4117_v20 }
 0xd6a   : > { %v4119_v23 = vpop.permute.xlu0 %4118 }
 0xd6b   : > { %4153 = vst.msk [vmem:[#allocation2 + $0x70] sm:$0xff] %vm4138_vm3, %v4119_v23  ;;  %v6526_v23 = vld [vmem:[%s7117_s18 + $0x60] sm:$0xff] }
 0xd6c   : > { %v4121_v54 = vpop.permute.xlu1 %4120 }
 0xd6d   : > { %4154 = vst.msk [vmem:[#allocation2 + $0x78] sm:$0xff] %vm4138_vm3, %v4121_v54 }
 0xd6e   : > { %v4167_v22 = vld [vmem:[#allocation2 + $0x60] sm:$0xff] }
 0xd70   : > { %v4168_v17 = vld [vmem:[#allocation2 + $0x68] sm:$0xff] }
 0xd71   : > { %v4177_v45 = vpack.c.bf16 %v4168_v17, %v4167_v22 }
 0xd72   : > { %v4169_v21 = vld [vmem:[#allocation2 + $0x70] sm:$0xff] }
 0xd73   : > { %5965 = vmatprep.mubr.bf16.mxu0 %v4177_v45  ;;  %v6527_v45 = vld [vmem:[%s7117_s18 + $0x68] sm:$0xff] }
 0xd74   : > { %v4170_v47 = vld [vmem:[#allocation2 + $0x78] sm:$0xff] }
 0xd75   : > { %v4178_v63 = vpack.c.bf16 %v4170_v47, %v4169_v21  ;;  %v6528_v47 = vld [vmem:[%s7117_s18 + $0x70] sm:$0xff] }
 0xd77   : > { %5966 = vmatmul.mubr.bf16.gmra.mrb[100].mxu0 %v4178_v63 }
 0xdd1   : > { %v5955_v27 = vpop.f32.mrb[88].mxu0 }
 0xdd2   : > { %v4284_v2 = vpop.f32.mrb[89].mxu0  ;;  %v4293_v46 = vadd.f32 %v5955_v27, %v8655_v49  ;;  %v6529_v27 = vld [vmem:[%s7117_s18 + $0x78] sm:$0xff]  ;;  %s9138_s18 = sld [smem:[#allocation38_spill]] }
 0xdd3   : > { %v4285_v61 = vadd.f32 %v8655_v49, %v4284_v2  ;;  %v5956_v5 = vpop.f32.mrb[90].mxu0 }
 0xdd4   : > { %v4287_v41 = vpop.f32.mrb[91].mxu0  ;;  %v8668_v55 = vadd.f32 %v6516_v36, %v4293_v46  ;;  %v4296_v53 = vadd.f32 %v5956_v5, %v8655_v49 }
 0xdd5   : > { %v8660_v30 = vadd.f32 %v6514_v33, %v4285_v61  ;;  %v4288_v13 = vadd.f32 %v8655_v49, %v4287_v41 }
 0xdd6   : > { %v8674_v29 = vadd.f32 %v6517_v31, %v4296_v53  ;;  %v6150_v53 = vld [vmem:[#allocation11] ss:$8 sps:$4 sm:$0xff]   ;;  %v6152_v31 = vld [vmem:[#allocation11 + $0x4] ss:$8 sps:$4 sm:$0xff]  }
 0xdd7   : > { %v8664_v48 = vadd.f32 %v6515_v59, %v4288_v13  ;;  %4363 = vadd.xlane.f32.xlu0 %v8660_v30  ;;  %4701 = vmatprep.subr.bf16.mxu1 %v6152_v31 }
 0xdd8   : > { %4702 = vmatpush1.bf16.msra.mxu1 %v6150_v53  ;;  %s8984_s15 = scalar_lea.hbm %s9138_s18, %s5424_s30 }
 0xdd9   : > { %4365 = vadd.xlane.f32.xlu1 %v8664_v48 }
 0xddb   : > { %4367 = vadd.xlane.f32.xlu0 %v8668_v55 }
 0xddf   : > { %4369 = vadd.xlane.f32.xlu0 %v8674_v29 }
 0xdff   : > { %v5959_v62 = vpop.f32.mrb[92].mxu0 }
 0xe00   : > { %v4300_v26 = vpop.f32.mrb[93].mxu0  ;;  %v4309_v4 = vadd.f32 %v5959_v62, %v8655_v49 }
 0xe01   : > { %v4301_v14 = vadd.f32 %v8655_v49, %v4300_v26  ;;  %v5960_v42 = vpop.f32.mrb[94].mxu0 }
 0xe02   : > { %v4303_v7 = vpop.f32.mrb[95].mxu0  ;;  %v4312_v25 = vadd.f32 %v5960_v42, %v8655_v49  ;;  %v8689_v38 = vadd.f32 %v6520_v28, %v4309_v4  ;;  %v6156_v28 = vld [vmem:[#allocation11 + $0x20] ss:$8 sps:$4 sm:$0xff]  }
 0xe03   : > { %v8680_v40 = vadd.f32 %v6518_v0, %v4301_v14  ;;  %v4304_v18 = vadd.f32 %v8655_v49, %v4303_v7  ;;  %v6155_v14 = vld [vmem:[#allocation11 + $0x14] ss:$8 sps:$4 sm:$0xff]   ;;  %v6153_v0 = vld [vmem:[#allocation11 + $0x10] ss:$8 sps:$4 sm:$0xff]  }
 0xe04   : > { %v8693_v43 = vadd.f32 %v6521_v44, %v4312_v25  ;;  %4703 = vmatprep.subr.bf16.mxu1 %v6155_v14  ;;  %v6161_v44 = vld [vmem:[#allocation11 + $0x34] ss:$8 sps:$4 sm:$0xff]  }
 0xe05   : > { %v8685_v19 = vadd.f32 %v6519_v52, %v4304_v18  ;;  %4371 = vadd.xlane.f32.xlu0 %v8680_v40  ;;  %4704 = vmatpush1.bf16.msra.mxu1 %v6153_v0  ;;  %v6158_v52 = vld [vmem:[#allocation11 + $0x24] ss:$8 sps:$4 sm:$0xff]  }
 0xe06   : > { %4705 = vmatprep.subr.bf16.mxu1 %v6158_v52 }
 0xe07   : > { %4373 = vadd.xlane.f32.xlu1 %v8685_v19 }
 0xe09   : > { %4375 = vadd.xlane.f32.xlu0 %v8689_v38  ;;  %4706 = vmatpush1.bf16.msra.mxu1 %v6156_v28 }
 0xe0a   : > { %4707 = vmatprep.subr.bf16.mxu1 %v6161_v44 }
 0xe0b   : > { %4377 = vadd.xlane.f32.xlu1 %v8693_v43 }
 0xe32   : > { %v5963_v6 = vpop.f32.mrb[96].mxu0 }
 0xe33   : > { %v4316_v32 = vpop.f32.mrb[97].mxu0  ;;  %v4325_v12 = vadd.f32 %v5963_v6, %v8655_v49  ;;  %v6159_v6 = vld [vmem:[#allocation11 + $0x30] ss:$8 sps:$4 sm:$0xff]  }
 0xe34   : > { %v4317_v11 = vadd.f32 %v8655_v49, %v4316_v32  ;;  %v5964_v58 = vpop.f32.mrb[98].mxu0  ;;  %4708 = vmatpush1.bf16.msra.mxu1 %v6159_v6  ;;  %v6164_v32 = vld [vmem:[#allocation11 + $0x44] ss:$8 sps:$4 sm:$0xff]  }
 0xe35   : > { %v4319_v3 = vpop.f32.mrb[99].mxu0  ;;  %v4328_v35 = vadd.f32 %v5964_v58, %v8655_v49  ;;  %v8709_v10 = vadd.f32 %v6524_v60, %v4325_v12  ;;  %4709 = vmatprep.subr.bf16.mxu1 %v6164_v32  ;;  %v6167_v58 = vld [vmem:[#allocation11 + $0x54] ss:$8 sps:$4 sm:$0xff]   ;;  %v6170_v12 = vld [vmem:[#allocation11 + $0x64] ss:$8 sps:$4 sm:$0xff]  }
 0xe36   : > { %v8700_v15 = vadd.f32 %v6522_v9, %v4317_v11  ;;  %v4320_v56 = vadd.f32 %v8655_v49, %v4319_v3  ;;  %v6162_v11 = vld [vmem:[#allocation11 + $0x40] ss:$8 sps:$4 sm:$0xff]   ;;  %v6165_v3 = vld [vmem:[#allocation11 + $0x50] ss:$8 sps:$4 sm:$0xff]  }
 0xe37   : > { %v8713_v1 = vadd.f32 %v6525_v37, %v4328_v35  ;;  %v6168_v9 = vld [vmem:[#allocation11 + $0x60] ss:$8 sps:$4 sm:$0xff]   ;;  %v6171_v35 = vld [vmem:[#allocation11 + $0x70] ss:$8 sps:$4 sm:$0xff]  }
 0xe38   : > { %v8705_v51 = vadd.f32 %v6523_v8, %v4320_v56  ;;  %4379 = vadd.xlane.f32.xlu0 %v8700_v15  ;;  %4710 = vmatpush1.bf16.msra.mxu1 %v6162_v11  ;;  %v6173_v56 = vld [vmem:[#allocation11 + $0x74] ss:$8 sps:$4 sm:$0xff]  }
 0xe39   : > { %4711 = vmatprep.subr.bf16.mxu1 %v6167_v58 }
 0xe3a   : > { %4381 = vadd.xlane.f32.xlu1 %v8705_v51 }
 0xe3c   : > { %4383 = vadd.xlane.f32.xlu0 %v8709_v10  ;;  %4712 = vmatpush1.bf16.msra.mxu1 %v6165_v3 }
 0xe3d   : > { %4713 = vmatprep.subr.bf16.mxu1 %v6170_v12 }
 0xe3e   : > { %4385 = vadd.xlane.f32.xlu1 %v8713_v1 }
 0xe40   : > { %4714 = vmatpush1.bf16.msra.mxu1 %v6168_v9 }
 0xe41   : > { %4715 = vmatprep.subr.bf16.mxu1 %v6173_v56 }
 0xe44   : > { %4716 = vmatpush1.bf16.msra.mxu1 %v6171_v35 }
 0xe4a   : > { %v5967_v57 = vpop.f32.mrb[100].mxu0 }
 0xe4b   : > { %v4332_v50 = vpop.f32.mrb[101].mxu0  ;;  %v4341_v20 = vadd.f32 %v5967_v57, %v8655_v49 }
 0xe4c   : > { %v4333_v24 = vadd.f32 %v8655_v49, %v4332_v50  ;;  %v5968_v34 = vpop.f32.mrb[102].mxu0 }
 0xe4d   : > { %v4335_v16 = vpop.f32.mrb[103].mxu0  ;;  %v4344_v17 = vadd.f32 %v5968_v34, %v8655_v49  ;;  %v8729_v63 = vadd.f32 %v6528_v47, %v4341_v20 }
 0xe4e   : > { %v8720_v54 = vadd.f32 %v6526_v23, %v4333_v24  ;;  %v4336_v22 = vadd.f32 %v8655_v49, %v4335_v16 }
 0xe4f   : > { %v8733_v2 = vadd.f32 %v6529_v27, %v4344_v17 }
 0xe50   : > { %v8725_v21 = vadd.f32 %v6527_v45, %v4336_v22  ;;  %4387 = vadd.xlane.f32.xlu0 %v8720_v54 }
 0xe52   : > { %4389 = vadd.xlane.f32.xlu1 %v8725_v21 }
 0xe54   : > { %4391 = vadd.xlane.f32.xlu0 %v8729_v63 }
 0xe56   : > { %4393 = vadd.xlane.f32.xlu1 %v8733_v2 }
 0xe64   : > { %v4364_v61 = vpop.xlane.xlu0 %4363 }
 0xe65   : > { %v4395_v5 = vmul.f32 0.0078125, %v4364_v61 }
 0xe66   : > { %v4366_v49 = vpop.xlane.xlu1 %4365 }
 0xe67   : > { %v8738_v41 = vsub.f32 %v8660_v30, %v4395_v5  ;;  %v4396_v46 = vmul.f32 0.0078125, %v4366_v49 }
 0xe68   : > { %v4368_v33 = vpop.xlane.xlu0 %4367 }
 0xe69   : > { %v8741_v13 = vsub.f32 %v8664_v48, %v4396_v46  ;;  %v4397_v59 = vmul.f32 0.0078125, %v4368_v33  ;;  %v4427_v36 = vmul.f32 %v8738_v41, %v8738_v41 }
 0xe6b   : > { %v8746_v62 = vsub.f32 %v8668_v55, %v4397_v59  ;;  %4443 = vadd.xlane.f32.xlu0 %v4427_v36  ;;  %v4428_v26 = vmul.f32 %v8741_v13, %v8741_v13 }
 0xe6c   : > { %v4370_v42 = vpop.xlane.xlu0 %4369 }
 0xe6d   : > { %v4398_v7 = vmul.f32 0.0078125, %v4370_v42  ;;  %4445 = vadd.xlane.f32.xlu1 %v4428_v26  ;;  %v4429_v4 = vmul.f32 %v8746_v62, %v8746_v62 }
 0xe6f   : > { %v8753_v18 = vsub.f32 %v8674_v29, %v4398_v7  ;;  %4447 = vadd.xlane.f32.xlu0 %v4429_v4 }
 0xe71   : > { %v4430_v25 = vmul.f32 %v8753_v18, %v8753_v18 }
 0xe73   : > { %4449 = vadd.xlane.f32.xlu1 %v4430_v25 }
 0xe92   : > { %v4372_v8 = vpop.xlane.xlu0 %4371 }
 0xe93   : > { %v4399_v60 = vmul.f32 0.0078125, %v4372_v8 }
 0xe94   : > { %v4374_v37 = vpop.xlane.xlu1 %4373 }
 0xe95   : > { %v8758_v57 = vsub.f32 %v8680_v40, %v4399_v60  ;;  %v4400_v50 = vmul.f32 0.0078125, %v4374_v37 }
 0xe96   : > { %v4376_v24 = vpop.xlane.xlu0 %4375 }
 0xe97   : > { %v8761_v34 = vsub.f32 %v8685_v19, %v4400_v50  ;;  %v4401_v16 = vmul.f32 0.0078125, %v4376_v24  ;;  %v4431_v20 = vmul.f32 %v8758_v57, %v8758_v57 }
 0xe98   : > { %v4378_v23 = vpop.xlane.xlu1 %4377 }
 0xe99   : > { %v8766_v22 = vsub.f32 %v8689_v38, %v4401_v16  ;;  %v4402_v17 = vmul.f32 0.0078125, %v4378_v23  ;;  %4451 = vadd.xlane.f32.xlu0 %v4431_v20  ;;  %v4432_v45 = vmul.f32 %v8761_v34, %v8761_v34 }
 0xe9b   : > { %v8771_v47 = vsub.f32 %v8693_v43, %v4402_v17  ;;  %4453 = vadd.xlane.f32.xlu1 %v4432_v45  ;;  %v4433_v27 = vmul.f32 %v8766_v22, %v8766_v22 }
 0xe9d   : > { %4455 = vadd.xlane.f32.xlu0 %v4433_v27  ;;  %v4434_v61 = vmul.f32 %v8771_v47, %v8771_v47 }
 0xe9f   : > { %4457 = vadd.xlane.f32.xlu1 %v4434_v61 }
 0xec5   : > { %v4380_v5 = vpop.xlane.xlu0 %4379 }
 0xec6   : > { %v4403_v49 = vmul.f32 0.0078125, %v4380_v5 }
 0xec7   : > { %v4382_v46 = vpop.xlane.xlu1 %4381 }
 0xec8   : > { %v8778_v33 = vsub.f32 %v8700_v15, %v4403_v49  ;;  %v4404_v59 = vmul.f32 0.0078125, %v4382_v46 }
 0xec9   : > { %v4384_v36 = vpop.xlane.xlu0 %4383 }
 0xeca   : > { %v8781_v53 = vsub.f32 %v8705_v51, %v4404_v59  ;;  %v4405_v31 = vmul.f32 0.0078125, %v4384_v36  ;;  %v4435_v26 = vmul.f32 %v8778_v33, %v8778_v33 }
 0xecb   : > { %v4386_v14 = vpop.xlane.xlu1 %4385 }
 0xecc   : > { %v8786_v42 = vsub.f32 %v8709_v10, %v4405_v31  ;;  %v4406_v7 = vmul.f32 0.0078125, %v4386_v14  ;;  %4459 = vadd.xlane.f32.xlu0 %v4435_v26  ;;  %v4436_v4 = vmul.f32 %v8781_v53, %v8781_v53  ;;  %v8820_v26 = vld [vmem:[%s9131_s20] ss:$0 sm:$0xff] }
 0xece   : > { %v8791_v0 = vsub.f32 %v8713_v1, %v4406_v7  ;;  %4461 = vadd.xlane.f32.xlu1 %v4436_v4  ;;  %v4437_v25 = vmul.f32 %v8786_v42, %v8786_v42 }
 0xed0   : > { %4463 = vadd.xlane.f32.xlu0 %v4437_v25  ;;  %v4438_v52 = vmul.f32 %v8791_v0, %v8791_v0 }
 0xed2   : > { %4465 = vadd.xlane.f32.xlu1 %v4438_v52 }
 0xedd   : > { %v4388_v28 = vpop.xlane.xlu0 %4387 }
 0xede   : > { %v4407_v44 = vmul.f32 0.0078125, %v4388_v28  ;;  %v8828_v28 = vld [vmem:[%s9132_s13] ss:$0 sm:$0xff]  ;;  %s6700_s13 = scalar_lea.vmem %s8986_s19, 2048 }
 0xedf   : > { %v4390_v6 = vpop.xlane.xlu1 %4389  ;;  %p6701_p2 = scmp.ne.s32.totalorder %s8986_s19, %s6700_s13 }
 0xee0   : > { %v8798_v32 = vsub.f32 %v8720_v54, %v4407_v44  ;;  %v4408_v11 = vmul.f32 0.0078125, %v4390_v6 }
 0xee1   : > { %v4392_v58 = vpop.xlane.xlu0 %4391  ;;  %p6702_p10 = pnand %p6701_p2, %p9139_p7 }
 0xee2   : > { %v8801_v3 = vsub.f32 %v8725_v21, %v4408_v11  ;;  %v4409_v12 = vmul.f32 0.0078125, %v4392_v58  ;;  %v4439_v9 = vmul.f32 %v8798_v32, %v8798_v32 }
 0xee3   : > { %v4394_v56 = vpop.xlane.xlu1 %4393  ;;  %p6703_p1 = pneg %p6702_p10 }
 0xee4   : > { %v8806_v35 = vsub.f32 %v8729_v63, %v4409_v12  ;;  %v4410_v8 = vmul.f32 0.0078125, %v4394_v56  ;;  %4467 = vadd.xlane.f32.xlu0 %v4439_v9  ;;  %v4440_v60 = vmul.f32 %v8801_v3, %v8801_v3 }
 0xee6   : > { %v8811_v37 = vsub.f32 %v8733_v2, %v4410_v8  ;;  %4469 = vadd.xlane.f32.xlu1 %v4440_v60  ;;  %v4441_v50 = vmul.f32 %v8806_v35, %v8806_v35  ;;  %v6174_v8 = vld [vmem:[#allocation12 + $0x40] sm:$0xff]  }
 0xee7   : > { %v6175_v60 = vld [vmem:[#allocation12] sm:$0xff]   ;;  %5585 = vmatprep.subr.bf16.mxu0 %v6174_v8 }
 0xee8   : > { %4471 = vadd.xlane.f32.xlu0 %v4441_v50  ;;  %v4442_v24 = vmul.f32 %v8811_v37, %v8811_v37  ;;  %v6176_v50 = vld [vmem:[#allocation12 + $0x48] sm:$0xff]   ;;  %5586 = vmatpush3.bf16.msra.mxu0 %v6175_v60 }
 0xee9   : > { %5587 = vmatprep.subr.bf16.mxu0 %v6176_v50 }
 0xeea   : > { %4473 = vadd.xlane.f32.xlu1 %v4442_v24 }
 0xef8   : > { %v4444_v16 = vpop.xlane.xlu0 %4443 }
 0xef9   : > { %v4475_v20 = vmul.f32 0.0078125, %v4444_v16 }
 0xefa   : > { %v4446_v23 = vpop.xlane.xlu1 %4445 }
 0xefb   : > { %v4491_v17 = vadd.f32 1e-06, %v4475_v20  ;;  %v4476_v45 = vmul.f32 0.0078125, %v4446_v23  ;;  %v6178_v20 = vld [vmem:[#allocation12 + $0x50] sm:$0xff]  }
 0xefc   : > { %v4448_v27 = vpop.xlane.xlu0 %4447  ;;  %v6179_v23 = vld [vmem:[#allocation12 + $0x10] sm:$0xff]  }
 0xefd   : > { %6478 = vrsqrt.f32 %v4491_v17  ;;  %v4492_v61 = vadd.f32 1e-06, %v4476_v45  ;;  %v4477_v5 = vmul.f32 0.0078125, %v4448_v27  ;;  %v6180_v17 = vld [vmem:[#allocation12 + $0x58] sm:$0xff]   ;;  %v6182_v27 = vld [vmem:[#allocation12 + $0x60] sm:$0xff]  }
 0xefe   : > { %v6181_v45 = vld [vmem:[#allocation12 + $0x18] sm:$0xff]  }
 0xeff   : > { %6480 = vrsqrt.f32 %v4492_v61  ;;  %v4493_v49 = vadd.f32 1e-06, %v4477_v5  ;;  %v6183_v61 = vld [vmem:[#allocation12 + $0x20] sm:$0xff]   ;;  %v6184_v5 = vld [vmem:[#allocation12 + $0x68] sm:$0xff]  }
 0xf00   : > { %v4450_v46 = vpop.xlane.xlu1 %4449 }
 0xf01   : > { %6482 = vrsqrt.f32 %v4493_v49  ;;  %v4478_v59 = vmul.f32 0.0078125, %v4450_v46 }
 0xf03   : > { %v4494_v36 = vadd.f32 1e-06, %v4478_v59 }
 0xf05   : > { %6484 = vrsqrt.f32 %v4494_v36 }
 0xf07   : > { %v6479_v31 = vpop.eup %6478 }
 0xf08   : > { %v4523_v14 = vmul.f32 %v6479_v31, %v8738_v41 }
 0xf09   : > { %v6481_v7 = vpop.eup %6480 }
 0xf0a   : > { %v4524_v4 = vmul.f32 %v6481_v7, %v8741_v13  ;;  %v4546_v25 = vmul.f32 %v8820_v26, %v4523_v14 }
 0xf0b   : > { %v6483_v52 = vpop.eup %6482 }
 0xf0c   : > { %v4547_v44 = vmul.f32 %v8820_v26, %v4524_v4  ;;  %v4569_v6 = vadd.f32 %v8828_v28, %v4546_v25  ;;  %v4525_v58 = vmul.f32 %v6483_v52, %v8746_v62  ;;  %v6177_v62 = vld [vmem:[#allocation12 + $0x8] sm:$0xff]  }
 0xf0d   : > { %5588 = vmatpush3.bf16.msra.mxu0 %v6177_v62 }
 0xf0e   : > { %v4570_v11 = vadd.f32 %v8828_v28, %v4547_v44  ;;  %v4548_v9 = vmul.f32 %v8820_v26, %v4525_v58  ;;  %5589 = vmatprep.subr.bf16.mxu0 %v6178_v20 }
 0xf0f   : > { %v6485_v41 = vpop.eup %6484 }
 0xf10   : > { %v4585_v12 = vpack.c.bf16 %v4570_v11, %v4569_v6  ;;  %v4526_v13 = vmul.f32 %v6485_v41, %v8753_v18  ;;  %v4571_v16 = vadd.f32 %v8828_v28, %v4548_v9 }
 0xf11   : > { %5590 = vmatpush3.bf16.msra.mxu0 %v6179_v23 }
 0xf12   : > { %4734 = vmatmul.mubr.bf16.vlgmr.msra.gmra.mrb[88].mxu1 %v4585_v12  ;;  %v4549_v56 = vmul.f32 %v8820_v26, %v4526_v13  ;;  %5591 = vmatprep.subr.bf16.mxu0 %v6180_v17 }
 0xf13   : > { %4743 = vmatprep.mubr.bf16.mxu1 %v9124_v39 }
 0xf14   : > { %v4572_v24 = vadd.f32 %v8828_v28, %v4549_v56 }
 0xf15   : > { %5592 = vmatpush3.bf16.msra.mxu0 %v6181_v45 }
 0xf16   : > { %v4586_v18 = vpack.c.bf16 %v4572_v24, %v4571_v16  ;;  %5593 = vmatprep.subr.bf16.mxu0 %v6182_v27 }
 0xf19   : > { %5594 = vmatpush3.bf16.msra.mxu0 %v6183_v61 }
 0xf1a   : > { %4744 = vmatmul.mubr.bf16.gmra.mrb[92].mxu1 %v4586_v18  ;;  %5595 = vmatprep.subr.bf16.mxu0 %v6184_v5 }
 0xf1b   : > { %4753 = vmatprep.mubr.bf16.mxu1 %v9124_v39 }
 0xf26   : > { %v4452_v49 = vpop.xlane.xlu0 %4451 }
 0xf27   : > { %v4479_v46 = vmul.f32 0.0078125, %v4452_v49 }
 0xf28   : > { %v4454_v59 = vpop.xlane.xlu1 %4453 }
 0xf29   : > { %v4495_v36 = vadd.f32 1e-06, %v4479_v46  ;;  %v4480_v31 = vmul.f32 0.0078125, %v4454_v59 }
 0xf2a   : > { %v4456_v14 = vpop.xlane.xlu0 %4455 }
 0xf2b   : > { %6486 = vrsqrt.f32 %v4495_v36  ;;  %v4496_v7 = vadd.f32 1e-06, %v4480_v31  ;;  %v4481_v4 = vmul.f32 0.0078125, %v4456_v14  ;;  %v6185_v14 = vld [vmem:[#allocation12 + $0x28] sm:$0xff]  }
 0xf2c   : > { %v4458_v25 = vpop.xlane.xlu1 %4457  ;;  %5596 = vmatpush3.bf16.msra.mxu0 %v6185_v14 }
 0xf2d   : > { %6488 = vrsqrt.f32 %v4496_v7  ;;  %v4497_v52 = vadd.f32 1e-06, %v4481_v4  ;;  %v4482_v44 = vmul.f32 0.0078125, %v4458_v25  ;;  %v6186_v7 = vld [vmem:[#allocation12 + $0x70] sm:$0xff]  }
 0xf2e   : > { %v6187_v4 = vld [vmem:[#allocation12 + $0x30] sm:$0xff]   ;;  %5597 = vmatprep.subr.bf16.mxu0 %v6186_v7 }
 0xf2f   : > { %6490 = vrsqrt.f32 %v4497_v52  ;;  %v4498_v6 = vadd.f32 1e-06, %v4482_v44 }
 0xf30   : > { %5598 = vmatpush3.bf16.msra.mxu0 %v6187_v4 }
 0xf31   : > { %6492 = vrsqrt.f32 %v4498_v6  ;;  %v6188_v6 = vld [vmem:[#allocation12 + $0x78] sm:$0xff]  }
 0xf32   : > { %5599 = vmatprep.subr.bf16.mxu0 %v6188_v6 }
 0xf35   : > { %v6487_v11 = vpop.eup %6486 }
 0xf36   : > { %v4527_v58 = vmul.f32 %v6487_v11, %v8758_v57 }
 0xf37   : > { %v6489_v41 = vpop.eup %6488 }
 0xf38   : > { %v4528_v12 = vmul.f32 %v6489_v41, %v8761_v34  ;;  %v4550_v13 = vmul.f32 %v8820_v26, %v4527_v58  ;;  %v6189_v41 = vld [vmem:[#allocation12 + $0x38] sm:$0xff]  }
 0xf39   : > { %v6491_v9 = vpop.eup %6490  ;;  %5600 = vmatpush3.bf16.msra.mxu0 %v6189_v41 }
 0xf3a   : > { %v4551_v56 = vmul.f32 %v8820_v26, %v4528_v12  ;;  %v4573_v60 = vadd.f32 %v8828_v28, %v4550_v13  ;;  %v4529_v24 = vmul.f32 %v6491_v9, %v8766_v22 }
 0xf3b   : > { %v6493_v8 = vpop.eup %6492 }
 0xf3c   : > { %v4574_v50 = vadd.f32 %v8828_v28, %v4551_v56  ;;  %v4530_v16 = vmul.f32 %v6493_v8, %v8771_v47  ;;  %v4552_v34 = vmul.f32 %v8820_v26, %v4529_v24 }
 0xf3e   : > { %v4587_v62 = vpack.c.bf16 %v4574_v50, %v4573_v60  ;;  %v4553_v57 = vmul.f32 %v8820_v26, %v4530_v16  ;;  %v4575_v18 = vadd.f32 %v8828_v28, %v4552_v34 }
 0xf40   : > { %4754 = vmatmul.mubr.bf16.gmra.mrb[96].mxu1 %v4587_v62  ;;  %v4576_v20 = vadd.f32 %v8828_v28, %v4553_v57 }
 0xf41   : > { %4763 = vmatprep.mubr.bf16.mxu1 %v9124_v39 }
 0xf42   : > { %v4588_v23 = vpack.c.bf16 %v4576_v20, %v4575_v18 }
 0xf48   : > { %4764 = vmatmul.mubr.bf16.gmra.mrb[100].mxu1 %v4588_v23 }
 0xf49   : > { %4773 = vmatprep.mubr.bf16.mxu1 %v9124_v39 }
 0xf59   : > { %v4460_v17 = vpop.xlane.xlu0 %4459 }
 0xf5a   : > { %v4483_v22 = vmul.f32 0.0078125, %v4460_v17 }
 0xf5b   : > { %v4462_v45 = vpop.xlane.xlu1 %4461 }
 0xf5c   : > { %v4499_v47 = vadd.f32 1e-06, %v4483_v22  ;;  %v4484_v27 = vmul.f32 0.0078125, %v4462_v45 }
 0xf5d   : > { %v4464_v61 = vpop.xlane.xlu0 %4463 }
 0xf5e   : > { %6494 = vrsqrt.f32 %v4499_v47  ;;  %v4500_v5 = vadd.f32 1e-06, %v4484_v27  ;;  %v4485_v49 = vmul.f32 0.0078125, %v4464_v61 }
 0xf5f   : > { %v4466_v46 = vpop.xlane.xlu1 %4465 }
 0xf60   : > { %6496 = vrsqrt.f32 %v4500_v5  ;;  %v4501_v59 = vadd.f32 1e-06, %v4485_v49  ;;  %v4486_v36 = vmul.f32 0.0078125, %v4466_v46 }
 0xf62   : > { %6498 = vrsqrt.f32 %v4501_v59  ;;  %v4502_v31 = vadd.f32 1e-06, %v4486_v36 }
 0xf64   : > { %6500 = vrsqrt.f32 %v4502_v31 }
 0xf68   : > { %v6495_v25 = vpop.eup %6494 }
 0xf69   : > { %v4531_v52 = vmul.f32 %v6495_v25, %v8778_v33 }
 0xf6a   : > { %v6497_v44 = vpop.eup %6496 }
 0xf6b   : > { %v4532_v11 = vmul.f32 %v6497_v44, %v8781_v53  ;;  %v4554_v58 = vmul.f32 %v8820_v26, %v4531_v52 }
 0xf6c   : > { %v6499_v12 = vpop.eup %6498 }
 0xf6d   : > { %v4555_v13 = vmul.f32 %v8820_v26, %v4532_v11  ;;  %v4577_v56 = vadd.f32 %v8828_v28, %v4554_v58  ;;  %v4533_v33 = vmul.f32 %v6499_v12, %v8786_v42  ;;  %v9134_v12 = vld [vmem:[#allocation20_spill] sm:$0xff] }
 0xf6e   : > { %v6501_v9 = vpop.eup %6500 }
 0xf6f   : > { %v4578_v8 = vadd.f32 %v8828_v28, %v4555_v13  ;;  %v4534_v60 = vmul.f32 %v6501_v9, %v8791_v0  ;;  %v4556_v57 = vmul.f32 %v8820_v26, %v4533_v33  ;;  %v9136_v9 = vsub.s32 1, %v9134_v12 }
 0xf71   : > { %v4468_v50 = vpop.xlane.xlu0 %4467  ;;  %v4589_v24 = vpack.c.bf16 %v4578_v8, %v4577_v56  ;;  %v4557_v53 = vmul.f32 %v8820_v26, %v4534_v60  ;;  %v4579_v22 = vadd.f32 %v8828_v28, %v4556_v57 }
 0xf72   : > { %v4487_v16 = vmul.f32 0.0078125, %v4468_v50 }
 0xf73   : > { %v4470_v62 = vpop.xlane.xlu1 %4469  ;;  %4774 = vmatmul.mubr.bf16.gmra.mrb[104].mxu1 %v4589_v24  ;;  %v4580_v23 = vadd.f32 %v8828_v28, %v4557_v53 }
 0xf74   : > { %v4503_v34 = vadd.f32 1e-06, %v4487_v16  ;;  %v4488_v20 = vmul.f32 0.0078125, %v4470_v62  ;;  %4783 = vmatprep.mubr.bf16.mxu1 %v9124_v39 }
 0xf75   : > { %v4472_v18 = vpop.xlane.xlu0 %4471  ;;  %v4590_v27 = vpack.c.bf16 %v4580_v23, %v4579_v22 }
 0xf76   : > { %6502 = vrsqrt.f32 %v4503_v34  ;;  %v4504_v42 = vadd.f32 1e-06, %v4488_v20  ;;  %v4489_v17 = vmul.f32 0.0078125, %v4472_v18 }
 0xf77   : > { %v4474_v0 = vpop.xlane.xlu1 %4473 }
 0xf78   : > { %6504 = vrsqrt.f32 %v4504_v42  ;;  %v4505_v45 = vadd.f32 1e-06, %v4489_v17  ;;  %v4490_v47 = vmul.f32 0.0078125, %v4474_v0 }
 0xf7a   : > { %6506 = vrsqrt.f32 %v4505_v45  ;;  %v4506_v61 = vadd.f32 1e-06, %v4490_v47 }
 0xf7b   : > { %4784 = vmatmul.mubr.bf16.gmra.mrb[108].mxu1 %v4590_v27 }
 0xf7c   : > { %6508 = vrsqrt.f32 %v4506_v61  ;;  %4793 = vmatprep.mubr.bf16.mxu1 %v9124_v39 }
 0xf80   : > { %v6503_v5 = vpop.eup %6502 }
 0xf81   : > { %v4535_v49 = vmul.f32 %v6503_v5, %v8798_v32 }
 0xf82   : > { %v6505_v46 = vpop.eup %6504 }
 0xf83   : > { %v4536_v59 = vmul.f32 %v6505_v46, %v8801_v3  ;;  %v4558_v36 = vmul.f32 %v8820_v26, %v4535_v49 }
 0xf84   : > { %v6507_v31 = vpop.eup %6506 }
 0xf85   : > { %v4559_v14 = vmul.f32 %v8820_v26, %v4536_v59  ;;  %v4581_v4 = vadd.f32 %v8828_v28, %v4558_v36  ;;  %v4537_v52 = vmul.f32 %v6507_v31, %v8806_v35  ;;  %v4609_v35 = vld [vmem:[%s9133_s8] sm:$0x3]  ;;  %s6706_s8 = scalar_lea.vmem %s6705_s12, 4096 }
 0xf86   : > { %v6509_v7 = vpop.eup %6508  ;;  %v8891_v56 = vrot.slane %v4609_v35, %v9136_v9  ;;  %p6708_p12 = scmp.lt.s32.totalorder %s6706_s8, %s6700_s13 }
 0xf87   : > { %v4582_v25 = vadd.f32 %v8828_v28, %v4559_v14  ;;  %v4538_v44 = vmul.f32 %v6509_v7, %v8811_v37  ;;  %v4560_v3 = vmul.f32 %v8820_v26, %v4537_v52  ;;  %v9135_v37 = vsub.s32 0, %v9134_v12 }
 0xf88   : > { %p6709_p13 = por %p6708_p12, %p6707_p11 }
 0xf89   : > { %v4591_v6 = vpack.c.bf16 %v4582_v25, %v4581_v4  ;;  %v4561_v32 = vmul.f32 %v8820_v26, %v4538_v44  ;;  %v4583_v58 = vadd.f32 %v8828_v28, %v4560_v3  ;;  %v8887_v13 = vrot.slane %v4609_v35, %v9135_v37 }
 0xf8a   : > { %p6710_p8 = pnand %p6709_p13, %p6703_p1 }
 0xf8b   : > { %4794 = vmatmul.mubr.bf16.gmra.mrb[112].mxu1 %v4591_v6  ;;  %v4584_v11 = vadd.f32 %v8828_v28, %v4561_v32 }
 0xf8c   : > { %4803 = vmatprep.mubr.bf16.mxu1 %v9124_v39 }
 0xf8d   : > { %v4592_v41 = vpack.c.bf16 %v4584_v11, %v4583_v58 }
 0xf93   : > { %4804 = vmatmul.mubr.bf16.gmra.mrb[116].mxu1 %v4592_v41 }
 0xfe5   : > { %v4735_v26 = vpop.f32.mrb[88].mxu1 }
 0xfe6   : > { %v4736_v39 = vadd.f32 %v4735_v26, %v8887_v13  ;;  %v4737_v8 = vpop.f32.mrb[89].mxu1 }
 0xfe7   : > { %v4738_v28 = vadd.f32 %v4737_v8, %v8891_v56  ;;  %v4739_v33 = vpop.f32.mrb[90].mxu1 }
 0xfe8   : > { %v4740_v60 = vadd.f32 %v4739_v33, %v8887_v13  ;;  %v4741_v50 = vpop.f32.mrb[91].mxu1  ;;  %v4814_v53 = vmax.f32 %v4736_v39, 0.0 }
 0xfe9   : > { %v4742_v24 = vadd.f32 %v4741_v50, %v8891_v56  ;;  %v4815_v62 = vmax.f32 %v4738_v28, 0.0 }
 0xfea   : > { %v4816_v16 = vmax.f32 %v4740_v60, 0.0 }
 0xfeb   : > { %v4817_v57 = vmax.f32 %v4742_v24, 0.0 }
 0xfec   : > { %v4846_v34 = vpack.c.bf16 %v4816_v16, %v4814_v53 }
 0xfed   : > { %v4847_v20 = vpack.c.bf16 %v4817_v57, %v4815_v62  ;;  %v4745_v18 = vpop.f32.mrb[92].mxu1 }
 0xfee   : > { %v4746_v23 = vadd.f32 %v4745_v18, %v8887_v13  ;;  %v4747_v42 = vpop.f32.mrb[93].mxu1 }
 0xfef   : > { %v4748_v17 = vadd.f32 %v4747_v42, %v8891_v56  ;;  %v4749_v0 = vpop.f32.mrb[94].mxu1  ;;  %5029 = vmatprep.mubr.bf16.mxu0 %v4847_v20 }
 0xff0   : > { %v4750_v22 = vadd.f32 %v4749_v0, %v8887_v13  ;;  %v4751_v45 = vpop.f32.mrb[95].mxu1  ;;  %5030 = vmatmul.mubr.bf16.vlgmr.msra.gmra.mrb[104].mxu0 %v4846_v34  ;;  %v4818_v27 = vmax.f32 %v4746_v23, 0.0 }
 0xff1   : > { %v4752_v47 = vadd.f32 %v4751_v45, %v8891_v56  ;;  %v4819_v5 = vmax.f32 %v4748_v17, 0.0 }
 0xff2   : > { %v4820_v61 = vmax.f32 %v4750_v22, 0.0 }
 0xff3   : > { %v4821_v49 = vmax.f32 %v4752_v47, 0.0 }
 0xff4   : > { %v4848_v46 = vpack.c.bf16 %v4820_v61, %v4818_v27 }
 0xff5   : > { %v4849_v59 = vpack.c.bf16 %v4821_v49, %v4819_v5 }
 0xff7   : > { %5037 = vmatprep.mubr.bf16.mxu0 %v4849_v59 }
 0xff8   : > { %5038 = vmatmul.mubr.bf16.gmra.mrb[108].mxu0 %v4848_v46 }
0x1013   : > { %v4755_v36 = vpop.f32.mrb[96].mxu1 }
0x1014   : > { %v4756_v31 = vadd.f32 %v4755_v36, %v8887_v13  ;;  %v4757_v14 = vpop.f32.mrb[97].mxu1 }
0x1015   : > { %v4758_v7 = vadd.f32 %v4757_v14, %v8891_v56  ;;  %v4759_v4 = vpop.f32.mrb[98].mxu1 }
0x1016   : > { %v4760_v25 = vadd.f32 %v4759_v4, %v8887_v13  ;;  %v4761_v52 = vpop.f32.mrb[99].mxu1  ;;  %v4822_v6 = vmax.f32 %v4756_v31, 0.0 }
0x1017   : > { %v4762_v44 = vadd.f32 %v4761_v52, %v8891_v56  ;;  %v4823_v3 = vmax.f32 %v4758_v7, 0.0 }
0x1018   : > { %v4824_v32 = vmax.f32 %v4760_v25, 0.0 }
0x1019   : > { %v4825_v11 = vmax.f32 %v4762_v44, 0.0 }
0x101a   : > { %v4850_v58 = vpack.c.bf16 %v4824_v32, %v4822_v6 }
0x101b   : > { %v4851_v41 = vpack.c.bf16 %v4825_v11, %v4823_v3  ;;  %v4765_v35 = vpop.f32.mrb[100].mxu1 }
0x101c   : > { %v4766_v12 = vadd.f32 %v4765_v35, %v8887_v13  ;;  %v4767_v37 = vpop.f32.mrb[101].mxu1 }
0x101d   : > { %v4768_v9 = vadd.f32 %v4767_v37, %v8891_v56  ;;  %v4769_v26 = vpop.f32.mrb[102].mxu1  ;;  %5045 = vmatprep.mubr.bf16.mxu0 %v4851_v41 }
0x101e   : > { %v4770_v39 = vadd.f32 %v4769_v26, %v8887_v13  ;;  %v4771_v8 = vpop.f32.mrb[103].mxu1  ;;  %5046 = vmatmul.mubr.bf16.gmra.mrb[112].mxu0 %v4850_v58  ;;  %v4826_v33 = vmax.f32 %v4766_v12, 0.0 }
0x101f   : > { %v4772_v28 = vadd.f32 %v4771_v8, %v8891_v56  ;;  %v4827_v50 = vmax.f32 %v4768_v9, 0.0 }
0x1020   : > { %v4828_v60 = vmax.f32 %v4770_v39, 0.0 }
0x1021   : > { %v4829_v24 = vmax.f32 %v4772_v28, 0.0 }
0x1022   : > { %v4852_v53 = vpack.c.bf16 %v4828_v60, %v4826_v33 }
0x1023   : > { %v4853_v16 = vpack.c.bf16 %v4829_v24, %v4827_v50 }
0x1025   : > { %5053 = vmatprep.mubr.bf16.mxu0 %v4853_v16 }
0x1026   : > { %5054 = vmatmul.mubr.bf16.gmra.mrb[116].mxu0 %v4852_v53 }
0x1046   : > { %v4775_v62 = vpop.f32.mrb[104].mxu1 }
0x1047   : > { %v4776_v57 = vadd.f32 %v4775_v62, %v8887_v13  ;;  %v4777_v34 = vpop.f32.mrb[105].mxu1 }
0x1048   : > { %v4778_v20 = vadd.f32 %v4777_v34, %v8891_v56  ;;  %v4779_v18 = vpop.f32.mrb[106].mxu1 }
0x1049   : > { %v4780_v23 = vadd.f32 %v4779_v18, %v8887_v13  ;;  %v4781_v42 = vpop.f32.mrb[107].mxu1  ;;  %v4830_v0 = vmax.f32 %v4776_v57, 0.0 }
0x104a   : > { %v4782_v17 = vadd.f32 %v4781_v42, %v8891_v56  ;;  %v4831_v45 = vmax.f32 %v4778_v20, 0.0 }
0x104b   : > { %v4832_v22 = vmax.f32 %v4780_v23, 0.0 }
0x104c   : > { %v4833_v47 = vmax.f32 %v4782_v17, 0.0 }
0x104d   : > { %v4854_v27 = vpack.c.bf16 %v4832_v22, %v4830_v0 }
0x104e   : > { %v4855_v61 = vpack.c.bf16 %v4833_v47, %v4831_v45  ;;  %v4785_v5 = vpop.f32.mrb[108].mxu1  ;;  %v8928_v47 = vld [vmem:[%s9137_s22] ss:$0 sm:$0xff] }
0x104f   : > { %v4786_v49 = vadd.f32 %v4785_v5, %v8887_v13  ;;  %v4787_v46 = vpop.f32.mrb[109].mxu1 }
0x1050   : > { %v4788_v59 = vadd.f32 %v4787_v46, %v8891_v56  ;;  %v4789_v36 = vpop.f32.mrb[110].mxu1  ;;  %5061 = vmatprep.mubr.bf16.mxu0 %v4855_v61 }
0x1051   : > { %v4790_v31 = vadd.f32 %v4789_v36, %v8887_v13  ;;  %v4791_v14 = vpop.f32.mrb[111].mxu1  ;;  %5062 = vmatmul.mubr.bf16.gmra.mrb[120].mxu0 %v4854_v27  ;;  %v4834_v4 = vmax.f32 %v4786_v49, 0.0 }
0x1052   : > { %v4792_v7 = vadd.f32 %v4791_v14, %v8891_v56  ;;  %v4835_v52 = vmax.f32 %v4788_v59, 0.0 }
0x1053   : > { %v4836_v25 = vmax.f32 %v4790_v31, 0.0 }
0x1054   : > { %v4837_v44 = vmax.f32 %v4792_v7, 0.0 }
0x1055   : > { %v4856_v6 = vpack.c.bf16 %v4836_v25, %v4834_v4 }
0x1056   : > { %v4857_v32 = vpack.c.bf16 %v4837_v44, %v4835_v52 }
0x1058   : > { %5069 = vmatprep.mubr.bf16.mxu0 %v4857_v32 }
0x1059   : > { %5070 = vmatmul.mubr.bf16.gmra.mrb[124].mxu0 %v4856_v6 }
0x105e   : > { %v4795_v3 = vpop.f32.mrb[112].mxu1 }
0x105f   : > { %v4796_v11 = vadd.f32 %v4795_v3, %v8887_v13  ;;  %v4797_v58 = vpop.f32.mrb[113].mxu1 }
0x1060   : > { %v4798_v41 = vadd.f32 %v4797_v58, %v8891_v56  ;;  %v4799_v35 = vpop.f32.mrb[114].mxu1 }
0x1061   : > { %v4800_v12 = vadd.f32 %v4799_v35, %v8887_v13  ;;  %v4801_v37 = vpop.f32.mrb[115].mxu1  ;;  %v4838_v26 = vmax.f32 %v4796_v11, 0.0 }
0x1062   : > { %v4802_v9 = vadd.f32 %v4801_v37, %v8891_v56  ;;  %v4839_v8 = vmax.f32 %v4798_v41, 0.0 }
0x1063   : > { %v4840_v39 = vmax.f32 %v4800_v12, 0.0 }
0x1064   : > { %v4841_v28 = vmax.f32 %v4802_v9, 0.0 }
0x1065   : > { %v4858_v33 = vpack.c.bf16 %v4840_v39, %v4838_v26 }
0x1066   : > { %v4859_v60 = vpack.c.bf16 %v4841_v28, %v4839_v8  ;;  %v4805_v50 = vpop.f32.mrb[116].mxu1 }
0x1067   : > { %v4806_v24 = vadd.f32 %v4805_v50, %v8887_v13  ;;  %v4807_v53 = vpop.f32.mrb[117].mxu1 }
0x1068   : > { %v4808_v16 = vadd.f32 %v4807_v53, %v8891_v56  ;;  %v4809_v62 = vpop.f32.mrb[118].mxu1  ;;  %5077 = vmatprep.mubr.bf16.mxu0 %v4859_v60 }
0x1069   : > { %v4810_v57 = vadd.f32 %v4809_v62, %v8887_v13  ;;  %v4811_v34 = vpop.f32.mrb[119].mxu1  ;;  %5078 = vmatmul.mubr.bf16.gmra.mrb[128].mxu0 %v4858_v33  ;;  %v4842_v18 = vmax.f32 %v4806_v24, 0.0 }
0x106a   : > { %v4812_v20 = vadd.f32 %v4811_v34, %v8891_v56  ;;  %v4843_v42 = vmax.f32 %v4808_v16, 0.0 }
0x106b   : > { %v4844_v23 = vmax.f32 %v4810_v57, 0.0 }
0x106c   : > { %v4845_v17 = vmax.f32 %v4812_v20, 0.0 }
0x106d   : > { %v4860_v0 = vpack.c.bf16 %v4844_v23, %v4842_v18 }
0x106e   : > { %v4861_v22 = vpack.c.bf16 %v4845_v17, %v4843_v42 }
0x1070   : > { %5085 = vmatprep.mubr.bf16.mxu0 %v4861_v22 }
0x1071   : > { %5086 = vmatmul.mubr.bf16.gmra.mrb[132].mxu0 %v4860_v0 }
0x10c3   : > { %v5601_v45 = vpop.f32.mrb[104].mxu0 }
0x10c4   : > { %v5602_v13 = vpop.f32.mrb[105].mxu0 }
0x10c5   : > { %v5603_v27 = vadd.f32 %v5602_v13, %v5601_v45  ;;  %v5604_v61 = vpop.f32.mrb[106].mxu0 }
0x10c6   : > { %v5605_v5 = vpop.f32.mrb[107].mxu0 }
0x10c7   : > { %v5032_v56 = vadd.f32 %v5603_v27, %v8928_v47  ;;  %v5606_v49 = vadd.f32 %v5605_v5, %v5604_v61 }
0x10c9   : > { %v5094_v46 = vadd.f32 %v5032_v56, %v8660_v30  ;;  %v5035_v59 = vadd.f32 %v5606_v49, %v8928_v47 }
0x10cb   : > { %5110 = vst [vmem:[%s8935_s24] sm:$0xff] %v5094_v46  ;;  %v5095_v36 = vadd.f32 %v5035_v59, %v8664_v48  ;;  %v5607_v31 = vpop.f32.mrb[108].mxu0 }
0x10cc   : > { %v5608_v14 = vpop.f32.mrb[109].mxu0 }
0x10cd   : > { %5111 = vst [vmem:[%s8935_s24 + $0x8] sm:$0xff] %v5095_v36  ;;  %v5609_v7 = vadd.f32 %v5608_v14, %v5607_v31  ;;  %v5610_v4 = vpop.f32.mrb[110].mxu0 }
0x10ce   : > { %v5611_v25 = vpop.f32.mrb[111].mxu0 }
0x10cf   : > { %v5040_v30 = vadd.f32 %v5609_v7, %v8928_v47  ;;  %v5612_v52 = vadd.f32 %v5611_v25, %v5610_v4 }
0x10d1   : > { %v5096_v44 = vadd.f32 %v5040_v30, %v8668_v55  ;;  %v5043_v6 = vadd.f32 %v5612_v52, %v8928_v47 }
0x10d3   : > { %5112 = vst [vmem:[%s8935_s24 + $0x10] sm:$0xff] %v5096_v44  ;;  %v5097_v32 = vadd.f32 %v5043_v6, %v8674_v29 }
0x10d5   : > { %5113 = vst [vmem:[%s8935_s24 + $0x18] sm:$0xff] %v5097_v32 }
0x10f1   : > { %v5613_v48 = vpop.f32.mrb[112].mxu0 }
0x10f2   : > { %v5614_v3 = vpop.f32.mrb[113].mxu0 }
0x10f3   : > { %v5615_v11 = vadd.f32 %v5614_v3, %v5613_v48  ;;  %v5616_v58 = vpop.f32.mrb[114].mxu0 }
0x10f4   : > { %v5617_v41 = vpop.f32.mrb[115].mxu0 }
0x10f5   : > { %v5048_v35 = vadd.f32 %v5615_v11, %v8928_v47  ;;  %v5618_v12 = vadd.f32 %v5617_v41, %v5616_v58 }
0x10f7   : > { %v5098_v37 = vadd.f32 %v5048_v35, %v8680_v40  ;;  %v5051_v55 = vadd.f32 %v5618_v12, %v8928_v47 }
0x10f9   : > { %5114 = vst [vmem:[%s8935_s24 + $0x20] sm:$0xff] %v5098_v37  ;;  %v5099_v9 = vadd.f32 %v5051_v55, %v8685_v19  ;;  %v5619_v26 = vpop.f32.mrb[116].mxu0 }
0x10fa   : > { %v5620_v29 = vpop.f32.mrb[117].mxu0 }
0x10fb   : > { %5115 = vst [vmem:[%s8935_s24 + $0x28] sm:$0xff] %v5099_v9  ;;  %v5621_v39 = vadd.f32 %v5620_v29, %v5619_v26  ;;  %v5622_v8 = vpop.f32.mrb[118].mxu0 }
0x10fc   : > { %v5623_v28 = vpop.f32.mrb[119].mxu0 }
0x10fd   : > { %v5056_v33 = vadd.f32 %v5621_v39, %v8928_v47  ;;  %v5624_v60 = vadd.f32 %v5623_v28, %v5622_v8 }
0x10ff   : > { %v5100_v50 = vadd.f32 %v5056_v33, %v8689_v38  ;;  %v5059_v40 = vadd.f32 %v5624_v60, %v8928_v47 }
0x1101   : > { %5116 = vst [vmem:[%s8935_s24 + $0x30] sm:$0xff] %v5100_v50  ;;  %v5101_v24 = vadd.f32 %v5059_v40, %v8693_v43 }
0x1103   : > { %5117 = vst [vmem:[%s8935_s24 + $0x38] sm:$0xff] %v5101_v24 }
0x1124   : > { %v5625_v19 = vpop.f32.mrb[120].mxu0 }
0x1125   : > { %v5626_v53 = vpop.f32.mrb[121].mxu0 }
0x1126   : > { %v5627_v16 = vadd.f32 %v5626_v53, %v5625_v19  ;;  %v5628_v62 = vpop.f32.mrb[122].mxu0 }
0x1127   : > { %v5629_v57 = vpop.f32.mrb[123].mxu0 }
0x1128   : > { %v5064_v34 = vadd.f32 %v5627_v16, %v8928_v47  ;;  %v5630_v20 = vadd.f32 %v5629_v57, %v5628_v62 }
0x112a   : > { %v5102_v18 = vadd.f32 %v5064_v34, %v8700_v15  ;;  %v5067_v38 = vadd.f32 %v5630_v20, %v8928_v47 }
0x112c   : > { %5118 = vst [vmem:[%s8935_s24 + $0x40] sm:$0xff] %v5102_v18  ;;  %v5103_v23 = vadd.f32 %v5067_v38, %v8705_v51  ;;  %v5631_v42 = vpop.f32.mrb[124].mxu0 }
0x112d   : > { %v5632_v43 = vpop.f32.mrb[125].mxu0 }
0x112e   : > { %5119 = vst [vmem:[%s8935_s24 + $0x48] sm:$0xff] %v5103_v23  ;;  %v5633_v17 = vadd.f32 %v5632_v43, %v5631_v42  ;;  %v5634_v0 = vpop.f32.mrb[126].mxu0 }
0x112f   : > { %v5635_v22 = vpop.f32.mrb[127].mxu0 }
0x1130   : > { %v5072_v45 = vadd.f32 %v5633_v17, %v8928_v47  ;;  %v5636_v13 = vadd.f32 %v5635_v22, %v5634_v0 }
0x1132   : > { %v5104_v27 = vadd.f32 %v5072_v45, %v8709_v10  ;;  %v5075_v15 = vadd.f32 %v5636_v13, %v8928_v47 }
0x1134   : > { %5120 = vst [vmem:[%s8935_s24 + $0x50] sm:$0xff] %v5104_v27  ;;  %v5105_v61 = vadd.f32 %v5075_v15, %v8713_v1 }
0x1136   : > { %5121 = vst [vmem:[%s8935_s24 + $0x58] sm:$0xff] %v5105_v61 }
0x113c   : > { %v5637_v51 = vpop.f32.mrb[128].mxu0 }
0x113d   : > { %v5638_v5 = vpop.f32.mrb[129].mxu0 }
0x113e   : > { %v5639_v56 = vadd.f32 %v5638_v5, %v5637_v51  ;;  %v5640_v49 = vpop.f32.mrb[130].mxu0 }
0x113f   : > { %v5641_v46 = vpop.f32.mrb[131].mxu0 }
0x1140   : > { %v5080_v59 = vadd.f32 %v5639_v56, %v8928_v47  ;;  %v5642_v36 = vadd.f32 %v5641_v46, %v5640_v49 }
0x1142   : > { %v5106_v31 = vadd.f32 %v5080_v59, %v8720_v54  ;;  %v5083_v10 = vadd.f32 %v5642_v36, %v8928_v47 }
0x1144   : > { %5122 = vst [vmem:[%s8935_s24 + $0x60] sm:$0xff] %v5106_v31  ;;  %v5107_v14 = vadd.f32 %v5083_v10, %v8725_v21  ;;  %v5643_v1 = vpop.f32.mrb[132].mxu0 }
0x1145   : > { %v5644_v7 = vpop.f32.mrb[133].mxu0 }
0x1146   : > { %5123 = vst [vmem:[%s8935_s24 + $0x68] sm:$0xff] %v5107_v14  ;;  %v5645_v4 = vadd.f32 %v5644_v7, %v5643_v1  ;;  %v5646_v25 = vpop.f32.mrb[134].mxu0 }
0x1147   : > { %v5647_v30 = vpop.f32.mrb[135].mxu0 }
0x1148   : > { %v5088_v52 = vadd.f32 %v5645_v4, %v8928_v47  ;;  %v5648_v44 = vadd.f32 %v5647_v30, %v5646_v25 }
0x114a   : > { %v5108_v54 = vadd.f32 %v5088_v52, %v8729_v63  ;;  %v5091_v6 = vadd.f32 %v5648_v44, %v8928_v47 }
0x114c   : > { %5124 = vst [vmem:[%s8935_s24 + $0x70] sm:$0xff] %v5108_v54  ;;  %v5109_v21 = vadd.f32 %v5091_v6, %v8733_v2 }
0x114e   : > { %5125 = vst [vmem:[%s8935_s24 + $0x78] sm:$0xff] %v5109_v21 }
0x114f   : > { %6713 = shalt.err (!%p6710_p8)
}
0x1150   : > { %s6714_s1 = scalar_lea.hbm %s8984_s15, 2048  ;;  %s6718_s24 = scalar_lea.hbm %s9138_s18, 4096 }
0x1151   : > { %p6715_p6 = scmp.ne.s32.totalorder %s8984_s15, %s6714_s1  ;;  %p6719_p3 = scmp.lt.u32.totalorder %s8984_s15, %s9138_s18 }
0x1152   : > { %p6720_p0 = scmp.lt.u32.totalorder %s6718_s24, %s6714_s1  ;;  %p6722_p2 = scmp.lt.u32.totalorder %s6714_s1, %s8984_s15 }
0x1153   : > { %p6716_p9 = pnand %p6715_p6, %p9139_p7 }
0x1154   : > { %p6721_p5 = por %p6720_p0, %p6719_p3 }
0x1155   : > { %p6717_p4 = pneg %p6716_p9 }
0x1156   : > { %p6723_p10 = por %p6722_p2, %p6721_p5 }
0x1158   : > { %p6724_p1 = pnand %p6723_p10, %p6717_p4 }
0x115a   : > { %6727 = shalt.err (!%p6724_p1)
}
0x115b   : > { %s6797_s20 = smov 128   ;;  %s6798_s13 = smov 8  }
0x115c   : > { %6023 = dma.vmem_to_hbm [thread:$0]  (%p9139_p7), %s8986_s19, 2048, %s8984_s15, %s5127_s14, %s6797_s20, %s6797_s20, %s6798_s13  }
0x115d PF: > { %s5156_s10 = sand.u32 1, %s6766_s25   ;;  %p9140_p11 = scmp.ne.s32.totalorder %s9090_s23, 0 }
0x115e   : > { %p9141_p12 = scmp.ge.s32.totalorder %s6778_s28, 2  ;;  %s5157_s12 = scalar_lea.sflag [#allocation5], %s5156_s10 }
0x1160   : > { %p6046_p13 = pnand %p9141_p12, %p9140_p11 }
0x1162   : > { %6761 = dma.done.wait (!%p6046_p13), %s5157_s12, 2048  }
0x1163   : > { %6763 = vsyncadd (!%p6046_p13), %s5157_s12, 4294965248  ;;  %p29_p8 = scmp.ge.s32.totalorder %s7035_s16, 4   ;;  %s9142_s25 = smov %s6770_s26 }
0x1164   : > { %s9143_s26 = smov %s6774_s27  ;;  %s9144_s27 = smov %s7047_s17 }
0x1165   : > { %s9145_s28 = smov %s7035_s16  ;;  %31 = sbr.rel (!%p29_p8) target bundleno = 16 (0x10), region = 137 }
0x116c   :  { %5162 = vsyncpa [#allocation4], 1 }
0x116d   :  { %5164 = vsyncpa [#allocation4 + $0x1], 1 }
0x116e   :  { %5165 = vsyncpa [#allocation7], 1 }
0x116f   :  { %5166 = vsyncpa [#allocation10], 1 }
0x1170   :  { %5167 = vsyncpa [#allocation13], 1 }
0x1171   :  { %5168 = vsyncpa [#allocation5], 1 }
0x1172   :  { %5170 = vsyncpa [#allocation5 + $0x1], 1 }

</bundles_post_ra>
